<compile_context>
chip_gen: v7x
topology: tpu7x:2x2x1
jax: 0.10.0
libtpu: 0.0.40
codegen_flags: <defaults>
</compile_context>

<pallas_src>
import functools

import jax
import jax.numpy as jnp
from jax.experimental import pallas as pl
from jax.experimental.pallas import tpu as pltpu

# ------------------------- configuration (small, but faithful) -------------------------
D = 32                      # d: token / channel dim
N_HEADS = 4
WINDOW = 8                  # window_size
MLP_RATIO = 4.0
HIDDEN = int(D * MLP_RATIO) # CNNMlp hidden channels
HEAD_DIM = D // N_HEADS
SCALE = HEAD_DIM ** -0.5    # qk_scale default (folded into q weights at init)
EPS = 1e-5                  # LayerNorm / BatchNorm eps
N_TOK = WINDOW * WINDOW     # tokens per window
MAX_TOKENS_PER_STEP = 2048  # attention-tile token target (VMEM-safe on all chips)
VMEM_LIMIT = 48 * 1024 * 1024


def _gelu(x):
    # exact (erf-based) GELU, matching torch.nn.GELU default
    return 0.5 * x * (1.0 + jax.lax.erf(x * (2.0 ** -0.5)))


def _shift_rows(a, dy):
    """out[h] = a[h + dy] (zero-padded); H is the outer axis -> cheap vreg-row moves."""
    if dy == 0:
        return a
    if dy == 1:
        return jnp.concatenate([a[1:], jnp.zeros_like(a[:1])], axis=0)
    return jnp.concatenate([jnp.zeros_like(a[:1]), a[:-1]], axis=0)


def _shift_cols(a, dx):
    """out[:, w] = a[:, w + dx] (zero-padded); W is the sublane axis (expensive-ish)."""
    if dx == 0:
        return a
    if dx == 1:
        return jnp.concatenate([a[:, 1:], jnp.zeros_like(a[:, :1])], axis=1)
    return jnp.concatenate([jnp.zeros_like(a[:, :1]), a[:, :-1]], axis=1)


# ---------------------------------- kernel 1: W-MSA ------------------------------------
# Per vertical window-column strip (hblk windows stacked along H, one window wide):
# LayerNorm1 -> 1x1 qkv conv -> multi-head attention (+ relative position bias,
# single softmax over all heads/windows) -> single 1x1 proj matmul -> residual with
# the pre-norm input.  The BlockSpec already delivers window-contiguous tokens, so no
# in-kernel partition / reverse shuffles are needed.
def _attn_kernel(x_ref, g_ref, b_ref, wqkv_t_ref, bqkv_ref, relb_ref, wproj_t_ref,
                 out_ref):
    xs = x_ref[0]                                  # (hblk*WINDOW, WINDOW, D)
    hb = xs.shape[0]
    nwin = hb // WINDOW
    m = nwin * N_TOK                               # tokens in this strip

    # tokens are already in PyTorch window order: window-major, then i*8+j inside it
    xf = xs.reshape(m, D)

    # ------------------------------ LayerNorm1 (per token) -----------------------------
    mu = jnp.mean(xf, axis=-1, keepdims=True)
    var = jnp.mean((xf - mu) ** 2, axis=-1, keepdims=True)
    xn = (xf - mu) * jax.lax.rsqrt(var + EPS) * g_ref[0] + b_ref[0]

    # ------------ qkv 1x1 conv as one big matmul (qk scale pre-folded into q) ----------
    qkv = jnp.dot(xn, wqkv_t_ref[...], preferred_element_type=jnp.float32) + bqkv_ref[0]
    q = qkv[:, :D].reshape(nwin, N_TOK, D)
    k = qkv[:, D:2 * D].reshape(nwin, N_TOK, D)
    v = qkv[:, 2 * D:3 * D].reshape(nwin, N_TOK, D)

    relb = relb_ref[...]                           # (N_HEADS, N_TOK, N_TOK)

    # per-head scores batched over windows, stacked along the batch axis so the softmax
    # (max / exp / sum / reciprocal) runs exactly once over all heads and windows
    s_parts = []
    for h in range(N_HEADS):
        sl = slice(h * HEAD_DIM, (h + 1) * HEAD_DIM)
        s_h = jnp.einsum('wqe,wke->wqk', q[:, :, sl], k[:, :, sl],
                         preferred_element_type=jnp.float32) + relb[h]
        s_parts.append(s_h)
    s = jnp.concatenate(s_parts, axis=0)           # (N_HEADS*nwin, 64, 64)
    s = s - jnp.max(s, axis=-1, keepdims=True)
    p = jnp.exp(s)
    p = p * pl.reciprocal(jnp.sum(p, axis=-1, keepdims=True), approx=True)

    # per-head attention outputs, lane-concatenated -> single (m,32)@(32,32) projection
    o_parts = []
    for h in range(N_HEADS):
        sl = slice(h * HEAD_DIM, (h + 1) * HEAD_DIM)
        o_parts.append(jnp.einsum('wqk,wke->wqe', p[h * nwin:(h + 1) * nwin],
                                  v[:, :, sl], preferred_element_type=jnp.float32))
    oh = jnp.concatenate(o_parts, axis=-1).reshape(m, D)
    proj = jnp.dot(oh, wproj_t_ref[...], preferred_element_type=jnp.float32)

    # Basic_block first residual (shortcut = pre-LN x); no window reverse needed
    out_ref[0] = (xf + proj).reshape(hb, WINDOW, D)


def window_attention(x_img, p, rel_bias, hblk):
    b, h, w, c = x_img.shape
    nh, nw = h // WINDOW, w // WINDOW
    hb = hblk * WINDOW
    return pl.pallas_call(
        _attn_kernel,
        out_shape=jax.ShapeDtypeStruct((b, h, w, c), jnp.float32),
        grid=(b, nh // hblk, nw),
        in_specs=[
            pl.BlockSpec((1, hb, WINDOW, c), lambda i, j, k: (i, j, k, 0)),
            pl.BlockSpec((1, D), lambda i, j, k: (0, 0)),
            pl.BlockSpec((1, D), lambda i, j, k: (0, 0)),
            pl.BlockSpec((D, 3 * D), lambda i, j, k: (0, 0)),
            pl.BlockSpec((1, 3 * D), lambda i, j, k: (0, 0)),
            pl.BlockSpec((N_HEADS, N_TOK, N_TOK), lambda i, j, k: (0, 0, 0)),
            pl.BlockSpec((D, D), lambda i, j, k: (0, 0)),
        ],
        out_specs=pl.BlockSpec((1, hb, WINDOW, c), lambda i, j, k: (i, j, k, 0)),
        compiler_params=pltpu.CompilerParams(
            dimension_semantics=("parallel", "parallel", "parallel"),
            vmem_limit_bytes=VMEM_LIMIT),
    )(x_img, p['ln1_g'], p['ln1_b'], p['wqkv_t'], p['bqkv'], rel_bias, p['wproj_t'])


# --------------------------------- kernel 2: CNN MLP -----------------------------------
# Per image: LayerNorm2 -> 1x1 conv up + GELU -> depthwise 3x3 conv + BN(eval) + GELU
# -> 1x1 conv down -> CNNMlp residual -> Basic_block residual.  HIDDEN=128 keeps the
# large intermediates lane-dense.
def _mlp_kernel(x_ref, g_ref, b_ref, w1t_ref, b1_ref, wdw_ref, bns_ref, bnb_ref,
                w2t_ref, b2_ref, out_ref):
    x = x_ref[0]                                   # (H, W, D)
    hh, ww, c = x.shape
    x2 = x.reshape(hh * ww, c)

    mu = jnp.mean(x2, axis=-1, keepdims=True)
    var = jnp.mean((x2 - mu) ** 2, axis=-1, keepdims=True)
    xn = (x2 - mu) * jax.lax.rsqrt(var + EPS) * g_ref[0] + b_ref[0]

    # convup (1x1, C -> HIDDEN) + GELU
    y = jnp.dot(xn, w1t_ref[...], preferred_element_type=jnp.float32) + b1_ref[0]
    y = _gelu(y)
    yimg = y.reshape(hh, ww, HIDDEN)

    # depthwise 3x3 conv (padding=1, no bias): hoist the 3 expensive column shifts
    # (W = sublane axis); only 2 cheap row shifts (H = outer axis) remain.
    cols = [_shift_cols(yimg, dx) for dx in (-1, 0, 1)]

    def row_tap(dy):
        t0 = (dy + 1) * 3
        return (cols[0] * wdw_ref[t0] + cols[1] * wdw_ref[t0 + 1]
                + cols[2] * wdw_ref[t0 + 2])

    acc = _shift_rows(row_tap(-1), -1) + row_tap(0) + _shift_rows(row_tap(1), 1)

    # BatchNorm2d (eval mode, folded into scale/shift) + GELU
    z = _gelu(acc * bns_ref[0] + bnb_ref[0])
    z2 = z.reshape(hh * ww, HIDDEN)

    # convdown (1x1, HIDDEN -> C)
    o = jnp.dot(z2, w2t_ref[...], preferred_element_type=jnp.float32) + b2_ref[0]

    mlp_out = xn + o                               # CNNMlp shortcut = normed input
    out_ref[0] = (mlp_out + x2).reshape(hh, ww, c) # Basic_block second residual


def cnn_mlp(x_img, p):
    b, h, w, _ = x_img.shape
    return pl.pallas_call(
        _mlp_kernel,
        out_shape=jax.ShapeDtypeStruct((b, h, w, D), jnp.float32),
        grid=(b,),
        in_specs=[
            pl.BlockSpec((1, h, w, D), lambda i: (i, 0, 0, 0)),
            pl.BlockSpec((1, D), lambda i: (0, 0)),
            pl.BlockSpec((1, D), lambda i: (0, 0)),
            pl.BlockSpec((D, HIDDEN), lambda i: (0, 0)),
            pl.BlockSpec((1, HIDDEN), lambda i: (0, 0)),
            pl.BlockSpec((9, HIDDEN), lambda i: (0, 0)),
            pl.BlockSpec((1, HIDDEN), lambda i: (0, 0)),
            pl.BlockSpec((1, HIDDEN), lambda i: (0, 0)),
            pl.BlockSpec((HIDDEN, D), lambda i: (0, 0)),
            pl.BlockSpec((1, D), lambda i: (0, 0)),
        ],
        out_specs=pl.BlockSpec((1, h, w, D), lambda i: (i, 0, 0, 0)),
        compiler_params=pltpu.CompilerParams(
            dimension_semantics=("parallel",),
            vmem_limit_bytes=VMEM_LIMIT),
    )(x_img, p['ln2_g'], p['ln2_b'], p['w1_t'], p['b1'], p['wdw'],
      p['bn_scale'], p['bn_shift'], p['w2_t'], p['b2'])


# ------------------------------------- glue (JAX) --------------------------------------
def rel_position_bias(table):
    """Build (n_heads, N_TOK, N_TOK) relative position bias (gather is glue)."""
    ws = WINDOW
    coords = jnp.stack(jnp.meshgrid(jnp.arange(ws), jnp.arange(ws), indexing='ij'))
    cf = coords.reshape(2, -1)
    rel = cf[:, :, None] - cf[:, None, :]          # (2, n, n)
    rel = jnp.transpose(rel, (1, 2, 0))
    rel = rel.at[:, :, 0].add(ws - 1)
    rel = rel.at[:, :, 1].add(ws - 1)
    rel = rel.at[:, :, 0].multiply(2 * ws - 1)
    idx = rel.sum(-1)                              # (n, n)
    bias = table[idx.reshape(-1)].reshape(N_TOK, N_TOK, N_HEADS)
    return jnp.transpose(bias, (2, 0, 1)).astype(jnp.float32)


def _pick_hblk(nh):
    """Windows per attention grid step (stacked vertically): largest divisor of nh that
    keeps the per-step token count within a VMEM-safe budget.  No minimum-step
    constraint: the grid already has B * nw * (nh/hblk) steps for megacore sharding."""
    hblk = 1
    for d in range(1, nh + 1):
        if nh % d == 0 and d * N_TOK <= MAX_TOKENS_PER_STEP:
            hblk = d
    return hblk


def basic_block_forward(x, params, H, W, mask_matrix=None):
    """x: (B, H*W, C) -> (B, H*W, C).  H, W must be multiples of WINDOW (no padding)."""
    B, L, C = x.shape
    assert L == H * W and C == D
    assert H % WINDOW == 0 and W % WINDOW == 0  # TODO(synk): Swin padding path absent

    rel_bias = rel_position_bias(params['rel_table'])
    nh = H // WINDOW
    hblk = _pick_hblk(nh)

    # NHWC view is a pure reshape; window partition/reverse happen via the BlockSpec.
    x_img = x.reshape(B, H, W, C)

    # LN1 + W-MSA + proj + first residual (inside kernel)
    attn_img = window_attention(x_img, params, rel_bias, hblk)

    # LN2 + CNNMlp + both remaining residuals (inside kernel)
    out_img = cnn_mlp(attn_img, params)
    return out_img.reshape(B, H * W, C)


def init_params(key):
    ks = jax.random.split(key, 20)
    std = 0.02
    rt_size = (2 * WINDOW - 1) * (2 * WINDOW - 1)

    wqkv = std * jax.random.normal(ks[0], (3 * D, D), jnp.float32)
    wproj = std * jax.random.normal(ks[1], (D, D), jnp.float32)
    w1 = std * jax.random.normal(ks[2], (HIDDEN, D), jnp.float32)
    w2 = std * jax.random.normal(ks[3], (D, HIDDEN), jnp.float32)
    wdw = std * jax.random.normal(ks[4], (HIDDEN, 3, 3), jnp.float32)      # depthwise

    bn_gamma = 1.0 + std * jax.random.normal(ks[5], (HIDDEN,), jnp.float32)
    bn_beta = std * jax.random.normal(ks[6], (HIDDEN,), jnp.float32)
    bn_mean = std * jax.random.normal(ks[7], (HIDDEN,), jnp.float32)
    bn_var = 1.0 + 0.1 * jax.random.uniform(ks[8], (HIDDEN,), jnp.float32)
    bn_scale = bn_gamma * jax.lax.rsqrt(bn_var + EPS)
    bn_shift = bn_beta - bn_mean * bn_scale

    # fold qk scale (head_dim ** -0.5) into the q columns of the qkv conv weight/bias
    wqkv_t = jnp.transpose(wqkv)                                            # (D, 3D)
    wqkv_t = wqkv_t.at[:, :D].multiply(SCALE)
    bqkv = (std * jax.random.normal(ks[13], (3 * D,))).reshape(1, 3 * D)
    bqkv = bqkv.at[:, :D].multiply(SCALE)

    return {
        'ln1_g': (1.0 + std * jax.random.normal(ks[9], (D,))).reshape(1, D),
        'ln1_b': (std * jax.random.normal(ks[10], (D,))).reshape(1, D),
        'ln2_g': (1.0 + std * jax.random.normal(ks[11], (D,))).reshape(1, D),
        'ln2_b': (std * jax.random.normal(ks[12], (D,))).reshape(1, D),
        'wqkv_t': wqkv_t,                                                   # (D, 3D), q scaled
        'bqkv': bqkv,                                                       # (1, 3D), q scaled
        'wproj_t': jnp.transpose(wproj),                                    # (D, D)
        'rel_table': std * jax.random.normal(ks[14], (rt_size, N_HEADS), jnp.float32),
        'w1_t': jnp.transpose(w1),                                          # (D, HIDDEN)
        'b1': (std * jax.random.normal(ks[15], (HIDDEN,))).reshape(1, HIDDEN),
        'wdw': jnp.transpose(wdw, (1, 2, 0)).reshape(9, HIDDEN),            # tap-major
        'bn_scale': bn_scale.reshape(1, HIDDEN),
        'bn_shift': bn_shift.reshape(1, HIDDEN),
        'w2_t': jnp.transpose(w2),                                          # (HIDDEN, D)
        'b2': (std * jax.random.normal(ks[16], (D,))).reshape(1, D),
    }


if __name__ == "__main__":
    key = jax.random.PRNGKey(0)
    kx, kp = jax.random.split(key)
    B, H, W = 2, 16, 16
    x = jax.random.normal(kx, (B, H * W, D), jnp.float32)
    params = init_params(kp)

    fwd = jax.jit(functools.partial(basic_block_forward, H=H, W=W))
    out = fwd(x, params)
    jax.block_until_ready(out)
    assert out.shape == (B, H * W, D)
    assert bool(jnp.all(jnp.isfinite(out)))
    print("KERNEL_OK")
</pallas_src>

<mosaic_0001>
module attributes {stable_mosaic.version = 11 : i64} {
  func.func @_attn_kernel(%arg0: i32, %arg1: i32, %arg2: i32, %arg3: memref<1x16x8x32xf32, #tpu.memory_space<vmem>>, %arg4: memref<1x32xf32, #tpu.memory_space<vmem>>, %arg5: memref<1x32xf32, #tpu.memory_space<vmem>>, %arg6: memref<32x96xf32, #tpu.memory_space<vmem>>, %arg7: memref<1x96xf32, #tpu.memory_space<vmem>>, %arg8: memref<4x64x64xf32, #tpu.memory_space<vmem>>, %arg9: memref<32x32xf32, #tpu.memory_space<vmem>>, %arg10: memref<1x16x8x32xf32, #tpu.memory_space<vmem>>) attributes {dimension_semantics = [#tpu.dimension_semantics<parallel>, #tpu.dimension_semantics<parallel>, #tpu.dimension_semantics<parallel>], iteration_bounds = array<i64: 2, 1, 2>, scalar_prefetch = 0 : i64, scratch_operands = 0 : i64, tpu.core_type = #tpu.core_type<tc>, window_params = [{transform_indices = @transform_0, window_bounds = array<i64: 1, 16, 8, 32>}, {pipeline_mode = #tpu.pipeline_mode<synchronous>, transform_indices = @transform_1, window_bounds = array<i64: 1, 32>}, {pipeline_mode = #tpu.pipeline_mode<synchronous>, transform_indices = @transform_2, window_bounds = array<i64: 1, 32>}, {pipeline_mode = #tpu.pipeline_mode<synchronous>, transform_indices = @transform_3, window_bounds = array<i64: 32, 96>}, {pipeline_mode = #tpu.pipeline_mode<synchronous>, transform_indices = @transform_4, window_bounds = array<i64: 1, 96>}, {pipeline_mode = #tpu.pipeline_mode<synchronous>, transform_indices = @transform_5, window_bounds = array<i64: 4, 64, 64>}, {pipeline_mode = #tpu.pipeline_mode<synchronous>, transform_indices = @transform_6, window_bounds = array<i64: 32, 32>}, {transform_indices = @transform_7, window_bounds = array<i64: 1, 16, 8, 32>}]} {
    %c0 = arith.constant 0 : index
    %c0_0 = arith.constant 0 : index
    %c0_1 = arith.constant 0 : index
    %c0_2 = arith.constant 0 : index
    %0 = vector.load %arg3[%c0, %c0_0, %c0_1, %c0_2] : memref<1x16x8x32xf32, #tpu.memory_space<vmem>>, vector<1x16x8x32xf32>
    %1 = vector.shape_cast %0 : vector<1x16x8x32xf32> to vector<16x8x32xf32>
    %2 = vector.shape_cast %1 : vector<16x8x32xf32> to vector<128x32xf32>
    %cst = arith.constant dense<0.000000e+00> : vector<128xf32>
    %3 = vector.multi_reduction <add>, %2, %cst [1] : vector<128x32xf32> to vector<128xf32>
    %4 = vector.shape_cast %3 : vector<128xf32> to vector<128x1xf32>
    %cst_3 = arith.constant 3.200000e+01 : f32
    %5 = vector.broadcast %cst_3 : f32 to vector<128x1xf32>
    %6 = arith.divf %4, %5 : vector<128x1xf32>
    %7 = vector.broadcast %6 : vector<128x1xf32> to vector<128x32xf32>
    %8 = arith.subf %2, %7 : vector<128x32xf32>
    %9 = arith.mulf %8, %8 : vector<128x32xf32>
    %cst_4 = arith.constant dense<0.000000e+00> : vector<128xf32>
    %10 = vector.multi_reduction <add>, %9, %cst_4 [1] : vector<128x32xf32> to vector<128xf32>
    %11 = vector.shape_cast %10 : vector<128xf32> to vector<128x1xf32>
    %cst_5 = arith.constant 3.200000e+01 : f32
    %12 = vector.broadcast %cst_5 : f32 to vector<128x1xf32>
    %13 = arith.divf %11, %12 : vector<128x1xf32>
    %14 = vector.broadcast %6 : vector<128x1xf32> to vector<128x32xf32>
    %15 = arith.subf %2, %14 : vector<128x32xf32>
    %cst_6 = arith.constant 9.99999974E-6 : f32
    %16 = vector.broadcast %cst_6 : f32 to vector<128x1xf32>
    %17 = arith.addf %13, %16 : vector<128x1xf32>
    %18 = math.rsqrt %17 : vector<128x1xf32>
    %19 = vector.broadcast %18 : vector<128x1xf32> to vector<128x32xf32>
    %20 = arith.mulf %15, %19 : vector<128x32xf32>
    %c0_7 = arith.constant 0 : index
    %c0_8 = arith.constant 0 : index
    %21 = vector.load %arg4[%c0_7, %c0_8] : memref<1x32xf32, #tpu.memory_space<vmem>>, vector<1x32xf32>
    %22 = vector.shape_cast %21 : vector<1x32xf32> to vector<32xf32>
    %23 = vector.shape_cast %22 : vector<32xf32> to vector<1x32xf32>
    %24 = vector.broadcast %23 : vector<1x32xf32> to vector<128x32xf32>
    %25 = arith.mulf %20, %24 : vector<128x32xf32>
    %c0_9 = arith.constant 0 : index
    %c0_10 = arith.constant 0 : index
    %26 = vector.load %arg5[%c0_9, %c0_10] : memref<1x32xf32, #tpu.memory_space<vmem>>, vector<1x32xf32>
    %27 = vector.shape_cast %26 : vector<1x32xf32> to vector<32xf32>
    %28 = vector.shape_cast %27 : vector<32xf32> to vector<1x32xf32>
    %29 = vector.broadcast %28 : vector<1x32xf32> to vector<128x32xf32>
    %30 = arith.addf %25, %29 : vector<128x32xf32>
    %c0_11 = arith.constant 0 : index
    %c0_12 = arith.constant 0 : index
    %31 = vector.load %arg6[%c0_11, %c0_12] : memref<32x96xf32, #tpu.memory_space<vmem>>, vector<32x96xf32>
    %cst_13 = arith.constant dense<0.000000e+00> : vector<128x96xf32>
    %32 = tpu.matmul %30, %31, %cst_13 {dimension_numbers = #tpu.dot_dimension_numbers<[1], [0], [0], [1], [0, 0, 1, 1], [], []>} : vector<128x32xf32>, vector<32x96xf32>, vector<128x96xf32> -> vector<128x96xf32>
    %c0_14 = arith.constant 0 : index
    %c0_15 = arith.constant 0 : index
    %33 = vector.load %arg7[%c0_14, %c0_15] : memref<1x96xf32, #tpu.memory_space<vmem>>, vector<1x96xf32>
    %34 = vector.shape_cast %33 : vector<1x96xf32> to vector<96xf32>
    %35 = vector.shape_cast %34 : vector<96xf32> to vector<1x96xf32>
    %36 = vector.broadcast %35 : vector<1x96xf32> to vector<128x96xf32>
    %37 = arith.addf %32, %36 : vector<128x96xf32>
    %38 = vector.extract_strided_slice %37 {offsets = [0, 0], sizes = [128, 32], strides = [1, 1]} : vector<128x96xf32> to vector<128x32xf32>
    %39 = vector.shape_cast %38 : vector<128x32xf32> to vector<2x64x32xf32>
    %40 = vector.extract_strided_slice %37 {offsets = [0, 32], sizes = [128, 32], strides = [1, 1]} : vector<128x96xf32> to vector<128x32xf32>
    %41 = vector.shape_cast %40 : vector<128x32xf32> to vector<2x64x32xf32>
    %42 = vector.extract_strided_slice %37 {offsets = [0, 64], sizes = [128, 32], strides = [1, 1]} : vector<128x96xf32> to vector<128x32xf32>
    %43 = vector.shape_cast %42 : vector<128x32xf32> to vector<2x64x32xf32>
    %c0_16 = arith.constant 0 : index
    %c0_17 = arith.constant 0 : index
    %c0_18 = arith.constant 0 : index
    %44 = vector.load %arg8[%c0_16, %c0_17, %c0_18] : memref<4x64x64xf32, #tpu.memory_space<vmem>>, vector<4x64x64xf32>
    %45 = vector.extract_strided_slice %39 {offsets = [0, 0, 0], sizes = [2, 64, 8], strides = [1, 1, 1]} : vector<2x64x32xf32> to vector<2x64x8xf32>
    %46 = vector.extract_strided_slice %41 {offsets = [0, 0, 0], sizes = [2, 64, 8], strides = [1, 1, 1]} : vector<2x64x32xf32> to vector<2x64x8xf32>
    "tpu.trace_start"() <{level = 10 : i32, message = "wqe,wke->wqk"}> : () -> ()
    %cst_19 = arith.constant dense<0.000000e+00> : vector<2x64x64xf32>
    %47 = tpu.matmul %45, %46, %cst_19 {dimension_numbers = #tpu.dot_dimension_numbers<[2], [2], [1], [1], [0, 0, 0, 1, 1, 1], [0], [0]>} : vector<2x64x8xf32>, vector<2x64x8xf32>, vector<2x64x64xf32> -> vector<2x64x64xf32>
    "tpu.trace_stop"() : () -> ()
    %48 = vector.extract_strided_slice %44 {offsets = [0, 0, 0], sizes = [1, 64, 64], strides = [1, 1, 1]} : vector<4x64x64xf32> to vector<1x64x64xf32>
    %49 = vector.shape_cast %48 : vector<1x64x64xf32> to vector<64x64xf32>
    %50 = vector.shape_cast %49 : vector<64x64xf32> to vector<1x64x64xf32>
    %51 = vector.broadcast %50 : vector<1x64x64xf32> to vector<2x64x64xf32>
    %52 = arith.addf %47, %51 : vector<2x64x64xf32>
    %53 = vector.extract_strided_slice %39 {offsets = [0, 0, 8], sizes = [2, 64, 8], strides = [1, 1, 1]} : vector<2x64x32xf32> to vector<2x64x8xf32>
    %54 = vector.extract_strided_slice %41 {offsets = [0, 0, 8], sizes = [2, 64, 8], strides = [1, 1, 1]} : vector<2x64x32xf32> to vector<2x64x8xf32>
    "tpu.trace_start"() <{level = 10 : i32, message = "wqe,wke->wqk"}> : () -> ()
    %cst_20 = arith.constant dense<0.000000e+00> : vector<2x64x64xf32>
    %55 = tpu.matmul %53, %54, %cst_20 {dimension_numbers = #tpu.dot_dimension_numbers<[2], [2], [1], [1], [0, 0, 0, 1, 1, 1], [0], [0]>} : vector<2x64x8xf32>, vector<2x64x8xf32>, vector<2x64x64xf32> -> vector<2x64x64xf32>
    "tpu.trace_stop"() : () -> ()
    %56 = vector.extract_strided_slice %44 {offsets = [1, 0, 0], sizes = [1, 64, 64], strides = [1, 1, 1]} : vector<4x64x64xf32> to vector<1x64x64xf32>
    %57 = vector.shape_cast %56 : vector<1x64x64xf32> to vector<64x64xf32>
    %58 = vector.shape_cast %57 : vector<64x64xf32> to vector<1x64x64xf32>
    %59 = vector.broadcast %58 : vector<1x64x64xf32> to vector<2x64x64xf32>
    %60 = arith.addf %55, %59 : vector<2x64x64xf32>
    %61 = vector.extract_strided_slice %39 {offsets = [0, 0, 16], sizes = [2, 64, 8], strides = [1, 1, 1]} : vector<2x64x32xf32> to vector<2x64x8xf32>
    %62 = vector.extract_strided_slice %41 {offsets = [0, 0, 16], sizes = [2, 64, 8], strides = [1, 1, 1]} : vector<2x64x32xf32> to vector<2x64x8xf32>
    "tpu.trace_start"() <{level = 10 : i32, message = "wqe,wke->wqk"}> : () -> ()
    %cst_21 = arith.constant dense<0.000000e+00> : vector<2x64x64xf32>
    %63 = tpu.matmul %61, %62, %cst_21 {dimension_numbers = #tpu.dot_dimension_numbers<[2], [2], [1], [1], [0, 0, 0, 1, 1, 1], [0], [0]>} : vector<2x64x8xf32>, vector<2x64x8xf32>, vector<2x64x64xf32> -> vector<2x64x64xf32>
    "tpu.trace_stop"() : () -> ()
    %64 = vector.extract_strided_slice %44 {offsets = [2, 0, 0], sizes = [1, 64, 64], strides = [1, 1, 1]} : vector<4x64x64xf32> to vector<1x64x64xf32>
    %65 = vector.shape_cast %64 : vector<1x64x64xf32> to vector<64x64xf32>
    %66 = vector.shape_cast %65 : vector<64x64xf32> to vector<1x64x64xf32>
    %67 = vector.broadcast %66 : vector<1x64x64xf32> to vector<2x64x64xf32>
    %68 = arith.addf %63, %67 : vector<2x64x64xf32>
    %69 = vector.extract_strided_slice %39 {offsets = [0, 0, 24], sizes = [2, 64, 8], strides = [1, 1, 1]} : vector<2x64x32xf32> to vector<2x64x8xf32>
    %70 = vector.extract_strided_slice %41 {offsets = [0, 0, 24], sizes = [2, 64, 8], strides = [1, 1, 1]} : vector<2x64x32xf32> to vector<2x64x8xf32>
    "tpu.trace_start"() <{level = 10 : i32, message = "wqe,wke->wqk"}> : () -> ()
    %cst_22 = arith.constant dense<0.000000e+00> : vector<2x64x64xf32>
    %71 = tpu.matmul %69, %70, %cst_22 {dimension_numbers = #tpu.dot_dimension_numbers<[2], [2], [1], [1], [0, 0, 0, 1, 1, 1], [0], [0]>} : vector<2x64x8xf32>, vector<2x64x8xf32>, vector<2x64x64xf32> -> vector<2x64x64xf32>
    "tpu.trace_stop"() : () -> ()
    %72 = vector.extract_strided_slice %44 {offsets = [3, 0, 0], sizes = [1, 64, 64], strides = [1, 1, 1]} : vector<4x64x64xf32> to vector<1x64x64xf32>
    %73 = vector.shape_cast %72 : vector<1x64x64xf32> to vector<64x64xf32>
    %74 = vector.shape_cast %73 : vector<64x64xf32> to vector<1x64x64xf32>
    %75 = vector.broadcast %74 : vector<1x64x64xf32> to vector<2x64x64xf32>
    %76 = arith.addf %71, %75 : vector<2x64x64xf32>
    %77 = tpu.concatenate %52, %60, %68, %76 in 0 : vector<2x64x64xf32>, vector<2x64x64xf32>, vector<2x64x64xf32>, vector<2x64x64xf32> -> vector<8x64x64xf32>
    %cst_23 = arith.constant dense<0xFF800000> : vector<8x64xf32>
    %78 = vector.multi_reduction <maximumf>, %77, %cst_23 [2] : vector<8x64x64xf32> to vector<8x64xf32>
    %79 = vector.shape_cast %78 : vector<8x64xf32> to vector<8x64x1xf32>
    %80 = vector.broadcast %79 : vector<8x64x1xf32> to vector<8x64x64xf32>
    %81 = arith.subf %77, %80 : vector<8x64x64xf32>
    %82 = math.exp %81 : vector<8x64x64xf32>
    %cst_24 = arith.constant dense<0.000000e+00> : vector<8x64xf32>
    %83 = vector.multi_reduction <add>, %82, %cst_24 [2] : vector<8x64x64xf32> to vector<8x64xf32>
    %84 = vector.shape_cast %83 : vector<8x64xf32> to vector<8x64x1xf32>
    %85 = tpu.reciprocal %84 {approx = true} : vector<8x64x1xf32> -> vector<8x64x1xf32>
    %86 = vector.broadcast %85 : vector<8x64x1xf32> to vector<8x64x64xf32>
    %87 = arith.mulf %82, %86 : vector<8x64x64xf32>
    %88 = vector.extract_strided_slice %87 {offsets = [0, 0, 0], sizes = [2, 64, 64], strides = [1, 1, 1]} : vector<8x64x64xf32> to vector<2x64x64xf32>
    %89 = vector.extract_strided_slice %43 {offsets = [0, 0, 0], sizes = [2, 64, 8], strides = [1, 1, 1]} : vector<2x64x32xf32> to vector<2x64x8xf32>
    "tpu.trace_start"() <{level = 10 : i32, message = "wqk,wke->wqe"}> : () -> ()
    %cst_25 = arith.constant dense<0.000000e+00> : vector<2x64x8xf32>
    %90 = tpu.matmul %88, %89, %cst_25 {dimension_numbers = #tpu.dot_dimension_numbers<[2], [1], [1], [2], [0, 0, 0, 1, 1, 2], [0], [0]>} : vector<2x64x64xf32>, vector<2x64x8xf32>, vector<2x64x8xf32> -> vector<2x64x8xf32>
    "tpu.trace_stop"() : () -> ()
    %91 = vector.extract_strided_slice %87 {offsets = [2, 0, 0], sizes = [2, 64, 64], strides = [1, 1, 1]} : vector<8x64x64xf32> to vector<2x64x64xf32>
    %92 = vector.extract_strided_slice %43 {offsets = [0, 0, 8], sizes = [2, 64, 8], strides = [1, 1, 1]} : vector<2x64x32xf32> to vector<2x64x8xf32>
    "tpu.trace_start"() <{level = 10 : i32, message = "wqk,wke->wqe"}> : () -> ()
    %cst_26 = arith.constant dense<0.000000e+00> : vector<2x64x8xf32>
    %93 = tpu.matmul %91, %92, %cst_26 {dimension_numbers = #tpu.dot_dimension_numbers<[2], [1], [1], [2], [0, 0, 0, 1, 1, 2], [0], [0]>} : vector<2x64x64xf32>, vector<2x64x8xf32>, vector<2x64x8xf32> -> vector<2x64x8xf32>
    "tpu.trace_stop"() : () -> ()
    %94 = vector.extract_strided_slice %87 {offsets = [4, 0, 0], sizes = [2, 64, 64], strides = [1, 1, 1]} : vector<8x64x64xf32> to vector<2x64x64xf32>
    %95 = vector.extract_strided_slice %43 {offsets = [0, 0, 16], sizes = [2, 64, 8], strides = [1, 1, 1]} : vector<2x64x32xf32> to vector<2x64x8xf32>
    "tpu.trace_start"() <{level = 10 : i32, message = "wqk,wke->wqe"}> : () -> ()
    %cst_27 = arith.constant dense<0.000000e+00> : vector<2x64x8xf32>
    %96 = tpu.matmul %94, %95, %cst_27 {dimension_numbers = #tpu.dot_dimension_numbers<[2], [1], [1], [2], [0, 0, 0, 1, 1, 2], [0], [0]>} : vector<2x64x64xf32>, vector<2x64x8xf32>, vector<2x64x8xf32> -> vector<2x64x8xf32>
    "tpu.trace_stop"() : () -> ()
    %97 = vector.extract_strided_slice %87 {offsets = [6, 0, 0], sizes = [2, 64, 64], strides = [1, 1, 1]} : vector<8x64x64xf32> to vector<2x64x64xf32>
    %98 = vector.extract_strided_slice %43 {offsets = [0, 0, 24], sizes = [2, 64, 8], strides = [1, 1, 1]} : vector<2x64x32xf32> to vector<2x64x8xf32>
    "tpu.trace_start"() <{level = 10 : i32, message = "wqk,wke->wqe"}> : () -> ()
    %cst_28 = arith.constant dense<0.000000e+00> : vector<2x64x8xf32>
    %99 = tpu.matmul %97, %98, %cst_28 {dimension_numbers = #tpu.dot_dimension_numbers<[2], [1], [1], [2], [0, 0, 0, 1, 1, 2], [0], [0]>} : vector<2x64x64xf32>, vector<2x64x8xf32>, vector<2x64x8xf32> -> vector<2x64x8xf32>
    "tpu.trace_stop"() : () -> ()
    %100 = tpu.concatenate %90, %93, %96, %99 in 2 : vector<2x64x8xf32>, vector<2x64x8xf32>, vector<2x64x8xf32>, vector<2x64x8xf32> -> vector<2x64x32xf32>
    %101 = vector.shape_cast %100 : vector<2x64x32xf32> to vector<128x32xf32>
    %c0_29 = arith.constant 0 : index
    %c0_30 = arith.constant 0 : index
    %102 = vector.load %arg9[%c0_29, %c0_30] : memref<32x32xf32, #tpu.memory_space<vmem>>, vector<32x32xf32>
    %cst_31 = arith.constant dense<0.000000e+00> : vector<128x32xf32>
    %103 = tpu.matmul %101, %102, %cst_31 {dimension_numbers = #tpu.dot_dimension_numbers<[1], [0], [0], [1], [0, 0, 1, 1], [], []>} : vector<128x32xf32>, vector<32x32xf32>, vector<128x32xf32> -> vector<128x32xf32>
    %104 = arith.addf %2, %103 : vector<128x32xf32>
    %105 = vector.shape_cast %104 : vector<128x32xf32> to vector<16x8x32xf32>
    %c0_32 = arith.constant 0 : index
    %c0_33 = arith.constant 0 : index
    %c0_34 = arith.constant 0 : index
    %c0_35 = arith.constant 0 : index
    %106 = vector.load %arg10[%c0_32, %c0_33, %c0_34, %c0_35] : memref<1x16x8x32xf32, #tpu.memory_space<vmem>>, vector<1x16x8x32xf32>
    %107 = vector.shape_cast %106 : vector<1x16x8x32xf32> to vector<16x8x32xf32>
    %108 = vector.shape_cast %105 : vector<16x8x32xf32> to vector<1x16x8x32xf32>
    tpu.vector_store %arg10[%c0_32, %c0_33, %c0_34, %c0_35], %108 {strides = array<i32>} : memref<1x16x8x32xf32, #tpu.memory_space<vmem>>, vector<1x16x8x32xf32>,
    return
  }
  func.func @transform_0(%arg0: i32, %arg1: i32, %arg2: i32) -> (i32, i32, i32, i32) {
    %c0_i32 = arith.constant 0 : i32
    %c0_i32_0 = arith.constant 0 : i32
    return %arg0, %arg1, %arg2, %c0_i32 : i32, i32, i32, i32
  }
  func.func @transform_1(%arg0: i32, %arg1: i32, %arg2: i32) -> (i32, i32) {
    %c0_i32 = arith.constant 0 : i32
    %c0_i32_0 = arith.constant 0 : i32
    %c0_i32_1 = arith.constant 0 : i32
    return %c0_i32, %c0_i32_0 : i32, i32
  }
  func.func @transform_2(%arg0: i32, %arg1: i32, %arg2: i32) -> (i32, i32) {
    %c0_i32 = arith.constant 0 : i32
    %c0_i32_0 = arith.constant 0 : i32
    %c0_i32_1 = arith.constant 0 : i32
    return %c0_i32, %c0_i32_0 : i32, i32
  }
  func.func @transform_3(%arg0: i32, %arg1: i32, %arg2: i32) -> (i32, i32) {
    %c0_i32 = arith.constant 0 : i32
    %c0_i32_0 = arith.constant 0 : i32
    %c0_i32_1 = arith.constant 0 : i32
    return %c0_i32, %c0_i32_0 : i32, i32
  }
  func.func @transform_4(%arg0: i32, %arg1: i32, %arg2: i32) -> (i32, i32) {
    %c0_i32 = arith.constant 0 : i32
    %c0_i32_0 = arith.constant 0 : i32
    %c0_i32_1 = arith.constant 0 : i32
    return %c0_i32, %c0_i32_0 : i32, i32
  }
  func.func @transform_5(%arg0: i32, %arg1: i32, %arg2: i32) -> (i32, i32, i32) {
    %c0_i32 = arith.constant 0 : i32
    %c0_i32_0 = arith.constant 0 : i32
    %c0_i32_1 = arith.constant 0 : i32
    %c0_i32_2 = arith.constant 0 : i32
    return %c0_i32, %c0_i32_0, %c0_i32_1 : i32, i32, i32
  }
  func.func @transform_6(%arg0: i32, %arg1: i32, %arg2: i32) -> (i32, i32) {
    %c0_i32 = arith.constant 0 : i32
    %c0_i32_0 = arith.constant 0 : i32
    %c0_i32_1 = arith.constant 0 : i32
    return %c0_i32, %c0_i32_0 : i32, i32
  }
  func.func @transform_7(%arg0: i32, %arg1: i32, %arg2: i32) -> (i32, i32, i32, i32) {
    %c0_i32 = arith.constant 0 : i32
    %c0_i32_0 = arith.constant 0 : i32
    return %arg0, %arg1, %arg2, %c0_i32 : i32, i32, i32, i32
  }
}

module attributes {stable_mosaic.version = 11 : i64} {
  func.func @_mlp_kernel(%arg0: i32, %arg1: memref<1x16x16x32xf32, #tpu.memory_space<vmem>>, %arg2: memref<1x32xf32, #tpu.memory_space<vmem>>, %arg3: memref<1x32xf32, #tpu.memory_space<vmem>>, %arg4: memref<32x128xf32, #tpu.memory_space<vmem>>, %arg5: memref<1x128xf32, #tpu.memory_space<vmem>>, %arg6: memref<9x128xf32, #tpu.memory_space<vmem>>, %arg7: memref<1x128xf32, #tpu.memory_space<vmem>>, %arg8: memref<1x128xf32, #tpu.memory_space<vmem>>, %arg9: memref<128x32xf32, #tpu.memory_space<vmem>>, %arg10: memref<1x32xf32, #tpu.memory_space<vmem>>, %arg11: memref<1x16x16x32xf32, #tpu.memory_space<vmem>>) attributes {dimension_semantics = [#tpu.dimension_semantics<parallel>], iteration_bounds = array<i64: 2>, scalar_prefetch = 0 : i64, scratch_operands = 0 : i64, tpu.core_type = #tpu.core_type<tc>, window_params = [{transform_indices = @transform_0, window_bounds = array<i64: 1, 16, 16, 32>}, {pipeline_mode = #tpu.pipeline_mode<synchronous>, transform_indices = @transform_1, window_bounds = array<i64: 1, 32>}, {pipeline_mode = #tpu.pipeline_mode<synchronous>, transform_indices = @transform_2, window_bounds = array<i64: 1, 32>}, {pipeline_mode = #tpu.pipeline_mode<synchronous>, transform_indices = @transform_3, window_bounds = array<i64: 32, 128>}, {pipeline_mode = #tpu.pipeline_mode<synchronous>, transform_indices = @transform_4, window_bounds = array<i64: 1, 128>}, {pipeline_mode = #tpu.pipeline_mode<synchronous>, transform_indices = @transform_5, window_bounds = array<i64: 9, 128>}, {pipeline_mode = #tpu.pipeline_mode<synchronous>, transform_indices = @transform_6, window_bounds = array<i64: 1, 128>}, {pipeline_mode = #tpu.pipeline_mode<synchronous>, transform_indices = @transform_7, window_bounds = array<i64: 1, 128>}, {pipeline_mode = #tpu.pipeline_mode<synchronous>, transform_indices = @transform_8, window_bounds = array<i64: 128, 32>}, {pipeline_mode = #tpu.pipeline_mode<synchronous>, transform_indices = @transform_9, window_bounds = array<i64: 1, 32>}, {transform_indices = @transform_10, window_bounds = array<i64: 1, 16, 16, 32>}]} {
    %c0 = arith.constant 0 : index
    %c0_0 = arith.constant 0 : index
    %c0_1 = arith.constant 0 : index
    %c0_2 = arith.constant 0 : index
    %0 = vector.load %arg1[%c0, %c0_0, %c0_1, %c0_2] : memref<1x16x16x32xf32, #tpu.memory_space<vmem>>, vector<1x16x16x32xf32>
    %1 = vector.shape_cast %0 : vector<1x16x16x32xf32> to vector<16x16x32xf32>
    %2 = vector.shape_cast %1 : vector<16x16x32xf32> to vector<256x32xf32>
    %cst = arith.constant dense<0.000000e+00> : vector<256xf32>
    %3 = vector.multi_reduction <add>, %2, %cst [1] : vector<256x32xf32> to vector<256xf32>
    %4 = vector.shape_cast %3 : vector<256xf32> to vector<256x1xf32>
    %cst_3 = arith.constant 3.200000e+01 : f32
    %5 = vector.broadcast %cst_3 : f32 to vector<256x1xf32>
    %6 = arith.divf %4, %5 : vector<256x1xf32>
    %7 = vector.broadcast %6 : vector<256x1xf32> to vector<256x32xf32>
    %8 = arith.subf %2, %7 : vector<256x32xf32>
    %9 = arith.mulf %8, %8 : vector<256x32xf32>
    %cst_4 = arith.constant dense<0.000000e+00> : vector<256xf32>
    %10 = vector.multi_reduction <add>, %9, %cst_4 [1] : vector<256x32xf32> to vector<256xf32>
    %11 = vector.shape_cast %10 : vector<256xf32> to vector<256x1xf32>
    %cst_5 = arith.constant 3.200000e+01 : f32
    %12 = vector.broadcast %cst_5 : f32 to vector<256x1xf32>
    %13 = arith.divf %11, %12 : vector<256x1xf32>
    %14 = vector.broadcast %6 : vector<256x1xf32> to vector<256x32xf32>
    %15 = arith.subf %2, %14 : vector<256x32xf32>
    %cst_6 = arith.constant 9.99999974E-6 : f32
    %16 = vector.broadcast %cst_6 : f32 to vector<256x1xf32>
    %17 = arith.addf %13, %16 : vector<256x1xf32>
    %18 = math.rsqrt %17 : vector<256x1xf32>
    %19 = vector.broadcast %18 : vector<256x1xf32> to vector<256x32xf32>
    %20 = arith.mulf %15, %19 : vector<256x32xf32>
    %c0_7 = arith.constant 0 : index
    %c0_8 = arith.constant 0 : index
    %21 = vector.load %arg2[%c0_7, %c0_8] : memref<1x32xf32, #tpu.memory_space<vmem>>, vector<1x32xf32>
    %22 = vector.shape_cast %21 : vector<1x32xf32> to vector<32xf32>
    %23 = vector.shape_cast %22 : vector<32xf32> to vector<1x32xf32>
    %24 = vector.broadcast %23 : vector<1x32xf32> to vector<256x32xf32>
    %25 = arith.mulf %20, %24 : vector<256x32xf32>
    %c0_9 = arith.constant 0 : index
    %c0_10 = arith.constant 0 : index
    %26 = vector.load %arg3[%c0_9, %c0_10] : memref<1x32xf32, #tpu.memory_space<vmem>>, vector<1x32xf32>
    %27 = vector.shape_cast %26 : vector<1x32xf32> to vector<32xf32>
    %28 = vector.shape_cast %27 : vector<32xf32> to vector<1x32xf32>
    %29 = vector.broadcast %28 : vector<1x32xf32> to vector<256x32xf32>
    %30 = arith.addf %25, %29 : vector<256x32xf32>
    %c0_11 = arith.constant 0 : index
    %c0_12 = arith.constant 0 : index
    %31 = vector.load %arg4[%c0_11, %c0_12] : memref<32x128xf32, #tpu.memory_space<vmem>>, vector<32x128xf32>
    %cst_13 = arith.constant dense<0.000000e+00> : vector<256x128xf32>
    %32 = tpu.matmul %30, %31, %cst_13 {dimension_numbers = #tpu.dot_dimension_numbers<[1], [0], [0], [1], [0, 0, 1, 1], [], []>} : vector<256x32xf32>, vector<32x128xf32>, vector<256x128xf32> -> vector<256x128xf32>
    %c0_14 = arith.constant 0 : index
    %c0_15 = arith.constant 0 : index
    %33 = vector.load %arg5[%c0_14, %c0_15] : memref<1x128xf32, #tpu.memory_space<vmem>>, vector<1x128xf32>
    %34 = vector.shape_cast %33 : vector<1x128xf32> to vector<128xf32>
    %35 = vector.shape_cast %34 : vector<128xf32> to vector<1x128xf32>
    %36 = vector.broadcast %35 : vector<1x128xf32> to vector<256x128xf32>
    %37 = arith.addf %32, %36 : vector<256x128xf32>
    %cst_16 = arith.constant 5.000000e-01 : f32
    %38 = vector.broadcast %cst_16 : f32 to vector<256x128xf32>
    %39 = arith.mulf %38, %37 : vector<256x128xf32>
    %cst_17 = arith.constant 0.707106769 : f32
    %40 = vector.broadcast %cst_17 : f32 to vector<256x128xf32>
    %41 = arith.mulf %37, %40 : vector<256x128xf32>
    %42 = math.erf %41 : vector<256x128xf32>
    %cst_18 = arith.constant 1.000000e+00 : f32
    %43 = vector.broadcast %cst_18 : f32 to vector<256x128xf32>
    %44 = arith.addf %43, %42 : vector<256x128xf32>
    %45 = arith.mulf %39, %44 : vector<256x128xf32>
    %46 = vector.shape_cast %45 : vector<256x128xf32> to vector<16x16x128xf32>
    %cst_19 = arith.constant 0.000000e+00 : f32
    %47 = vector.broadcast %cst_19 : f32 to vector<16x1x128xf32>
    %48 = vector.extract_strided_slice %46 {offsets = [0, 0, 0], sizes = [16, 15, 128], strides = [1, 1, 1]} : vector<16x16x128xf32> to vector<16x15x128xf32>
    %49 = tpu.concatenate %47, %48 in 1 : vector<16x1x128xf32>, vector<16x15x128xf32> -> vector<16x16x128xf32>
    %50 = vector.extract_strided_slice %46 {offsets = [0, 1, 0], sizes = [16, 15, 128], strides = [1, 1, 1]} : vector<16x16x128xf32> to vector<16x15x128xf32>
    %cst_20 = arith.constant 0.000000e+00 : f32
    %51 = vector.broadcast %cst_20 : f32 to vector<16x1x128xf32>
    %52 = tpu.concatenate %50, %51 in 1 : vector<16x15x128xf32>, vector<16x1x128xf32> -> vector<16x16x128xf32>
    %c0_21 = arith.constant 0 : index
    %c0_22 = arith.constant 0 : index
    %53 = vector.load %arg6[%c0_21, %c0_22] : memref<9x128xf32, #tpu.memory_space<vmem>>, vector<1x128xf32>
    %54 = vector.shape_cast %53 : vector<1x128xf32> to vector<128xf32>
    %55 = vector.shape_cast %54 : vector<128xf32> to vector<1x1x128xf32>
    %56 = vector.broadcast %55 : vector<1x1x128xf32> to vector<16x16x128xf32>
    %57 = arith.mulf %49, %56 : vector<16x16x128xf32>
    %c1 = arith.constant 1 : index
    %c0_23 = arith.constant 0 : index
    %58 = vector.load %arg6[%c1, %c0_23] : memref<9x128xf32, #tpu.memory_space<vmem>>, vector<1x128xf32>
    %59 = vector.shape_cast %58 : vector<1x128xf32> to vector<128xf32>
    %60 = vector.shape_cast %59 : vector<128xf32> to vector<1x1x128xf32>
    %61 = vector.broadcast %60 : vector<1x1x128xf32> to vector<16x16x128xf32>
    %62 = arith.mulf %46, %61 : vector<16x16x128xf32>
    %63 = arith.addf %57, %62 : vector<16x16x128xf32>
    %c2 = arith.constant 2 : index
    %c0_24 = arith.constant 0 : index
    %64 = vector.load %arg6[%c2, %c0_24] : memref<9x128xf32, #tpu.memory_space<vmem>>, vector<1x128xf32>
    %65 = vector.shape_cast %64 : vector<1x128xf32> to vector<128xf32>
    %66 = vector.shape_cast %65 : vector<128xf32> to vector<1x1x128xf32>
    %67 = vector.broadcast %66 : vector<1x1x128xf32> to vector<16x16x128xf32>
    %68 = arith.mulf %52, %67 : vector<16x16x128xf32>
    %69 = arith.addf %63, %68 : vector<16x16x128xf32>
    %cst_25 = arith.constant 0.000000e+00 : f32
    %70 = vector.broadcast %cst_25 : f32 to vector<1x16x128xf32>
    %71 = vector.extract_strided_slice %69 {offsets = [0, 0, 0], sizes = [15, 16, 128], strides = [1, 1, 1]} : vector<16x16x128xf32> to vector<15x16x128xf32>
    %72 = tpu.concatenate %70, %71 in 0 : vector<1x16x128xf32>, vector<15x16x128xf32> -> vector<16x16x128xf32>
    %c3 = arith.constant 3 : index
    %c0_26 = arith.constant 0 : index
    %73 = vector.load %arg6[%c3, %c0_26] : memref<9x128xf32, #tpu.memory_space<vmem>>, vector<1x128xf32>
    %74 = vector.shape_cast %73 : vector<1x128xf32> to vector<128xf32>
    %75 = vector.shape_cast %74 : vector<128xf32> to vector<1x1x128xf32>
    %76 = vector.broadcast %75 : vector<1x1x128xf32> to vector<16x16x128xf32>
    %77 = arith.mulf %49, %76 : vector<16x16x128xf32>
    %c4 = arith.constant 4 : index
    %c0_27 = arith.constant 0 : index
    %78 = vector.load %arg6[%c4, %c0_27] : memref<9x128xf32, #tpu.memory_space<vmem>>, vector<1x128xf32>
    %79 = vector.shape_cast %78 : vector<1x128xf32> to vector<128xf32>
    %80 = vector.shape_cast %79 : vector<128xf32> to vector<1x1x128xf32>
    %81 = vector.broadcast %80 : vector<1x1x128xf32> to vector<16x16x128xf32>
    %82 = arith.mulf %46, %81 : vector<16x16x128xf32>
    %83 = arith.addf %77, %82 : vector<16x16x128xf32>
    %c5 = arith.constant 5 : index
    %c0_28 = arith.constant 0 : index
    %84 = vector.load %arg6[%c5, %c0_28] : memref<9x128xf32, #tpu.memory_space<vmem>>, vector<1x128xf32>
    %85 = vector.shape_cast %84 : vector<1x128xf32> to vector<128xf32>
    %86 = vector.shape_cast %85 : vector<128xf32> to vector<1x1x128xf32>
    %87 = vector.broadcast %86 : vector<1x1x128xf32> to vector<16x16x128xf32>
    %88 = arith.mulf %52, %87 : vector<16x16x128xf32>
    %89 = arith.addf %83, %88 : vector<16x16x128xf32>
    %90 = arith.addf %72, %89 : vector<16x16x128xf32>
    %c6 = arith.constant 6 : index
    %c0_29 = arith.constant 0 : index
    %91 = vector.load %arg6[%c6, %c0_29] : memref<9x128xf32, #tpu.memory_space<vmem>>, vector<1x128xf32>
    %92 = vector.shape_cast %91 : vector<1x128xf32> to vector<128xf32>
    %93 = vector.shape_cast %92 : vector<128xf32> to vector<1x1x128xf32>
    %94 = vector.broadcast %93 : vector<1x1x128xf32> to vector<16x16x128xf32>
    %95 = arith.mulf %49, %94 : vector<16x16x128xf32>
    %c7 = arith.constant 7 : index
    %c0_30 = arith.constant 0 : index
    %96 = vector.load %arg6[%c7, %c0_30] : memref<9x128xf32, #tpu.memory_space<vmem>>, vector<1x128xf32>
    %97 = vector.shape_cast %96 : vector<1x128xf32> to vector<128xf32>
    %98 = vector.shape_cast %97 : vector<128xf32> to vector<1x1x128xf32>
    %99 = vector.broadcast %98 : vector<1x1x128xf32> to vector<16x16x128xf32>
    %100 = arith.mulf %46, %99 : vector<16x16x128xf32>
    %101 = arith.addf %95, %100 : vector<16x16x128xf32>
    %c8 = arith.constant 8 : index
    %c0_31 = arith.constant 0 : index
    %102 = vector.load %arg6[%c8, %c0_31] : memref<9x128xf32, #tpu.memory_space<vmem>>, vector<1x128xf32>
    %103 = vector.shape_cast %102 : vector<1x128xf32> to vector<128xf32>
    %104 = vector.shape_cast %103 : vector<128xf32> to vector<1x1x128xf32>
    %105 = vector.broadcast %104 : vector<1x1x128xf32> to vector<16x16x128xf32>
    %106 = arith.mulf %52, %105 : vector<16x16x128xf32>
    %107 = arith.addf %101, %106 : vector<16x16x128xf32>
    %108 = vector.extract_strided_slice %107 {offsets = [1, 0, 0], sizes = [15, 16, 128], strides = [1, 1, 1]} : vector<16x16x128xf32> to vector<15x16x128xf32>
    %cst_32 = arith.constant 0.000000e+00 : f32
    %109 = vector.broadcast %cst_32 : f32 to vector<1x16x128xf32>
    %110 = tpu.concatenate %108, %109 in 0 : vector<15x16x128xf32>, vector<1x16x128xf32> -> vector<16x16x128xf32>
    %111 = arith.addf %90, %110 : vector<16x16x128xf32>
    %c0_33 = arith.constant 0 : index
    %c0_34 = arith.constant 0 : index
    %112 = vector.load %arg7[%c0_33, %c0_34] : memref<1x128xf32, #tpu.memory_space<vmem>>, vector<1x128xf32>
    %113 = vector.shape_cast %112 : vector<1x128xf32> to vector<128xf32>
    %114 = vector.shape_cast %113 : vector<128xf32> to vector<1x1x128xf32>
    %115 = vector.broadcast %114 : vector<1x1x128xf32> to vector<16x16x128xf32>
    %116 = arith.mulf %111, %115 : vector<16x16x128xf32>
    %c0_35 = arith.constant 0 : index
    %c0_36 = arith.constant 0 : index
    %117 = vector.load %arg8[%c0_35, %c0_36] : memref<1x128xf32, #tpu.memory_space<vmem>>, vector<1x128xf32>
    %118 = vector.shape_cast %117 : vector<1x128xf32> to vector<128xf32>
    %119 = vector.shape_cast %118 : vector<128xf32> to vector<1x1x128xf32>
    %120 = vector.broadcast %119 : vector<1x1x128xf32> to vector<16x16x128xf32>
    %121 = arith.addf %116, %120 : vector<16x16x128xf32>
    %cst_37 = arith.constant 5.000000e-01 : f32
    %122 = vector.broadcast %cst_37 : f32 to vector<16x16x128xf32>
    %123 = arith.mulf %122, %121 : vector<16x16x128xf32>
    %cst_38 = arith.constant 0.707106769 : f32
    %124 = vector.broadcast %cst_38 : f32 to vector<16x16x128xf32>
    %125 = arith.mulf %121, %124 : vector<16x16x128xf32>
    %126 = math.erf %125 : vector<16x16x128xf32>
    %cst_39 = arith.constant 1.000000e+00 : f32
    %127 = vector.broadcast %cst_39 : f32 to vector<16x16x128xf32>
    %128 = arith.addf %127, %126 : vector<16x16x128xf32>
    %129 = arith.mulf %123, %128 : vector<16x16x128xf32>
    %130 = vector.shape_cast %129 : vector<16x16x128xf32> to vector<256x128xf32>
    %c0_40 = arith.constant 0 : index
    %c0_41 = arith.constant 0 : index
    %131 = vector.load %arg9[%c0_40, %c0_41] : memref<128x32xf32, #tpu.memory_space<vmem>>, vector<128x32xf32>
    %cst_42 = arith.constant dense<0.000000e+00> : vector<256x32xf32>
    %132 = tpu.matmul %130, %131, %cst_42 {dimension_numbers = #tpu.dot_dimension_numbers<[1], [0], [0], [1], [0, 0, 1, 1], [], []>} : vector<256x128xf32>, vector<128x32xf32>, vector<256x32xf32> -> vector<256x32xf32>
    %c0_43 = arith.constant 0 : index
    %c0_44 = arith.constant 0 : index
    %133 = vector.load %arg10[%c0_43, %c0_44] : memref<1x32xf32, #tpu.memory_space<vmem>>, vector<1x32xf32>
    %134 = vector.shape_cast %133 : vector<1x32xf32> to vector<32xf32>
    %135 = vector.shape_cast %134 : vector<32xf32> to vector<1x32xf32>
    %136 = vector.broadcast %135 : vector<1x32xf32> to vector<256x32xf32>
    %137 = arith.addf %132, %136 : vector<256x32xf32>
    %138 = arith.addf %30, %137 : vector<256x32xf32>
    %139 = arith.addf %138, %2 : vector<256x32xf32>
    %140 = vector.shape_cast %139 : vector<256x32xf32> to vector<16x16x32xf32>
    %c0_45 = arith.constant 0 : index
    %c0_46 = arith.constant 0 : index
    %c0_47 = arith.constant 0 : index
    %c0_48 = arith.constant 0 : index
    %141 = vector.load %arg11[%c0_45, %c0_46, %c0_47, %c0_48] : memref<1x16x16x32xf32, #tpu.memory_space<vmem>>, vector<1x16x16x32xf32>
    %142 = vector.shape_cast %141 : vector<1x16x16x32xf32> to vector<16x16x32xf32>
    %143 = vector.shape_cast %140 : vector<16x16x32xf32> to vector<1x16x16x32xf32>
    tpu.vector_store %arg11[%c0_45, %c0_46, %c0_47, %c0_48], %143 {strides = array<i32>} : memref<1x16x16x32xf32, #tpu.memory_space<vmem>>, vector<1x16x16x32xf32>,
    return
  }
  func.func @transform_0(%arg0: i32) -> (i32, i32, i32, i32) {
    %c0_i32 = arith.constant 0 : i32
    %c0_i32_0 = arith.constant 0 : i32
    %c0_i32_1 = arith.constant 0 : i32
    %c0_i32_2 = arith.constant 0 : i32
    return %arg0, %c0_i32, %c0_i32_0, %c0_i32_1 : i32, i32, i32, i32
  }
  func.func @transform_1(%arg0: i32) -> (i32, i32) {
    %c0_i32 = arith.constant 0 : i32
    %c0_i32_0 = arith.constant 0 : i32
    %c0_i32_1 = arith.constant 0 : i32
    return %c0_i32, %c0_i32_0 : i32, i32
  }
  func.func @transform_2(%arg0: i32) -> (i32, i32) {
    %c0_i32 = arith.constant 0 : i32
    %c0_i32_0 = arith.constant 0 : i32
    %c0_i32_1 = arith.constant 0 : i32
    return %c0_i32, %c0_i32_0 : i32, i32
  }
  func.func @transform_3(%arg0: i32) -> (i32, i32) {
    %c0_i32 = arith.constant 0 : i32
    %c0_i32_0 = arith.constant 0 : i32
    %c0_i32_1 = arith.constant 0 : i32
    return %c0_i32, %c0_i32_0 : i32, i32
  }
  func.func @transform_4(%arg0: i32) -> (i32, i32) {
    %c0_i32 = arith.constant 0 : i32
    %c0_i32_0 = arith.constant 0 : i32
    %c0_i32_1 = arith.constant 0 : i32
    return %c0_i32, %c0_i32_0 : i32, i32
  }
  func.func @transform_5(%arg0: i32) -> (i32, i32) {
    %c0_i32 = arith.constant 0 : i32
    %c0_i32_0 = arith.constant 0 : i32
    %c0_i32_1 = arith.constant 0 : i32
    return %c0_i32, %c0_i32_0 : i32, i32
  }
  func.func @transform_6(%arg0: i32) -> (i32, i32) {
    %c0_i32 = arith.constant 0 : i32
    %c0_i32_0 = arith.constant 0 : i32
    %c0_i32_1 = arith.constant 0 : i32
    return %c0_i32, %c0_i32_0 : i32, i32
  }
  func.func @transform_7(%arg0: i32) -> (i32, i32) {
    %c0_i32 = arith.constant 0 : i32
    %c0_i32_0 = arith.constant 0 : i32
    %c0_i32_1 = arith.constant 0 : i32
    return %c0_i32, %c0_i32_0 : i32, i32
  }
  func.func @transform_8(%arg0: i32) -> (i32, i32) {
    %c0_i32 = arith.constant 0 : i32
    %c0_i32_0 = arith.constant 0 : i32
    %c0_i32_1 = arith.constant 0 : i32
    return %c0_i32, %c0_i32_0 : i32, i32
  }
  func.func @transform_9(%arg0: i32) -> (i32, i32) {
    %c0_i32 = arith.constant 0 : i32
    %c0_i32_0 = arith.constant 0 : i32
    %c0_i32_1 = arith.constant 0 : i32
    return %c0_i32, %c0_i32_0 : i32, i32
  }
  func.func @transform_10(%arg0: i32) -> (i32, i32, i32, i32) {
    %c0_i32 = arith.constant 0 : i32
    %c0_i32_0 = arith.constant 0 : i32
    %c0_i32_1 = arith.constant 0 : i32
    %c0_i32_2 = arith.constant 0 : i32
    return %arg0, %c0_i32, %c0_i32_0, %c0_i32_1 : i32, i32, i32, i32
  }
}

</mosaic_0001>

<bundles_post_ra>
// kernel: sub.8
= control target key start
LH: loop header
LB: loop body
LE: loop exit
PB: predicated region body
PF: predicated region fallthrough
CT: control target
= control target key end

     0   :  { %s7_s6 = smov 3  ;;  %s21_s9 = smov 3  ;;  %vm4_vm0 = vcmask 64512   ;;  %vm11_vm1 = vcmask 523712   ;;  %vm18_vm2 = vcmask 458112   ;;  %vm25_vm3 = vcmask 392512   ;;  %s119_s0 = inlined_call_operand.vmem [shape: s32[2,8,8], index: 0, kind: input, shape index: {}]   ;;  %s120_s1 = inlined_call_operand.vmem [shape: s32[2,64], index: 1, kind: output, shape index: {}]  }
   0x1   :  { %v61_v0 = vld [vmem:[%s119_s0 + $0x7] ss:$8 sm:%s7_s6]   ;;  %s75_s10 = smov 56   ;;  %v63_v1 = vld [vmem:[%s119_s0 + $0x5] ss:$8 sm:%s21_s9]   ;;  %s14_s13 = smov 3 }
   0x2   :  { %9 = vrot.lane.b32.xlu0 %v61_v0, %s75_s10  ;;  %s76_s14 = smov 40   ;;  %v62_v2 = vld [vmem:[%s119_s0 + $0x6] ss:$8 sm:%s14_s13]   ;;  %s28_s17 = smov 3  ;;  %vm32_vm4 = vcmask 326912   ;;  %vm39_vm5 = vcmask 261312  }
   0x3   :  { %23 = vrot.lane.b32.xlu1 %v63_v1, %s76_s14  ;;  %v64_v3 = vld [vmem:[%s119_s0 + $0x4] ss:$8 sm:%s28_s17]   ;;  %s35_s20 = smov 3  ;;  %s42_s21 = smov 3  ;;  %vm46_vm6 = vcmask 195712   ;;  %vm53_vm7 = vcmask 130112  }
   0x4   :  { %s77_s22 = smov 48   ;;  %s78_s23 = smov 32   ;;  %v65_v4 = vld [vmem:[%s119_s0 + $0x3] ss:$8 sm:%s35_s20]   ;;  %v66_v5 = vld [vmem:[%s119_s0 + $0x2] ss:$8 sm:%s42_s21]  }
   0x5   :  { %s2_s26 = smov 3  ;;  %s49_s29 = smov 3 }
   0x6   :  { %16 = vrot.lane.b32.xlu0 %v62_v2, %s77_s22  ;;  %v3_v6 = vld [vmem:[%s119_s0] ss:$8 sm:%s2_s26]   ;;  %s79_s3 = smov 24   ;;  %s80_s4 = smov 16  }
   0x7   :  { %30 = vrot.lane.b32.xlu1 %v64_v3, %s78_s23  ;;  %5 = vst.msk [vmem:[#allocation0] sm:$0x3] %vm4_vm0, %v3_v6   ;;  %v67_v7 = vld [vmem:[%s119_s0 + $0x1] ss:$8 sm:%s49_s29]   ;;  %s81_s0 = smov 8  }
   0xa   :  { %37 = vrot.lane.b32.xlu0 %v65_v4, %s79_s3 }
   0xb   :  { %44 = vrot.lane.b32.xlu1 %v66_v5, %s80_s4 }
   0xe   :  { %51 = vrot.lane.b32.xlu0 %v67_v7, %s81_s0 }
  0x74   :  { %v10_v8 = vpop.permute.xlu0 %9  }
  0x75   :  { %12 = vst.msk [vmem:[#allocation0] sm:$0x3] %vm11_vm1, %v10_v8   ;;  %v24_v9 = vpop.permute.xlu1 %23  }
  0x78   :  { %v17_v10 = vpop.permute.xlu0 %16  }
  0x79   :  { %19 = vst.msk [vmem:[#allocation0] sm:$0x3] %vm18_vm2, %v17_v10   ;;  %v31_v11 = vpop.permute.xlu1 %30  }
  0x7a   :  { %26 = vst.msk [vmem:[#allocation0] sm:$0x3] %vm25_vm3, %v24_v9  }
  0x7b   :  { %33 = vst.msk [vmem:[#allocation0] sm:$0x3] %vm32_vm4, %v31_v11  }
  0x7c   :  { %v38_v12 = vpop.permute.xlu0 %37  }
  0x7d   :  { %40 = vst.msk [vmem:[#allocation0] sm:$0x3] %vm39_vm5, %v38_v12   ;;  %v45_v13 = vpop.permute.xlu1 %44  }
  0x7e   :  { %47 = vst.msk [vmem:[#allocation0] sm:$0x3] %vm46_vm6, %v45_v13  }
  0x80   :  { %v52_v14 = vpop.permute.xlu0 %51  }
  0x81   :  { %54 = vst.msk [vmem:[#allocation0] sm:$0x3] %vm53_vm7, %v52_v14  }
  0x88   :  { %v58_v15 = vld [vmem:[#allocation0] sm:$0x3] }
  0x89   :  { %60 = vst [vmem:[%s120_s1] sm:$0x3] %v58_v15 }

// kernel: basic_block_forward.3
= control target key start
LH: loop header
LB: loop body
LE: loop exit
PB: predicated region body
PF: predicated region fallthrough
CT: control target
= control target key end

     0   :  { %s3458_s13 = smov 0   ;;  %s5941_s0 = inlined_call_operand.vmem [shape: f32[2,16,16,32], index: 0, kind: input, shape index: {}]   ;;  %s5942_s1 = inlined_call_operand.vmem [shape: f32[1,32], index: 1, kind: input, shape index: {}]   ;;  %s5943_s2 = inlined_call_operand.vmem [shape: f32[1,32], index: 2, kind: input, shape index: {}]   ;;  %s5944_s3 = inlined_call_operand.vmem [shape: f32[32,128], index: 3, kind: input, shape index: {}]   ;;  %s5945_s4 = inlined_call_operand.vmem [shape: f32[1,128], index: 4, kind: input, shape index: {}]   ;;  %s5946_s5 = inlined_call_operand.vmem [shape: f32[9,128], index: 5, kind: input, shape index: {}]   ;;  %s5947_s6 = inlined_call_operand.vmem [shape: f32[1,128], index: 6, kind: input, shape index: {}]   ;;  %s5948_s7 = inlined_call_operand.vmem [shape: f32[1,128], index: 7, kind: input, shape index: {}]   ;;  %s5949_s8 = inlined_call_operand.vmem [shape: f32[128,32], index: 8, kind: input, shape index: {}]   ;;  %s5950_s9 = inlined_call_operand.vmem [shape: f32[1,32], index: 9, kind: input, shape index: {}]   ;;  %s5951_s10 = inlined_call_operand.vmem [shape: f32[2,16,16,32], index: 10, kind: output, shape index: {}]  }
   0x1 LB: > { %s2812_s14 = sadd.s32 4294967295, %s3401_s13   ;;  %p2816_p0 = scmp.ge.s32.totalorder %s3401_s13, 1  ;;  %s3401_s13 = sphi %s3458_s13, %s20_s13  }
   0x2   : > { %p312_p1 = scmp.lt.s32.totalorder %s3401_s13, 3 }
   0x4   : > { %p313_p2 = pnand %p2816_p0, %p312_p1 }
   0x6   : > { %316 = sbr.rel (%p313_p2) target bundleno = 1069 (0x42d), region = 60 }
   0xd   : > { %p350_p3 = scmp.lt.s32.totalorder %s2812_s14, 1  ;;  %vm392_vm0 = vcmask 261120   ;;  %vm1509_vm1 = vcmask 1046528   ;;  %vm1412_vm2 = vcmask 1040384  }
   0xf   : > { %s6399_s14 = smov (!%p350_p3, %s2812_s14), 1 }
  0x10   : > { %s2870_s15 = sshll.u32 %s6399_s14, 8 }
  0x11   : > { %s3474_s18 = scalar_lea.vmem %s5941_s0, %s2870_s15  ;;  %s5779_s25 = scalar_lea.vmem %s5951_s10, %s2870_s15 }
  0x12   : > { %v3477_v0 = vld [vmem:[%s3474_s18] sm:$0xff]  ;;  %v3480_v1 = vld [vmem:[%s3474_s18 + $0x10] sm:$0xff]  ;;  %v3483_v2 = vld [vmem:[%s3474_s18 + $0x8] sm:$0xff] }
  0x13   : > { %v393_v3 = vsel %vm392_vm0, %v3477_v0, 0.0  ;;  %v399_v4 = vsel %vm392_vm0, %v3480_v1, 0.0  ;;  %v3490_v5 = vld [vmem:[%s3474_s18 + $0x18] sm:$0xff]  ;;  %v396_v6 = vsel %vm392_vm0, %v3483_v2, 0.0  ;;  %v3497_v8 = vld [vmem:[%s3474_s18 + $0x20] sm:$0xff]  ;;  %v3500_v9 = vld [vmem:[%s3474_s18 + $0x28] sm:$0xff] }
  0x14   : > { %394 = vadd.xlane.f32.xlu0 %v393_v3  ;;  %400 = vadd.xlane.f32.xlu1 %v399_v4  ;;  %v402_v7 = vsel %vm392_vm0, %v3490_v5, 0.0  ;;  %v405_v10 = vsel %vm392_vm0, %v3497_v8, 0.0  ;;  %v408_v11 = vsel %vm392_vm0, %v3500_v9, 0.0  ;;  %v3507_v12 = vld [vmem:[%s3474_s18 + $0x30] sm:$0xff]  ;;  %v3510_v13 = vld [vmem:[%s3474_s18 + $0x38] sm:$0xff]  ;;  %v3517_v16 = vld [vmem:[%s3474_s18 + $0x40] sm:$0xff] }
  0x15   : > { %v411_v14 = vsel %vm392_vm0, %v3507_v12, 0.0  ;;  %v414_v15 = vsel %vm392_vm0, %v3510_v13, 0.0  ;;  %v3520_v17 = vld [vmem:[%s3474_s18 + $0x48] sm:$0xff]  ;;  %v417_v18 = vsel %vm392_vm0, %v3517_v16, 0.0  ;;  %v3527_v20 = vld [vmem:[%s3474_s18 + $0x50] sm:$0xff]  ;;  %v3530_v21 = vld [vmem:[%s3474_s18 + $0x58] sm:$0xff] }
  0x16   : > { %v420_v19 = vsel %vm392_vm0, %v3520_v17, 0.0  ;;  %v423_v22 = vsel %vm392_vm0, %v3527_v20, 0.0  ;;  %v426_v23 = vsel %vm392_vm0, %v3530_v21, 0.0  ;;  %v3537_v24 = vld [vmem:[%s3474_s18 + $0x60] sm:$0xff]  ;;  %v3540_v25 = vld [vmem:[%s3474_s18 + $0x68] sm:$0xff]  ;;  %v3547_v28 = vld [vmem:[%s3474_s18 + $0x70] sm:$0xff] }
  0x17   : > { %v429_v26 = vsel %vm392_vm0, %v3537_v24, 0.0  ;;  %v432_v27 = vsel %vm392_vm0, %v3540_v25, 0.0  ;;  %v3550_v29 = vld [vmem:[%s3474_s18 + $0x78] sm:$0xff]  ;;  %v435_v30 = vsel %vm392_vm0, %v3547_v28, 0.0  ;;  %v3557_v32 = vld [vmem:[%s3474_s18 + $0x80] sm:$0xff]  ;;  %v3560_v33 = vld [vmem:[%s3474_s18 + $0x88] sm:$0xff] }
  0x18   : > { %397 = vadd.xlane.f32.xlu0 %v396_v6  ;;  %403 = vadd.xlane.f32.xlu1 %v402_v7  ;;  %v438_v31 = vsel %vm392_vm0, %v3550_v29, 0.0  ;;  %v441_v34 = vsel %vm392_vm0, %v3557_v32, 0.0  ;;  %v444_v35 = vsel %vm392_vm0, %v3560_v33, 0.0  ;;  %v3567_v36 = vld [vmem:[%s3474_s18 + $0x90] sm:$0xff]  ;;  %v3570_v37 = vld [vmem:[%s3474_s18 + $0x98] sm:$0xff]  ;;  %v3577_v40 = vld [vmem:[%s3474_s18 + $0xa0] sm:$0xff] }
  0x19   : > { %v447_v38 = vsel %vm392_vm0, %v3567_v36, 0.0  ;;  %v450_v39 = vsel %vm392_vm0, %v3570_v37, 0.0  ;;  %v3580_v41 = vld [vmem:[%s3474_s18 + $0xa8] sm:$0xff]  ;;  %v453_v42 = vsel %vm392_vm0, %v3577_v40, 0.0  ;;  %v3587_v44 = vld [vmem:[%s3474_s18 + $0xb0] sm:$0xff]  ;;  %v3590_v45 = vld [vmem:[%s3474_s18 + $0xb8] sm:$0xff] }
  0x1a   : > { %v456_v43 = vsel %vm392_vm0, %v3580_v41, 0.0  ;;  %v459_v46 = vsel %vm392_vm0, %v3587_v44, 0.0  ;;  %v462_v47 = vsel %vm392_vm0, %v3590_v45, 0.0  ;;  %v3597_v48 = vld [vmem:[%s3474_s18 + $0xc0] sm:$0xff]  ;;  %v3600_v49 = vld [vmem:[%s3474_s18 + $0xc8] sm:$0xff]  ;;  %v3607_v52 = vld [vmem:[%s3474_s18 + $0xd0] sm:$0xff] }
  0x1b   : > { %v465_v50 = vsel %vm392_vm0, %v3597_v48, 0.0  ;;  %v468_v51 = vsel %vm392_vm0, %v3600_v49, 0.0  ;;  %v3610_v53 = vld [vmem:[%s3474_s18 + $0xd8] sm:$0xff]  ;;  %v471_v54 = vsel %vm392_vm0, %v3607_v52, 0.0  ;;  %v3617_v56 = vld [vmem:[%s3474_s18 + $0xe0] sm:$0xff]  ;;  %v3620_v57 = vld [vmem:[%s3474_s18 + $0xe8] sm:$0xff] }
  0x1c   : > { %406 = vadd.xlane.f32.xlu0 %v405_v10  ;;  %409 = vadd.xlane.f32.xlu1 %v408_v11  ;;  %v474_v55 = vsel %vm392_vm0, %v3610_v53, 0.0  ;;  %v477_v58 = vsel %vm392_vm0, %v3617_v56, 0.0  ;;  %v480_v59 = vsel %vm392_vm0, %v3620_v57, 0.0  ;;  %v3627_v60 = vld [vmem:[%s3474_s18 + $0xf0] sm:$0xff]  ;;  %v3630_v61 = vld [vmem:[%s3474_s18 + $0xf8] sm:$0xff] }
  0x1d   : > { %v483_v62 = vsel %vm392_vm0, %v3627_v60, 0.0  ;;  %v486_v63 = vsel %vm392_vm0, %v3630_v61, 0.0 }
  0x20   : > { %412 = vadd.xlane.f32.xlu0 %v411_v14  ;;  %415 = vadd.xlane.f32.xlu1 %v414_v15 }
  0x24   : > { %418 = vadd.xlane.f32.xlu0 %v417_v18  ;;  %421 = vadd.xlane.f32.xlu1 %v420_v19 }
  0x28   : > { %424 = vadd.xlane.f32.xlu0 %v423_v22  ;;  %427 = vadd.xlane.f32.xlu1 %v426_v23 }
  0x2c   : > { %430 = vadd.xlane.f32.xlu0 %v429_v26  ;;  %433 = vadd.xlane.f32.xlu1 %v432_v27 }
  0x30   : > { %436 = vadd.xlane.f32.xlu0 %v435_v30  ;;  %439 = vadd.xlane.f32.xlu1 %v438_v31 }
  0x34   : > { %442 = vadd.xlane.f32.xlu0 %v441_v34  ;;  %445 = vadd.xlane.f32.xlu1 %v444_v35 }
  0x38   : > { %448 = vadd.xlane.f32.xlu0 %v447_v38  ;;  %451 = vadd.xlane.f32.xlu1 %v450_v39 }
  0x3c   : > { %454 = vadd.xlane.f32.xlu0 %v453_v42  ;;  %457 = vadd.xlane.f32.xlu1 %v456_v43 }
  0x40   : > { %460 = vadd.xlane.f32.xlu0 %v459_v46  ;;  %463 = vadd.xlane.f32.xlu1 %v462_v47 }
  0x44   : > { %466 = vadd.xlane.f32.xlu0 %v465_v50  ;;  %469 = vadd.xlane.f32.xlu1 %v468_v51 }
  0x48   : > { %472 = vadd.xlane.f32.xlu0 %v471_v54  ;;  %475 = vadd.xlane.f32.xlu1 %v474_v55 }
  0x4c   : > { %478 = vadd.xlane.f32.xlu0 %v477_v58  ;;  %481 = vadd.xlane.f32.xlu1 %v480_v59 }
  0x50   : > { %484 = vadd.xlane.f32.xlu0 %v483_v62  ;;  %487 = vadd.xlane.f32.xlu1 %v486_v63 }
  0xa1   : > { %v395_v3 = vpop.xlane.xlu0 %394  ;;  %v401_v4 = vpop.xlane.xlu1 %400 }
  0xa2   : > { %v490_v6 = vmul.f32 0.03125, %v395_v3  ;;  %v492_v7 = vmul.f32 0.03125, %v401_v4 }
  0xa4   : > { %v3637_v10 = vsub.f32 %v3477_v0, %v490_v6  ;;  %v3640_v11 = vsub.f32 %v3480_v1, %v492_v7 }
  0xa5   : > { %v398_v14 = vpop.xlane.xlu0 %397  ;;  %v404_v15 = vpop.xlane.xlu1 %403 }
  0xa6   : > { %v491_v18 = vmul.f32 0.03125, %v398_v14  ;;  %v493_v19 = vmul.f32 0.03125, %v404_v15  ;;  %v554_v22 = vmul.f32 %v3637_v10, %v3637_v10  ;;  %v556_v23 = vmul.f32 %v3640_v11, %v3640_v11 }
  0xa8   : > { %v3647_v26 = vsub.f32 %v3483_v2, %v491_v18  ;;  %v3650_v27 = vsub.f32 %v3490_v5, %v493_v19  ;;  %v586_v0 = vsel %vm392_vm0, %v554_v22, 0.0  ;;  %v592_v31 = vsel %vm392_vm0, %v556_v23, 0.0 }
  0xa9   : > { %587 = vadd.xlane.f32.xlu0 %v586_v0  ;;  %v407_v1 = vpop.xlane.xlu0 %406  ;;  %v410_v30 = vpop.xlane.xlu1 %409 }
  0xaa   : > { %v494_v34 = vmul.f32 0.03125, %v407_v1  ;;  %v495_v35 = vmul.f32 0.03125, %v410_v30  ;;  %v555_v38 = vmul.f32 %v3647_v26, %v3647_v26  ;;  %v557_v39 = vmul.f32 %v3650_v27, %v3650_v27 }
  0xac   : > { %v3659_v2 = vsub.f32 %v3497_v8, %v494_v34  ;;  %v3662_v5 = vsub.f32 %v3500_v9, %v495_v35  ;;  %v589_v42 = vsel %vm392_vm0, %v555_v38, 0.0  ;;  %v595_v47 = vsel %vm392_vm0, %v557_v39, 0.0 }
  0xad   : > { %593 = vadd.xlane.f32.xlu0 %v592_v31  ;;  %590 = vadd.xlane.f32.xlu1 %v589_v42  ;;  %v413_v43 = vpop.xlane.xlu0 %412  ;;  %v416_v46 = vpop.xlane.xlu1 %415 }
  0xae   : > { %v496_v50 = vmul.f32 0.03125, %v413_v43  ;;  %v497_v51 = vmul.f32 0.03125, %v416_v46  ;;  %v558_v54 = vmul.f32 %v3659_v2, %v3659_v2  ;;  %v559_v8 = vmul.f32 %v3662_v5, %v3662_v5 }
  0xb0   : > { %v3671_v55 = vsub.f32 %v3507_v12, %v496_v50  ;;  %v3674_v9 = vsub.f32 %v3510_v13, %v497_v51  ;;  %v598_v58 = vsel %vm392_vm0, %v558_v54, 0.0  ;;  %v601_v63 = vsel %vm392_vm0, %v559_v8, 0.0 }
  0xb1   : > { %596 = vadd.xlane.f32.xlu1 %v595_v47  ;;  %599 = vadd.xlane.f32.xlu0 %v598_v58  ;;  %v419_v59 = vpop.xlane.xlu0 %418  ;;  %v422_v62 = vpop.xlane.xlu1 %421 }
  0xb2   : > { %v498_v3 = vmul.f32 0.03125, %v419_v59  ;;  %v499_v4 = vmul.f32 0.03125, %v422_v62  ;;  %v560_v6 = vmul.f32 %v3671_v55, %v3671_v55  ;;  %v561_v12 = vmul.f32 %v3674_v9, %v3674_v9 }
  0xb4   : > { %v3683_v7 = vsub.f32 %v3517_v16, %v498_v3  ;;  %v3686_v13 = vsub.f32 %v3520_v17, %v499_v4  ;;  %v604_v14 = vsel %vm392_vm0, %v560_v6, 0.0  ;;  %v607_v19 = vsel %vm392_vm0, %v561_v12, 0.0 }
  0xb5   : > { %602 = vadd.xlane.f32.xlu1 %v601_v63  ;;  %605 = vadd.xlane.f32.xlu0 %v604_v14  ;;  %v425_v15 = vpop.xlane.xlu0 %424  ;;  %v428_v18 = vpop.xlane.xlu1 %427 }
  0xb6   : > { %v500_v22 = vmul.f32 0.03125, %v425_v15  ;;  %v501_v23 = vmul.f32 0.03125, %v428_v18  ;;  %v562_v0 = vmul.f32 %v3683_v7, %v3683_v7  ;;  %v563_v16 = vmul.f32 %v3686_v13, %v3686_v13 }
  0xb8   : > { %v3695_v1 = vsub.f32 %v3527_v20, %v500_v22  ;;  %v3698_v17 = vsub.f32 %v3530_v21, %v501_v23  ;;  %v610_v30 = vsel %vm392_vm0, %v562_v0, 0.0  ;;  %v613_v35 = vsel %vm392_vm0, %v563_v16, 0.0 }
  0xb9   : > { %608 = vadd.xlane.f32.xlu1 %v607_v19  ;;  %611 = vadd.xlane.f32.xlu0 %v610_v30  ;;  %v431_v31 = vpop.xlane.xlu0 %430  ;;  %v434_v34 = vpop.xlane.xlu1 %433 }
  0xba   : > { %v502_v38 = vmul.f32 0.03125, %v431_v31  ;;  %v503_v39 = vmul.f32 0.03125, %v434_v34  ;;  %v564_v42 = vmul.f32 %v3695_v1, %v3695_v1  ;;  %v565_v20 = vmul.f32 %v3698_v17, %v3698_v17  ;;  %v889_v31 = vld [vmem:[%s5944_s3 + $0x8] sm:$0xff] }
  0xbc   : > { %v3707_v43 = vsub.f32 %v3537_v24, %v502_v38  ;;  %v3710_v21 = vsub.f32 %v3540_v25, %v503_v39  ;;  %v616_v46 = vsel %vm392_vm0, %v564_v42, 0.0  ;;  %v619_v51 = vsel %vm392_vm0, %v565_v20, 0.0 }
  0xbd   : > { %614 = vadd.xlane.f32.xlu1 %v613_v35  ;;  %617 = vadd.xlane.f32.xlu0 %v616_v46  ;;  %v437_v47 = vpop.xlane.xlu0 %436  ;;  %v440_v50 = vpop.xlane.xlu1 %439 }
  0xbe   : > { %v504_v54 = vmul.f32 0.03125, %v437_v47  ;;  %v505_v8 = vmul.f32 0.03125, %v440_v50  ;;  %v566_v58 = vmul.f32 %v3707_v43, %v3707_v43  ;;  %v567_v24 = vmul.f32 %v3710_v21, %v3710_v21 }
  0xc0   : > { %v3719_v59 = vsub.f32 %v3547_v28, %v504_v54  ;;  %v3722_v25 = vsub.f32 %v3550_v29, %v505_v8  ;;  %v622_v62 = vsel %vm392_vm0, %v566_v58, 0.0  ;;  %v625_v4 = vsel %vm392_vm0, %v567_v24, 0.0  ;;  %v891_v54 = vld [vmem:[%s5944_s3 + $0x18] sm:$0xff] }
  0xc1   : > { %620 = vadd.xlane.f32.xlu1 %v619_v51  ;;  %623 = vadd.xlane.f32.xlu0 %v622_v62  ;;  %v443_v63 = vpop.xlane.xlu0 %442  ;;  %v446_v3 = vpop.xlane.xlu1 %445 }
  0xc2   : > { %v506_v6 = vmul.f32 0.03125, %v443_v63  ;;  %v507_v12 = vmul.f32 0.03125, %v446_v3  ;;  %v568_v14 = vmul.f32 %v3719_v59, %v3719_v59  ;;  %v569_v28 = vmul.f32 %v3722_v25, %v3722_v25 }
  0xc4   : > { %v3731_v15 = vsub.f32 %v3557_v32, %v506_v6  ;;  %v3734_v29 = vsub.f32 %v3560_v33, %v507_v12  ;;  %v628_v18 = vsel %vm392_vm0, %v568_v14, 0.0  ;;  %v631_v23 = vsel %vm392_vm0, %v569_v28, 0.0  ;;  %v888_v33 = vld [vmem:[%s5944_s3] sm:$0xff] }
  0xc5   : > { %626 = vadd.xlane.f32.xlu1 %v625_v4  ;;  %629 = vadd.xlane.f32.xlu0 %v628_v18  ;;  %v449_v19 = vpop.xlane.xlu0 %448  ;;  %v452_v22 = vpop.xlane.xlu1 %451  ;;  %v3092_v34 = vpack.c.bf16 %v889_v31, %v888_v33 }
  0xc6   : > { %v508_v0 = vmul.f32 0.03125, %v449_v19  ;;  %v509_v16 = vmul.f32 0.03125, %v452_v22  ;;  %v570_v30 = vmul.f32 %v3731_v15, %v3731_v15  ;;  %v571_v32 = vmul.f32 %v3734_v29, %v3734_v29 }
  0xc7   : > { %3093 = vmatprep.subr.bf16.mxu0 %v3092_v34 }
  0xc8   : > { %v3749_v35 = vsub.f32 %v3567_v36, %v508_v0  ;;  %v3752_v38 = vsub.f32 %v3570_v37, %v509_v16  ;;  %v634_v39 = vsel %vm392_vm0, %v570_v30, 0.0  ;;  %v637_v46 = vsel %vm392_vm0, %v571_v32, 0.0  ;;  %v890_v37 = vld [vmem:[%s5944_s3 + $0x10] sm:$0xff]  ;;  %3095 = vmatpush3.bf16.msra.mxu0 %v3092_v34 }
  0xc9   : > { %632 = vadd.xlane.f32.xlu1 %v631_v23  ;;  %635 = vadd.xlane.f32.xlu0 %v634_v39  ;;  %v455_v42 = vpop.xlane.xlu0 %454  ;;  %v458_v20 = vpop.xlane.xlu1 %457  ;;  %v3096_v8 = vpack.c.bf16 %v891_v54, %v890_v37 }
  0xca   : > { %v510_v47 = vmul.f32 0.03125, %v455_v42  ;;  %v511_v50 = vmul.f32 0.03125, %v458_v20  ;;  %v572_v51 = vmul.f32 %v3749_v35, %v3749_v35  ;;  %v573_v36 = vmul.f32 %v3752_v38, %v3752_v38 }
  0xcb   : > { %3097 = vmatprep.subr.bf16.mxu0 %v3096_v8 }
  0xcc   : > { %v3767_v58 = vsub.f32 %v3577_v40, %v510_v47  ;;  %v3770_v24 = vsub.f32 %v3580_v41, %v511_v50  ;;  %v640_v62 = vsel %vm392_vm0, %v572_v51, 0.0  ;;  %v643_v4 = vsel %vm392_vm0, %v573_v36, 0.0  ;;  %3099 = vmatpush3.bf16.msra.mxu0 %v3096_v8 }
  0xcd   : > { %638 = vadd.xlane.f32.xlu1 %v637_v46  ;;  %641 = vadd.xlane.f32.xlu0 %v640_v62  ;;  %v461_v63 = vpop.xlane.xlu0 %460  ;;  %v464_v3 = vpop.xlane.xlu1 %463 }
  0xce   : > { %v512_v6 = vmul.f32 0.03125, %v461_v63  ;;  %v513_v12 = vmul.f32 0.03125, %v464_v3  ;;  %v574_v14 = vmul.f32 %v3767_v58, %v3767_v58  ;;  %v575_v40 = vmul.f32 %v3770_v24, %v3770_v24 }
  0xd0   : > { %v3779_v41 = vsub.f32 %v3587_v44, %v512_v6  ;;  %v3782_v28 = vsub.f32 %v3590_v45, %v513_v12  ;;  %v646_v18 = vsel %vm392_vm0, %v574_v14, 0.0  ;;  %v649_v23 = vsel %vm392_vm0, %v575_v40, 0.0 }
  0xd1   : > { %644 = vadd.xlane.f32.xlu1 %v643_v4  ;;  %647 = vadd.xlane.f32.xlu0 %v646_v18  ;;  %v467_v19 = vpop.xlane.xlu0 %466  ;;  %v470_v22 = vpop.xlane.xlu1 %469 }
  0xd2   : > { %v514_v0 = vmul.f32 0.03125, %v467_v19  ;;  %v515_v16 = vmul.f32 0.03125, %v470_v22  ;;  %v576_v30 = vmul.f32 %v3779_v41, %v3779_v41  ;;  %v577_v44 = vmul.f32 %v3782_v28, %v3782_v28 }
  0xd4   : > { %v3791_v32 = vsub.f32 %v3597_v48, %v514_v0  ;;  %v3794_v45 = vsub.f32 %v3600_v49, %v515_v16  ;;  %v652_v33 = vsel %vm392_vm0, %v576_v30, 0.0  ;;  %v655_v39 = vsel %vm392_vm0, %v577_v44, 0.0 }
  0xd5   : > { %650 = vadd.xlane.f32.xlu1 %v649_v23  ;;  %653 = vadd.xlane.f32.xlu0 %v652_v33  ;;  %v473_v31 = vpop.xlane.xlu0 %472  ;;  %v476_v34 = vpop.xlane.xlu1 %475 }
  0xd6   : > { %v516_v42 = vmul.f32 0.03125, %v473_v31  ;;  %v517_v20 = vmul.f32 0.03125, %v476_v34  ;;  %v578_v46 = vmul.f32 %v3791_v32, %v3791_v32  ;;  %v579_v48 = vmul.f32 %v3794_v45, %v3794_v45 }
  0xd8   : > { %v3803_v47 = vsub.f32 %v3607_v52, %v516_v42  ;;  %v3806_v49 = vsub.f32 %v3610_v53, %v517_v20  ;;  %v658_v50 = vsel %vm392_vm0, %v578_v46, 0.0  ;;  %v661_v37 = vsel %vm392_vm0, %v579_v48, 0.0 }
  0xd9   : > { %656 = vadd.xlane.f32.xlu1 %v655_v39  ;;  %659 = vadd.xlane.f32.xlu0 %v658_v50  ;;  %v479_v51 = vpop.xlane.xlu0 %478  ;;  %v482_v36 = vpop.xlane.xlu1 %481 }
  0xda   : > { %v518_v54 = vmul.f32 0.03125, %v479_v51  ;;  %v519_v8 = vmul.f32 0.03125, %v482_v36  ;;  %v580_v62 = vmul.f32 %v3803_v47, %v3803_v47  ;;  %v581_v52 = vmul.f32 %v3806_v49, %v3806_v49 }
  0xdc   : > { %v3815_v63 = vsub.f32 %v3617_v56, %v518_v54  ;;  %v3818_v53 = vsub.f32 %v3620_v57, %v519_v8  ;;  %v664_v3 = vsel %vm392_vm0, %v580_v62, 0.0  ;;  %v667_v12 = vsel %vm392_vm0, %v581_v52, 0.0 }
  0xdd   : > { %662 = vadd.xlane.f32.xlu1 %v661_v37  ;;  %665 = vadd.xlane.f32.xlu0 %v664_v3  ;;  %v485_v4 = vpop.xlane.xlu0 %484  ;;  %v488_v6 = vpop.xlane.xlu1 %487 }
  0xde   : > { %v520_v14 = vmul.f32 0.03125, %v485_v4  ;;  %v521_v40 = vmul.f32 0.03125, %v488_v6  ;;  %v582_v18 = vmul.f32 %v3815_v63, %v3815_v63  ;;  %v583_v56 = vmul.f32 %v3818_v53, %v3818_v53 }
  0xe0   : > { %v3827_v19 = vsub.f32 %v3627_v60, %v520_v14  ;;  %v3830_v57 = vsub.f32 %v3630_v61, %v521_v40  ;;  %v670_v22 = vsel %vm392_vm0, %v582_v18, 0.0  ;;  %v673_v23 = vsel %vm392_vm0, %v583_v56, 0.0  ;;  %v3843_v14 = vld [vmem:[%s5942_s1] ss:$0 sm:$0xff] }
  0xe1   : > { %668 = vadd.xlane.f32.xlu1 %v667_v12  ;;  %671 = vadd.xlane.f32.xlu0 %v670_v22 }
  0xe2   : > { %v584_v0 = vmul.f32 %v3827_v19, %v3827_v19  ;;  %v585_v16 = vmul.f32 %v3830_v57, %v3830_v57 }
  0xe4   : > { %v676_v30 = vsel %vm392_vm0, %v584_v0, 0.0  ;;  %v679_v60 = vsel %vm392_vm0, %v585_v16, 0.0  ;;  %v3849_v0 = vld [vmem:[%s5943_s2] ss:$0 sm:$0xff] }
  0xe5   : > { %674 = vadd.xlane.f32.xlu1 %v673_v23  ;;  %677 = vadd.xlane.f32.xlu0 %v676_v30 }
  0xe9   : > { %680 = vadd.xlane.f32.xlu1 %v679_v60 }
 0x136   : > { %v588_v61 = vpop.xlane.xlu0 %587 }
 0x137   : > { %v682_v44 = vmul.f32 0.03125, %v588_v61 }
 0x139   : > { %v714_v33 = vadd.f32 1e-05, %v682_v44 }
 0x13a   : > { %v591_v31 = vpop.xlane.xlu1 %590  ;;  %v594_v34 = vpop.xlane.xlu0 %593 }
 0x13b   : > { %3156 = vrsqrt.f32 %v714_v33  ;;  %v683_v39 = vmul.f32 0.03125, %v591_v31  ;;  %v684_v42 = vmul.f32 0.03125, %v594_v34 }
 0x13d   : > { %v715_v20 = vadd.f32 1e-05, %v683_v39  ;;  %v716_v46 = vadd.f32 1e-05, %v684_v42 }
 0x13e   : > { %v597_v48 = vpop.xlane.xlu1 %596  ;;  %v600_v50 = vpop.xlane.xlu0 %599 }
 0x13f   : > { %3158 = vrsqrt.f32 %v715_v20  ;;  %v685_v51 = vmul.f32 0.03125, %v597_v48  ;;  %v686_v36 = vmul.f32 0.03125, %v600_v50 }
 0x140   : > { %3160 = vrsqrt.f32 %v716_v46 }
 0x141   : > { %v717_v37 = vadd.f32 1e-05, %v685_v51  ;;  %v718_v54 = vadd.f32 1e-05, %v686_v36 }
 0x142   : > { %v603_v8 = vpop.xlane.xlu1 %602  ;;  %v606_v62 = vpop.xlane.xlu0 %605 }
 0x143   : > { %3162 = vrsqrt.f32 %v717_v37  ;;  %v687_v52 = vmul.f32 0.03125, %v603_v8  ;;  %v688_v3 = vmul.f32 0.03125, %v606_v62 }
 0x144   : > { %3164 = vrsqrt.f32 %v718_v54 }
 0x145   : > { %v3157_v4 = vpop.eup %3156  ;;  %v719_v6 = vadd.f32 1e-05, %v687_v52  ;;  %v720_v12 = vadd.f32 1e-05, %v688_v3 }
 0x146   : > { %v609_v40 = vpop.xlane.xlu1 %608  ;;  %v612_v18 = vpop.xlane.xlu0 %611  ;;  %v778_v56 = vmul.f32 %v3157_v4, %v3637_v10 }
 0x147   : > { %3166 = vrsqrt.f32 %v719_v6  ;;  %v689_v22 = vmul.f32 0.03125, %v609_v40  ;;  %v690_v23 = vmul.f32 0.03125, %v612_v18 }
 0x148   : > { %3168 = vrsqrt.f32 %v720_v12  ;;  %v817_v16 = vmul.f32 %v3843_v14, %v778_v56 }
 0x149   : > { %v3159_v30 = vpop.eup %3158  ;;  %v721_v60 = vadd.f32 1e-05, %v689_v22  ;;  %v722_v61 = vadd.f32 1e-05, %v690_v23 }
 0x14a   : > { %v3161_v44 = vpop.eup %3160  ;;  %v615_v33 = vpop.xlane.xlu1 %614  ;;  %v3853_v34 = vadd.f32 %v3849_v0, %v817_v16  ;;  %v779_v10 = vmul.f32 %v3159_v30, %v3647_v26 }
 0x14b   : > { %v618_v31 = vpop.xlane.xlu0 %617  ;;  %3170 = vrsqrt.f32 %v721_v60  ;;  %v691_v39 = vmul.f32 0.03125, %v615_v33  ;;  %v780_v20 = vmul.f32 %v3161_v44, %v3640_v11 }
 0x14c   : > { %6035 = vst [vmem:[#allocation2_spill] sm:$0xff] %v3853_v34  ;;  %v692_v42 = vmul.f32 0.03125, %v618_v31  ;;  %3172 = vrsqrt.f32 %v722_v61  ;;  %2964 = vmatprep.mubr.msk.f32.mxu0 %vm392_vm0, %v3853_v34  ;;  %v818_v46 = vmul.f32 %v3843_v14, %v779_v10 }
 0x14d   : > { %v3163_v48 = vpop.eup %3162  ;;  %v723_v50 = vadd.f32 1e-05, %v691_v39  ;;  %v819_v36 = vmul.f32 %v3843_v14, %v780_v20 }
 0x14e   : > { %v724_v51 = vadd.f32 1e-05, %v692_v42  ;;  %v3165_v37 = vpop.eup %3164  ;;  %v621_v54 = vpop.xlane.xlu1 %620  ;;  %v3862_v26 = vadd.f32 %v3849_v0, %v818_v46  ;;  %v781_v62 = vmul.f32 %v3163_v48, %v3650_v27 }
 0x14f   : > { %v624_v8 = vpop.xlane.xlu0 %623  ;;  %3174 = vrsqrt.f32 %v723_v50  ;;  %v693_v11 = vmul.f32 0.03125, %v621_v54  ;;  %v3866_v3 = vadd.f32 %v3849_v0, %v819_v36  ;;  %v782_v6 = vmul.f32 %v3165_v37, %v3659_v2 }
 0x150   : > { %6036 = vst [vmem:[#allocation3_spill] sm:$0xff] %v3862_v26  ;;  %v694_v52 = vmul.f32 0.03125, %v624_v8  ;;  %3176 = vrsqrt.f32 %v724_v51  ;;  %2965 = vmatmul.mubr.msk.f32.vlgmr.msra.gmra.mrb[0].mxu0 %vm392_vm0, %v3862_v26  ;;  %v820_v4 = vmul.f32 %v3843_v14, %v781_v62 }
 0x151   : > { %6037 = vst [vmem:[#allocation4_spill] sm:$0xff] %v3866_v3  ;;  %v3167_v12 = vpop.eup %3166  ;;  %v725_v40 = vadd.f32 1e-05, %v693_v11  ;;  %2967 = vmatprep.mubr.msk.f32.mxu0 %vm392_vm0, %v3866_v3  ;;  %v821_v16 = vmul.f32 %v3843_v14, %v782_v6 }
 0x152   : > { %v726_v18 = vadd.f32 1e-05, %v694_v52  ;;  %v3169_v27 = vpop.eup %3168  ;;  %v627_v56 = vpop.xlane.xlu1 %626  ;;  %v3875_v23 = vadd.f32 %v3849_v0, %v820_v4  ;;  %v783_v30 = vmul.f32 %v3167_v12, %v3662_v5 }
 0x153   : > { %v630_v22 = vpop.xlane.xlu0 %629  ;;  %3178 = vrsqrt.f32 %v725_v40  ;;  %v695_v60 = vmul.f32 0.03125, %v627_v56  ;;  %v784_v2 = vmul.f32 %v3169_v27, %v3671_v55  ;;  %v3883_v44 = vadd.f32 %v3849_v0, %v821_v16 }
 0x154   : > { %6038 = vst [vmem:[#allocation5_spill] sm:$0xff] %v3875_v23  ;;  %v696_v61 = vmul.f32 0.03125, %v630_v22  ;;  %3180 = vrsqrt.f32 %v726_v18  ;;  %2968 = vmatmul.mubr.msk.f32.gmra.mrb[2].mxu0 %vm392_vm0, %v3875_v23  ;;  %v822_v33 = vmul.f32 %v3843_v14, %v783_v30 }
 0x155   : > { %6039 = vst [vmem:[#allocation6_spill] sm:$0xff] %v3883_v44  ;;  %v3171_v31 = vpop.eup %3170  ;;  %v727_v10 = vadd.f32 1e-05, %v695_v60  ;;  %v823_v42 = vmul.f32 %v3843_v14, %v784_v2  ;;  %2970 = vmatprep.mubr.msk.f32.mxu0 %vm392_vm0, %v3883_v44 }
 0x156   : > { %v728_v39 = vadd.f32 1e-05, %v696_v61  ;;  %v3173_v5 = vpop.eup %3172  ;;  %v633_v20 = vpop.xlane.xlu1 %632  ;;  %v3890_v46 = vadd.f32 %v3849_v0, %v822_v33  ;;  %v785_v48 = vmul.f32 %v3171_v31, %v3674_v9 }
 0x157   : > { %v636_v55 = vpop.xlane.xlu0 %635  ;;  %3182 = vrsqrt.f32 %v727_v10  ;;  %v697_v50 = vmul.f32 0.03125, %v633_v20  ;;  %v3894_v36 = vadd.f32 %v3849_v0, %v823_v42  ;;  %v786_v54 = vmul.f32 %v3173_v5, %v3683_v7 }
 0x158   : > { %6040 = vst [vmem:[#allocation7_spill] sm:$0xff] %v3890_v46  ;;  %v698_v51 = vmul.f32 0.03125, %v636_v55  ;;  %3184 = vrsqrt.f32 %v728_v39  ;;  %2971 = vmatmul.mubr.msk.f32.gmra.mrb[4].mxu0 %vm392_vm0, %v3890_v46  ;;  %v824_v37 = vmul.f32 %v3843_v14, %v785_v48 }
 0x159   : > { %6041 = vst [vmem:[#allocation8_spill] sm:$0xff] %v3894_v36  ;;  %v3175_v8 = vpop.eup %3174  ;;  %v729_v62 = vadd.f32 1e-05, %v697_v50  ;;  %2973 = vmatprep.mubr.msk.f32.mxu0 %vm392_vm0, %v3894_v36  ;;  %v825_v12 = vmul.f32 %v3843_v14, %v786_v54 }
 0x15a   : > { %v730_v11 = vadd.f32 1e-05, %v698_v51  ;;  %v3177_v9 = vpop.eup %3176  ;;  %v639_v52 = vpop.xlane.xlu1 %638  ;;  %v3903_v6 = vadd.f32 %v3849_v0, %v824_v37  ;;  %v787_v40 = vmul.f32 %v3175_v8, %v3686_v13 }
 0x15b   : > { %v642_v4 = vpop.xlane.xlu0 %641  ;;  %3186 = vrsqrt.f32 %v729_v62  ;;  %v699_v18 = vmul.f32 0.03125, %v639_v52  ;;  %v788_v7 = vmul.f32 %v3177_v9, %v3695_v1  ;;  %v3911_v56 = vadd.f32 %v3849_v0, %v825_v12 }
 0x15c   : > { %6042 = vst [vmem:[#allocation9_spill] sm:$0xff] %v3903_v6  ;;  %v700_v27 = vmul.f32 0.03125, %v642_v4  ;;  %3188 = vrsqrt.f32 %v730_v11  ;;  %2974 = vmatmul.mubr.msk.f32.gmra.mrb[6].mxu0 %vm392_vm0, %v3903_v6  ;;  %v826_v22 = vmul.f32 %v3843_v14, %v787_v40 }
 0x15d   : > { %6043 = vst [vmem:[#allocation10_spill] sm:$0xff] %v3911_v56  ;;  %v3179_v16 = vpop.eup %3178  ;;  %v731_v30 = vadd.f32 1e-05, %v699_v18  ;;  %v827_v61 = vmul.f32 %v3843_v14, %v788_v7  ;;  %2976 = vmatprep.mubr.msk.f32.mxu0 %vm392_vm0, %v3911_v56 }
 0x15e   : > { %v732_v60 = vadd.f32 1e-05, %v700_v27  ;;  %v3181_v13 = vpop.eup %3180  ;;  %v645_v2 = vpop.xlane.xlu1 %644  ;;  %v3918_v33 = vadd.f32 %v3849_v0, %v826_v22  ;;  %v789_v31 = vmul.f32 %v3179_v16, %v3698_v17 }
 0x15f   : > { %v648_v1 = vpop.xlane.xlu0 %647  ;;  %3190 = vrsqrt.f32 %v731_v30  ;;  %v701_v10 = vmul.f32 0.03125, %v645_v2  ;;  %v3922_v42 = vadd.f32 %v3849_v0, %v827_v61  ;;  %v790_v20 = vmul.f32 %v3181_v13, %v3707_v43 }
 0x160   : > { %6044 = vst [vmem:[#allocation11_spill] sm:$0xff] %v3918_v33  ;;  %v702_v39 = vmul.f32 0.03125, %v648_v1  ;;  %3192 = vrsqrt.f32 %v732_v60  ;;  %2977 = vmatmul.mubr.msk.f32.gmra.mrb[8].mxu0 %vm392_vm0, %v3918_v33  ;;  %v828_v5 = vmul.f32 %v3843_v14, %v789_v31 }
 0x161   : > { %6045 = vst [vmem:[#allocation12_spill] sm:$0xff] %v3922_v42  ;;  %v3183_v55 = vpop.eup %3182  ;;  %v733_v48 = vadd.f32 1e-05, %v701_v10  ;;  %2979 = vmatprep.mubr.msk.f32.mxu0 %vm392_vm0, %v3922_v42  ;;  %v829_v8 = vmul.f32 %v3843_v14, %v790_v20 }
 0x162   : > { %v734_v50 = vadd.f32 1e-05, %v702_v39  ;;  %v3185_v17 = vpop.eup %3184  ;;  %v651_v51 = vpop.xlane.xlu1 %650  ;;  %v3931_v54 = vadd.f32 %v3849_v0, %v828_v5  ;;  %v791_v62 = vmul.f32 %v3183_v55, %v3710_v21 }
 0x163   : > { %v654_v37 = vpop.xlane.xlu0 %653  ;;  %3194 = vrsqrt.f32 %v733_v48  ;;  %v703_v11 = vmul.f32 0.03125, %v651_v51  ;;  %v792_v43 = vmul.f32 %v3185_v17, %v3719_v59  ;;  %v3939_v52 = vadd.f32 %v3849_v0, %v829_v8 }
 0x164   : > { %6046 = vst [vmem:[#allocation13_spill] sm:$0xff] %v3931_v54  ;;  %v704_v9 = vmul.f32 0.03125, %v654_v37  ;;  %3196 = vrsqrt.f32 %v734_v50  ;;  %2980 = vmatmul.mubr.msk.f32.gmra.mrb[10].mxu0 %vm392_vm0, %v3931_v54  ;;  %v830_v4 = vmul.f32 %v3843_v14, %v791_v62 }
 0x165   : > { %6047 = vst [vmem:[#allocation14_spill] sm:$0xff] %v3939_v52  ;;  %v3187_v12 = vpop.eup %3186  ;;  %v735_v40 = vadd.f32 1e-05, %v703_v11  ;;  %v831_v27 = vmul.f32 %v3843_v14, %v792_v43  ;;  %2982 = vmatprep.mubr.msk.f32.mxu0 %vm392_vm0, %v3939_v52 }
 0x166   : > { %v736_v18 = vadd.f32 1e-05, %v704_v9  ;;  %v3189_v21 = vpop.eup %3188  ;;  %v657_v7 = vpop.xlane.xlu1 %656  ;;  %v3946_v22 = vadd.f32 %v3849_v0, %v830_v4  ;;  %v793_v16 = vmul.f32 %v3187_v12, %v3722_v25 }
 0x167   : > { %v660_v59 = vpop.xlane.xlu0 %659  ;;  %3198 = vrsqrt.f32 %v735_v40  ;;  %v705_v30 = vmul.f32 0.03125, %v657_v7  ;;  %v3950_v61 = vadd.f32 %v3849_v0, %v831_v27  ;;  %v794_v2 = vmul.f32 %v3189_v21, %v3731_v15 }
 0x168   : > { %6048 = vst [vmem:[#allocation15_spill] sm:$0xff] %v3946_v22  ;;  %v706_v60 = vmul.f32 0.03125, %v660_v59  ;;  %3200 = vrsqrt.f32 %v736_v18  ;;  %2983 = vmatmul.mubr.msk.f32.gmra.mrb[12].mxu0 %vm392_vm0, %v3946_v22  ;;  %v832_v13 = vmul.f32 %v3843_v14, %v793_v16 }
 0x169   : > { %6049 = vst [vmem:[#allocation16_spill] sm:$0xff] %v3950_v61  ;;  %v3191_v1 = vpop.eup %3190  ;;  %v737_v31 = vadd.f32 1e-05, %v705_v30  ;;  %2985 = vmatprep.mubr.msk.f32.mxu0 %vm392_vm0, %v3950_v61  ;;  %v833_v55 = vmul.f32 %v3843_v14, %v794_v2 }
 0x16a   : > { %v738_v10 = vadd.f32 1e-05, %v706_v60  ;;  %v3193_v25 = vpop.eup %3192  ;;  %v663_v39 = vpop.xlane.xlu1 %662  ;;  %v3959_v20 = vadd.f32 %v3849_v0, %v832_v13  ;;  %v795_v48 = vmul.f32 %v3191_v1, %v3734_v29 }
 0x16b   : > { %v666_v5 = vpop.xlane.xlu0 %665  ;;  %3202 = vrsqrt.f32 %v737_v31  ;;  %v707_v50 = vmul.f32 0.03125, %v663_v39  ;;  %v796_v15 = vmul.f32 %v3193_v25, %v3749_v35  ;;  %v3967_v51 = vadd.f32 %v3849_v0, %v833_v55 }
 0x16c   : > { %6050 = vst [vmem:[#allocation17_spill] sm:$0xff] %v3959_v20  ;;  %v708_v17 = vmul.f32 0.03125, %v666_v5  ;;  %3204 = vrsqrt.f32 %v738_v10  ;;  %2986 = vmatmul.mubr.msk.f32.gmra.mrb[14].mxu0 %vm392_vm0, %v3959_v20  ;;  %v834_v37 = vmul.f32 %v3843_v14, %v795_v48 }
 0x16d   : > { %6051 = vst [vmem:[#allocation18_spill] sm:$0xff] %v3967_v51  ;;  %v3195_v8 = vpop.eup %3194  ;;  %v739_v62 = vadd.f32 1e-05, %v707_v50  ;;  %v835_v9 = vmul.f32 %v3843_v14, %v796_v15  ;;  %2988 = vmatprep.mubr.msk.f32.mxu0 %vm392_vm0, %v3967_v51 }
 0x16e   : > { %v740_v11 = vadd.f32 1e-05, %v708_v17  ;;  %v3197_v29 = vpop.eup %3196  ;;  %v669_v43 = vpop.xlane.xlu1 %668  ;;  %v3974_v4 = vadd.f32 %v3849_v0, %v834_v37  ;;  %v797_v12 = vmul.f32 %v3195_v8, %v3752_v38 }
 0x16f   : > { %v672_v35 = vpop.xlane.xlu0 %671  ;;  %3206 = vrsqrt.f32 %v739_v62  ;;  %v709_v40 = vmul.f32 0.03125, %v669_v43  ;;  %v3978_v27 = vadd.f32 %v3849_v0, %v835_v9  ;;  %v798_v7 = vmul.f32 %v3197_v29, %v3767_v58 }
 0x170   : > { %6052 = vst [vmem:[#allocation19_spill] sm:$0xff] %v3974_v4  ;;  %v710_v18 = vmul.f32 0.03125, %v672_v35  ;;  %3208 = vrsqrt.f32 %v740_v11  ;;  %2989 = vmatmul.mubr.msk.f32.gmra.mrb[16].mxu0 %vm392_vm0, %v3974_v4  ;;  %v836_v21 = vmul.f32 %v3843_v14, %v797_v12 }
 0x171   : > { %6053 = vst [vmem:[#allocation20_spill] sm:$0xff] %v3978_v27  ;;  %v3199_v59 = vpop.eup %3198  ;;  %v741_v16 = vadd.f32 1e-05, %v709_v40  ;;  %2991 = vmatprep.mubr.msk.f32.mxu0 %vm392_vm0, %v3978_v27  ;;  %v837_v1 = vmul.f32 %v3843_v14, %v798_v7 }
 0x172   : > { %v742_v30 = vadd.f32 1e-05, %v710_v18  ;;  %v3201_v38 = vpop.eup %3200  ;;  %v675_v60 = vpop.xlane.xlu1 %674  ;;  %v3987_v2 = vadd.f32 %v3849_v0, %v836_v21  ;;  %v799_v31 = vmul.f32 %v3199_v59, %v3770_v24 }
 0x173   : > { %v678_v13 = vpop.xlane.xlu0 %677  ;;  %3210 = vrsqrt.f32 %v741_v16  ;;  %v711_v10 = vmul.f32 0.03125, %v675_v60  ;;  %v800_v58 = vmul.f32 %v3201_v38, %v3779_v41  ;;  %v3995_v39 = vadd.f32 %v3849_v0, %v837_v1 }
 0x174   : > { %6054 = vst [vmem:[#allocation21_spill] sm:$0xff] %v3987_v2  ;;  %v712_v25 = vmul.f32 0.03125, %v678_v13  ;;  %3212 = vrsqrt.f32 %v742_v30  ;;  %2992 = vmatmul.mubr.msk.f32.gmra.mrb[18].mxu0 %vm392_vm0, %v3987_v2  ;;  %v838_v5 = vmul.f32 %v3843_v14, %v799_v31 }
 0x175   : > { %6055 = vst [vmem:[#allocation22_spill] sm:$0xff] %v3995_v39  ;;  %v3203_v55 = vpop.eup %3202  ;;  %v743_v48 = vadd.f32 1e-05, %v711_v10  ;;  %v839_v17 = vmul.f32 %v3843_v14, %v800_v58  ;;  %2994 = vmatprep.mubr.msk.f32.mxu0 %vm392_vm0, %v3995_v39  ;;  %v4270_v39 = vld [vmem:[%s5946_s5 + $0x6] ss:$0 sm:$0xff] }
 0x176   : > { %v744_v50 = vadd.f32 1e-05, %v712_v25  ;;  %v3205_v24 = vpop.eup %3204  ;;  %v681_v15 = vpop.xlane.xlu1 %680  ;;  %v4002_v41 = vadd.f32 %v3849_v0, %v838_v5  ;;  %v801_v37 = vmul.f32 %v3203_v55, %v3782_v28 }
 0x177   : > { %3214 = vrsqrt.f32 %v743_v48  ;;  %v713_v8 = vmul.f32 0.03125, %v681_v15  ;;  %v4006_v62 = vadd.f32 %v3849_v0, %v839_v17  ;;  %v802_v11 = vmul.f32 %v3205_v24, %v3791_v32  ;;  %v2414_v24 = vld [vmem:[%s5949_s8 + $0x8] sm:$0xff] }
 0x178   : > { %6056 = vst [vmem:[#allocation23_spill] sm:$0xff] %v4002_v41  ;;  %3216 = vrsqrt.f32 %v744_v50  ;;  %2995 = vmatmul.mubr.msk.f32.gmra.mrb[20].mxu0 %vm392_vm0, %v4002_v41  ;;  %v840_v9 = vmul.f32 %v3843_v14, %v801_v37 }
 0x179   : > { %6057 = vst [vmem:[#allocation24_spill] sm:$0xff] %v4006_v62  ;;  %v3207_v29 = vpop.eup %3206  ;;  %v745_v43 = vadd.f32 1e-05, %v713_v8  ;;  %2997 = vmatprep.mubr.msk.f32.mxu0 %vm392_vm0, %v4006_v62  ;;  %v841_v28 = vmul.f32 %v3843_v14, %v802_v11  ;;  %v2417_v8 = vld [vmem:[%s5949_s8 + $0x20] sm:$0xff]  ;;  %v2418_v11 = vld [vmem:[%s5949_s8 + $0x28] sm:$0xff] }
 0x17a   : > { %v3209_v35 = vpop.eup %3208  ;;  %v4016_v12 = vadd.f32 %v3849_v0, %v840_v9  ;;  %v803_v40 = vmul.f32 %v3207_v29, %v3794_v45  ;;  %v3108_v9 = vpack.c.bf16 %v2418_v11, %v2417_v8  ;;  %v2419_v29 = vld [vmem:[%s5949_s8 + $0x30] sm:$0xff]  ;;  %v4228_v62 = vld [vmem:[%s5946_s5 + $0x7] ss:$0 sm:$0xff] }
 0x17b   : > { %3218 = vrsqrt.f32 %v745_v43  ;;  %v4020_v32 = vadd.f32 %v3849_v0, %v841_v28  ;;  %v804_v18 = vmul.f32 %v3209_v35, %v3803_v47  ;;  %v2420_v43 = vld [vmem:[%s5949_s8 + $0x38] sm:$0xff]  ;;  %v2421_v35 = vld [vmem:[%s5949_s8 + $0x40] sm:$0xff] }
 0x17c   : > { %6058 = vst [vmem:[#allocation25_spill] sm:$0xff] %v4016_v12  ;;  %2998 = vmatmul.mubr.msk.f32.gmra.mrb[22].mxu0 %vm392_vm0, %v4016_v12  ;;  %v842_v21 = vmul.f32 %v3843_v14, %v803_v40  ;;  %v3112_v28 = vpack.c.bf16 %v2420_v43, %v2419_v29  ;;  %v2422_v40 = vld [vmem:[%s5949_s8 + $0x48] sm:$0xff] }
 0x17d   : > { %6059 = vst [vmem:[#allocation26_spill] sm:$0xff] %v4020_v32  ;;  %v3211_v7 = vpop.eup %3210  ;;  %3000 = vmatprep.mubr.msk.f32.mxu0 %vm392_vm0, %v4020_v32  ;;  %v843_v59 = vmul.f32 %v3843_v14, %v804_v18  ;;  %v3116_v18 = vpack.c.bf16 %v2422_v40, %v2421_v35 }
 0x17e   : > { %v3213_v16 = vpop.eup %3212  ;;  %v4030_v45 = vadd.f32 %v3849_v0, %v842_v21  ;;  %v805_v30 = vmul.f32 %v3211_v7, %v3806_v49  ;;  %v2423_v21 = vld [vmem:[%s5949_s8 + $0x50] sm:$0xff]  ;;  %v2424_v7 = vld [vmem:[%s5949_s8 + $0x58] sm:$0xff] }
 0x17f   : > { %v4034_v38 = vadd.f32 %v3849_v0, %v843_v59  ;;  %v806_v47 = vmul.f32 %v3213_v16, %v3815_v63  ;;  %v3120_v59 = vpack.c.bf16 %v2424_v7, %v2423_v21  ;;  %v2425_v16 = vld [vmem:[%s5949_s8 + $0x60] sm:$0xff] }
 0x180   : > { %6060 = vst [vmem:[#allocation27_spill] sm:$0xff] %v4030_v45  ;;  %3001 = vmatmul.mubr.msk.f32.gmra.mrb[24].mxu0 %vm392_vm0, %v4030_v45  ;;  %v844_v60 = vmul.f32 %v3843_v14, %v805_v30  ;;  %v2426_v30 = vld [vmem:[%s5949_s8 + $0x68] sm:$0xff] }
 0x181   : > { %6061 = vst [vmem:[#allocation28_spill] sm:$0xff] %v4034_v38  ;;  %v3215_v13 = vpop.eup %3214  ;;  %3003 = vmatprep.mubr.msk.f32.mxu0 %vm392_vm0, %v4034_v38  ;;  %v845_v1 = vmul.f32 %v3843_v14, %v806_v47  ;;  %v3124_v47 = vpack.c.bf16 %v2426_v30, %v2425_v16 }
 0x182   : > { %v3217_v31 = vpop.eup %3216  ;;  %v4044_v10 = vadd.f32 %v3849_v0, %v844_v60  ;;  %v807_v49 = vmul.f32 %v3215_v13, %v3818_v53  ;;  %v2427_v60 = vld [vmem:[%s5949_s8 + $0x70] sm:$0xff]  ;;  %v2428_v13 = vld [vmem:[%s5949_s8 + $0x78] sm:$0xff] }
 0x183   : > { %v4048_v25 = vadd.f32 %v3849_v0, %v845_v1  ;;  %v808_v63 = vmul.f32 %v3217_v31, %v3827_v19  ;;  %v3128_v1 = vpack.c.bf16 %v2428_v13, %v2427_v60  ;;  %v4125_v31 = vld [vmem:[%s5945_s4] ss:$0 sm:$0xff] }
 0x184   : > { %6062 = vst [vmem:[#allocation29_spill] sm:$0xff] %v4044_v10  ;;  %3004 = vmatmul.mubr.msk.f32.gmra.mrb[26].mxu0 %vm392_vm0, %v4044_v10  ;;  %v846_v58 = vmul.f32 %v3843_v14, %v807_v49 }
 0x185   : > { %6063 = vst [vmem:[#allocation30_spill] sm:$0xff] %v4048_v25  ;;  %v3219_v5 = vpop.eup %3218  ;;  %3006 = vmatprep.mubr.msk.f32.mxu0 %vm392_vm0, %v4048_v25  ;;  %v847_v55 = vmul.f32 %v3843_v14, %v808_v63 }
 0x186   : > { %v4058_v48 = vadd.f32 %v3849_v0, %v846_v58  ;;  %v809_v53 = vmul.f32 %v3219_v5, %v3830_v57  ;;  %v2413_v57 = vld [vmem:[%s5949_s8] sm:$0xff] }
 0x187   : > { %v4062_v50 = vadd.f32 %v3849_v0, %v847_v55  ;;  %v3100_v15 = vpack.c.bf16 %v2414_v24, %v2413_v57 }
 0x188   : > { %6064 = vst [vmem:[#allocation31_spill] sm:$0xff] %v4058_v48  ;;  %3007 = vmatmul.mubr.msk.f32.gmra.mrb[28].mxu0 %vm392_vm0, %v4058_v48  ;;  %v848_v19 = vmul.f32 %v3843_v14, %v809_v53  ;;  %v2415_v14 = vld [vmem:[%s5949_s8 + $0x10] sm:$0xff] }
 0x189   : > { %6065 = vst [vmem:[#allocation32_spill] sm:$0xff] %v4062_v50  ;;  %3009 = vmatprep.mubr.msk.f32.mxu0 %vm392_vm0, %v4062_v50  ;;  %3101 = vmatprep.subr.bf16.mxu0 %v3100_v15 }
 0x18a   : > { %v4070_v17 = vadd.f32 %v3849_v0, %v848_v19  ;;  %3132 = vmatprep.subr.bf16.mxu1 %v3100_v15  ;;  %3103 = vmatpush3.bf16.msra.mxu0 %v3100_v15  ;;  %v2416_v0 = vld [vmem:[%s5949_s8 + $0x18] sm:$0xff] }
 0x18b   : > { %3140 = vmatpush3.bf16.msra.mxu1 %v3100_v15  ;;  %v3104_v37 = vpack.c.bf16 %v2416_v0, %v2415_v14 }
 0x18c   : > { %6066 = vst [vmem:[#allocation33_spill] sm:$0xff] %v4070_v17  ;;  %3010 = vmatmul.mubr.msk.f32.gmra.mrb[30].mxu0 %vm392_vm0, %v4070_v17 }
 0x18d   : > { %3105 = vmatprep.subr.bf16.mxu0 %v3104_v37  ;;  %3133 = vmatprep.subr.bf16.mxu1 %v3104_v37 }
 0x18e   : > { %3107 = vmatpush3.bf16.msra.mxu0 %v3104_v37 }
 0x18f   : > { %3141 = vmatpush3.bf16.msra.mxu1 %v3104_v37  ;;  %3109 = vmatprep.subr.bf16.mxu0 %v3108_v9 }
 0x190   : > { %3134 = vmatprep.subr.bf16.mxu1 %v3108_v9 }
 0x192   : > { %3111 = vmatpush3.bf16.msra.mxu0 %v3108_v9 }
 0x193   : > { %3142 = vmatpush3.bf16.msra.mxu1 %v3108_v9  ;;  %3113 = vmatprep.subr.bf16.mxu0 %v3112_v28 }
 0x194   : > { %3135 = vmatprep.subr.bf16.mxu1 %v3112_v28 }
 0x196   : > { %3115 = vmatpush3.bf16.msra.mxu0 %v3112_v28 }
 0x197   : > { %3143 = vmatpush3.bf16.msra.mxu1 %v3112_v28  ;;  %3117 = vmatprep.subr.bf16.mxu0 %v3116_v18 }
 0x198   : > { %3136 = vmatprep.subr.bf16.mxu1 %v3116_v18 }
 0x19a   : > { %3119 = vmatpush3.bf16.msra.mxu0 %v3116_v18 }
 0x19b   : > { %3144 = vmatpush3.bf16.msra.mxu1 %v3116_v18  ;;  %3121 = vmatprep.subr.bf16.mxu0 %v3120_v59 }
 0x19c   : > { %3137 = vmatprep.subr.bf16.mxu1 %v3120_v59 }
 0x19e   : > { %3123 = vmatpush3.bf16.msra.mxu0 %v3120_v59 }
 0x19f   : > { %3145 = vmatpush3.bf16.msra.mxu1 %v3120_v59  ;;  %3125 = vmatprep.subr.bf16.mxu0 %v3124_v47 }
 0x1a0   : > { %3138 = vmatprep.subr.bf16.mxu1 %v3124_v47 }
 0x1a2   : > { %3127 = vmatpush3.bf16.msra.mxu0 %v3124_v47 }
 0x1a3   : > { %3146 = vmatpush3.bf16.msra.mxu1 %v3124_v47  ;;  %3129 = vmatprep.subr.bf16.mxu0 %v3128_v1 }
 0x1a4   : > { %3139 = vmatprep.subr.bf16.mxu1 %v3128_v1 }
 0x1a6   : > { %3131 = vmatpush3.bf16.msra.mxu0 %v3128_v1 }
 0x1a7   : > { %3147 = vmatpush3.bf16.msra.mxu1 %v3128_v1 }
 0x223   : > { %v2966_v49 = vpop.f32.mrb[0].mxu0 }
 0x224   : > { %v1067_v63 = vadd.f32 %v2966_v49, %v4125_v31  ;;  %v1061_v58 = vpop.f32.mrb[1].mxu0 }
 0x225   : > { %v1062_v5 = vadd.f32 %v4125_v31, %v1061_v58 }
 0x226   : > { %v1253_v55 = vmul.f32 0.70710677, %v1067_v63  ;;  %v1221_v16 = vmul.f32 0.5, %v1067_v63 }
 0x227   : > { %v1252_v53 = vmul.f32 0.70710677, %v1062_v5  ;;  %v2969_v19 = vpop.f32.mrb[2].mxu0  ;;  %v1220_v13 = vmul.f32 0.5, %v1062_v5  ;;  %v4150_v5 = vld [vmem:[%s5946_s5 + $0x4] ss:$0 sm:$0xff] }
 0x228   : > { %3220 = verf.f32 %v1253_v55  ;;  %v1077_v57 = vadd.f32 %v2969_v19, %v4125_v31  ;;  %v1071_v24 = vpop.f32.mrb[3].mxu0  ;;  %v4141_v19 = vld [vmem:[%s5946_s5 + $0x1] ss:$0 sm:$0xff] }
 0x229   : > { %3222 = verf.f32 %v1252_v53  ;;  %v1072_v15 = vadd.f32 %v4125_v31, %v1071_v24 }
 0x22a   : > { %v1255_v14 = vmul.f32 0.70710677, %v1077_v57  ;;  %v1223_v49 = vmul.f32 0.5, %v1077_v57 }
 0x22b   : > { %v1254_v0 = vmul.f32 0.70710677, %v1072_v15  ;;  %v2972_v37 = vpop.f32.mrb[4].mxu0  ;;  %v1222_v24 = vmul.f32 0.5, %v1072_v15 }
 0x22c   : > { %3224 = verf.f32 %v1255_v14  ;;  %v1087_v8 = vadd.f32 %v2972_v37, %v4125_v31  ;;  %v1081_v11 = vpop.f32.mrb[5].mxu0 }
 0x22d   : > { %3226 = verf.f32 %v1254_v0  ;;  %v1082_v9 = vadd.f32 %v4125_v31, %v1081_v11 }
 0x22e   : > { %v1257_v29 = vmul.f32 0.70710677, %v1087_v8  ;;  %v4143_v14 = vmul.f32 0.5, %v1087_v8  ;;  %v4161_v8 = vld [vmem:[%s5946_s5] ss:$0 sm:$0xff] }
 0x22f   : > { %v1256_v43 = vmul.f32 0.70710677, %v1082_v9  ;;  %v2975_v28 = vpop.f32.mrb[6].mxu0  ;;  %v4145_v63 = vmul.f32 0.5, %v1082_v9  ;;  %6067 = vst [vmem:[#allocation34_spill] sm:$0xff] %v4161_v8 }
 0x230   : > { %3228 = verf.f32 %v1257_v29  ;;  %v1097_v35 = vadd.f32 %v2975_v28, %v4125_v31  ;;  %v1091_v40 = vpop.f32.mrb[7].mxu0 }
 0x231   : > { %3230 = verf.f32 %v1256_v43  ;;  %v1092_v18 = vadd.f32 %v4125_v31, %v1091_v40 }
 0x232   : > { %v3221_v21 = vpop.eup %3220  ;;  %v1259_v7 = vmul.f32 0.70710677, %v1097_v35  ;;  %v4154_v37 = vmul.f32 0.5, %v1097_v35 }
 0x233   : > { %v3223_v59 = vpop.eup %3222  ;;  %v1317_v30 = vadd.f32 1.0, %v3221_v21  ;;  %v1258_v47 = vmul.f32 0.70710677, %v1092_v18  ;;  %v2978_v60 = vpop.f32.mrb[8].mxu0  ;;  %v4163_v9 = vmul.f32 0.5, %v1092_v18 }
 0x234   : > { %v1316_v1 = vadd.f32 1.0, %v3223_v59  ;;  %v1107_v58 = vadd.f32 %v2978_v60, %v4125_v31  ;;  %v1101_v55 = vpop.f32.mrb[9].mxu0  ;;  %3232 = verf.f32 %v1259_v7  ;;  %v4175_v21 = vld [vmem:[%s5946_s5 + $0x3] ss:$0 sm:$0xff] }
 0x235   : > { %v4136_v53 = vmul.f32 %v1317_v30, %v1221_v16  ;;  %3234 = verf.f32 %v1258_v47  ;;  %v4180_v59 = vadd.f32 %v4125_v31, %v1101_v55  ;;  %v4187_v16 = vld [vmem:[%s5946_s5 + $0x2] ss:$0 sm:$0xff] }
 0x236   : > { %v3225_v0 = vpop.eup %3224  ;;  %v4152_v57 = vmul.f32 %v1316_v1, %v1220_v13  ;;  %v1261_v11 = vmul.f32 0.70710677, %v1107_v58  ;;  %v4177_v7 = vmul.f32 0.5, %v1107_v58  ;;  %v4197_v58 = vld [vmem:[%s5946_s5 + $0x5] ss:$0 sm:$0xff] }
 0x237   : > { %v3227_v29 = vpop.eup %3226  ;;  %v1414_v43 = vrot.slane %v4136_v53, 7  ;;  %v5955_v15 = vrot.slane %v4136_v53, 1  ;;  %v4165_v28 = vpop.f32.mrb[10].mxu0  ;;  %v4169_v35 = vmul.f32 %v4141_v19, %v4136_v53  ;;  %v1814_v30 = vmul.f32 %v4150_v5, %v4136_v53 }
 0x238   : > { %v1413_v40 = vrot.slane %v4152_v57, 7  ;;  %v4182_v18 = vpop.f32.mrb[11].mxu0  ;;  %v1319_v47 = vadd.f32 1.0, %v3225_v0  ;;  %v1318_v60 = vadd.f32 1.0, %v3227_v29  ;;  %3236 = verf.f32 %v1261_v11 }
 0x239   : > { %6068 = vst [vmem:[#allocation35_spill] sm:$0xff] %v4169_v35  ;;  %v1590_v1 = vsel %vm1509_vm1, %v5955_v15, 0.0  ;;  %v1646_v11 = vmul.f32 %v4141_v19, %v4152_v57  ;;  %v1813_v38 = vmul.f32 %v4150_v5, %v4152_v57  ;;  %v1260_v52 = vmul.f32 0.70710677, %v4180_v59 }
 0x23a   : > { %v3229_v13 = vpop.eup %3228  ;;  %v1415_v55 = vsel %vm1412_vm2, %v1413_v40, %v1414_v43  ;;  %v1493_v50 = vsel %vm1412_vm2, 0.0, %v1413_v40  ;;  %v4211_v43 = vmul.f32 %v1319_v47, %v1223_v49  ;;  %v4213_v40 = vmul.f32 %v1318_v60, %v1222_v24 }
 0x23b   : > { %v3231_v25 = vpop.eup %3230  ;;  %v1611_v0 = vmul.f32 %v4161_v8, %v1493_v50  ;;  %v1776_v29 = vmul.f32 %v4175_v21, %v1493_v50  ;;  %v1777_v15 = vmul.f32 %v4175_v21, %v1415_v55  ;;  %v4207_v48 = vpop.f32.mrb[12].mxu0  ;;  %v1321_v17 = vadd.f32 1.0, %v3229_v13 }
 0x23c   : > { %v4215_v10 = vpop.f32.mrb[13].mxu0  ;;  %v4218_v32 = vmul.f32 %v4187_v16, %v1590_v1  ;;  %v4221_v45 = vmul.f32 %v4197_v58, %v1590_v1  ;;  %v1320_v49 = vadd.f32 1.0, %v3231_v25  ;;  %v4231_v24 = vmul.f32 %v4161_v8, %v1415_v55 }
 0x23d   : > { %v4223_v50 = vadd.f32 %v1814_v30, %v1777_v15  ;;  %v4233_v47 = vadd.f32 %v1646_v11, %v1611_v0  ;;  %v1417_v60 = vrot.slane %v4211_v43, 7  ;;  %v5967_v13 = vrot.slane %v4211_v43, 1  ;;  %v4246_v30 = vld [vmem:[%s5946_s5 + $0x8] ss:$0 sm:$0xff] }
 0x23e   : > { %6069 = vst [vmem:[#allocation36_spill] sm:$0xff] %v4218_v32  ;;  %6070 = vst [vmem:[#allocation37_spill] sm:$0xff] %v4231_v24  ;;  %v4237_v12 = vadd.f32 %v1813_v38, %v1776_v29  ;;  %v4241_v15 = vmul.f32 %v4141_v19, %v4211_v43  ;;  %v1416_v25 = vrot.slane %v4213_v40, 7  ;;  %v4250_v1 = vmul.f32 0.5, %v4180_v59  ;;  %v3233_v0 = vpop.eup %3232 }
 0x23f   : > { %v4252_v55 = vpop.f32.mrb[14].mxu0  ;;  %v4257_v38 = vsel %vm1509_vm1, %v5967_v13, 0.0  ;;  %v4261_v11 = vmul.f32 %v4150_v5, %v4211_v43  ;;  %v4265_v29 = vmul.f32 %v4228_v62, %v4211_v43  ;;  %v4273_v41 = vmul.f32 %v1321_v17, %v4143_v14  ;;  %v3235_v2 = vpop.eup %3234 }
 0x240   : > { %6071 = vst [vmem:[#allocation38_spill] sm:$0xff] %v4241_v15  ;;  %6072 = vst [vmem:[#allocation39_spill] sm:$0xff] %v4257_v38  ;;  %v1131_v27 = vpop.f32.mrb[15].mxu0  ;;  %v4276_v13 = vsel %vm1412_vm2, %v1416_v25, %v1417_v60  ;;  %v4281_v4 = vmul.f32 %v4141_v19, %v4213_v40  ;;  %v4284_v61 = vmul.f32 %v1320_v49, %v4145_v63  ;;  %v4291_v17 = vsel %vm1412_vm2, 0.0, %v1416_v25 }
 0x241   : > { %6073 = vst [vmem:[#allocation40_spill] sm:$0xff] %v4261_v11  ;;  %6074 = vst [vmem:[#allocation41_spill] sm:$0xff] %v4276_v13  ;;  %v4288_v20 = vmul.f32 %v4246_v30, %v4257_v38  ;;  %v4295_v14 = vmul.f32 %v4150_v5, %v4213_v40  ;;  %v4299_v60 = vmul.f32 %v4228_v62, %v4213_v40  ;;  %v1323_v56 = vadd.f32 1.0, %v3233_v0 }
 0x242   : > { %6075 = vst [vmem:[#allocation42_spill] sm:$0xff] %v4281_v4  ;;  %v3237_v51 = vpop.eup %3236  ;;  %v4303_v63 = vmul.f32 %v4270_v39, %v4276_v13  ;;  %v4309_v25 = vmul.f32 %v4141_v19, %v4273_v41  ;;  %v4313_v42 = vmul.f32 %v4150_v5, %v4273_v41  ;;  %v5984_v54 = vrot.slane %v4284_v61, 7 }
 0x243   : > { %v2990_v22 = vpop.f32.mrb[16].mxu0  ;;  %v1322_v33 = vadd.f32 1.0, %v3235_v2  ;;  %v4318_v6 = vmul.f32 %v4228_v62, %v4273_v41  ;;  %v1325_v49 = vadd.f32 1.0, %v3237_v51  ;;  %v1117_v44 = vadd.f32 %v4165_v28, %v4125_v31 }
 0x244   : > { %6076 = vst [vmem:[#allocation43_spill] sm:$0xff] %v4309_v25  ;;  %6077 = vst [vmem:[#allocation44_spill] sm:$0xff] %v4313_v42  ;;  %v1141_v36 = vpop.f32.mrb[17].mxu0  ;;  %v4326_v3 = vmul.f32 %v4150_v5, %v4284_v61  ;;  %v4329_v0 = vmul.f32 %v1323_v56, %v4154_v37  ;;  %v4336_v51 = vmul.f32 %v4228_v62, %v4284_v61  ;;  %3238 = verf.f32 %v1260_v52 }
 0x245   : > { %6078 = vst [vmem:[#allocation45_spill] sm:$0xff] %v4318_v6  ;;  %v4332_v2 = vmul.f32 %v1322_v33, %v4163_v9  ;;  %v4339_v59 = vmul.f32 %v1325_v49, %v4177_v7  ;;  %v1263_v28 = vmul.f32 0.70710677, %v1117_v44  ;;  %v4344_v23 = vsel %vm1412_vm2, 0.0, %v5984_v54 }
 0x246   : > { %6079 = vst [vmem:[#allocation46_spill] sm:$0xff] %v4326_v3  ;;  %6080 = vst [vmem:[#allocation47_spill] sm:$0xff] %v4329_v0  ;;  %v4346_v56 = vmul.f32 0.5, %v1117_v44  ;;  %v1112_v33 = vadd.f32 %v4125_v31, %v4182_v18  ;;  %v1127_v37 = vadd.f32 %v4207_v48, %v4125_v31  ;;  %v4356_v49 = vmul.f32 %v4141_v19, %v4329_v0 }
 0x247   : > { %6081 = vst [vmem:[#allocation48_spill] sm:$0xff] %v4332_v2  ;;  %6082 = vst [vmem:[#allocation49_spill] sm:$0xff] %v4336_v51  ;;  %v2993_v46 = vpop.f32.mrb[18].mxu0  ;;  %v4361_v44 = vmul.f32 %v4150_v5, %v4329_v0  ;;  %v4365_v18 = vmul.f32 %v4228_v62, %v4329_v0  ;;  %v4370_v7 = vmul.f32 %v4141_v19, %v4332_v2  ;;  %3240 = verf.f32 %v1263_v28 }
 0x248   : > { %6083 = vst [vmem:[#allocation50_spill] sm:$0xff] %v4339_v59  ;;  %v1151_v9 = vpop.f32.mrb[19].mxu0  ;;  %6084 = vst [vmem:[#allocation51_spill] sm:$0xff] %v4356_v49  ;;  %v4374_v52 = vmul.f32 %v4228_v62, %v4332_v2  ;;  %v6089_v49 = vrot.slane %v4332_v2, 7  ;;  %v4385_v48 = vmul.f32 %v4141_v19, %v4339_v59  ;;  %v1265_v25 = vmul.f32 0.70710677, %v1127_v37 }
 0x249   : > { %6085 = vst [vmem:[#allocation52_spill] sm:$0xff] %v4361_v44  ;;  %6086 = vst [vmem:[#allocation53_spill] sm:$0xff] %v4365_v18  ;;  %v1122_v18 = vadd.f32 %v4125_v31, %v4215_v10  ;;  %v1137_v54 = vadd.f32 %v4252_v55, %v4125_v31  ;;  %v1132_v28 = vadd.f32 %v4125_v31, %v1131_v27  ;;  %v4402_v10 = vmul.f32 0.5, %v1112_v33 }
 0x24a   : > { %6087 = vst [vmem:[#allocation54_spill] sm:$0xff] %v4370_v7  ;;  %6088 = vst [vmem:[#allocation55_spill] sm:$0xff] %v4374_v52  ;;  %v4381_v44 = vsel %vm1412_vm2, 0.0, %v6089_v49  ;;  %v1262_v7 = vmul.f32 0.70710677, %v1112_v33  ;;  %v1147_v34 = vadd.f32 %v2990_v22, %v4125_v31  ;;  %v4395_v49 = vmul.f32 %v4150_v5, %v4339_v59 }
 0x24b   : > { %v2996_v26 = vpop.f32.mrb[20].mxu0  ;;  %6090 = vst [vmem:[#allocation56_spill] sm:$0xff] %v4381_v44  ;;  %6091 = vst [vmem:[#allocation57_spill] sm:$0xff] %v4385_v48  ;;  %v4399_v48 = vmul.f32 %v4228_v62, %v4339_v59  ;;  %v1142_v15 = vadd.f32 %v4125_v31, %v1141_v36  ;;  %v4404_v52 = vmul.f32 0.5, %v1127_v37  ;;  %v1264_v27 = vmul.f32 0.70710677, %v1122_v18 }
 0x24c   : > { %v1161_v42 = vpop.f32.mrb[21].mxu0  ;;  %6092 = vst [vmem:[#allocation58_spill] sm:$0xff] %v4395_v49  ;;  %3242 = verf.f32 %v1262_v7  ;;  %v1267_v22 = vmul.f32 0.70710677, %v1137_v54  ;;  %v1266_v44 = vmul.f32 0.70710677, %v1132_v28  ;;  %v1157_v3 = vadd.f32 %v2993_v46, %v4125_v31 }
 0x24d   : > { %6093 = vst [vmem:[#allocation59_spill] sm:$0xff] %v4399_v48  ;;  %3244 = verf.f32 %v1265_v25  ;;  %v1152_v49 = vadd.f32 %v4125_v31, %v1151_v9  ;;  %v4408_v8 = vmul.f32 0.5, %v1122_v18  ;;  %v1269_v7 = vmul.f32 0.70710677, %v1147_v34 }
 0x24e   : > { %v3239_v4 = vpop.eup %3238  ;;  %3246 = verf.f32 %v1264_v27  ;;  %v1268_v48 = vmul.f32 0.70710677, %v1142_v15  ;;  %v4410_v59 = vmul.f32 0.5, %v1137_v54  ;;  %v4412_v25 = vmul.f32 0.5, %v1132_v28 }
 0x24f   : > { %v2999_v55 = vpop.f32.mrb[22].mxu0  ;;  %v1324_v33 = vadd.f32 1.0, %v3239_v4  ;;  %3248 = verf.f32 %v1267_v22  ;;  %v4414_v37 = vmul.f32 0.5, %v1147_v34  ;;  %v4416_v6 = vmul.f32 0.5, %v1142_v15 }
 0x250   : > { %v1171_v36 = vpop.f32.mrb[23].mxu0  ;;  %3250 = verf.f32 %v1266_v44  ;;  %v1167_v46 = vadd.f32 %v2996_v26, %v4125_v31  ;;  %v1271_v27 = vmul.f32 0.70710677, %v1157_v3  ;;  %v1162_v4 = vadd.f32 %v4125_v31, %v1161_v42 }
 0x251   : > { %v4420_v18 = vmul.f32 %v1324_v33, %v4250_v1  ;;  %3252 = verf.f32 %v1269_v7  ;;  %v3241_v11 = vpop.eup %3240  ;;  %v4423_v28 = vmul.f32 0.5, %v1157_v3  ;;  %v1270_v44 = vmul.f32 0.70710677, %v1152_v49 }
 0x252   : > { %3254 = verf.f32 %v1268_v48  ;;  %v1177_v34 = vadd.f32 %v2999_v55, %v4125_v31  ;;  %v4426_v15 = vmul.f32 0.5, %v1152_v49  ;;  %v4428_v22 = vmul.f32 0.5, %v1167_v46 }
 0x253   : > { %v3002_v9 = vpop.f32.mrb[24].mxu0  ;;  %6094 = vst [vmem:[#allocation60_spill] sm:$0xff] %v4420_v18  ;;  %v1273_v26 = vmul.f32 0.70710677, %v1167_v46  ;;  %v1172_v1 = vadd.f32 %v4125_v31, %v1171_v36  ;;  %v1327_v42 = vadd.f32 1.0, %v3241_v11  ;;  %v4437_v48 = vmul.f32 %v4141_v19, %v4420_v18 }
 0x254   : > { %v1181_v54 = vpop.f32.mrb[25].mxu0  ;;  %v1272_v38 = vmul.f32 0.70710677, %v1162_v4  ;;  %v4441_v49 = vmul.f32 %v4150_v5, %v4420_v18  ;;  %3256 = verf.f32 %v1271_v27  ;;  %v4443_v55 = vmul.f32 0.5, %v1162_v4 }
 0x255   : > { %6095 = vst [vmem:[#allocation61_spill] sm:$0xff] %v4437_v48  ;;  %v4448_v11 = vmul.f32 %v1327_v42, %v4346_v56  ;;  %3258 = verf.f32 %v1270_v44  ;;  %v4450_v7 = vmul.f32 0.5, %v1177_v34  ;;  %v1275_v48 = vmul.f32 0.70710677, %v1177_v34 }
 0x256   : > { %v3243_v3 = vpop.eup %3242  ;;  %6096 = vst [vmem:[#allocation62_spill] sm:$0xff] %v4441_v49  ;;  %3260 = verf.f32 %v1273_v26  ;;  %v1187_v32 = vadd.f32 %v3002_v9, %v4125_v31  ;;  %v4453_v27 = vmul.f32 0.5, %v1172_v1  ;;  %v4455_v4 = vmul.f32 0.70710677, %v1172_v1 }
 0x257   : > { %v4433_v2 = vpop.f32.mrb[26].mxu0  ;;  %v3245_v46 = vpop.eup %3244  ;;  %6097 = vst [vmem:[#allocation63_spill] sm:$0xff] %v4448_v11  ;;  %v1326_v33 = vadd.f32 1.0, %v3243_v3  ;;  %3262 = verf.f32 %v1272_v38  ;;  %v4458_v49 = vadd.f32 %v4125_v31, %v1181_v54  ;;  %v4474_v54 = vmul.f32 %v4141_v19, %v4448_v11 }
 0x258   : > { %v4445_v36 = vpop.f32.mrb[27].mxu0  ;;  %v1329_v0 = vadd.f32 1.0, %v3245_v46  ;;  %v3247_v18 = vpop.eup %3246  ;;  %v4478_v46 = vmul.f32 %v4150_v5, %v4448_v11  ;;  %3264 = verf.f32 %v1275_v48 }
 0x259   : > { %v3249_v42 = vpop.eup %3248  ;;  %v4464_v3 = vmul.f32 %v1326_v33, %v4402_v10  ;;  %v1328_v9 = vadd.f32 1.0, %v3247_v18  ;;  %6099 = vst [vmem:[#allocation65_spill] sm:$0xff] %v4474_v54  ;;  %v4485_v18 = vmul.f32 0.5, %v1187_v32  ;;  %3266 = verf.f32 %v4455_v4 }
 0x25a   : > { %v4467_v34 = vmul.f32 %v1329_v0, %v4404_v52  ;;  %v3251_v26 = vpop.eup %3250  ;;  %6100 = vst [vmem:[#allocation66_spill] sm:$0xff] %v4478_v46  ;;  %v1331_v44 = vadd.f32 1.0, %v3249_v42  ;;  %v4482_v0 = vmul.f32 %v4228_v62, %v4448_v11  ;;  %v4496_v46 = vmul.f32 0.70710677, %v1187_v32 }
 0x25b   : > { %v4460_v56 = vpop.f32.mrb[28].mxu0  ;;  %v3253_v10 = vpop.eup %3252  ;;  %v4490_v54 = vmul.f32 %v4141_v19, %v4464_v3  ;;  %v4494_v42 = vmul.f32 %v4150_v5, %v4464_v3  ;;  %v4502_v48 = vmul.f32 %v4228_v62, %v4464_v3  ;;  %v1330_v32 = vadd.f32 1.0, %v3251_v26 }
 0x25c   : > { %6098 = vst [vmem:[#allocation64_spill] sm:$0xff] %v4467_v34  ;;  %v4469_v38 = vpop.f32.mrb[29].mxu0  ;;  %6101 = vst [vmem:[#allocation67_spill] sm:$0xff] %v4482_v0  ;;  %v3255_v33 = vpop.eup %3254  ;;  %v4507_v0 = vmul.f32 %v1328_v9, %v4408_v8  ;;  %v4512_v13 = vmul.f32 %v1331_v44, %v4410_v59  ;;  %v6105_v51 = vrot.slane %v4464_v3, 7  ;;  %v4521_v52 = vmul.f32 %v4141_v19, %v4467_v34 }
 0x25d   : > { %6102 = vst [vmem:[#allocation68_spill] sm:$0xff] %v4490_v54  ;;  %6103 = vst [vmem:[#allocation69_spill] sm:$0xff] %v4494_v42  ;;  %v1333_v42 = vadd.f32 1.0, %v3253_v10  ;;  %v1332_v35 = vadd.f32 1.0, %v3255_v33  ;;  %v4525_v8 = vmul.f32 %v4150_v5, %v4467_v34  ;;  %v4530_v9 = vmul.f32 %v4228_v62, %v4467_v34 }
 0x25e   : > { %6104 = vst [vmem:[#allocation70_spill] sm:$0xff] %v4502_v48  ;;  %v3257_v24 = vpop.eup %3256  ;;  %v4517_v48 = vsel %vm1412_vm2, 0.0, %v6105_v51  ;;  %6106 = vst [vmem:[#allocation71_spill] sm:$0xff] %v4521_v52  ;;  %v4535_v51 = vmul.f32 %v4141_v19, %v4507_v0  ;;  %v4539_v10 = vmul.f32 %v4150_v5, %v4507_v0  ;;  %v4543_v1 = vmul.f32 %v4228_v62, %v4507_v0 }
 0x25f   : > { %v4498_v11 = vpop.f32.mrb[30].mxu0  ;;  %6107 = vst [vmem:[#allocation72_spill] sm:$0xff] %v4525_v8  ;;  %v3259_v44 = vpop.eup %3258  ;;  %6108 = vst [vmem:[#allocation73_spill] sm:$0xff] %v4530_v9  ;;  %v4548_v8 = vmul.f32 %v1330_v32, %v4412_v25  ;;  %v6112_v9 = vrot.slane %v4507_v0, 7  ;;  %v4560_v34 = vmul.f32 %v1333_v42, %v4414_v37  ;;  %v4563_v59 = vmul.f32 %v1332_v35, %v4416_v6 }
 0x260   : > { %v4509_v54 = vpop.f32.mrb[31].mxu0  ;;  %6109 = vst [vmem:[#allocation74_spill] sm:$0xff] %v4535_v51  ;;  %6110 = vst [vmem:[#allocation75_spill] sm:$0xff] %v4539_v10  ;;  %v3261_v33 = vpop.eup %3260  ;;  %v4557_v10 = vmul.f32 %v4141_v19, %v4512_v13  ;;  %v4567_v25 = vmul.f32 %v4150_v5, %v4512_v13  ;;  %v1335_v52 = vadd.f32 1.0, %v3257_v24  ;;  %3268 = verf.f32 %v4496_v46 }
 0x261   : > { %6111 = vst [vmem:[#allocation76_spill] sm:$0xff] %v4543_v1  ;;  %v3263_v26 = vpop.eup %3262  ;;  %v4553_v51 = vsel %vm1412_vm2, 0.0, %v6112_v9  ;;  %v1334_v1 = vadd.f32 1.0, %v3259_v44  ;;  %v4572_v9 = vmul.f32 %v4228_v62, %v4512_v13  ;;  %v4577_v37 = vmul.f32 %v4141_v19, %v4548_v8 }
 0x262   : > { %6113 = vst [vmem:[#allocation77_spill] sm:$0xff] %v4557_v10  ;;  %6114 = vst [vmem:[#allocation78_spill] sm:$0xff] %v4567_v25  ;;  %v4581_v6 = vmul.f32 %v4150_v5, %v4548_v8  ;;  %v3265_v35 = vpop.eup %3264  ;;  %v4585_v42 = vmul.f32 %v4228_v62, %v4548_v8  ;;  %v6119_v10 = vrot.slane %v4548_v8, 7  ;;  %v4605_v24 = vmul.f32 %v4228_v62, %v4560_v34 }
 0x263   : > { %6115 = vst [vmem:[#allocation79_spill] sm:$0xff] %v4572_v9  ;;  %6116 = vst [vmem:[#allocation80_spill] sm:$0xff] %v4577_v37  ;;  %v4597_v37 = vmul.f32 %v4141_v19, %v4560_v34  ;;  %v4609_v32 = vmul.f32 %v1335_v52, %v4423_v28  ;;  %v1337_v9 = vadd.f32 1.0, %v3261_v33  ;;  %v4626_v28 = vmul.f32 %v4150_v5, %v4563_v59 }
 0x264   : > { %6117 = vst [vmem:[#allocation81_spill] sm:$0xff] %v4581_v6  ;;  %6118 = vst [vmem:[#allocation82_spill] sm:$0xff] %v4585_v42  ;;  %v4593_v25 = vsel %vm1412_vm2, 0.0, %v6119_v10  ;;  %v4601_v6 = vmul.f32 %v4150_v5, %v4560_v34  ;;  %v4612_v10 = vmul.f32 %v1334_v1, %v4426_v15  ;;  %v1336_v42 = vadd.f32 1.0, %v3263_v26 }
 0x265   : > { %6120 = vst [vmem:[#allocation83_spill] sm:$0xff] %v4593_v25  ;;  %6121 = vst [vmem:[#allocation84_spill] sm:$0xff] %v4597_v37  ;;  %v4616_v37 = vmul.f32 %v4141_v19, %v4563_v59  ;;  %v1339_v25 = vadd.f32 1.0, %v3265_v35  ;;  %v4630_v15 = vmul.f32 %v4228_v62, %v4563_v59  ;;  %v4633_v1 = vmul.f32 0.5, %v4458_v49 }
 0x266   : > { %6122 = vst [vmem:[#allocation85_spill] sm:$0xff] %v4601_v6  ;;  %6123 = vst [vmem:[#allocation86_spill] sm:$0xff] %v4605_v24  ;;  %v6125_v6 = vrot.slane %v4563_v59, 7  ;;  %v4639_v26 = vmul.f32 %v4141_v19, %v4609_v32  ;;  %v4648_v35 = vmul.f32 %v4228_v62, %v4609_v32  ;;  %v4651_v44 = vmul.f32 %v1337_v9, %v4428_v22 }
 0x267   : > { %6124 = vst [vmem:[#allocation87_spill] sm:$0xff] %v4616_v37  ;;  %v4654_v52 = vmul.f32 %v1336_v42, %v4443_v55  ;;  %v4662_v33 = vmul.f32 %v1339_v25, %v4450_v7  ;;  %v4672_v22 = vmul.f32 %v4150_v5, %v4612_v10  ;;  %v4676_v55 = vmul.f32 %v4228_v62, %v4612_v10 }
 0x268   : > { %v4622_v24 = vsel %vm1412_vm2, 0.0, %v6125_v6  ;;  %6126 = vst [vmem:[#allocation88_spill] sm:$0xff] %v4639_v26  ;;  %v4644_v6 = vmul.f32 %v4150_v5, %v4609_v32  ;;  %6128 = vst [vmem:[#allocation90_spill] sm:$0xff] %v4648_v35  ;;  %v4659_v26 = vmul.f32 %v4141_v19, %v4612_v10  ;;  %v1276_v9 = vmul.f32 0.70710677, %v4458_v49 }
 0x269   : > { %6129 = vst [vmem:[#allocation91_spill] sm:$0xff] %v4651_v44  ;;  %6130 = vst [vmem:[#allocation92_spill] sm:$0xff] %v4654_v52  ;;  %v4683_v46 = vmul.f32 %v4141_v19, %v4651_v44  ;;  %v4687_v42 = vmul.f32 %v4150_v5, %v4651_v44  ;;  %v4697_v7 = vmul.f32 %v4141_v19, %v4654_v52 }
 0x26a   : > { %6127 = vst [vmem:[#allocation89_spill] sm:$0xff] %v4644_v6  ;;  %6131 = vst [vmem:[#allocation93_spill] sm:$0xff] %v4659_v26  ;;  %v6133_v6 = vrot.slane %v4612_v10, 7  ;;  %v4701_v25 = vmul.f32 %v4150_v5, %v4654_v52  ;;  %3270 = verf.f32 %v1276_v9  ;;  %v1197_v49 = vadd.f32 %v4433_v2, %v4125_v31 }
 0x26b   : > { %6132 = vst [vmem:[#allocation94_spill] sm:$0xff] %v4662_v33  ;;  %6134 = vst [vmem:[#allocation95_spill] sm:$0xff] %v4672_v22  ;;  %v1192_v4 = vadd.f32 %v4125_v31, %v4445_v36  ;;  %v6144_v9 = vrot.slane %v4211_v43, 1  ;;  %v6145_v2 = vrot.slane %v4213_v40, 1  ;;  %v1983_v36 = vmul.f32 %v4270_v39, %v4291_v17 }
 0x26c   : > { %v4668_v37 = vsel %vm1412_vm2, 0.0, %v6133_v6  ;;  %6135 = vst [vmem:[#allocation96_spill] sm:$0xff] %v4676_v55  ;;  %6136 = vst [vmem:[#allocation97_spill] sm:$0xff] %v4683_v46  ;;  %v4691_v6 = vmul.f32 %v4228_v62, %v4651_v44  ;;  %v4705_v46 = vmul.f32 %v4228_v62, %v4654_v52  ;;  %v4742_v43 = vmul.f32 %v4150_v5, %v4662_v33 }
 0x26d   : > { %6137 = vst [vmem:[#allocation98_spill] sm:$0xff] %v4687_v42  ;;  %6139 = vst [vmem:[#allocation100_spill] sm:$0xff] %v4697_v7  ;;  %v1207_v7 = vadd.f32 %v4460_v56, %v4125_v31  ;;  %v6143_v42 = vrot.slane %v4152_v57, 1  ;;  %v4727_v22 = vsel %vm1509_vm1, %v6145_v2, %v6144_v9  ;;  %v6146_v56 = vrot.slane %v4654_v52, 7 }
 0x26e   : > { %6138 = vst [vmem:[#allocation99_spill] sm:$0xff] %v4691_v6  ;;  %6140 = vst [vmem:[#allocation101_spill] sm:$0xff] %v4701_v25  ;;  %v3267_v6 = vpop.eup %3266  ;;  %v1202_v25 = vadd.f32 %v4125_v31, %v4469_v38  ;;  %v4746_v40 = vmul.f32 %v4228_v62, %v4662_v33  ;;  %v4755_v52 = vmul.f32 0.5, %v1192_v4 }
 0x26f   : > { %6141 = vst [vmem:[#allocation102_spill] sm:$0xff] %v4705_v46  ;;  %v6142_v46 = vrot.slane %v4136_v53, 1  ;;  %v4734_v38 = vsel %vm1412_vm2, 0.0, %v6146_v56  ;;  %v4738_v53 = vmul.f32 %v4141_v19, %v4662_v33  ;;  %v1338_v57 = vadd.f32 1.0, %v3267_v6  ;;  %6149 = vst [vmem:[#allocation105_spill] sm:$0xff] %v4742_v43  ;;  %v3269_v35 = vpop.eup %3268 }
 0x270   : > { %6147 = vst [vmem:[#allocation103_spill] sm:$0xff] %v4734_v38  ;;  %6150 = vst [vmem:[#allocation106_spill] sm:$0xff] %v4746_v40  ;;  %v1281_v9 = vmul.f32 0.70710677, %v1207_v7  ;;  %v1247_v56 = vmul.f32 0.5, %v1197_v49  ;;  %v1915_v43 = vadd.f32 %v4221_v45, %v4223_v50  ;;  %v4757_v40 = vmul.f32 0.5, %v1207_v7 }
 0x271   : > { %v1512_v26 = vsel %vm1509_vm1, %v6143_v42, %v6142_v46  ;;  %6148 = vst [vmem:[#allocation104_spill] sm:$0xff] %v4738_v53  ;;  %v1279_v46 = vmul.f32 0.70710677, %v1197_v49  ;;  %v1278_v42 = vmul.f32 0.70710677, %v1192_v4  ;;  %v4749_v2 = vmul.f32 %v1338_v57, %v4453_v27 }
 0x272   : > { %v1280_v38 = vmul.f32 0.70710677, %v1202_v25  ;;  %v1882_v6 = vmul.f32 %v4197_v58, %v1512_v26  ;;  %v2048_v53 = vadd.f32 %v4299_v60, %v1983_v36  ;;  %v4759_v33 = vmul.f32 0.5, %v1202_v25 }
 0x273   : > { %6151 = vst [vmem:[#allocation107_spill] sm:$0xff] %v4749_v2  ;;  %3272 = verf.f32 %v1279_v46  ;;  %v2083_v27 = vmul.f32 %v4246_v30, %v4727_v22  ;;  %v6012_v49 = vrot.slane %v4749_v2, 7  ;;  %v1341_v57 = vadd.f32 1.0, %v3269_v35  ;;  %v4778_v35 = vld [vmem:[%s5947_s6] ss:$0 sm:$0xff] }
 0x274   : > { %3274 = verf.f32 %v1278_v42  ;;  %v1914_v46 = vadd.f32 %v1882_v6, %v4237_v12  ;;  %v2049_v45 = vadd.f32 %v4265_v29, %v4303_v63  ;;  %v4770_v50 = vmul.f32 %v4141_v19, %v4749_v2  ;;  %v3271_v63 = vpop.eup %3270 }
 0x275   : > { %3276 = verf.f32 %v1281_v9  ;;  %v2113_v36 = vadd.f32 %v2083_v27, %v2048_v53  ;;  %v4773_v4 = vmul.f32 %v1341_v57, %v4485_v18  ;;  %v1217_v12 = vadd.f32 %v4498_v11, %v4125_v31  ;;  %v4806_v9 = vld [vmem:[%s5948_s7] ss:$0 sm:$0xff] }
 0x276   : > { %3278 = verf.f32 %v1280_v38  ;;  %6152 = vst [vmem:[#allocation108_spill] sm:$0xff] %v4770_v50  ;;  %v6154_v7 = vrot.slane %v4273_v41, 1  ;;  %v6155_v25 = vrot.slane %v4284_v61, 1  ;;  %v4791_v18 = vmul.f32 %v4150_v5, %v4749_v2 }
 0x277   : > { %6153 = vst [vmem:[#allocation109_spill] sm:$0xff] %v4773_v4  ;;  %v4795_v38 = vmul.f32 %v4228_v62, %v4749_v2  ;;  %v2143_v53 = vadd.f32 %v2113_v36, %v1914_v46  ;;  %v2114_v42 = vadd.f32 %v4288_v20, %v2049_v45  ;;  %v4801_v11 = vsel %vm1412_vm2, 0.0, %v6012_v49 }
 0x278   : > { %v4787_v29 = vsel %vm1509_vm1, %v6155_v25, %v6154_v7  ;;  %6156 = vst [vmem:[#allocation110_spill] sm:$0xff] %v4791_v18  ;;  %6158 = vst [vmem:[#allocation112_spill] sm:$0xff] %v4801_v11  ;;  %v1212_v6 = vadd.f32 %v4125_v31, %v4509_v54  ;;  %v1711_v27 = vmul.f32 %v4187_v16, %v1512_v26  ;;  %v1340_v46 = vadd.f32 1.0, %v3271_v63 }
 0x279   : > { %6157 = vst [vmem:[#allocation111_spill] sm:$0xff] %v4795_v38  ;;  %v1778_v57 = vmul.f32 %v4175_v21, %v4291_v17  ;;  %v2182_v36 = vmul.f32 %v4778_v35, %v2143_v53  ;;  %v2144_v45 = vadd.f32 %v2114_v42, %v1915_v43  ;;  %v4818_v25 = vmul.f32 %v4141_v19, %v4773_v4 }
 0x27a   : > { %v4822_v31 = vmul.f32 %v4150_v5, %v4773_v4  ;;  %v1283_v54 = vmul.f32 0.70710677, %v1217_v12  ;;  %v4825_v49 = vmul.f32 %v1340_v46, %v4633_v1  ;;  %v1741_v43 = vadd.f32 %v1711_v27, %v4233_v47 }
 0x27b   : > { %6159 = vst [vmem:[#allocation113_spill] sm:$0xff] %v4818_v25  ;;  %v2221_v63 = vadd.f32 %v4806_v9, %v2182_v36  ;;  %v2183_v53 = vmul.f32 %v4778_v35, %v2144_v45  ;;  %v4832_v20 = vmul.f32 %v4228_v62, %v4773_v4  ;;  %v1251_v60 = vmul.f32 0.5, %v1217_v12 }
 0x27c   : > { %6160 = vst [vmem:[#allocation114_spill] sm:$0xff] %v4822_v31  ;;  %6161 = vst [vmem:[#allocation115_spill] sm:$0xff] %v4825_v49  ;;  %3280 = verf.f32 %v1283_v54  ;;  %v6013_v25 = vrot.slane %v4825_v49, 7  ;;  %v4835_v31 = vmul.f32 0.5, %v1212_v6  ;;  %v1282_v1 = vmul.f32 0.70710677, %v1212_v6 }
 0x27d   : > { %v3273_v26 = vpop.eup %3272  ;;  %6162 = vst [vmem:[#allocation116_spill] sm:$0xff] %v4832_v20  ;;  %v1847_v46 = vadd.f32 %v4295_v14, %v1778_v57  ;;  %v1884_v27 = vmul.f32 %v4197_v58, %v4727_v22  ;;  %v4845_v12 = vmul.f32 %v4141_v19, %v4825_v49  ;;  %v2222_v6 = vadd.f32 %v4806_v9, %v2183_v53 }
 0x27e   : > { %v3275_v42 = vpop.eup %3274  ;;  %v1343_v7 = vadd.f32 1.0, %v3273_v26  ;;  %v2285_v26 = vmul.f32 0.70710677, %v2221_v63  ;;  %v4851_v14 = vsel %vm1412_vm2, 0.0, %v6013_v25  ;;  %v4859_v57 = vmul.f32 %v4228_v62, %v4825_v49 }
 0x27f   : > { %v3277_v36 = vpop.eup %3276  ;;  %v1342_v47 = vadd.f32 1.0, %v3275_v42  ;;  %6164 = vst [vmem:[#allocation118_spill] sm:$0xff] %v4845_v12  ;;  %6165 = vst [vmem:[#allocation119_spill] sm:$0xff] %v4851_v14  ;;  %v2286_v12 = vmul.f32 0.70710677, %v2222_v6  ;;  %v1916_v14 = vadd.f32 %v1884_v27, %v1847_v46  ;;  %v4891_v27 = vmul.f32 0.5, %v2222_v6 }
 0x280   : > { %v4839_v50 = vmul.f32 %v1343_v7, %v1247_v56  ;;  %v3279_v20 = vpop.eup %3278  ;;  %v1345_v54 = vadd.f32 1.0, %v3277_v36  ;;  %v4855_v56 = vmul.f32 %v4150_v5, %v4825_v49  ;;  %6167 = vst [vmem:[#allocation121_spill] sm:$0xff] %v4859_v57  ;;  %v2253_v7 = vmul.f32 0.5, %v2221_v63  ;;  %v6200_v57 = vld [vmem:[#allocation40_spill] sm:$0xff] }
 0x281   : > { %v4863_v36 = vmul.f32 %v1342_v47, %v4755_v52  ;;  %v1344_v45 = vadd.f32 1.0, %v3279_v20  ;;  %3282 = verf.f32 %v2285_v26  ;;  %v1985_v6 = vmul.f32 %v4270_v39, %v4344_v23 }
 0x282   : > { %6163 = vst [vmem:[#allocation117_spill] sm:$0xff] %v4839_v50  ;;  %6166 = vst [vmem:[#allocation120_spill] sm:$0xff] %v4855_v56  ;;  %v4866_v53 = vmul.f32 %v1345_v54, %v4757_v40  ;;  %v4871_v56 = vmul.f32 %v4141_v19, %v4839_v50  ;;  %v4875_v63 = vmul.f32 %v4150_v5, %v4839_v50  ;;  %3284 = verf.f32 %v2286_v12 }
 0x283   : > { %6168 = vst [vmem:[#allocation122_spill] sm:$0xff] %v4863_v36  ;;  %v4879_v52 = vmul.f32 %v4228_v62, %v4839_v50  ;;  %v4885_v47 = vmul.f32 %v4141_v19, %v4863_v36  ;;  %v4889_v46 = vmul.f32 %v4150_v5, %v4863_v36  ;;  %v4895_v54 = vmul.f32 %v4228_v62, %v4863_v36 }
 0x284   : > { %6169 = vst [vmem:[#allocation123_spill] sm:$0xff] %v4866_v53  ;;  %6170 = vst [vmem:[#allocation124_spill] sm:$0xff] %v4871_v56  ;;  %v4900_v20 = vmul.f32 %v1344_v45, %v4759_v33  ;;  %v4904_v40 = vmul.f32 %v4141_v19, %v4866_v53  ;;  %v1948_v56 = vadd.f32 %v1916_v14, %v1741_v43  ;;  %3286 = verf.f32 %v1282_v1  ;;  %v6182_v14 = vld [vmem:[#allocation49_spill] sm:$0xff] }
 0x285   : > { %6171 = vst [vmem:[#allocation125_spill] sm:$0xff] %v4875_v63  ;;  %6172 = vst [vmem:[#allocation126_spill] sm:$0xff] %v4879_v52  ;;  %v4915_v26 = vmul.f32 %v4150_v5, %v4866_v53  ;;  %v4919_v33 = vmul.f32 %v4228_v62, %v4866_v53  ;;  %v2085_v45 = vmul.f32 %v4246_v30, %v4787_v29  ;;  %v6186_v52 = vld [vmem:[#allocation37_spill] sm:$0xff]  ;;  %v6187_v53 = vld [vmem:[#allocation35_spill] sm:$0xff] }
 0x286   : > { %6173 = vst [vmem:[#allocation127_spill] sm:$0xff] %v4885_v47  ;;  %6174 = vst [vmem:[#allocation128_spill] sm:$0xff] %v4889_v46  ;;  %v3281_v25 = vpop.eup %3280  ;;  %v6178_v47 = vrot.slane %v4863_v36, 7  ;;  %v2050_v42 = vadd.f32 %v6182_v14, %v1985_v6  ;;  %v6185_v46 = vrot.slane %v4284_v61, 7  ;;  %v1677_v43 = vadd.f32 %v6187_v53, %v6186_v52  ;;  %v6189_v14 = vld [vmem:[#allocation41_spill] sm:$0xff]  ;;  %v6192_v52 = vld [vmem:[#allocation47_spill] sm:$0xff] }
 0x287   : > { %6175 = vst [vmem:[#allocation129_spill] sm:$0xff] %v4895_v54  ;;  %6176 = vst [vmem:[#allocation130_spill] sm:$0xff] %v4900_v20  ;;  %v1347_v12 = vadd.f32 1.0, %v3281_v25  ;;  %v4941_v25 = vmul.f32 %v4150_v5, %v4900_v20  ;;  %v6193_v54 = vrot.slane %v6192_v52, 1 }
 0x288   : > { %6177 = vst [vmem:[#allocation131_spill] sm:$0xff] %v4904_v40  ;;  %v4911_v63 = vsel %vm1412_vm2, 0.0, %v6178_v47  ;;  %6180 = vst [vmem:[#allocation133_spill] sm:$0xff] %v4915_v26  ;;  %v4928_v40 = vmul.f32 %v4141_v19, %v4900_v20  ;;  %v6184_v26 = vrot.slane %v4273_v41, 7  ;;  %v2115_v6 = vadd.f32 %v2085_v45, %v2050_v42 }
 0x289   : > { %6179 = vst [vmem:[#allocation132_spill] sm:$0xff] %v4911_v63  ;;  %6181 = vst [vmem:[#allocation134_spill] sm:$0xff] %v4919_v33  ;;  %v4943_v1 = vmul.f32 %v1347_v12, %v1251_v60  ;;  %v1779_v19 = vmul.f32 %v4175_v21, %v6189_v14  ;;  %v6190_v47 = vrot.slane %v4273_v41, 1  ;;  %v6194_v63 = vld [vmem:[#allocation48_spill] sm:$0xff]  ;;  %v6196_v45 = vrot.slane %v4900_v20, 7 }
 0x28a   : > { %6183 = vst [vmem:[#allocation49_spill] sm:$0xff] %v4928_v40  ;;  %v4935_v33 = vsel %vm1412_vm2, %v6185_v46, %v6184_v26  ;;  %6188 = vst [vmem:[#allocation37_spill] sm:$0xff] %v4941_v25  ;;  %v6191_v46 = vld [vmem:[#allocation36_spill] sm:$0xff]  ;;  %v6195_v25 = vrot.slane %v6194_v63, 1  ;;  %v4969_v12 = vmul.f32 %v4228_v62, %v4900_v20  ;;  %v2145_v50 = vadd.f32 %v2115_v6, %v1948_v56 }
 0x28b   : > { %v4950_v40 = vsel %vm1509_vm1, %v6190_v47, 0.0  ;;  %v1742_v26 = vadd.f32 %v6191_v46, %v1677_v43  ;;  %v1986_v53 = vmul.f32 %v4270_v39, %v4935_v33  ;;  %v3283_v42 = vpop.eup %3282  ;;  %v4965_v41 = vsel %vm1412_vm2, 0.0, %v6196_v45  ;;  %v6199_v47 = vld [vmem:[#allocation39_spill] sm:$0xff] }
 0x28c   : > { %v4960_v60 = vsel %vm1509_vm1, %v6195_v25, %v6193_v54  ;;  %6197 = vst [vmem:[#allocation35_spill] sm:$0xff] %v4965_v41  ;;  %6198 = vst [vmem:[#allocation41_spill] sm:$0xff] %v4969_v12  ;;  %v1885_v46 = vmul.f32 %v4197_v58, %v6199_v47  ;;  %v2349_v36 = vadd.f32 1.0, %v3283_v42  ;;  %v1848_v54 = vadd.f32 %v6200_v57, %v1779_v19  ;;  %v6201_v25 = vld [vmem:[#allocation45_spill] sm:$0xff]  ;;  %v6202_v41 = vld [vmem:[#allocation34_spill] sm:$0xff]  ;;  %v3285_v19 = vpop.eup %3284 }
 0x28d   : > { %v2051_v18 = vadd.f32 %v6201_v25, %v1986_v53  ;;  %v1459_v49 = vrot.slane %v4943_v1, 7  ;;  %v2086_v45 = vmul.f32 %v4246_v30, %v4950_v40  ;;  %v1613_v20 = vmul.f32 %v6202_v41, %v4291_v17  ;;  %v6205_v25 = vld [vmem:[#allocation42_spill] sm:$0xff] }
 0x28e   : > { %v1780_v43 = vmul.f32 %v4175_v21, %v4344_v23  ;;  %v2381_v12 = vmul.f32 %v2349_v36, %v2253_v7  ;;  %v6203_v4 = vrot.slane %v4943_v1, 1  ;;  %v2184_v57 = vmul.f32 %v4778_v35, %v2145_v50  ;;  %v6206_v17 = vld [vmem:[#allocation46_spill] sm:$0xff]  ;;  %v6208_v36 = vld [vmem:[#allocation56_spill] sm:$0xff]  ;;  %v3287_v44 = vpop.eup %3286 }
 0x28f   : > { %v1713_v6 = vmul.f32 %v4187_v16, %v4727_v22  ;;  %v1917_v53 = vadd.f32 %v1885_v46, %v1848_v54  ;;  %v2116_v42 = vadd.f32 %v2086_v45, %v2051_v18  ;;  %v1678_v38 = vadd.f32 %v6205_v25, %v1613_v20 }
 0x290   : > { %v4986_v56 = vsel %vm1509_vm1, %v6203_v4, 0.0  ;;  %v1849_v11 = vadd.f32 %v6206_v17, %v1780_v43  ;;  %3044 = vmatprep.mubr.f32.mxu0 %v2381_v12  ;;  %v2350_v2 = vadd.f32 1.0, %v3285_v19  ;;  %v4995_v7 = vmul.f32 %v4228_v62, %v4943_v1 }
 0x291   : > { %6204 = vst [vmem:[#allocation36_spill] sm:$0xff] %v4986_v56  ;;  %v2223_v4 = vadd.f32 %v4806_v9, %v2184_v57  ;;  %v1987_v50 = vmul.f32 %v4270_v39, %v6208_v36  ;;  %v1949_v22 = vadd.f32 %v1917_v53, %v1742_v26  ;;  %v1743_v55 = vadd.f32 %v1713_v6, %v1678_v38  ;;  %v6212_v6 = vld [vmem:[#allocation55_spill] sm:$0xff] }
 0x292   : > { %6207 = vst [vmem:[#allocation47_spill] sm:$0xff] %v4995_v7  ;;  %v1886_v18 = vmul.f32 %v4197_v58, %v4787_v29  ;;  %v6209_v20 = vrot.slane %v6192_v52, 7  ;;  %v6210_v12 = vrot.slane %v6194_v63, 7  ;;  %v2382_v46 = vmul.f32 %v2350_v2, %v4891_v27 }
 0x293   : > { %v5012_v54 = vmul.f32 %v4246_v30, %v4986_v56  ;;  %v1346_v45 = vadd.f32 1.0, %v3287_v44  ;;  %v2287_v57 = vmul.f32 0.70710677, %v2223_v4  ;;  %v2146_v26 = vadd.f32 %v2116_v42, %v1949_v22 }
 0x294   : > { %v5007_v43 = vsel %vm1412_vm2, %v6210_v12, %v6209_v20  ;;  %v1918_v38 = vadd.f32 %v1886_v18, %v1849_v11  ;;  %v2052_v19 = vadd.f32 %v6212_v6, %v1987_v50  ;;  %v2087_v53 = vmul.f32 %v4246_v30, %v4960_v60  ;;  %3045 = vmatmul.mubr.f32.vlgmr.msra.gmra.mrb[32].mxu0 %v2382_v46  ;;  %v6215_v46 = vld [vmem:[#allocation44_spill] sm:$0xff] }
 0x295   : > { %6211 = vst [vmem:[#allocation48_spill] sm:$0xff] %v5012_v54  ;;  %v5018_v25 = vmul.f32 %v1346_v45, %v4835_v31  ;;  %v2255_v17 = vmul.f32 0.5, %v2223_v4  ;;  %3288 = verf.f32 %v2287_v57  ;;  %v1614_v2 = vmul.f32 %v6202_v41, %v6189_v14 }
 0x296   : > { %v2185_v27 = vmul.f32 %v4778_v35, %v2146_v26  ;;  %v1950_v44 = vadd.f32 %v1918_v38, %v1743_v55  ;;  %v2117_v20 = vadd.f32 %v2087_v53, %v2052_v19  ;;  %v1781_v11 = vmul.f32 %v4175_v21, %v4935_v33  ;;  %v6214_v55 = vld [vmem:[#allocation38_spill] sm:$0xff] }
 0x297   : > { %v1458_v42 = vrot.slane %v5018_v25, 7  ;;  %v6213_v22 = vrot.slane %v6192_v52, 1  ;;  %v1714_v4 = vmul.f32 %v4187_v16, %v6199_v47  ;;  %v1679_v12 = vadd.f32 %v6214_v55, %v1614_v2 }
 0x298   : > { %v2224_v14 = vadd.f32 %v4806_v9, %v2185_v27  ;;  %v2147_v18 = vadd.f32 %v2117_v20, %v1950_v44  ;;  %v1850_v45 = vadd.f32 %v6215_v46, %v1781_v11  ;;  %v1887_v52 = vmul.f32 %v4197_v58, %v4950_v40  ;;  %v6216_v44 = vld [vmem:[#allocation53_spill] sm:$0xff]  ;;  %v6217_v46 = vld [vmem:[#allocation60_spill] sm:$0xff] }
 0x299   : > { %v5030_v31 = vsel %vm1509_vm1, %v6213_v22, 0.0  ;;  %v5038_v57 = vsel %vm1412_vm2, %v1458_v42, %v1459_v49  ;;  %v1508_v26 = vsel %vm1412_vm2, 0.0, %v1458_v42  ;;  %v1988_v38 = vmul.f32 %v4270_v39, %v5007_v43 }
 0x29a   : > { %v1806_v47 = vmul.f32 %v4175_v21, %v1508_v26  ;;  %v1843_v6 = vmul.f32 %v4150_v5, %v5018_v25  ;;  %v5050_v19 = vmul.f32 %v4228_v62, %v5018_v25  ;;  %v2288_v53 = vmul.f32 0.70710677, %v2224_v14 }
 0x29b   : > { %v2186_v49 = vmul.f32 %v4778_v35, %v2147_v18  ;;  %v1744_v2 = vadd.f32 %v1714_v4, %v1679_v12  ;;  %v1919_v27 = vadd.f32 %v1887_v52, %v1850_v45  ;;  %v2053_v20 = vadd.f32 %v6216_v44, %v1988_v38  ;;  %v6219_v18 = vld [vmem:[#allocation50_spill] sm:$0xff] }
 0x29c   : > { %v5055_v11 = vmul.f32 %v4270_v39, %v1508_v26  ;;  %v2256_v42 = vmul.f32 0.5, %v2224_v14  ;;  %3290 = verf.f32 %v2288_v53  ;;  %v2088_v22 = vmul.f32 %v4246_v30, %v5030_v31  ;;  %v3348_v38 = vld [vmem:[%s5946_s5 + $0x1] ss:$0 sm:$0xff] }
 0x29d   : > { %v2225_v5 = vadd.f32 %v4806_v9, %v2186_v49  ;;  %v1951_v55 = vadd.f32 %v1919_v27, %v1744_v2  ;;  %v6218_v50 = vrot.slane %v6217_v46, 7  ;;  %v6220_v4 = vrot.slane %v6219_v18, 1 }
 0x29e   : > { %v6221_v12 = vrot.slane %v6217_v46, 1  ;;  %v5068_v26 = vadd.f32 %v1843_v6, %v1806_v47  ;;  %v2118_v14 = vadd.f32 %v2088_v22, %v2053_v20  ;;  %v1615_v52 = vmul.f32 %v6202_v41, %v4344_v23 }
 0x29f   : > { %v1497_v56 = vsel %vm1412_vm2, 0.0, %v6218_v50  ;;  %v1650_v53 = vmul.f32 %v3348_v38, %v4284_v61  ;;  %v3289_v49 = vpop.eup %3288  ;;  %v5076_v50 = vmul.f32 0.5, %v2225_v5  ;;  %v2289_v2 = vmul.f32 0.70710677, %v2225_v5 }
 0x2a0   : > { %v1524_v45 = vsel %vm1509_vm1, %v6221_v12, %v6220_v4  ;;  %6222 = vst [vmem:[#allocation39_spill] sm:$0xff] %v5068_v26  ;;  %v5079_v27 = vmul.f32 %v6202_v41, %v1497_v56  ;;  %v1715_v47 = vmul.f32 %v4187_v16, %v4787_v29  ;;  %v2351_v6 = vadd.f32 1.0, %v3289_v49  ;;  %v3349_v41 = vld [vmem:[%s5946_s5 + $0x4] ss:$0 sm:$0xff]  ;;  %v6228_v26 = vld [vmem:[#allocation63_spill] sm:$0xff] }
 0x2a1   : > { %v2148_v44 = vadd.f32 %v2118_v14, %v1951_v55  ;;  %v1680_v20 = vadd.f32 %v1650_v53, %v1615_v52  ;;  %v1782_v23 = vmul.f32 %v4175_v21, %v6208_v36  ;;  %3292 = verf.f32 %v2289_v2 }
 0x2a2   : > { %v5086_v22 = vmul.f32 %v4187_v16, %v1524_v45  ;;  %v1784_v61 = vmul.f32 %v4175_v21, %v1497_v56  ;;  %v1819_v5 = vmul.f32 %v3349_v41, %v6194_v63  ;;  %v2383_v4 = vmul.f32 %v2351_v6, %v2255_v17 }
 0x2a3   : > { %v2187_v29 = vmul.f32 %v4778_v35, %v2148_v44  ;;  %v1745_v55 = vadd.f32 %v1715_v47, %v1680_v20  ;;  %v1888_v12 = vmul.f32 %v4197_v58, %v4960_v60  ;;  %v1890_v52 = vmul.f32 %v4197_v58, %v1524_v45  ;;  %v5112_v58 = vld [vmem:[%s5946_s5] ss:$0 sm:$0xff] }
 0x2a4   : > { %v1851_v14 = vadd.f32 %v1819_v5, %v1782_v23  ;;  %v1989_v16 = vmul.f32 %v4270_v39, %v1497_v56  ;;  %v2024_v21 = vmul.f32 %v4228_v62, %v6217_v46  ;;  %3047 = vmatprep.mubr.f32.mxu0 %v2383_v4  ;;  %v2089_v63 = vmul.f32 %v4246_v30, %v1524_v45  ;;  %v6226_v23 = vld [vmem:[#allocation43_spill] sm:$0xff]  ;;  %v5139_v5 = vld [vmem:[%s5946_s5 + $0x5] ss:$0 sm:$0xff] }
 0x2a5   : > { %v2226_v38 = vadd.f32 %v4806_v9, %v2187_v29  ;;  %v6223_v17 = vrot.slane %v6219_v18, 7  ;;  %v6224_v53 = vrot.slane %v6217_v46, 7  ;;  %v1616_v62 = vmul.f32 %v5112_v58, %v4935_v33  ;;  %v5124_v46 = vld [vmem:[%s5946_s5 + $0x3] ss:$0 sm:$0xff]  ;;  %v5132_v33 = vld [vmem:[%s5946_s5 + $0x2] ss:$0 sm:$0xff] }
 0x2a6   : > { %v1920_v56 = vadd.f32 %v1888_v12, %v1851_v14  ;;  %v2054_v2 = vadd.f32 %v2024_v21, %v1989_v16  ;;  %v6225_v47 = vrot.slane %v6219_v18, 1  ;;  %v1783_v6 = vmul.f32 %v5124_v46, %v5007_v43  ;;  %v3291_v44 = vpop.eup %3290  ;;  %v6227_v16 = vld [vmem:[#allocation52_spill] sm:$0xff] }
 0x2a7   : > { %v5107_v49 = vsel %vm1412_vm2, %v6224_v53, %v6223_v17  ;;  %v2290_v20 = vmul.f32 0.70710677, %v2226_v38  ;;  %v1681_v41 = vadd.f32 %v6226_v23, %v1616_v62  ;;  %v1716_v18 = vmul.f32 %v5132_v33, %v4950_v40 }
 0x2a8   : > { %v5119_v45 = vsel %vm1509_vm1, %v6225_v47, 0.0  ;;  %v1889_v4 = vmul.f32 %v5139_v5, %v5030_v31  ;;  %v2352_v29 = vadd.f32 1.0, %v3291_v44  ;;  %v1952_v12 = vadd.f32 %v1920_v56, %v1745_v55  ;;  %v6232_v44 = vld [vmem:[#allocation62_spill] sm:$0xff] }
 0x2a9   : > { %v2119_v14 = vadd.f32 %v2089_v63, %v2054_v2  ;;  %v1852_v21 = vadd.f32 %v6227_v16, %v1783_v6  ;;  %3294 = verf.f32 %v2290_v20  ;;  %v1746_v17 = vadd.f32 %v1716_v18, %v1681_v41  ;;  %v6231_v63 = vld [vmem:[#allocation59_spill] sm:$0xff] }
 0x2aa   : > { %v1990_v53 = vmul.f32 %v4270_v39, %v5107_v49  ;;  %v2090_v40 = vmul.f32 %v4246_v30, %v5119_v45  ;;  %v2384_v62 = vmul.f32 %v2352_v29, %v2256_v42  ;;  %v6229_v54 = vrot.slane %v6228_v26, 1 }
 0x2ab   : > { %v2149_v47 = vadd.f32 %v2119_v14, %v1952_v12  ;;  %v1921_v23 = vadd.f32 %v1889_v4, %v1852_v21  ;;  %v6230_v7 = vrot.slane %v4464_v3, 1  ;;  %v1617_v2 = vmul.f32 %v5112_v58, %v6208_v36  ;;  %v3293_v42 = vpop.eup %3292  ;;  %v6233_v4 = vld [vmem:[#allocation54_spill] sm:$0xff] }
 0x2ac   : > { %v2055_v56 = vadd.f32 %v6231_v63, %v1990_v53  ;;  %v1717_v6 = vmul.f32 %v5132_v33, %v4960_v60  ;;  %v1853_v30 = vadd.f32 %v6232_v44, %v1784_v61  ;;  %3048 = vmatmul.mubr.f32.gmra.mrb[34].mxu0 %v2384_v62  ;;  %v1991_v18 = vmul.f32 %v4270_v39, %v4517_v48  ;;  %v6234_v14 = vld [vmem:[#allocation70_spill] sm:$0xff] }
 0x2ad   : > { %v5153_v55 = vsel %vm1509_vm1, %v6230_v7, %v6229_v54  ;;  %v2188_v20 = vmul.f32 %v4778_v35, %v2149_v47  ;;  %v1953_v41 = vadd.f32 %v1921_v23, %v1746_v17  ;;  %v5167_v7 = vld [vmem:[%s5946_s5 + $0x8] ss:$0 sm:$0xff]  ;;  %v2353_v54 = vadd.f32 1.0, %v3293_v42 }
 0x2ae   : > { %v2091_v36 = vmul.f32 %v5167_v7, %v5153_v55  ;;  %v2120_v60 = vadd.f32 %v2090_v40, %v2055_v56  ;;  %v1682_v61 = vadd.f32 %v6233_v4, %v1617_v2  ;;  %v1922_v29 = vadd.f32 %v1890_v52, %v1853_v30  ;;  %v6238_v30 = vld [vmem:[#allocation51_spill] sm:$0xff] }
 0x2af   : > { %v2227_v12 = vadd.f32 %v4806_v9, %v2188_v20  ;;  %v2056_v16 = vadd.f32 %v6234_v14, %v1991_v18  ;;  %v6235_v21 = vrot.slane %v6228_v26, 7  ;;  %v6236_v39 = vrot.slane %v4464_v3, 7  ;;  %v6241_v14 = vld [vmem:[#allocation64_spill] sm:$0xff] }
 0x2b0   : > { %v6237_v53 = vrot.slane %v6228_v26, 1  ;;  %v2385_v40 = vmul.f32 %v2353_v54, %v5076_v50  ;;  %v2150_v47 = vadd.f32 %v2120_v60, %v1953_v41  ;;  %v1747_v52 = vadd.f32 %v1717_v6, %v1682_v61  ;;  %v6239_v54 = vld [vmem:[#allocation58_spill] sm:$0xff]  ;;  %v6240_v61 = vld [vmem:[#allocation67_spill] sm:$0xff] }
 0x2b1   : > { %v5179_v17 = vsel %vm1412_vm2, %v6236_v39, %v6235_v21  ;;  %v1618_v23 = vmul.f32 %v5112_v58, %v5007_v43  ;;  %v2258_v63 = vmul.f32 0.5, %v2226_v38  ;;  %v2291_v56 = vmul.f32 0.70710677, %v2227_v12  ;;  %v5200_v43 = vld [vmem:[%s5946_s5 + $0x6] ss:$0 sm:$0xff] }
 0x2b2   : > { %v5184_v62 = vsel %vm1509_vm1, %v6237_v53, 0.0  ;;  %v2121_v2 = vadd.f32 %v2091_v36, %v2056_v16  ;;  %v1718_v3 = vmul.f32 %v5132_v33, %v5030_v31  ;;  %3050 = vmatprep.mubr.f32.mxu0 %v2385_v40  ;;  %v2189_v44 = vmul.f32 %v4778_v35, %v2150_v47  ;;  %v6244_v53 = vld [vmem:[#allocation61_spill] sm:$0xff] }
 0x2b3   : > { %v1954_v26 = vadd.f32 %v1922_v29, %v1747_v52  ;;  %v1683_v42 = vadd.f32 %v6238_v30, %v1618_v23  ;;  %v1785_v50 = vmul.f32 %v5124_v46, %v5107_v49  ;;  %3296 = verf.f32 %v2291_v56  ;;  %v3295_v20 = vpop.eup %3294 }
 0x2b4   : > { %v1891_v6 = vmul.f32 %v5139_v5, %v5119_v45  ;;  %v1992_v31 = vmul.f32 %v5200_v43, %v5179_v17  ;;  %v2092_v38 = vmul.f32 %v5167_v7, %v5184_v62  ;;  %v2228_v41 = vadd.f32 %v4806_v9, %v2189_v44 }
 0x2b5   : > { %v2151_v18 = vadd.f32 %v2121_v2, %v1954_v26  ;;  %v1748_v36 = vadd.f32 %v1718_v3, %v1683_v42  ;;  %v1854_v60 = vadd.f32 %v6239_v54, %v1785_v50  ;;  %v2354_v4 = vadd.f32 1.0, %v3295_v20  ;;  %v6245_v50 = vld [vmem:[#allocation69_spill] sm:$0xff] }
 0x2b6   : > { %v2057_v29 = vadd.f32 %v6240_v61, %v1992_v31  ;;  %v6242_v16 = vrot.slane %v6241_v14, 1  ;;  %v6243_v21 = vrot.slane %v4507_v0, 1  ;;  %v1684_v40 = vadd.f32 %v6244_v53, %v5079_v27 }
 0x2b7   : > { %v5220_v47 = vadd.f32 %v5050_v19, %v5055_v11  ;;  %v2292_v52 = vmul.f32 0.70710677, %v2228_v41  ;;  %v2190_v23 = vmul.f32 %v4778_v35, %v2151_v18  ;;  %v1923_v56 = vadd.f32 %v1891_v6, %v1854_v60  ;;  %v6249_v60 = vld [vmem:[#allocation76_spill] sm:$0xff] }
 0x2b8   : > { %v5214_v39 = vsel %vm1509_vm1, %v6243_v21, %v6242_v16  ;;  %v2386_v2 = vmul.f32 %v2354_v4, %v2258_v63  ;;  %v2122_v3 = vadd.f32 %v2092_v38, %v2057_v29  ;;  %v1749_v44 = vadd.f32 %v5086_v22, %v1684_v40 }
 0x2b9   : > { %v1786_v26 = vmul.f32 %v5124_v46, %v4517_v48  ;;  %v2259_v30 = vmul.f32 0.5, %v2227_v12  ;;  %3298 = verf.f32 %v2292_v52  ;;  %v2229_v42 = vadd.f32 %v4806_v9, %v2190_v23  ;;  %v6250_v52 = vld [vmem:[#allocation57_spill] sm:$0xff] }
 0x2ba   : > { %v1955_v27 = vadd.f32 %v1923_v56, %v1748_v36  ;;  %3051 = vmatmul.mubr.f32.gmra.mrb[36].mxu0 %v2386_v2  ;;  %v1892_v11 = vmul.f32 %v5139_v5, %v5153_v55  ;;  %v1993_v63 = vmul.f32 %v5200_v43, %v4553_v51  ;;  %v6246_v6 = vrot.slane %v6241_v14, 7  ;;  %v6251_v2 = vld [vmem:[#allocation66_spill] sm:$0xff] }
 0x2bb   : > { %v1855_v19 = vadd.f32 %v6245_v50, %v1786_v26  ;;  %v6247_v22 = vrot.slane %v4507_v0, 7  ;;  %v2293_v12 = vmul.f32 0.70710677, %v2229_v42  ;;  %v2093_v20 = vmul.f32 %v5167_v7, %v5214_v39 }
 0x2bc   : > { %v2152_v38 = vadd.f32 %v2122_v3, %v1955_v27  ;;  %v6248_v18 = vmov %v6242_v16  ;;  %v2058_v4 = vadd.f32 %v6249_v60, %v1993_v63  ;;  %v1620_v61 = vmul.f32 %v5112_v58, %v5107_v49 }
 0x2bd   : > { %v5237_v31 = vsel %vm1412_vm2, %v6247_v22, %v6246_v6  ;;  %v5244_v36 = vsel %vm1509_vm1, %v6248_v18, 0.0  ;;  %v1924_v54 = vadd.f32 %v1892_v11, %v1855_v19  ;;  %v1720_v0 = vmul.f32 %v5132_v33, %v5119_v45  ;;  %v3297_v21 = vpop.eup %3296  ;;  %v6252_v19 = vld [vmem:[#allocation73_spill] sm:$0xff] }
 0x2be   : > { %3300 = verf.f32 %v2293_v12  ;;  %v2191_v29 = vmul.f32 %v4778_v35, %v2152_v38  ;;  %v1787_v16 = vmul.f32 %v5124_v46, %v5179_v17  ;;  %v1893_v14 = vmul.f32 %v5139_v5, %v5184_v62 }
 0x2bf   : > { %v1956_v53 = vadd.f32 %v1924_v54, %v1749_v44  ;;  %v2123_v40 = vadd.f32 %v2093_v20, %v2058_v4  ;;  %v1685_v23 = vadd.f32 %v6250_v52, %v1620_v61  ;;  %v1994_v49 = vmul.f32 %v5200_v43, %v5237_v31 }
 0x2c0   : > { %v2355_v56 = vadd.f32 1.0, %v3297_v21  ;;  %v2230_v45 = vadd.f32 %v4806_v9, %v2191_v29  ;;  %v1856_v3 = vadd.f32 %v6251_v2, %v1787_v16  ;;  %v2094_v26 = vmul.f32 %v5167_v7, %v5244_v36  ;;  %v6256_v21 = vld [vmem:[#allocation83_spill] sm:$0xff] }
 0x2c1   : > { %v2153_v27 = vadd.f32 %v2123_v40, %v1956_v53  ;;  %v1750_v50 = vadd.f32 %v1720_v0, %v1685_v23  ;;  %v2059_v11 = vadd.f32 %v6252_v19, %v1994_v49  ;;  %v6253_v44 = vrot.slane %v4512_v13, 1 }
 0x2c2   : > { %v6254_v63 = vrot.slane %v4548_v8, 1  ;;  %v2387_v22 = vmul.f32 %v2355_v56, %v2259_v30  ;;  %v2260_v12 = vmul.f32 0.5, %v2228_v41  ;;  %v2294_v38 = vmul.f32 0.70710677, %v2230_v45 }
 0x2c3   : > { %v1925_v20 = vadd.f32 %v1893_v14, %v1856_v3  ;;  %v2261_v18 = vmul.f32 0.5, %v2229_v42  ;;  %v2192_v54 = vmul.f32 %v4778_v35, %v2153_v27  ;;  %v2124_v60 = vadd.f32 %v2094_v26, %v2059_v11  ;;  %v3299_v61 = vpop.eup %3298  ;;  %v6255_v42 = vld [vmem:[#allocation68_spill] sm:$0xff] }
 0x2c4   : > { %v5269_v6 = vsel %vm1509_vm1, %v6254_v63, %v6253_v44  ;;  %v1621_v4 = vmul.f32 %v5112_v58, %v4517_v48  ;;  %3053 = vmatprep.mubr.f32.mxu1 %v2387_v22  ;;  %3302 = verf.f32 %v2294_v38  ;;  %v1721_v29 = vmul.f32 %v5132_v33, %v5153_v55  ;;  %v6257_v48 = vld [vmem:[#allocation75_spill] sm:$0xff]  ;;  %v6260_v44 = vld [vmem:[#allocation82_spill] sm:$0xff] }
 0x2c5   : > { %v1957_v0 = vadd.f32 %v1925_v20, %v1750_v50  ;;  %v1788_v30 = vmul.f32 %v5124_v46, %v4553_v51  ;;  %v2356_v41 = vadd.f32 1.0, %v3299_v61  ;;  %v2231_v16 = vadd.f32 %v4806_v9, %v2192_v54 }
 0x2c6   : > { %v1686_v14 = vadd.f32 %v6255_v42, %v1621_v4  ;;  %v1995_v53 = vmul.f32 %v5200_v43, %v6256_v21  ;;  %v1894_v23 = vmul.f32 %v5139_v5, %v5214_v39  ;;  %v6258_v49 = vrot.slane %v4512_v13, 7 }
 0x2c7   : > { %v2154_v40 = vadd.f32 %v2124_v60, %v1957_v0  ;;  %v1857_v52 = vadd.f32 %v6257_v48, %v1788_v30  ;;  %v6259_v55 = vrot.slane %v4548_v8, 7  ;;  %v2388_v2 = vmul.f32 %v2356_v41, %v2260_v12  ;;  %v6262_v0 = vld [vmem:[#allocation65_spill] sm:$0xff]  ;;  %v6264_v48 = vld [vmem:[#allocation79_spill] sm:$0xff] }
 0x2c8   : > { %v2262_v3 = vmul.f32 0.5, %v2230_v45  ;;  %v2295_v26 = vmul.f32 0.70710677, %v2231_v16  ;;  %v1751_v27 = vadd.f32 %v1721_v29, %v1686_v14  ;;  %v3301_v50 = vpop.eup %3300  ;;  %v2060_v63 = vadd.f32 %v6260_v44, %v1995_v53  ;;  %v6263_v14 = vld [vmem:[#allocation72_spill] sm:$0xff] }
 0x2c9   : > { %v5290_v56 = vsel %vm1412_vm2, %v6259_v55, %v6258_v49  ;;  %v2193_v19 = vmul.f32 %v4778_v35, %v2154_v40  ;;  %v1926_v11 = vadd.f32 %v1894_v23, %v1857_v52  ;;  %v2095_v22 = vmul.f32 %v5167_v7, %v5269_v6  ;;  %3054 = vmatmul.mubr.f32.vlgmr.msra.gmra.mrb[0].mxu1 %v2388_v2 }
 0x2ca   : > { %v2357_v38 = vadd.f32 1.0, %v3301_v50  ;;  %3304 = verf.f32 %v2295_v26  ;;  %v6261_v8 = vrot.slane %v4512_v13, 1  ;;  %v1622_v45 = vmul.f32 %v5112_v58, %v5179_v17 }
 0x2cb   : > { %v2232_v12 = vadd.f32 %v4806_v9, %v2193_v19  ;;  %v1958_v54 = vadd.f32 %v1926_v11, %v1751_v27  ;;  %v2125_v60 = vadd.f32 %v2095_v22, %v2060_v63  ;;  %v1789_v4 = vmul.f32 %v5124_v46, %v5237_v31 }
 0x2cc   : > { %v5299_v20 = vsel %vm1509_vm1, %v6261_v8, 0.0  ;;  %v2389_v61 = vmul.f32 %v2357_v38, %v2261_v18  ;;  %v1687_v29 = vadd.f32 %v6262_v0, %v1622_v45  ;;  %v1722_v30 = vmul.f32 %v5132_v33, %v5184_v62  ;;  %v6267_v38 = vld [vmem:[#allocation74_spill] sm:$0xff] }
 0x2cd   : > { %v1996_v13 = vmul.f32 %v5200_v43, %v5290_v56  ;;  %v2296_v41 = vmul.f32 0.70710677, %v2232_v12  ;;  %v2155_v42 = vadd.f32 %v2125_v60, %v1958_v54  ;;  %v1858_v17 = vadd.f32 %v6263_v14, %v1789_v4  ;;  %v6268_v60 = vld [vmem:[#allocation81_spill] sm:$0xff] }
 0x2ce   : > { %v1895_v53 = vmul.f32 %v5139_v5, %v5244_v36  ;;  %3056 = vmatprep.mubr.f32.mxu1 %v2389_v61  ;;  %v1752_v40 = vadd.f32 %v1722_v30, %v1687_v29  ;;  %v2096_v18 = vmul.f32 %v5167_v7, %v5299_v20  ;;  %v6265_v23 = vrot.slane %v4560_v34, 1  ;;  %v3303_v55 = vpop.eup %3302 }
 0x2cf   : > { %v2061_v52 = vadd.f32 %v6264_v48, %v1996_v13  ;;  %v6266_v62 = vrot.slane %v4563_v59, 1  ;;  %3306 = verf.f32 %v2296_v41  ;;  %v2194_v2 = vmul.f32 %v4778_v35, %v2155_v42 }
 0x2d0   : > { %v1927_v26 = vadd.f32 %v1895_v53, %v1858_v17  ;;  %v1623_v27 = vmul.f32 %v5112_v58, %v4553_v51  ;;  %v2358_v50 = vadd.f32 1.0, %v3303_v55  ;;  %v2263_v19 = vmul.f32 0.5, %v2231_v16  ;;  %v6272_v55 = vld [vmem:[#allocation71_spill] sm:$0xff] }
 0x2d1   : > { %v5322_v49 = vsel %vm1509_vm1, %v6266_v62, %v6265_v23  ;;  %v2126_v11 = vadd.f32 %v2096_v18, %v2061_v52  ;;  %v1790_v44 = vmul.f32 %v5124_v46, %v6256_v21  ;;  %v2233_v63 = vadd.f32 %v4806_v9, %v2194_v2 }
 0x2d2   : > { %v1959_v22 = vadd.f32 %v1927_v26, %v1752_v40  ;;  %v1688_v8 = vadd.f32 %v6267_v38, %v1623_v27  ;;  %v1723_v45 = vmul.f32 %v5132_v33, %v5214_v39  ;;  %v2390_v54 = vmul.f32 %v2358_v50, %v2262_v3 }
 0x2d3   : > { %v1859_v4 = vadd.f32 %v6268_v60, %v1790_v44  ;;  %v1896_v51 = vmul.f32 %v5139_v5, %v5269_v6  ;;  %v1997_v16 = vmul.f32 %v5200_v43, %v4622_v24  ;;  %v2264_v61 = vmul.f32 0.5, %v2232_v12 }
 0x2d4   : > { %v2297_v0 = vmul.f32 0.70710677, %v2233_v63  ;;  %v2156_v29 = vadd.f32 %v2126_v11, %v1959_v22  ;;  %v1753_v30 = vadd.f32 %v1723_v45, %v1688_v8  ;;  %v3305_v13 = vpop.eup %3304  ;;  %3057 = vmatmul.mubr.f32.gmra.mrb[2].mxu1 %v2390_v54  ;;  %v2097_v39 = vmul.f32 %v5167_v7, %v5322_v49 }
 0x2d5   : > { %v1928_v41 = vadd.f32 %v1896_v51, %v1859_v4  ;;  %v2062_v42 = vadd.f32 %v4630_v15, %v1997_v16  ;;  %v6269_v3 = vrot.slane %v4560_v34, 7  ;;  %v6270_v14 = vrot.slane %v4563_v59, 7  ;;  %v6276_v51 = vld [vmem:[#allocation86_spill] sm:$0xff] }
 0x2d6   : > { %v2359_v53 = vadd.f32 1.0, %v3305_v13  ;;  %3308 = verf.f32 %v2297_v0  ;;  %v2195_v12 = vmul.f32 %v4778_v35, %v2156_v29  ;;  %v1624_v40 = vmul.f32 %v5112_v58, %v5237_v31  ;;  %v6273_v31 = vld [vmem:[#allocation78_spill] sm:$0xff] }
 0x2d7   : > { %v5346_v17 = vsel %vm1412_vm2, %v6270_v14, %v6269_v3  ;;  %v1960_v48 = vadd.f32 %v1928_v41, %v1753_v30  ;;  %v2127_v52 = vadd.f32 %v2097_v39, %v2062_v42  ;;  %v6271_v15 = vmov %v6265_v23  ;;  %v6277_v3 = vld [vmem:[#allocation80_spill] sm:$0xff] }
 0x2d8   : > { %v5354_v18 = vsel %vm1509_vm1, %v6271_v15, 0.0  ;;  %v1791_v59 = vmul.f32 %v5124_v46, %v5290_v56  ;;  %v2391_v23 = vmul.f32 %v2359_v53, %v2263_v19  ;;  %v2234_v62 = vadd.f32 %v4806_v9, %v2195_v12 }
 0x2d9   : > { %v1689_v2 = vadd.f32 %v6272_v55, %v1624_v40  ;;  %v1724_v26 = vmul.f32 %v5132_v33, %v5244_v36  ;;  %v2157_v27 = vadd.f32 %v2127_v52, %v1960_v48  ;;  %v1897_v34 = vmul.f32 %v5139_v5, %v5299_v20  ;;  %v3307_v44 = vpop.eup %3306 }
 0x2da   : > { %v1860_v50 = vadd.f32 %v6273_v31, %v1791_v59  ;;  %v1998_v11 = vmul.f32 %v5200_v43, %v5346_v17  ;;  %3059 = vmatprep.mubr.f32.mxu1 %v2391_v23  ;;  %v2298_v22 = vmul.f32 0.70710677, %v2234_v62  ;;  %v2098_v38 = vmul.f32 %v5167_v7, %v5354_v18  ;;  %v6278_v23 = vld [vmem:[#allocation96_spill] sm:$0xff] }
 0x2db   : > { %v1754_v19 = vadd.f32 %v1724_v26, %v1689_v2  ;;  %v6274_v8 = vrot.slane %v4609_v32, 1  ;;  %v6275_v36 = vrot.slane %v4612_v10, 1  ;;  %v2360_v54 = vadd.f32 1.0, %v3307_v44 }
 0x2dc   : > { %v2196_v60 = vmul.f32 %v4778_v35, %v2157_v27  ;;  %v1929_v4 = vadd.f32 %v1897_v34, %v1860_v50  ;;  %v2063_v16 = vadd.f32 %v6276_v51, %v1998_v11  ;;  %3310 = verf.f32 %v2298_v22 }
 0x2dd   : > { %v5374_v45 = vsel %vm1509_vm1, %v6275_v36, %v6274_v8  ;;  %v1625_v0 = vmul.f32 %v5112_v58, %v6256_v21  ;;  %v1725_v29 = vmul.f32 %v5132_v33, %v5269_v6  ;;  %v1792_v30 = vmul.f32 %v5124_v46, %v4622_v24  ;;  %v6282_v36 = vld [vmem:[#allocation77_spill] sm:$0xff] }
 0x2de   : > { %v2392_v13 = vmul.f32 %v2360_v54, %v2264_v61  ;;  %v2235_v41 = vadd.f32 %v4806_v9, %v2196_v60  ;;  %v1961_v42 = vadd.f32 %v1929_v4, %v1754_v19  ;;  %v2128_v39 = vadd.f32 %v2098_v38, %v2063_v16  ;;  %v6283_v4 = vld [vmem:[#allocation85_spill] sm:$0xff] }
 0x2df   : > { %v1690_v14 = vadd.f32 %v6277_v3, %v1625_v0  ;;  %v1861_v53 = vadd.f32 %v4626_v28, %v1792_v30  ;;  %v1898_v12 = vmul.f32 %v5139_v5, %v5322_v49  ;;  %v1999_v21 = vmul.f32 %v5200_v43, %v4668_v37 }
 0x2e0   : > { %3060 = vmatmul.mubr.f32.gmra.mrb[4].mxu1 %v2392_v13  ;;  %v2265_v6 = vmul.f32 0.5, %v2233_v63  ;;  %v2299_v40 = vmul.f32 0.70710677, %v2235_v41  ;;  %v2158_v48 = vadd.f32 %v2128_v39, %v1961_v42  ;;  %v2099_v61 = vmul.f32 %v5167_v7, %v5374_v45  ;;  %v3309_v52 = vpop.eup %3308 }
 0x2e1   : > { %v1755_v15 = vadd.f32 %v1725_v29, %v1690_v14  ;;  %v1930_v59 = vadd.f32 %v1898_v12, %v1861_v53  ;;  %v2064_v55 = vadd.f32 %v6278_v23, %v1999_v21  ;;  %v6279_v28 = vrot.slane %v4609_v32, 7  ;;  %v6286_v29 = vld [vmem:[#allocation92_spill] sm:$0xff]  ;;  %v6288_v14 = vld [vmem:[#allocation90_spill] sm:$0xff] }
 0x2e2   : > { %v6280_v2 = vrot.slane %v4612_v10, 7  ;;  %v2361_v27 = vadd.f32 1.0, %v3309_v52  ;;  %v2266_v31 = vmul.f32 0.5, %v2234_v62  ;;  %3312 = verf.f32 %v2299_v40  ;;  %v6289_v52 = vld [vmem:[#allocation87_spill] sm:$0xff] }
 0x2e3   : > { %v2197_v63 = vmul.f32 %v4778_v35, %v2158_v48  ;;  %v1962_v50 = vadd.f32 %v1930_v59, %v1755_v15  ;;  %v2129_v34 = vadd.f32 %v2099_v61, %v2064_v55  ;;  %v6281_v11 = vmov %v6274_v8 }
 0x2e4   : > { %v5399_v26 = vsel %vm1412_vm2, %v6280_v2, %v6279_v28  ;;  %v5405_v44 = vsel %vm1509_vm1, %v6281_v11, 0.0  ;;  %v1626_v22 = vmul.f32 %v5112_v58, %v5290_v56  ;;  %v2393_v19 = vmul.f32 %v2361_v27, %v2265_v6  ;;  %v6290_v2 = vld [vmem:[#allocation103_spill] sm:$0xff] }
 0x2e5   : > { %v2236_v10 = vadd.f32 %v4806_v9, %v2197_v63  ;;  %v1726_v38 = vmul.f32 %v5132_v33, %v5299_v20  ;;  %v1793_v62 = vmul.f32 %v5124_v46, %v5346_v17  ;;  %v2159_v8 = vadd.f32 %v2129_v34, %v1962_v50  ;;  %v6284_v20 = vld [vmem:[#allocation91_spill] sm:$0xff] }
 0x2e6   : > { %v1691_v54 = vadd.f32 %v6282_v36, %v1626_v22  ;;  %v1899_v32 = vmul.f32 %v5139_v5, %v5354_v18  ;;  %v2000_v60 = vmul.f32 %v5200_v43, %v5399_v26  ;;  %3062 = vmatprep.mubr.f32.mxu1 %v2393_v19  ;;  %v2100_v16 = vmul.f32 %v5167_v7, %v5405_v44  ;;  %v3311_v42 = vpop.eup %3310  ;;  %v6291_v50 = vld [vmem:[#allocation95_spill] sm:$0xff]  ;;  %v6292_v19 = vld [vmem:[#allocation102_spill] sm:$0xff] }
 0x2e7   : > { %v2300_v56 = vmul.f32 0.70710677, %v2236_v10  ;;  %v1862_v51 = vadd.f32 %v6283_v4, %v1793_v62  ;;  %v6285_v0 = vrot.slane %v6284_v20, 1  ;;  %v6287_v30 = vrot.slane %v6286_v29, 1 }
 0x2e8   : > { %v2198_v39 = vmul.f32 %v4778_v35, %v2159_v8  ;;  %v1756_v3 = vadd.f32 %v1726_v38, %v1691_v54  ;;  %v2065_v53 = vadd.f32 %v6288_v14, %v2000_v60  ;;  %v1627_v12 = vmul.f32 %v5112_v58, %v4622_v24 }
 0x2e9   : > { %v5427_v13 = vsel %vm1509_vm1, %v6287_v30, %v6285_v0  ;;  %v2362_v21 = vadd.f32 1.0, %v3311_v42  ;;  %3314 = verf.f32 %v2300_v56  ;;  %v1931_v6 = vadd.f32 %v1899_v32, %v1862_v51 }
 0x2ea   : > { %v1727_v40 = vmul.f32 %v5132_v33, %v5322_v49  ;;  %v2237_v48 = vadd.f32 %v4806_v9, %v2198_v39  ;;  %v2130_v61 = vadd.f32 %v2100_v16, %v2065_v53  ;;  %v1692_v15 = vadd.f32 %v6289_v52, %v1627_v12  ;;  %v6296_v39 = vld [vmem:[#allocation84_spill] sm:$0xff]  ;;  %v6297_v53 = vld [vmem:[#allocation89_spill] sm:$0xff] }
 0x2eb   : > { %v1794_v59 = vmul.f32 %v5124_v46, %v4668_v37  ;;  %v2394_v23 = vmul.f32 %v2362_v21, %v2266_v31  ;;  %v2267_v55 = vmul.f32 0.5, %v2235_v41  ;;  %v1963_v28 = vadd.f32 %v1931_v6, %v1756_v3  ;;  %v6298_v21 = vld [vmem:[#allocation94_spill] sm:$0xff] }
 0x2ec   : > { %v2001_v24 = vmul.f32 %v5200_v43, %v6290_v2  ;;  %v2301_v27 = vmul.f32 0.70710677, %v2237_v48  ;;  %v1757_v63 = vadd.f32 %v1727_v40, %v1692_v15  ;;  %v1900_v49 = vmul.f32 %v5139_v5, %v5374_v45  ;;  %v3313_v11 = vpop.eup %3312 }
 0x2ed   : > { %v1863_v34 = vadd.f32 %v6291_v50, %v1794_v59  ;;  %3063 = vmatmul.mubr.f32.gmra.mrb[6].mxu1 %v2394_v23  ;;  %v2160_v22 = vadd.f32 %v2130_v61, %v1963_v28  ;;  %v2101_v31 = vmul.f32 %v5167_v7, %v5427_v13  ;;  %v6293_v41 = vrot.slane %v6284_v20, 7 }
 0x2ee   : > { %v2066_v38 = vadd.f32 %v6292_v19, %v2001_v24  ;;  %v6294_v62 = vrot.slane %v6286_v29, 7  ;;  %v2363_v36 = vadd.f32 1.0, %v3313_v11  ;;  %v2268_v54 = vmul.f32 0.5, %v2236_v10 }
 0x2ef   : > { %3316 = verf.f32 %v2301_v27  ;;  %v1932_v32 = vadd.f32 %v1900_v49, %v1863_v34  ;;  %v2199_v60 = vmul.f32 %v4778_v35, %v2160_v22  ;;  %v6295_v4 = vmov %v6285_v0  ;;  %v6303_v34 = vld [vmem:[#allocation93_spill] sm:$0xff] }
 0x2f0   : > { %v5452_v8 = vsel %vm1412_vm2, %v6294_v62, %v6293_v41  ;;  %v2131_v56 = vadd.f32 %v2101_v31, %v2066_v38  ;;  %v5458_v51 = vsel %vm1509_vm1, %v6295_v4, 0.0  ;;  %v1628_v16 = vmul.f32 %v5112_v58, %v5346_v17 }
 0x2f1   : > { %v2395_v0 = vmul.f32 %v2363_v36, %v2267_v55  ;;  %v1964_v29 = vadd.f32 %v1932_v32, %v1757_v63  ;;  %v1728_v30 = vmul.f32 %v5132_v33, %v5354_v18  ;;  %v1795_v10 = vmul.f32 %v5124_v46, %v5399_v26  ;;  %v6300_v18 = vld [vmem:[#allocation107_spill] sm:$0xff]  ;;  %v6304_v36 = vld [vmem:[#allocation101_spill] sm:$0xff] }
 0x2f2   : > { %v2238_v42 = vadd.f32 %v4806_v9, %v2199_v60  ;;  %v1693_v3 = vadd.f32 %v6296_v39, %v1628_v16  ;;  %v1901_v20 = vmul.f32 %v5139_v5, %v5405_v44  ;;  %v2002_v14 = vmul.f32 %v5200_v43, %v5452_v8  ;;  %v6302_v55 = vld [vmem:[#allocation99_spill] sm:$0xff]  ;;  %v6305_v60 = vld [vmem:[#allocation112_spill] sm:$0xff] }
 0x2f3   : > { %3065 = vmatprep.mubr.f32.mxu1 %v2395_v0  ;;  %v2161_v17 = vadd.f32 %v2131_v56, %v1964_v29  ;;  %v1864_v12 = vadd.f32 %v6297_v53, %v1795_v10  ;;  %v6299_v6 = vrot.slane %v6298_v21, 1  ;;  %v6301_v40 = vrot.slane %v6300_v18, 1  ;;  %v3315_v15 = vpop.eup %3314  ;;  %v6308_v10 = vld [vmem:[#allocation111_spill] sm:$0xff] }
 0x2f4   : > { %v1629_v52 = vmul.f32 %v5112_v58, %v4668_v37  ;;  %v2302_v59 = vmul.f32 0.70710677, %v2238_v42  ;;  %v1758_v23 = vadd.f32 %v1728_v30, %v1693_v3  ;;  %v2067_v28 = vadd.f32 %v6302_v55, %v2002_v14 }
 0x2f5   : > { %v5478_v61 = vsel %vm1509_vm1, %v6301_v40, %v6299_v6  ;;  %v2102_v24 = vmul.f32 %v5167_v7, %v5458_v51  ;;  %v2364_v27 = vadd.f32 1.0, %v3315_v15  ;;  %v2200_v63 = vmul.f32 %v4778_v35, %v2161_v17 }
 0x2f6   : > { %v1933_v50 = vadd.f32 %v1901_v20, %v1864_v12  ;;  %v1694_v49 = vadd.f32 %v6303_v34, %v1629_v52  ;;  %3318 = verf.f32 %v2302_v59  ;;  %v1729_v22 = vmul.f32 %v5132_v33, %v5374_v45  ;;  %v5525_v52 = vld [vmem:[%s5948_s7] ss:$0 sm:$0xff]  ;;  %v6314_v34 = vld [vmem:[#allocation115_spill] sm:$0xff] }
 0x2f7   : > { %v2132_v11 = vadd.f32 %v2102_v24, %v2067_v28  ;;  %v1796_v37 = vmul.f32 %v5124_v46, %v6290_v2  ;;  %v2396_v19 = vmul.f32 %v2364_v27, %v2268_v54  ;;  %v2269_v38 = vmul.f32 0.5, %v2237_v48  ;;  %v6311_v28 = vld [vmem:[#allocation98_spill] sm:$0xff] }
 0x2f8   : > { %v2239_v31 = vadd.f32 %v4806_v9, %v2200_v63  ;;  %v1965_v41 = vadd.f32 %v1933_v50, %v1758_v23  ;;  %v1759_v62 = vadd.f32 %v1729_v22, %v1694_v49  ;;  %v1902_v35 = vmul.f32 %v5139_v5, %v5427_v13  ;;  %v6312_v63 = vld [vmem:[#allocation109_spill] sm:$0xff] }
 0x2f9   : > { %v1865_v32 = vadd.f32 %v6304_v36, %v1796_v37  ;;  %v2003_v56 = vmul.f32 %v5200_v43, %v6305_v60  ;;  %v3317_v4 = vpop.eup %3316  ;;  %3066 = vmatmul.mubr.f32.gmra.mrb[8].mxu1 %v2396_v19  ;;  %v2270_v45 = vmul.f32 0.5, %v2238_v42  ;;  %v6306_v54 = vrot.slane %v6298_v21, 7  ;;  %v5510_v42 = vld [vmem:[%s5947_s6] ss:$0 sm:$0xff]  ;;  %v6310_v21 = vld [vmem:[#allocation88_spill] sm:$0xff] }
 0x2fa   : > { %v2303_v16 = vmul.f32 0.70710677, %v2239_v31  ;;  %v2162_v0 = vadd.f32 %v2132_v11, %v1965_v41  ;;  %v6307_v48 = vrot.slane %v6300_v18, 7  ;;  %v2365_v29 = vadd.f32 1.0, %v3317_v4 }
 0x2fb   : > { %v1934_v30 = vadd.f32 %v1902_v35, %v1865_v32  ;;  %v2068_v39 = vadd.f32 %v6308_v10, %v2003_v56  ;;  %v2103_v3 = vmul.f32 %v5167_v7, %v5478_v61  ;;  %v6309_v14 = vmov %v6299_v6  ;;  %v6318_v10 = vld [vmem:[#allocation110_spill] sm:$0xff] }
 0x2fc   : > { %v5502_v9 = vsel %vm1412_vm2, %v6307_v48, %v6306_v54  ;;  %3320 = verf.f32 %v2303_v16  ;;  %v2201_v20 = vmul.f32 %v5510_v42, %v2162_v0  ;;  %v5516_v17 = vsel %vm1509_vm1, %v6309_v14, 0.0  ;;  %v6317_v48 = vld [vmem:[#allocation100_spill] sm:$0xff] }
 0x2fd   : > { %v1630_v53 = vmul.f32 %v5112_v58, %v5399_v26  ;;  %v2397_v12 = vmul.f32 %v2365_v29, %v2269_v38  ;;  %v1966_v6 = vadd.f32 %v1934_v30, %v1759_v62  ;;  %v2133_v18 = vadd.f32 %v2103_v3, %v2068_v39  ;;  %v6319_v3 = vld [vmem:[#allocation119_spill] sm:$0xff] }
 0x2fe   : > { %v1797_v40 = vmul.f32 %v5124_v46, %v5452_v8  ;;  %v2240_v15 = vadd.f32 %v5525_v52, %v2201_v20  ;;  %v1730_v23 = vmul.f32 %v5132_v33, %v5405_v44  ;;  %v2004_v26 = vmul.f32 %v5200_v43, %v5502_v9  ;;  %v6316_v44 = vld [vmem:[#allocation106_spill] sm:$0xff] }
 0x2ff   : > { %v1695_v59 = vadd.f32 %v6310_v21, %v1630_v53  ;;  %3068 = vmatprep.mubr.f32.mxu1 %v2397_v12  ;;  %v2163_v55 = vadd.f32 %v2133_v18, %v1966_v6  ;;  %v1903_v27 = vmul.f32 %v5139_v5, %v5458_v51  ;;  %v6313_v50 = vrot.slane %v6312_v63, 1  ;;  %v6320_v21 = vld [vmem:[#allocation121_spill] sm:$0xff] }
 0x300   : > { %v1866_v24 = vadd.f32 %v6311_v28, %v1797_v40  ;;  %v6315_v49 = vrot.slane %v6314_v34, 1  ;;  %v2304_v22 = vmul.f32 0.70710677, %v2240_v15  ;;  %v2069_v19 = vadd.f32 %v6316_v44, %v2004_v26  ;;  %v3319_v41 = vpop.eup %3318  ;;  %v6323_v44 = vld [vmem:[#allocation97_spill] sm:$0xff] }
 0x301   : > { %v1760_v37 = vadd.f32 %v1730_v23, %v1695_v59  ;;  %v2104_v38 = vmul.f32 %v5167_v7, %v5516_v17  ;;  %v2271_v62 = vmul.f32 0.5, %v2239_v31  ;;  %v2202_v36 = vmul.f32 %v5510_v42, %v2163_v55 }
 0x302   : > { %v5541_v11 = vsel %vm1509_vm1, %v6315_v49, %v6313_v50  ;;  %v1935_v32 = vadd.f32 %v1903_v27, %v1866_v24  ;;  %v1631_v35 = vmul.f32 %v5112_v58, %v6290_v2  ;;  %v2366_v56 = vadd.f32 1.0, %v3319_v41 }
 0x303   : > { %3322 = verf.f32 %v2304_v22  ;;  %v2134_v4 = vadd.f32 %v2104_v38, %v2069_v19  ;;  %v1798_v16 = vmul.f32 %v5124_v46, %v6305_v60  ;;  %v2241_v0 = vadd.f32 %v5525_v52, %v2202_v36 }
 0x304   : > { %v1967_v54 = vadd.f32 %v1935_v32, %v1760_v37  ;;  %v1696_v29 = vadd.f32 %v6317_v48, %v1631_v35  ;;  %v1731_v31 = vmul.f32 %v5132_v33, %v5427_v13  ;;  %v2398_v30 = vmul.f32 %v2366_v56, %v2270_v45 }
 0x305   : > { %v1867_v39 = vadd.f32 %v6318_v10, %v1798_v16  ;;  %v1904_v2 = vmul.f32 %v5139_v5, %v5478_v61  ;;  %v2005_v20 = vmul.f32 %v5200_v43, %v6319_v3  ;;  %v2272_v14 = vmul.f32 0.5, %v2240_v15  ;;  %v6329_v10 = vld [vmem:[#allocation116_spill] sm:$0xff] }
 0x306   : > { %v2305_v53 = vmul.f32 0.70710677, %v2241_v0  ;;  %v2164_v12 = vadd.f32 %v2134_v4, %v1967_v54  ;;  %v1761_v6 = vadd.f32 %v1731_v31, %v1696_v29  ;;  %v3321_v18 = vpop.eup %3320  ;;  %3069 = vmatmul.mubr.f32.gmra.mrb[10].mxu1 %v2398_v30  ;;  %v2105_v13 = vmul.f32 %v5167_v7, %v5541_v11  ;;  %v6325_v4 = vld [vmem:[#allocation117_spill] sm:$0xff]  ;;  %v6327_v54 = vld [vmem:[#allocation122_spill] sm:$0xff] }
 0x307   : > { %v1936_v40 = vadd.f32 %v1904_v2, %v1867_v39  ;;  %v2070_v59 = vadd.f32 %v6320_v21, %v2005_v20  ;;  %v6321_v45 = vrot.slane %v6312_v63, 7  ;;  %v6322_v23 = vrot.slane %v6314_v34, 7  ;;  %v6330_v21 = vld [vmem:[#allocation108_spill] sm:$0xff] }
 0x308   : > { %v2367_v55 = vadd.f32 1.0, %v3321_v18  ;;  %3324 = verf.f32 %v2305_v53  ;;  %v2203_v15 = vmul.f32 %v5510_v42, %v2164_v12  ;;  %v1632_v28 = vmul.f32 %v5112_v58, %v5452_v8  ;;  %v6324_v8 = vld [vmem:[#allocation105_spill] sm:$0xff] }
 0x309   : > { %v5568_v26 = vsel %vm1412_vm2, %v6322_v23, %v6321_v45  ;;  %v1968_v24 = vadd.f32 %v1936_v40, %v1761_v6  ;;  %v2135_v27 = vadd.f32 %v2105_v13, %v2070_v59  ;;  %v5576_v49 = vsel %vm1509_vm1, %v6313_v50, 0.0  ;;  %v6331_v45 = vld [vmem:[#allocation120_spill] sm:$0xff] }
 0x30a   : > { %v1799_v34 = vmul.f32 %v5124_v46, %v5502_v9  ;;  %v2399_v22 = vmul.f32 %v2367_v55, %v2271_v62  ;;  %v2242_v37 = vadd.f32 %v5525_v52, %v2203_v15  ;;  %v1697_v19 = vadd.f32 %v6323_v44, %v1632_v28  ;;  %v6332_v55 = vld [vmem:[#allocation132_spill] sm:$0xff] }
 0x30b   : > { %v1732_v38 = vmul.f32 %v5132_v33, %v5458_v51  ;;  %v2165_v41 = vadd.f32 %v2135_v27, %v1968_v24  ;;  %v1905_v63 = vmul.f32 %v5139_v5, %v5516_v17  ;;  %v2006_v32 = vmul.f32 %v5200_v43, %v5568_v26 }
 0x30c   : > { %v1868_v36 = vadd.f32 %v6324_v8, %v1799_v34  ;;  %3071 = vmatprep.mubr.f32.mxu1 %v2399_v22  ;;  %v2306_v35 = vmul.f32 0.70710677, %v2242_v37  ;;  %v2106_v62 = vmul.f32 %v5167_v7, %v5576_v49  ;;  %v6326_v16 = vrot.slane %v6325_v4, 1  ;;  %v6333_v22 = vld [vmem:[#allocation129_spill] sm:$0xff] }
 0x30d   : > { %v1762_v56 = vadd.f32 %v1732_v38, %v1697_v19  ;;  %v6328_v48 = vrot.slane %v6327_v54, 1  ;;  %v3323_v29 = vpop.eup %3322  ;;  %v2204_v31 = vmul.f32 %v5510_v42, %v2165_v41  ;;  %v2071_v39 = vadd.f32 %v6329_v10, %v2006_v32 }
 0x30e   : > { %v1937_v30 = vadd.f32 %v1905_v63, %v1868_v36  ;;  %v1633_v2 = vmul.f32 %v5112_v58, %v6305_v60  ;;  %v2368_v20 = vadd.f32 1.0, %v3323_v29  ;;  %3326 = verf.f32 %v2306_v35 }
 0x30f   : > { %v5596_v51 = vsel %vm1509_vm1, %v6328_v48, %v6326_v16  ;;  %v1733_v53 = vmul.f32 %v5132_v33, %v5478_v61  ;;  %v1800_v12 = vmul.f32 %v5124_v46, %v6319_v3  ;;  %v2243_v6 = vadd.f32 %v5525_v52, %v2204_v31  ;;  %v6337_v31 = vld [vmem:[#allocation104_spill] sm:$0xff] }
 0x310   : > { %v1969_v18 = vadd.f32 %v1937_v30, %v1762_v56  ;;  %v2136_v40 = vadd.f32 %v2106_v62, %v2071_v39  ;;  %v1698_v59 = vadd.f32 %v6330_v21, %v1633_v2  ;;  %v2400_v13 = vmul.f32 %v2368_v20, %v2272_v14  ;;  %v6338_v39 = vld [vmem:[#allocation114_spill] sm:$0xff] }
 0x311   : > { %v1869_v23 = vadd.f32 %v6331_v45, %v1800_v12  ;;  %v1906_v60 = vmul.f32 %v5139_v5, %v5541_v11  ;;  %v2007_v15 = vmul.f32 %v5200_v43, %v6332_v55  ;;  %v2273_v28 = vmul.f32 0.5, %v2241_v0  ;;  %v6341_v12 = vld [vmem:[#allocation130_spill] sm:$0xff] }
 0x312   : > { %v2307_v61 = vmul.f32 0.70710677, %v2243_v6  ;;  %v2166_v24 = vadd.f32 %v2136_v40, %v1969_v18  ;;  %v1763_v27 = vadd.f32 %v1733_v53, %v1698_v59  ;;  %v3325_v50 = vpop.eup %3324  ;;  %3072 = vmatmul.mubr.f32.gmra.mrb[12].mxu1 %v2400_v13  ;;  %v2107_v14 = vmul.f32 %v5167_v7, %v5596_v51  ;;  %v6343_v45 = vld [vmem:[#allocation126_spill] sm:$0xff] }
 0x313   : > { %v1938_v34 = vadd.f32 %v1906_v60, %v1869_v23  ;;  %v2072_v44 = vadd.f32 %v6333_v22, %v2007_v15  ;;  %v6334_v19 = vrot.slane %v6325_v4, 7  ;;  %v6335_v38 = vrot.slane %v6327_v54, 7 }
 0x314   : > { %v2369_v8 = vadd.f32 1.0, %v3325_v50  ;;  %v2274_v0 = vmul.f32 0.5, %v2242_v37  ;;  %3328 = verf.f32 %v2307_v61  ;;  %v2205_v36 = vmul.f32 %v5510_v42, %v2166_v24  ;;  %v6344_v50 = vld [vmem:[#allocation118_spill] sm:$0xff] }
 0x315   : > { %v5621_v41 = vsel %vm1412_vm2, %v6335_v38, %v6334_v19  ;;  %v1970_v63 = vadd.f32 %v1938_v34, %v1763_v27  ;;  %v2137_v32 = vadd.f32 %v2107_v14, %v2072_v44  ;;  %v6336_v35 = vmov %v6326_v16  ;;  %v6345_v38 = vld [vmem:[#allocation35_spill] sm:$0xff] }
 0x316   : > { %v5627_v56 = vsel %vm1509_vm1, %v6336_v35, 0.0  ;;  %v1634_v62 = vmul.f32 %v5112_v58, %v5502_v9  ;;  %v2401_v16 = vmul.f32 %v2369_v8, %v2273_v28  ;;  %v2244_v54 = vadd.f32 %v5525_v52, %v2205_v36 }
 0x317   : > { %v1734_v48 = vmul.f32 %v5132_v33, %v5516_v17  ;;  %v1801_v37 = vmul.f32 %v5124_v46, %v5568_v26  ;;  %v2167_v29 = vadd.f32 %v2137_v32, %v1970_v63  ;;  %v1907_v4 = vmul.f32 %v5139_v5, %v5576_v49  ;;  %v6339_v17 = vld [vmem:[#allocation123_spill] sm:$0xff]  ;;  %v6346_v63 = vld [vmem:[#allocation128_spill] sm:$0xff] }
 0x318   : > { %v1699_v30 = vadd.f32 %v6337_v31, %v1634_v62  ;;  %v2008_v10 = vmul.f32 %v5200_v43, %v5621_v41  ;;  %3074 = vmatprep.mubr.f32.mxu1 %v2401_v16  ;;  %v2308_v9 = vmul.f32 0.70710677, %v2244_v54  ;;  %v2108_v20 = vmul.f32 %v5167_v7, %v5627_v56  ;;  %v3327_v21 = vpop.eup %3326  ;;  %v6347_v16 = vld [vmem:[#allocation41_spill] sm:$0xff] }
 0x319   : > { %v1870_v2 = vadd.f32 %v6338_v39, %v1801_v37  ;;  %v6340_v53 = vrot.slane %v6339_v17, 1  ;;  %v6342_v18 = vrot.slane %v6341_v12, 1  ;;  %v2206_v59 = vmul.f32 %v5510_v42, %v2167_v29 }
 0x31a   : > { %v1764_v13 = vadd.f32 %v1734_v48, %v1699_v30  ;;  %v2073_v23 = vadd.f32 %v6343_v45, %v2008_v10  ;;  %v1635_v60 = vmul.f32 %v5112_v58, %v6319_v3  ;;  %v2370_v15 = vadd.f32 1.0, %v3327_v21 }
 0x31b   : > { %v5649_v40 = vsel %vm1509_vm1, %v6342_v18, %v6340_v53  ;;  %3330 = verf.f32 %v2308_v9  ;;  %v1939_v28 = vadd.f32 %v1907_v4, %v1870_v2  ;;  %v1735_v61 = vmul.f32 %v5132_v33, %v5541_v11 }
 0x31c   : > { %v2245_v24 = vadd.f32 %v5525_v52, %v2206_v59  ;;  %v2138_v27 = vadd.f32 %v2108_v20, %v2073_v23  ;;  %v1700_v34 = vadd.f32 %v6344_v50, %v1635_v60  ;;  %v1802_v22 = vmul.f32 %v5124_v46, %v6332_v55  ;;  %v6351_v59 = vld [vmem:[#allocation113_spill] sm:$0xff] }
 0x31d   : > { %v2402_v44 = vmul.f32 %v2370_v15, %v2274_v0  ;;  %v2275_v14 = vmul.f32 0.5, %v2243_v6  ;;  %v1971_v19 = vadd.f32 %v1939_v28, %v1764_v13  ;;  %v2009_v3 = vmul.f32 %v5200_v43, %v6345_v38  ;;  %v6352_v23 = vld [vmem:[#allocation125_spill] sm:$0xff] }
 0x31e   : > { %v2309_v8 = vmul.f32 0.70710677, %v2245_v24  ;;  %v1765_v36 = vadd.f32 %v1735_v61, %v1700_v34  ;;  %v1871_v32 = vadd.f32 %v6346_v63, %v1802_v22  ;;  %v1908_v11 = vmul.f32 %v5139_v5, %v5596_v51  ;;  %v3329_v35 = vpop.eup %3328  ;;  %v6355_v22 = vld [vmem:[#allocation134_spill] sm:$0xff] }
 0x31f   : > { %3075 = vmatmul.mubr.f32.gmra.mrb[14].mxu1 %v2402_v44  ;;  %v2168_v62 = vadd.f32 %v2138_v27, %v1971_v19  ;;  %v2074_v48 = vadd.f32 %v6347_v16, %v2009_v3  ;;  %v2109_v0 = vmul.f32 %v5167_v7, %v5649_v40  ;;  %v6348_v6 = vrot.slane %v6339_v17, 7 }
 0x320   : > { %v6349_v37 = vrot.slane %v6341_v12, 7  ;;  %v2371_v31 = vadd.f32 1.0, %v3329_v35  ;;  %v2276_v30 = vmul.f32 0.5, %v2244_v54  ;;  %3332 = verf.f32 %v2309_v8 }
 0x321   : > { %v1940_v4 = vadd.f32 %v1908_v11, %v1871_v32  ;;  %v2207_v10 = vmul.f32 %v5510_v42, %v2168_v62  ;;  %v2139_v9 = vadd.f32 %v2109_v0, %v2074_v48  ;;  %v6350_v39 = vmov %v6340_v53  ;;  %v6357_v48 = vld [vmem:[#allocation37_spill] sm:$0xff] }
 0x322   : > { %v5674_v29 = vsel %vm1412_vm2, %v6349_v37, %v6348_v6  ;;  %v5680_v2 = vsel %vm1509_vm1, %v6350_v39, 0.0  ;;  %v1636_v20 = vmul.f32 %v5112_v58, %v5568_v26  ;;  %v2403_v53 = vmul.f32 %v2371_v31, %v2275_v14  ;;  %v6358_v39 = vld [vmem:[#allocation124_spill] sm:$0xff] }
 0x323   : > { %v1972_v12 = vadd.f32 %v1940_v4, %v1765_v36  ;;  %v1736_v18 = vmul.f32 %v5132_v33, %v5576_v49  ;;  %v1803_v54 = vmul.f32 %v5124_v46, %v5621_v41  ;;  %v2246_v21 = vadd.f32 %v5525_v52, %v2207_v10  ;;  %v6356_v36 = vld [vmem:[#allocation127_spill] sm:$0xff] }
 0x324   : > { %v1701_v13 = vadd.f32 %v6351_v59, %v1636_v20  ;;  %v1909_v17 = vmul.f32 %v5139_v5, %v5627_v56  ;;  %v2010_v45 = vmul.f32 %v5200_v43, %v5674_v29  ;;  %3077 = vmatprep.mubr.f32.mxu1 %v2403_v53  ;;  %v6353_v15 = vrot.slane %v4943_v1, 1 }
 0x325   : > { %v2169_v26 = vadd.f32 %v2139_v9, %v1972_v12  ;;  %v1872_v60 = vadd.f32 %v6352_v23, %v1803_v54  ;;  %v6354_v49 = vrot.slane %v5018_v25, 1  ;;  %v1637_v61 = vmul.f32 %v5112_v58, %v6332_v55  ;;  %v3331_v27 = vpop.eup %3330 }
 0x326   : > { %v2310_v50 = vmul.f32 0.70710677, %v2246_v21  ;;  %v1766_v34 = vadd.f32 %v1736_v18, %v1701_v13  ;;  %v2075_v44 = vadd.f32 %v6355_v22, %v2010_v45  ;;  %v2110_v14 = vmul.f32 %v5167_v7, %v5680_v2  ;;  %v6359_v13 = vld [vmem:[#allocation133_spill] sm:$0xff] }
 0x327   : > { %v1557_v28 = vsel %vm1509_vm1, %v6354_v49, %v6353_v15  ;;  %v2372_v19 = vadd.f32 1.0, %v3331_v27  ;;  %v2208_v3 = vmul.f32 %v5510_v42, %v2169_v26  ;;  %v1941_v8 = vadd.f32 %v1909_v17, %v1872_v60  ;;  %v6360_v60 = vld [vmem:[#allocation47_spill] sm:$0xff] }
 0x328   : > { %v1702_v63 = vadd.f32 %v6356_v36, %v1637_v61  ;;  %3334 = verf.f32 %v2310_v50  ;;  %v2140_v25 = vadd.f32 %v2110_v14, %v2075_v44  ;;  %v1737_v32 = vmul.f32 %v5132_v33, %v5596_v51  ;;  %v3358_v33 = vld [vmem:[%s5946_s5] ss:$0 sm:$0xff]  ;;  %v6361_v50 = vld [vmem:[#allocation49_spill] sm:$0xff]  ;;  %v6364_v36 = vld [vmem:[#allocation131_spill] sm:$0xff] }
 0x329   : > { %v1804_v58 = vmul.f32 %v5124_v46, %v6345_v38  ;;  %v2404_v55 = vmul.f32 %v2372_v19, %v2276_v30  ;;  %v5712_v11 = vadd.f32 %v5525_v52, %v2208_v3  ;;  %v1973_v35 = vadd.f32 %v1941_v8, %v1766_v34  ;;  %v6362_v19 = vld [vmem:[#allocation48_spill] sm:$0xff]  ;;  %v6363_v8 = vld [vmem:[#allocation39_spill] sm:$0xff] }
 0x32a   : > { %v1910_v62 = vmul.f32 %v5139_v5, %v5649_v40  ;;  %v1767_v16 = vadd.f32 %v1737_v32, %v1702_v63  ;;  %v2111_v6 = vmul.f32 %v5167_v7, %v1557_v28  ;;  %v1638_v51 = vmul.f32 %v3358_v33, %v5621_v41  ;;  %v3333_v46 = vpop.eup %3332  ;;  %v3359_v5 = vld [vmem:[%s5946_s5 + $0x2] ss:$0 sm:$0xff] }
 0x32b   : > { %v1873_v0 = vadd.f32 %v6357_v48, %v1804_v58  ;;  %3078 = vmatmul.mubr.f32.gmra.mrb[16].mxu1 %v2404_v55  ;;  %v2277_v37 = vmul.f32 0.5, %v2245_v24  ;;  %v2311_v31 = vmul.f32 0.70710677, %v5712_v11  ;;  %v2170_v30 = vadd.f32 %v2140_v25, %v1973_v35  ;;  %v3360_v24 = vld [vmem:[%s5946_s5 + $0x3] ss:$0 sm:$0xff] }
 0x32c   : > { %v1738_v4 = vmul.f32 %v3359_v5, %v5627_v56  ;;  %v2373_v10 = vadd.f32 1.0, %v3333_v46  ;;  %v2141_v9 = vadd.f32 %v2111_v6, %v5220_v47  ;;  %v1703_v20 = vadd.f32 %v6358_v39, %v1638_v51 }
 0x32d   : > { %v1942_v7 = vadd.f32 %v1910_v62, %v1873_v0  ;;  %v2278_v53 = vmul.f32 0.5, %v2246_v21  ;;  %3336 = verf.f32 %v2311_v31  ;;  %v2209_v41 = vmul.f32 %v5510_v42, %v2170_v30  ;;  %v3361_v21 = vld [vmem:[%s5946_s5 + $0x5] ss:$0 sm:$0xff]  ;;  %v6365_v0 = vld [vmem:[#allocation36_spill] sm:$0xff] }
 0x32e   : > { %v1805_v12 = vmul.f32 %v3360_v24, %v5674_v29  ;;  %v2405_v18 = vmul.f32 %v2373_v10, %v2277_v37  ;;  %v1768_v59 = vadd.f32 %v1738_v4, %v1703_v20  ;;  %v2012_v56 = vmul.f32 %v5200_v43, %v5038_v57 }
 0x32f   : > { %v1974_v54 = vadd.f32 %v1942_v7, %v1767_v16  ;;  %v2248_v47 = vadd.f32 %v5525_v52, %v2209_v41  ;;  %v1911_v45 = vmul.f32 %v3361_v21, %v5680_v2  ;;  %v1639_v26 = vmul.f32 %v3358_v33, %v6345_v38 }
 0x330   : > { %v1874_v17 = vadd.f32 %v6359_v13, %v1805_v12  ;;  %3080 = vmatprep.mubr.f32.mxu1 %v2405_v18  ;;  %v2077_v15 = vadd.f32 %v6360_v60, %v2012_v56  ;;  %v1912_v49 = vmul.f32 %v3361_v21, %v1557_v28  ;;  %v1640_v61 = vmul.f32 %v3358_v33, %v5674_v29  ;;  %v3362_v29 = vld [vmem:[%s5946_s5 + $0x4] ss:$0 sm:$0xff] }
 0x331   : > { %v2171_v23 = vadd.f32 %v2141_v9, %v1974_v54  ;;  %v2312_v43 = vmul.f32 0.70710677, %v2248_v47  ;;  %v1704_v34 = vadd.f32 %v6361_v50, %v1639_v26  ;;  %v1739_v22 = vmul.f32 %v3359_v5, %v5649_v40 }
 0x332   : > { %v1943_v27 = vadd.f32 %v1911_v45, %v1874_v17  ;;  %v3335_v44 = vpop.eup %3334  ;;  %v2142_v3 = vadd.f32 %v6362_v19, %v2077_v15  ;;  %v1944_v38 = vadd.f32 %v1912_v49, %v6363_v8  ;;  %v1705_v63 = vadd.f32 %v6364_v36, %v1640_v61  ;;  %v6367_v19 = vld [vmem:[#allocation2_spill] sm:$0xff]  ;;  %v3363_v8 = vld [vmem:[%s3474_s18 + $0x8] sm:$0xff] }
 0x333   : > { %v2210_v14 = vmul.f32 %v5510_v42, %v2171_v23  ;;  %v2374_v25 = vadd.f32 1.0, %v3335_v44  ;;  %3338 = verf.f32 %v2312_v43  ;;  %v1769_v32 = vadd.f32 %v1739_v22, %v1704_v34  ;;  %v5769_v43 = vld [vmem:[%s5950_s9] ss:$0 sm:$0xff]  ;;  %v6366_v44 = vld [vmem:[#allocation3_spill] sm:$0xff] }
 0x334   : > { %v1975_v28 = vadd.f32 %v1943_v27, %v1768_v59  ;;  %v1844_v58 = vmul.f32 %v3362_v29, %v4943_v1  ;;  %v1740_v55 = vmul.f32 %v3359_v5, %v5680_v2  ;;  %v1807_v35 = vmul.f32 %v3360_v24, %v5038_v57  ;;  %v3364_v36 = vld [vmem:[%s3474_s18] sm:$0xff] }
 0x335   : > { %v2249_v40 = vadd.f32 %v5525_v52, %v2210_v14  ;;  %v2406_v62 = vmul.f32 %v2374_v25, %v2278_v53  ;;  %v1976_v48 = vadd.f32 %v1944_v38, %v1769_v32  ;;  %v1913_v6 = vmul.f32 %v3361_v21, %v6365_v0 }
 0x336   : > { %v2172_v16 = vadd.f32 %v2142_v3, %v1975_v28  ;;  %v1770_v51 = vadd.f32 %v1740_v55, %v1705_v63  ;;  %v1876_v46 = vadd.f32 %v1844_v58, %v1807_v35  ;;  %v2279_v30 = vmul.f32 0.5, %v5712_v11  ;;  %v6368_v58 = vld [vmem:[#allocation5_spill] sm:$0xff]  ;;  %v6369_v55 = vld [vmem:[#allocation4_spill] sm:$0xff] }
 0x337   : > { %v2313_v33 = vmul.f32 0.70710677, %v2249_v40  ;;  %v3337_v37 = vpop.eup %3336  ;;  %3081 = vmatmul.mubr.f32.gmra.mrb[18].mxu1 %v2406_v62  ;;  %v2212_v1 = vmul.f32 %v5510_v42, %v1976_v48  ;;  %v2280_v41 = vmul.f32 0.5, %v2248_v47  ;;  %v2281_v59 = vmul.f32 0.5, %v2249_v40  ;;  %v3365_v62 = vld [vmem:[%s3474_s18 + $0x18] sm:$0xff]  ;;  %v3366_v48 = vld [vmem:[%s3474_s18 + $0x10] sm:$0xff] }
 0x338   : > { %v2211_v31 = vmul.f32 %v5510_v42, %v2172_v16  ;;  %v2375_v4 = vadd.f32 1.0, %v3337_v37  ;;  %v1945_v2 = vadd.f32 %v1913_v6, %v1876_v46  ;;  %v6370_v37 = vld [vmem:[#allocation7_spill] sm:$0xff] }
 0x339   : > { %3340 = verf.f32 %v2313_v33  ;;  %v2251_v5 = vadd.f32 %v5525_v52, %v2212_v1  ;;  %v6371_v1 = vld [vmem:[#allocation6_spill] sm:$0xff] }
 0x33a   : > { %v2250_v57 = vadd.f32 %v5525_v52, %v2211_v31  ;;  %v2407_v10 = vmul.f32 %v2375_v4, %v2279_v30  ;;  %v1977_v7 = vadd.f32 %v1945_v2, %v1770_v51  ;;  %v3367_v4 = vld [vmem:[%s3474_s18 + $0x28] sm:$0xff] }
 0x33b   : > { %v2315_v39 = vmul.f32 0.70710677, %v2251_v5  ;;  %v2283_v26 = vmul.f32 0.5, %v2251_v5 }
 0x33c   : > { %v2314_v9 = vmul.f32 0.70710677, %v2250_v57  ;;  %3083 = vmatprep.mubr.f32.mxu1 %v2407_v10  ;;  %v2213_v20 = vmul.f32 %v5510_v42, %v1977_v7  ;;  %v2282_v45 = vmul.f32 0.5, %v2250_v57  ;;  %v3368_v57 = vld [vmem:[%s3474_s18 + $0x20] sm:$0xff] }
 0x33d   : > { %v3339_v53 = vpop.eup %3338 }
 0x33e   : > { %3342 = verf.f32 %v2314_v9  ;;  %v2376_v24 = vadd.f32 1.0, %v3339_v53  ;;  %v2252_v11 = vadd.f32 %v5525_v52, %v2213_v20  ;;  %v6372_v20 = vld [vmem:[#allocation9_spill] sm:$0xff] }
 0x33f   : > { %3344 = verf.f32 %v2315_v39 }
 0x340   : > { %v2408_v12 = vmul.f32 %v2376_v24, %v2280_v41  ;;  %v2316_v18 = vmul.f32 0.70710677, %v2252_v11  ;;  %v2284_v15 = vmul.f32 0.5, %v2252_v11  ;;  %v6373_v41 = vld [vmem:[#allocation8_spill] sm:$0xff]  ;;  %v3369_v11 = vld [vmem:[%s3474_s18 + $0x38] sm:$0xff] }
 0x342   : > { %3084 = vmatmul.mubr.f32.gmra.mrb[20].mxu1 %v2408_v12  ;;  %3346 = verf.f32 %v2316_v18  ;;  %v3370_v18 = vld [vmem:[%s3474_s18 + $0x30] sm:$0xff] }
 0x343   : > { %v3341_v54 = vpop.eup %3340 }
 0x344   : > { %v2377_v56 = vadd.f32 1.0, %v3341_v54 }
 0x346   : > { %v2409_v13 = vmul.f32 %v2377_v56, %v2281_v59 }
 0x348   : > { %v3343_v17 = vpop.eup %3342  ;;  %3086 = vmatprep.mubr.f32.mxu1 %v2409_v13 }
 0x349   : > { %v3345_v21 = vpop.eup %3344  ;;  %v2378_v42 = vadd.f32 1.0, %v3343_v17 }
 0x34a   : > { %v2379_v23 = vadd.f32 1.0, %v3345_v21  ;;  %v6374_v21 = vld [vmem:[#allocation11_spill] sm:$0xff] }
 0x34b   : > { %v2410_v47 = vmul.f32 %v2378_v42, %v2282_v45  ;;  %v6375_v42 = vld [vmem:[#allocation10_spill] sm:$0xff] }
 0x34c   : > { %v2411_v60 = vmul.f32 %v2379_v23, %v2283_v26  ;;  %v3347_v52 = vpop.eup %3346  ;;  %v3371_v23 = vld [vmem:[%s3474_s18 + $0x48] sm:$0xff] }
 0x34d   : > { %3087 = vmatmul.mubr.f32.gmra.mrb[22].mxu1 %v2410_v47  ;;  %v2380_v49 = vadd.f32 1.0, %v3347_v52 }
 0x34e   : > { %3089 = vmatprep.mubr.f32.mxu1 %v2411_v60  ;;  %v3372_v60 = vld [vmem:[%s3474_s18 + $0x40] sm:$0xff] }
 0x34f   : > { %v2412_v61 = vmul.f32 %v2380_v49, %v2284_v15 }
 0x351   : > { %3090 = vmatmul.mubr.f32.gmra.mrb[24].mxu1 %v2412_v61 }
 0x367   : > { %v3046_v27 = vpop.f32.mrb[32].mxu0 }
 0x368   : > { %v2508_v50 = vadd.f32 %v3046_v27, %v5769_v43  ;;  %v2502_v34 = vpop.f32.mrb[33].mxu0 }
 0x369   : > { %v2503_v22 = vadd.f32 %v5769_v43, %v2502_v34 }
 0x36a   : > { %v2662_v14 = vadd.f32 %v2508_v50, %v6366_v44  ;;  %v6376_v50 = vld [vmem:[#allocation13_spill] sm:$0xff] }
 0x36b   : > { %v2661_v3 = vadd.f32 %v2503_v22, %v6367_v19  ;;  %v6377_v22 = vld [vmem:[#allocation12_spill] sm:$0xff] }
 0x36c   : > { %v2694_v38 = vadd.f32 %v3363_v8, %v2662_v14  ;;  %v3373_v14 = vld [vmem:[%s3474_s18 + $0x58] sm:$0xff] }
 0x36d   : > { %v2693_v63 = vadd.f32 %v3364_v36, %v2661_v3  ;;  %v3374_v3 = vld [vmem:[%s3474_s18 + $0x50] sm:$0xff] }
 0x36e   : > { %2726 = vst.msk [vmem:[%s5779_s25 + $0x8] sm:$0xff] %vm392_vm0, %v2694_v38 }
 0x36f   : > { %2725 = vst.msk [vmem:[%s5779_s25] sm:$0xff] %vm392_vm0, %v2693_v63 }
 0x37f   : > { %v3049_v25 = vpop.f32.mrb[34].mxu0 }
 0x380   : > { %v2518_v28 = vadd.f32 %v3049_v25, %v5769_v43  ;;  %v2512_v32 = vpop.f32.mrb[35].mxu0 }
 0x381   : > { %v2513_v29 = vadd.f32 %v5769_v43, %v2512_v32 }
 0x382   : > { %v2664_v40 = vadd.f32 %v2518_v28, %v6368_v58  ;;  %v6378_v28 = vld [vmem:[#allocation15_spill] sm:$0xff] }
 0x383   : > { %v2663_v35 = vadd.f32 %v2513_v29, %v6369_v55  ;;  %v6379_v29 = vld [vmem:[#allocation14_spill] sm:$0xff] }
 0x384   : > { %v2696_v16 = vadd.f32 %v3365_v62, %v2664_v40  ;;  %v3375_v40 = vld [vmem:[%s3474_s18 + $0x68] sm:$0xff] }
 0x385   : > { %v2695_v0 = vadd.f32 %v3366_v48, %v2663_v35  ;;  %v3376_v35 = vld [vmem:[%s3474_s18 + $0x60] sm:$0xff] }
 0x386   : > { %2728 = vst.msk [vmem:[%s5779_s25 + $0x18] sm:$0xff] %vm392_vm0, %v2696_v16 }
 0x387   : > { %2727 = vst.msk [vmem:[%s5779_s25 + $0x10] sm:$0xff] %vm392_vm0, %v2695_v0 }
 0x38d   : > { %v3052_v6 = vpop.f32.mrb[36].mxu0 }
 0x38e   : > { %v2528_v33 = vadd.f32 %v3052_v6, %v5769_v43  ;;  %v2522_v51 = vpop.f32.mrb[37].mxu0 }
 0x38f   : > { %v2523_v46 = vadd.f32 %v5769_v43, %v2522_v51 }
 0x390   : > { %v2666_v31 = vadd.f32 %v2528_v33, %v6370_v37  ;;  %v6380_v33 = vld [vmem:[#allocation17_spill] sm:$0xff] }
 0x391   : > { %v2665_v30 = vadd.f32 %v2523_v46, %v6371_v1  ;;  %v6381_v46 = vld [vmem:[#allocation16_spill] sm:$0xff] }
 0x392   : > { %v2698_v2 = vadd.f32 %v3367_v4, %v2666_v31  ;;  %v3377_v31 = vld [vmem:[%s3474_s18 + $0x78] sm:$0xff] }
 0x393   : > { %v2697_v5 = vadd.f32 %v3368_v57, %v2665_v30  ;;  %v3378_v30 = vld [vmem:[%s3474_s18 + $0x70] sm:$0xff] }
 0x394   : > { %2730 = vst.msk [vmem:[%s5779_s25 + $0x28] sm:$0xff] %vm392_vm0, %v2698_v2 }
 0x395   : > { %2729 = vst.msk [vmem:[%s5779_s25 + $0x20] sm:$0xff] %vm392_vm0, %v2697_v5 }
 0x39c   : > { %v3055_v10 = vpop.f32.mrb[0].mxu1 }
 0x39d   : > { %v2538_v7 = vadd.f32 %v3055_v10, %v5769_v43  ;;  %v2532_v9 = vpop.f32.mrb[1].mxu1 }
 0x39e   : > { %v2533_v39 = vadd.f32 %v5769_v43, %v2532_v9 }
 0x39f   : > { %v2668_v53 = vadd.f32 %v2538_v7, %v6372_v20  ;;  %v6382_v7 = vld [vmem:[#allocation19_spill] sm:$0xff] }
 0x3a0   : > { %v2667_v24 = vadd.f32 %v2533_v39, %v6373_v41  ;;  %v6383_v39 = vld [vmem:[#allocation18_spill] sm:$0xff] }
 0x3a1   : > { %v2700_v12 = vadd.f32 %v3369_v11, %v2668_v53  ;;  %v3379_v53 = vld [vmem:[%s3474_s18 + $0x88] sm:$0xff] }
 0x3a2   : > { %v2699_v54 = vadd.f32 %v3370_v18, %v2667_v24  ;;  %v3380_v24 = vld [vmem:[%s3474_s18 + $0x80] sm:$0xff] }
 0x3a3   : > { %2732 = vst.msk [vmem:[%s5779_s25 + $0x38] sm:$0xff] %vm392_vm0, %v2700_v12 }
 0x3a4   : > { %2731 = vst.msk [vmem:[%s5779_s25 + $0x30] sm:$0xff] %vm392_vm0, %v2699_v54 }
 0x3a7   : > { %v3058_v59 = vpop.f32.mrb[2].mxu1 }
 0x3a8   : > { %v2548_v56 = vadd.f32 %v3058_v59, %v5769_v43  ;;  %v2542_v13 = vpop.f32.mrb[3].mxu1 }
 0x3a9   : > { %v2543_v17 = vadd.f32 %v5769_v43, %v2542_v13 }
 0x3aa   : > { %v2670_v45 = vadd.f32 %v2548_v56, %v6374_v21  ;;  %v6384_v56 = vld [vmem:[#allocation21_spill] sm:$0xff] }
 0x3ab   : > { %v2669_v26 = vadd.f32 %v2543_v17, %v6375_v42  ;;  %v6385_v17 = vld [vmem:[#allocation20_spill] sm:$0xff] }
 0x3ac   : > { %v2702_v47 = vadd.f32 %v3371_v23, %v2670_v45  ;;  %v3381_v45 = vld [vmem:[%s3474_s18 + $0x98] sm:$0xff] }
 0x3ad   : > { %v2701_v52 = vadd.f32 %v3372_v60, %v2669_v26  ;;  %v3382_v26 = vld [vmem:[%s3474_s18 + $0x90] sm:$0xff] }
 0x3ae   : > { %2734 = vst.msk [vmem:[%s5779_s25 + $0x48] sm:$0xff] %vm392_vm0, %v2702_v47 }
 0x3af   : > { %2733 = vst.msk [vmem:[%s5779_s25 + $0x40] sm:$0xff] %vm392_vm0, %v2701_v52 }
 0x3b3   : > { %v3061_v15 = vpop.f32.mrb[4].mxu1 }
 0x3b4   : > { %v2558_v49 = vadd.f32 %v3061_v15, %v5769_v43  ;;  %v2552_v61 = vpop.f32.mrb[5].mxu1 }
 0x3b5   : > { %v2553_v27 = vadd.f32 %v5769_v43, %v2552_v61 }
 0x3b6   : > { %v2672_v34 = vadd.f32 %v2558_v49, %v6376_v50  ;;  %v6386_v49 = vld [vmem:[#allocation23_spill] sm:$0xff] }
 0x3b7   : > { %v2671_v44 = vadd.f32 %v2553_v27, %v6377_v22  ;;  %v6387_v27 = vld [vmem:[#allocation22_spill] sm:$0xff] }
 0x3b8   : > { %v2704_v19 = vadd.f32 %v3373_v14, %v2672_v34  ;;  %v3383_v34 = vld [vmem:[%s3474_s18 + $0xa8] sm:$0xff] }
 0x3b9   : > { %v2703_v8 = vadd.f32 %v3374_v3, %v2671_v44  ;;  %v3384_v44 = vld [vmem:[%s3474_s18 + $0xa0] sm:$0xff] }
 0x3ba   : > { %2736 = vst.msk [vmem:[%s5779_s25 + $0x58] sm:$0xff] %vm392_vm0, %v2704_v19 }
 0x3bb   : > { %2735 = vst.msk [vmem:[%s5779_s25 + $0x50] sm:$0xff] %vm392_vm0, %v2703_v8 }
 0x3c0   : > { %v3064_v38 = vpop.f32.mrb[6].mxu1 }
 0x3c1   : > { %v2568_v36 = vadd.f32 %v3064_v38, %v5769_v43  ;;  %v2562_v63 = vpop.f32.mrb[7].mxu1 }
 0x3c2   : > { %v2563_v25 = vadd.f32 %v5769_v43, %v2562_v63 }
 0x3c3   : > { %v2674_v32 = vadd.f32 %v2568_v36, %v6378_v28  ;;  %v6388_v36 = vld [vmem:[#allocation25_spill] sm:$0xff] }
 0x3c4   : > { %v2673_v58 = vadd.f32 %v2563_v25, %v6379_v29  ;;  %v6389_v25 = vld [vmem:[#allocation24_spill] sm:$0xff] }
 0x3c5   : > { %v2706_v55 = vadd.f32 %v3375_v40, %v2674_v32  ;;  %v3385_v32 = vld [vmem:[%s3474_s18 + $0xb8] sm:$0xff] }
 0x3c6   : > { %v2705_v62 = vadd.f32 %v3376_v35, %v2673_v58  ;;  %v3386_v58 = vld [vmem:[%s3474_s18 + $0xb0] sm:$0xff] }
 0x3c7   : > { %2738 = vst.msk [vmem:[%s5779_s25 + $0x68] sm:$0xff] %vm392_vm0, %v2706_v55 }
 0x3c8   : > { %2737 = vst.msk [vmem:[%s5779_s25 + $0x60] sm:$0xff] %vm392_vm0, %v2705_v62 }
 0x3cc   : > { %v3067_v16 = vpop.f32.mrb[8].mxu1 }
 0x3cd   : > { %v2578_v48 = vadd.f32 %v3067_v16, %v5769_v43  ;;  %v2572_v0 = vpop.f32.mrb[9].mxu1 }
 0x3ce   : > { %v2573_v6 = vadd.f32 %v5769_v43, %v2572_v0 }
 0x3cf   : > { %v2676_v51 = vadd.f32 %v2578_v48, %v6380_v33  ;;  %v6390_v48 = vld [vmem:[#allocation27_spill] sm:$0xff] }
 0x3d0   : > { %v2675_v37 = vadd.f32 %v2573_v6, %v6381_v46  ;;  %v6391_v6 = vld [vmem:[#allocation26_spill] sm:$0xff] }
 0x3d1   : > { %v2708_v1 = vadd.f32 %v3377_v31, %v2676_v51  ;;  %v3387_v51 = vld [vmem:[%s3474_s18 + $0xc8] sm:$0xff] }
 0x3d2   : > { %v2707_v4 = vadd.f32 %v3378_v30, %v2675_v37  ;;  %v3388_v37 = vld [vmem:[%s3474_s18 + $0xc0] sm:$0xff] }
 0x3d3   : > { %2740 = vst.msk [vmem:[%s5779_s25 + $0x78] sm:$0xff] %vm392_vm0, %v2708_v1 }
 0x3d4   : > { %2739 = vst.msk [vmem:[%s5779_s25 + $0x70] sm:$0xff] %vm392_vm0, %v2707_v4 }
 0x3d9   : > { %v3070_v2 = vpop.f32.mrb[10].mxu1 }
 0x3da   : > { %v2588_v57 = vadd.f32 %v3070_v2, %v5769_v43  ;;  %v2582_v5 = vpop.f32.mrb[11].mxu1 }
 0x3db   : > { %v2583_v10 = vadd.f32 %v5769_v43, %v2582_v5 }
 0x3dc   : > { %v2678_v9 = vadd.f32 %v2588_v57, %v6382_v7  ;;  %v6392_v57 = vld [vmem:[#allocation29_spill] sm:$0xff] }
 0x3dd   : > { %v2677_v20 = vadd.f32 %v2583_v10, %v6383_v39  ;;  %v6393_v10 = vld [vmem:[#allocation28_spill] sm:$0xff] }
 0x3de   : > { %v2710_v41 = vadd.f32 %v3379_v53, %v2678_v9  ;;  %v3389_v9 = vld [vmem:[%s3474_s18 + $0xd8] sm:$0xff] }
 0x3df   : > { %v2709_v11 = vadd.f32 %v3380_v24, %v2677_v20  ;;  %v3390_v20 = vld [vmem:[%s3474_s18 + $0xd0] sm:$0xff] }
 0x3e0   : > { %2742 = vst.msk [vmem:[%s5779_s25 + $0x88] sm:$0xff] %vm392_vm0, %v2710_v41 }
 0x3e1   : > { %2741 = vst.msk [vmem:[%s5779_s25 + $0x80] sm:$0xff] %vm392_vm0, %v2709_v11 }
 0x3e5   : > { %v3073_v12 = vpop.f32.mrb[12].mxu1 }
 0x3e6   : > { %v2598_v18 = vadd.f32 %v3073_v12, %v5769_v43  ;;  %v2592_v54 = vpop.f32.mrb[13].mxu1 }
 0x3e7   : > { %v2593_v59 = vadd.f32 %v5769_v43, %v2592_v54 }
 0x3e8   : > { %v2680_v13 = vadd.f32 %v2598_v18, %v6384_v56  ;;  %v6394_v18 = vld [vmem:[#allocation31_spill] sm:$0xff] }
 0x3e9   : > { %v2679_v21 = vadd.f32 %v2593_v59, %v6385_v17  ;;  %v6395_v59 = vld [vmem:[#allocation30_spill] sm:$0xff] }
 0x3ea   : > { %v2712_v42 = vadd.f32 %v3381_v45, %v2680_v13  ;;  %v3391_v13 = vld [vmem:[%s3474_s18 + $0xe8] sm:$0xff]  ;;  %v3392_v45 = vld [vmem:[%s3474_s18 + $0xe0] sm:$0xff] }
 0x3eb   : > { %v2711_v23 = vadd.f32 %v3382_v26, %v2679_v21 }
 0x3ec   : > { %2744 = vst.msk [vmem:[%s5779_s25 + $0x98] sm:$0xff] %vm392_vm0, %v2712_v42 }
 0x3ed   : > { %2743 = vst.msk [vmem:[%s5779_s25 + $0x90] sm:$0xff] %vm392_vm0, %v2711_v23 }
 0x3f2   : > { %v3076_v47 = vpop.f32.mrb[14].mxu1 }
 0x3f3   : > { %v2608_v60 = vadd.f32 %v3076_v47, %v5769_v43  ;;  %v2602_v52 = vpop.f32.mrb[15].mxu1 }
 0x3f4   : > { %v2603_v15 = vadd.f32 %v5769_v43, %v2602_v52 }
 0x3f5   : > { %v2682_v61 = vadd.f32 %v2608_v60, %v6386_v49  ;;  %v6396_v60 = vld [vmem:[#allocation33_spill] sm:$0xff] }
 0x3f6   : > { %v2681_v50 = vadd.f32 %v2603_v15, %v6387_v27  ;;  %v6397_v15 = vld [vmem:[#allocation32_spill] sm:$0xff] }
 0x3f7   : > { %v2714_v22 = vadd.f32 %v3383_v34, %v2682_v61  ;;  %v3393_v61 = vld [vmem:[%s3474_s18 + $0xf8] sm:$0xff] }
 0x3f8   : > { %v2713_v14 = vadd.f32 %v3384_v44, %v2681_v50  ;;  %v3394_v50 = vld [vmem:[%s3474_s18 + $0xf0] sm:$0xff] }
 0x3f9   : > { %2746 = vst.msk [vmem:[%s5779_s25 + $0xa8] sm:$0xff] %vm392_vm0, %v2714_v22 }
 0x3fa   : > { %2745 = vst.msk [vmem:[%s5779_s25 + $0xa0] sm:$0xff] %vm392_vm0, %v2713_v14 }
 0x3fe   : > { %v3079_v19 = vpop.f32.mrb[16].mxu1 }
 0x3ff   : > { %v2618_v3 = vadd.f32 %v3079_v19, %v5769_v43  ;;  %v2612_v8 = vpop.f32.mrb[17].mxu1 }
 0x400   : > { %v2613_v38 = vadd.f32 %v5769_v43, %v2612_v8 }
 0x401   : > { %v2684_v63 = vadd.f32 %v2618_v3, %v6388_v36 }
 0x402   : > { %v2683_v28 = vadd.f32 %v2613_v38, %v6389_v25 }
 0x403   : > { %v2716_v29 = vadd.f32 %v3385_v32, %v2684_v63 }
 0x404   : > { %v2715_v40 = vadd.f32 %v3386_v58, %v2683_v28 }
 0x405   : > { %2748 = vst.msk [vmem:[%s5779_s25 + $0xb8] sm:$0xff] %vm392_vm0, %v2716_v29 }
 0x406   : > { %2747 = vst.msk [vmem:[%s5779_s25 + $0xb0] sm:$0xff] %vm392_vm0, %v2715_v40 }
 0x40a   : > { %v3082_v55 = vpop.f32.mrb[18].mxu1 }
 0x40b   : > { %v2628_v35 = vadd.f32 %v3082_v55, %v5769_v43  ;;  %v2622_v62 = vpop.f32.mrb[19].mxu1 }
 0x40c   : > { %v2623_v16 = vadd.f32 %v5769_v43, %v2622_v62 }
 0x40d   : > { %v2686_v0 = vadd.f32 %v2628_v35, %v6390_v48 }
 0x40e   : > { %v2685_v33 = vadd.f32 %v2623_v16, %v6391_v6 }
 0x40f   : > { %v2718_v46 = vadd.f32 %v3387_v51, %v2686_v0 }
 0x410   : > { %v2717_v31 = vadd.f32 %v3388_v37, %v2685_v33 }
 0x411   : > { %2750 = vst.msk [vmem:[%s5779_s25 + $0xc8] sm:$0xff] %vm392_vm0, %v2718_v46 }
 0x412   : > { %2749 = vst.msk [vmem:[%s5779_s25 + $0xc0] sm:$0xff] %vm392_vm0, %v2717_v31 }
 0x415   : > { %v3085_v1 = vpop.f32.mrb[20].mxu1 }
 0x416   : > { %v2638_v30 = vadd.f32 %v3085_v1, %v5769_v43  ;;  %v2632_v4 = vpop.f32.mrb[21].mxu1 }
 0x417   : > { %v2633_v2 = vadd.f32 %v5769_v43, %v2632_v4 }
 0x418   : > { %v2688_v5 = vadd.f32 %v2638_v30, %v6392_v57 }
 0x419   : > { %v2687_v7 = vadd.f32 %v2633_v2, %v6393_v10 }
 0x41a   : > { %v2720_v39 = vadd.f32 %v3389_v9, %v2688_v5 }
 0x41b   : > { %v2719_v53 = vadd.f32 %v3390_v20, %v2687_v7 }
 0x41c   : > { %2752 = vst.msk [vmem:[%s5779_s25 + $0xd8] sm:$0xff] %vm392_vm0, %v2720_v39 }
 0x41d   : > { %2751 = vst.msk [vmem:[%s5779_s25 + $0xd0] sm:$0xff] %vm392_vm0, %v2719_v53 }
 0x420   : > { %v3088_v41 = vpop.f32.mrb[22].mxu1 }
 0x421   : > { %v2648_v24 = vadd.f32 %v3088_v41, %v5769_v43  ;;  %v2642_v11 = vpop.f32.mrb[23].mxu1 }
 0x422   : > { %v2643_v12 = vadd.f32 %v5769_v43, %v2642_v11 }
 0x423   : > { %v2690_v54 = vadd.f32 %v2648_v24, %v6394_v18 }
 0x424   : > { %v2689_v56 = vadd.f32 %v2643_v12, %v6395_v59  ;;  %v3091_v21 = vpop.f32.mrb[24].mxu1 }
 0x425   : > { %v2722_v17 = vadd.f32 %v3391_v13, %v2690_v54  ;;  %v2658_v26 = vadd.f32 %v3091_v21, %v5769_v43  ;;  %v2652_v23 = vpop.f32.mrb[25].mxu1 }
 0x426   : > { %v2721_v42 = vadd.f32 %v3392_v45, %v2689_v56  ;;  %v2653_v47 = vadd.f32 %v5769_v43, %v2652_v23 }
 0x427   : > { %2754 = vst.msk [vmem:[%s5779_s25 + $0xe8] sm:$0xff] %vm392_vm0, %v2722_v17  ;;  %v2692_v52 = vadd.f32 %v2658_v26, %v6396_v60 }
 0x428   : > { %2753 = vst.msk [vmem:[%s5779_s25 + $0xe0] sm:$0xff] %vm392_vm0, %v2721_v42  ;;  %v2691_v49 = vadd.f32 %v2653_v47, %v6397_v15 }
 0x429   : > { %v2724_v27 = vadd.f32 %v3393_v61, %v2692_v52 }
 0x42a   : > { %v2723_v34 = vadd.f32 %v3394_v50, %v2691_v49 }
 0x42b   : > { %2756 = vst.msk [vmem:[%s5779_s25 + $0xf8] sm:$0xff] %vm392_vm0, %v2724_v27 }
 0x42c   : > { %2755 = vst.msk [vmem:[%s5779_s25 + $0xf0] sm:$0xff] %vm392_vm0, %v2723_v34 }
 0x42d PF: > { %s20_s13 = sadd.s32 1, %s3401_s13  }
 0x42e   : > { %p17_p4 = scmp.ge.s32.totalorder %s20_s13, 4  }
 0x430   :  { %19 = sbr.rel (!%p17_p4) target bundleno = 1 (0x1), region = 90 }

// kernel: basic_block_forward.2
= control target key start
LH: loop header
LB: loop body
LE: loop exit
PB: predicated region body
PF: predicated region fallthrough
CT: control target
= control target key end

     0   :  { %s7025_s24 = smov 0   ;;  %s7027_s25 = smov 0   ;;  %s9437_s0 = inlined_call_operand.vmem [shape: f32[2,16,16,32], index: 0, kind: input, shape index: {}]   ;;  %s9438_s1 = inlined_call_operand.vmem [shape: f32[1,32], index: 1, kind: input, shape index: {}]   ;;  %s9439_s2 = inlined_call_operand.vmem [shape: f32[1,32], index: 2, kind: input, shape index: {}]   ;;  %s9440_s3 = inlined_call_operand.vmem [shape: f32[32,96], index: 3, kind: input, shape index: {}]   ;;  %s9441_s4 = inlined_call_operand.vmem [shape: f32[1,96], index: 4, kind: input, shape index: {}]   ;;  %s9442_s5 = inlined_call_operand.vmem [shape: f32[4,64,64], index: 5, kind: input, shape index: {}]   ;;  %s9443_s6 = inlined_call_operand.vmem [shape: f32[32,32], index: 6, kind: input, shape index: {}]   ;;  %s9444_s7 = inlined_call_operand.vmem [shape: f32[2,16,16,32], index: 7, kind: output, shape index: {}]  }
   0x1   :  { %s7029_s26 = smov 0   ;;  %s7031_s27 = smov 0  }
   0x2   :  { %s7033_s28 = smov 0   ;;  %s7035_s29 = smov 0  }
   0x3   :  { %s7037_s30 = smov 0  }
   0x4 LB: > { %s29_s8 = sadd.s32 1, %s6961_s28  ;;  %s36_s9 = sadd.s32 1, %s6965_s29  ;;  %s6969_s30 = sphi %s7037_s30, %s17_s30   ;;  %s6965_s29 = sphi %s7035_s29, %s9619_s29   ;;  %s6961_s28 = sphi %s7033_s28, %s9618_s28   ;;  %s6957_s27 = sphi %s7031_s27, %s9617_s27   ;;  %s6953_s26 = sphi %s7029_s26, %s9616_s26   ;;  %s6949_s25 = sphi %s7027_s25, %s9615_s25   ;;  %s6945_s24 = sphi %s7025_s24, %s9614_s24  }
   0x5   : > { %p30_p0 = scmp.ge.s32.totalorder %s29_s8, 2  ;;  %s4831_s10 = sadd.s32 4294967295, %s6969_s30  }
   0x6   : > { %p54_p1 = scmp.ne.s32.totalorder %s6949_s25, %s6945_s24  ;;  %p55_p2 = scmp.eq.s32.totalorder %s6969_s30, 0 }
   0x7   : > { %s9621_s8 = smov (%p30_p0, %s29_s8), 0  ;;  %s9623_s9 = smov (!%p30_p0, %s36_s9), %s6965_s29 }
   0x8   : > { %p38_p3 = scmp.ge.s32.totalorder %s9623_s9, 2  ;;  %p214_p4 = scmp.eq.s32.totalorder %s4831_s10, 3 }
   0x9   : > { %s43_s11 = ssub.s32 %s6961_s28, %s9621_s8  ;;  %p56_p5 = por %p55_p2, %p54_p1 }
   0xa   : > { %s9625_s9 = smov (%p38_p3, %s9623_s9), 0  ;;  %p7073_p6 = por %p214_p4, %p54_p1 }
   0xb   : > { %s40_s13 = ssub.s32 %s6965_s29, %s9625_s9  ;;  %s47_s15 = sadd.s32 1, %s6949_s25 }
   0xc   : > { %s44_s14 = sor.u32 %s43_s11, %s40_s13  ;;  %p4834_p8 = scmp.ge.s32.totalorder %s6969_s30, 4 }
   0xd   : > { %p45_p7 = scmp.eq.s32.totalorder %s44_s14, 0 }
   0xe   : > { %254 = sbr.rel (%p4834_p8) target bundleno = 35 (0x23), region = 40 }
   0xf   : > { %s7081_s16 = scalar_select %p45_p7, %s6949_s25, %s47_s15  }
  0x15   : > { %257 = sbr.rel (!%p56_p5) target bundleno = 35 (0x23), region = 44  ;;  %s259_s17 = sand.u32 (%p56_p5), 1, %s6949_s25  }
  0x16   : > { %s4836_s18 = sshll.u32 (%p56_p5), %s6965_s29, 5  ;;  %s4835_s19 = sshll.u32 (%p56_p5), %s259_s17, 7 }
  0x17   : > { %s266_s20 = sadd.s32 (%p56_p5), %s6961_s28, %s4836_s18  ;;  %s261_s11 = scalar_lea.vmem (%p56_p5), [#allocation2], %s4835_s19 }
  0x18   : > { %s4837_s21 = sshll.u32 (%p56_p5), %s266_s20, 3 }
  0x19   : > { %s7090_s10 = scalar_lea.vmem (%p56_p5), %s9437_s0, %s4837_s21 }
  0x1a   : > { %v326_v0 = vld [vmem:[%s7090_s10] sm:$0xff] (%p56_p5)  ;;  %v328_v1 = vld [vmem:[%s7090_s10 + $0x10] sm:$0xff] (%p56_p5) }
  0x1b   : > { %v330_v2 = vld [vmem:[%s7090_s10 + $0x20] sm:$0xff] (%p56_p5)  ;;  %327 = vst [vmem:[%s261_s11] sm:$0xff] (%p56_p5), %v326_v0  ;;  %329 = vst [vmem:[%s261_s11 + $0x8] sm:$0xff] (%p56_p5), %v328_v1  ;;  %v332_v3 = vld [vmem:[%s7090_s10 + $0x30] sm:$0xff] (%p56_p5) }
  0x1c   : > { %331 = vst [vmem:[%s261_s11 + $0x10] sm:$0xff] %v330_v2  ;;  %v334_v4 = vld [vmem:[%s7090_s10 + $0x40] sm:$0xff]  ;;  %v336_v5 = vld [vmem:[%s7090_s10 + $0x50] sm:$0xff]  ;;  %333 = vst [vmem:[%s261_s11 + $0x18] sm:$0xff] %v332_v3 }
  0x1d   : > { %335 = vst [vmem:[%s261_s11 + $0x20] sm:$0xff] %v334_v4  ;;  %337 = vst [vmem:[%s261_s11 + $0x28] sm:$0xff] %v336_v5  ;;  %v338_v6 = vld [vmem:[%s7090_s10 + $0x60] sm:$0xff]  ;;  %v340_v7 = vld [vmem:[%s7090_s10 + $0x70] sm:$0xff] }
  0x1e   : > { %v342_v8 = vld [vmem:[%s7090_s10 + $0x80] sm:$0xff]  ;;  %339 = vst [vmem:[%s261_s11 + $0x30] sm:$0xff] %v338_v6  ;;  %341 = vst [vmem:[%s261_s11 + $0x38] sm:$0xff] %v340_v7  ;;  %v344_v9 = vld [vmem:[%s7090_s10 + $0x90] sm:$0xff] }
  0x1f   : > { %343 = vst [vmem:[%s261_s11 + $0x40] sm:$0xff] %v342_v8  ;;  %v346_v10 = vld [vmem:[%s7090_s10 + $0xa0] sm:$0xff]  ;;  %v348_v11 = vld [vmem:[%s7090_s10 + $0xb0] sm:$0xff]  ;;  %345 = vst [vmem:[%s261_s11 + $0x48] sm:$0xff] %v344_v9 }
  0x20   : > { %347 = vst [vmem:[%s261_s11 + $0x50] sm:$0xff] %v346_v10  ;;  %349 = vst [vmem:[%s261_s11 + $0x58] sm:$0xff] %v348_v11  ;;  %v350_v12 = vld [vmem:[%s7090_s10 + $0xc0] sm:$0xff]  ;;  %v352_v13 = vld [vmem:[%s7090_s10 + $0xd0] sm:$0xff] }
  0x21   : > { %v354_v14 = vld [vmem:[%s7090_s10 + $0xe0] sm:$0xff]  ;;  %351 = vst [vmem:[%s261_s11 + $0x60] sm:$0xff] %v350_v12  ;;  %353 = vst [vmem:[%s261_s11 + $0x68] sm:$0xff] %v352_v13  ;;  %v356_v15 = vld [vmem:[%s7090_s10 + $0xf0] sm:$0xff] }
  0x22   : > { %355 = vst [vmem:[%s261_s11 + $0x70] sm:$0xff] %v354_v14  ;;  %357 = vst [vmem:[%s261_s11 + $0x78] sm:$0xff] %v356_v15 }
  0x23 PF: > { %p4838_p9 = scmp.ge.s32.totalorder %s6969_s30, 1  ;;  %p362_p10 = scmp.lt.s32.totalorder %s6969_s30, 5 }
  0x25   : > { %p363_p11 = pnand %p4838_p9, %p362_p10 }
  0x27   : > { %366 = sbr.rel (%p363_p11) target bundleno = 2091 (0x82b), region = 82 }
  0x2e   : > { %s369_s13 = sand.u32 1, %s6945_s24   ;;  %vm417_vm0 = vcmask 261120   ;;  %vm933_vm1 = vcmask 64512   ;;  %s6971_s19 = smov 120   ;;  %vm2246_vm3 = vcmask 523264   ;;  %vm4383_vm4 = vcmask 130048  }
  0x2f   : > { %s7111_s14 = sshll.u32 %s369_s13, 7  ;;  %s6972_s20 = smov 96   ;;  %vm7569_vm2 = vmpackc.low %vm933_vm1, %vm933_vm1  ;;  %vm4400_vm5 = vcmask 195584  }
  0x30   : > { %s7114_s15 = scalar_lea.vmem [#allocation2], %s7111_s14  ;;  %s6973_s21 = smov 112  }
  0x31   : > { %v401_v16 = vld [vmem:[%s7114_s15] sm:$0xff]  ;;  %v403_v17 = vld [vmem:[%s7114_s15 + $0x10] sm:$0xff]  ;;  %v402_v18 = vld [vmem:[%s7114_s15 + $0x8] sm:$0xff]  ;;  %s6974_s22 = smov 88   ;;  %s6975_s23 = smov 80  }
  0x32   : > { %v418_v19 = vsel %vm417_vm0, %v401_v16, 0.0  ;;  %v424_v20 = vsel %vm417_vm0, %v403_v17, 0.0  ;;  %v404_v21 = vld [vmem:[%s7114_s15 + $0x18] sm:$0xff]  ;;  %v421_v22 = vsel %vm417_vm0, %v402_v18, 0.0  ;;  %v405_v24 = vld [vmem:[%s7114_s15 + $0x20] sm:$0xff]  ;;  %v406_v25 = vld [vmem:[%s7114_s15 + $0x28] sm:$0xff] }
  0x33   : > { %419 = vadd.xlane.f32.xlu0 %v418_v19  ;;  %425 = vadd.xlane.f32.xlu1 %v424_v20  ;;  %v427_v23 = vsel %vm417_vm0, %v404_v21, 0.0  ;;  %v430_v26 = vsel %vm417_vm0, %v405_v24, 0.0  ;;  %v433_v27 = vsel %vm417_vm0, %v406_v25, 0.0  ;;  %v7129_v28 = vld [vmem:[%s7114_s15 + $0x30] sm:$0xff]  ;;  %v7132_v29 = vld [vmem:[%s7114_s15 + $0x38] sm:$0xff]  ;;  %v7139_v32 = vld [vmem:[%s7114_s15 + $0x40] sm:$0xff] }
  0x34   : > { %v436_v30 = vsel %vm417_vm0, %v7129_v28, 0.0  ;;  %v439_v31 = vsel %vm417_vm0, %v7132_v29, 0.0  ;;  %v7142_v33 = vld [vmem:[%s7114_s15 + $0x48] sm:$0xff]  ;;  %v442_v34 = vsel %vm417_vm0, %v7139_v32, 0.0  ;;  %v7149_v36 = vld [vmem:[%s7114_s15 + $0x50] sm:$0xff]  ;;  %v7152_v37 = vld [vmem:[%s7114_s15 + $0x58] sm:$0xff] }
  0x35   : > { %v445_v35 = vsel %vm417_vm0, %v7142_v33, 0.0  ;;  %v448_v38 = vsel %vm417_vm0, %v7149_v36, 0.0  ;;  %v451_v39 = vsel %vm417_vm0, %v7152_v37, 0.0  ;;  %v7159_v40 = vld [vmem:[%s7114_s15 + $0x60] sm:$0xff]  ;;  %v7162_v41 = vld [vmem:[%s7114_s15 + $0x68] sm:$0xff]  ;;  %v7169_v44 = vld [vmem:[%s7114_s15 + $0x70] sm:$0xff] }
  0x36   : > { %v454_v42 = vsel %vm417_vm0, %v7159_v40, 0.0  ;;  %v457_v43 = vsel %vm417_vm0, %v7162_v41, 0.0  ;;  %v7172_v45 = vld [vmem:[%s7114_s15 + $0x78] sm:$0xff]  ;;  %v460_v46 = vsel %vm417_vm0, %v7169_v44, 0.0  ;;  %s6976_s10 = smov 72   ;;  %s6977_s11 = smov 104  }
  0x37   : > { %422 = vadd.xlane.f32.xlu0 %v421_v22  ;;  %428 = vadd.xlane.f32.xlu1 %v427_v23  ;;  %v463_v47 = vsel %vm417_vm0, %v7172_v45, 0.0  ;;  %s6978_s13 = smov 64   ;;  %s6979_s24 = smov 56  }
  0x38   : > { %s6980_s17 = smov 48   ;;  %s6981_s18 = smov 40  }
  0x3b   : > { %431 = vadd.xlane.f32.xlu0 %v430_v26  ;;  %434 = vadd.xlane.f32.xlu1 %v433_v27 }
  0x3f   : > { %437 = vadd.xlane.f32.xlu0 %v436_v30  ;;  %440 = vadd.xlane.f32.xlu1 %v439_v31 }
  0x43   : > { %443 = vadd.xlane.f32.xlu0 %v442_v34  ;;  %446 = vadd.xlane.f32.xlu1 %v445_v35 }
  0x47   : > { %449 = vadd.xlane.f32.xlu0 %v448_v38  ;;  %452 = vadd.xlane.f32.xlu1 %v451_v39 }
  0x4b   : > { %455 = vadd.xlane.f32.xlu0 %v454_v42  ;;  %458 = vadd.xlane.f32.xlu1 %v457_v43 }
  0x4f   : > { %461 = vadd.xlane.f32.xlu0 %v460_v46  ;;  %464 = vadd.xlane.f32.xlu1 %v463_v47 }
  0xc0   : > { %v420_v48 = vpop.xlane.xlu0 %419  ;;  %v426_v49 = vpop.xlane.xlu1 %425 }
  0xc1   : > { %v467_v50 = vmul.f32 0.03125, %v420_v48  ;;  %v469_v51 = vmul.f32 0.03125, %v426_v49 }
  0xc3   : > { %v7178_v52 = vsub.f32 %v401_v16, %v467_v50  ;;  %v7180_v53 = vsub.f32 %v403_v17, %v469_v51 }
  0xc4   : > { %v423_v54 = vpop.xlane.xlu0 %422  ;;  %v429_v55 = vpop.xlane.xlu1 %428 }
  0xc5   : > { %v468_v56 = vmul.f32 0.03125, %v423_v54  ;;  %v470_v57 = vmul.f32 0.03125, %v429_v55  ;;  %v499_v58 = vmul.f32 %v7178_v52, %v7178_v52  ;;  %v501_v59 = vmul.f32 %v7180_v53, %v7180_v53 }
  0xc7   : > { %v7186_v60 = vsub.f32 %v402_v18, %v468_v56  ;;  %v7188_v61 = vsub.f32 %v404_v21, %v470_v57  ;;  %v515_v62 = vsel %vm417_vm0, %v499_v58, 0.0  ;;  %v521_v1 = vsel %vm417_vm0, %v501_v59, 0.0 }
  0xc8   : > { %516 = vadd.xlane.f32.xlu0 %v515_v62  ;;  %v432_v63 = vpop.xlane.xlu0 %431  ;;  %v435_v0 = vpop.xlane.xlu1 %434 }
  0xc9   : > { %v471_v2 = vmul.f32 0.03125, %v432_v63  ;;  %v472_v3 = vmul.f32 0.03125, %v435_v0  ;;  %v500_v4 = vmul.f32 %v7186_v60, %v7186_v60  ;;  %v502_v5 = vmul.f32 %v7188_v61, %v7188_v61 }
  0xcb   : > { %v7196_v6 = vsub.f32 %v405_v24, %v471_v2  ;;  %v7198_v7 = vsub.f32 %v406_v25, %v472_v3  ;;  %v518_v8 = vsel %vm417_vm0, %v500_v4, 0.0  ;;  %v524_v11 = vsel %vm417_vm0, %v502_v5, 0.0  ;;  %v674_v5 = vld [vmem:[%s9440_s3 + $0x8] sm:$0xff] }
  0xcc   : > { %522 = vadd.xlane.f32.xlu0 %v521_v1  ;;  %519 = vadd.xlane.f32.xlu1 %v518_v8  ;;  %v438_v9 = vpop.xlane.xlu0 %437  ;;  %v441_v10 = vpop.xlane.xlu1 %440 }
  0xcd   : > { %v473_v12 = vmul.f32 0.03125, %v438_v9  ;;  %v474_v13 = vmul.f32 0.03125, %v441_v10  ;;  %v503_v14 = vmul.f32 %v7196_v6, %v7196_v6  ;;  %v504_v15 = vmul.f32 %v7198_v7, %v7198_v7  ;;  %v675_v9 = vld [vmem:[%s9440_s3 + $0x10] sm:$0xff]  ;;  %v676_v10 = vld [vmem:[%s9440_s3 + $0x18] sm:$0xff] }
  0xcf   : > { %v7207_v16 = vsub.f32 %v7129_v28, %v473_v12  ;;  %v7210_v17 = vsub.f32 %v7132_v29, %v474_v13  ;;  %v527_v18 = vsel %vm417_vm0, %v503_v14, 0.0  ;;  %v530_v21 = vsel %vm417_vm0, %v504_v15, 0.0 }
  0xd0   : > { %525 = vadd.xlane.f32.xlu1 %v524_v11  ;;  %528 = vadd.xlane.f32.xlu0 %v527_v18  ;;  %v444_v19 = vpop.xlane.xlu0 %443  ;;  %v447_v20 = vpop.xlane.xlu1 %446  ;;  %v5885_v11 = vpack.c.bf16 %v676_v10, %v675_v9 }
  0xd1   : > { %v475_v22 = vmul.f32 0.03125, %v444_v19  ;;  %v476_v23 = vmul.f32 0.03125, %v447_v20  ;;  %v505_v24 = vmul.f32 %v7207_v16, %v7207_v16  ;;  %v506_v25 = vmul.f32 %v7210_v17, %v7210_v17 }
  0xd3   : > { %v7219_v26 = vsub.f32 %v7139_v32, %v475_v22  ;;  %v7222_v27 = vsub.f32 %v7142_v33, %v476_v23  ;;  %v533_v28 = vsel %vm417_vm0, %v505_v24, 0.0  ;;  %v536_v31 = vsel %vm417_vm0, %v506_v25, 0.0 }
  0xd4   : > { %531 = vadd.xlane.f32.xlu1 %v530_v21  ;;  %534 = vadd.xlane.f32.xlu0 %v533_v28  ;;  %v450_v29 = vpop.xlane.xlu0 %449  ;;  %v453_v30 = vpop.xlane.xlu1 %452 }
  0xd5   : > { %v477_v34 = vmul.f32 0.03125, %v450_v29  ;;  %v478_v35 = vmul.f32 0.03125, %v453_v30  ;;  %v507_v38 = vmul.f32 %v7219_v26, %v7219_v26  ;;  %v508_v32 = vmul.f32 %v7222_v27, %v7222_v27 }
  0xd7   : > { %v7231_v39 = vsub.f32 %v7149_v36, %v477_v34  ;;  %v7234_v33 = vsub.f32 %v7152_v37, %v478_v35  ;;  %v539_v42 = vsel %vm417_vm0, %v507_v38, 0.0  ;;  %v542_v47 = vsel %vm417_vm0, %v508_v32, 0.0 }
  0xd8   : > { %537 = vadd.xlane.f32.xlu1 %v536_v31  ;;  %540 = vadd.xlane.f32.xlu0 %v539_v42  ;;  %v456_v43 = vpop.xlane.xlu0 %455  ;;  %v459_v46 = vpop.xlane.xlu1 %458 }
  0xd9   : > { %v479_v48 = vmul.f32 0.03125, %v456_v43  ;;  %v480_v49 = vmul.f32 0.03125, %v459_v46  ;;  %v509_v50 = vmul.f32 %v7231_v39, %v7231_v39  ;;  %v510_v36 = vmul.f32 %v7234_v33, %v7234_v33  ;;  %v7283_v46 = vld [vmem:[%s9438_s1] ss:$0 sm:$0xff] }
  0xdb   : > { %v7243_v51 = vsub.f32 %v7159_v40, %v479_v48  ;;  %v7246_v37 = vsub.f32 %v7162_v41, %v480_v49  ;;  %v545_v54 = vsel %vm417_vm0, %v509_v50, 0.0  ;;  %v548_v57 = vsel %vm417_vm0, %v510_v36, 0.0 }
  0xdc   : > { %543 = vadd.xlane.f32.xlu1 %v542_v47  ;;  %546 = vadd.xlane.f32.xlu0 %v545_v54  ;;  %v462_v55 = vpop.xlane.xlu0 %461  ;;  %v465_v56 = vpop.xlane.xlu1 %464  ;;  %v7289_v54 = vld [vmem:[%s9439_s2] ss:$0 sm:$0xff] }
  0xdd   : > { %v481_v58 = vmul.f32 0.03125, %v462_v55  ;;  %v482_v59 = vmul.f32 0.03125, %v465_v56  ;;  %v511_v62 = vmul.f32 %v7243_v51, %v7243_v51  ;;  %v512_v40 = vmul.f32 %v7246_v37, %v7246_v37 }
  0xdf   : > { %v7255_v63 = vsub.f32 %v7169_v44, %v481_v58  ;;  %v7258_v41 = vsub.f32 %v7172_v45, %v482_v59  ;;  %v551_v0 = vsel %vm417_vm0, %v511_v62, 0.0  ;;  %v554_v1 = vsel %vm417_vm0, %v512_v40, 0.0  ;;  %v673_v45 = vld [vmem:[%s9440_s3] sm:$0xff] }
  0xe0   : > { %549 = vadd.xlane.f32.xlu1 %v548_v57  ;;  %552 = vadd.xlane.f32.xlu0 %v551_v0  ;;  %v5881_v8 = vpack.c.bf16 %v674_v5, %v673_v45 }
  0xe1   : > { %v513_v2 = vmul.f32 %v7255_v63, %v7255_v63  ;;  %v514_v3 = vmul.f32 %v7258_v41, %v7258_v41 }
  0xe2   : > { %5882 = vmatprep.subr.bf16.mxu0 %v5881_v8 }
  0xe3   : > { %v557_v4 = vsel %vm417_vm0, %v513_v2, 0.0  ;;  %v560_v44 = vsel %vm417_vm0, %v514_v3, 0.0  ;;  %5884 = vmatpush3.bf16.msra.mxu0 %v5881_v8 }
  0xe4   : > { %555 = vadd.xlane.f32.xlu1 %v554_v1  ;;  %558 = vadd.xlane.f32.xlu0 %v557_v4 }
  0xe5   : > { %5886 = vmatprep.subr.bf16.mxu0 %v5885_v11 }
  0xe7   : > { %5888 = vmatpush3.bf16.msra.mxu0 %v5885_v11 }
  0xe8   : > { %561 = vadd.xlane.f32.xlu1 %v560_v44 }
 0x155   : > { %v517_v12 = vpop.xlane.xlu0 %516 }
 0x156   : > { %v563_v13 = vmul.f32 0.03125, %v517_v12 }
 0x158   : > { %v579_v14 = vadd.f32 1e-05, %v563_v13 }
 0x159   : > { %v520_v15 = vpop.xlane.xlu1 %519  ;;  %v523_v18 = vpop.xlane.xlu0 %522 }
 0x15a   : > { %6611 = vrsqrt.f32 %v579_v14  ;;  %v564_v19 = vmul.f32 0.03125, %v520_v15  ;;  %v565_v20 = vmul.f32 0.03125, %v523_v18 }
 0x15c   : > { %v580_v21 = vadd.f32 1e-05, %v564_v19  ;;  %v581_v22 = vadd.f32 1e-05, %v565_v20 }
 0x15d   : > { %v526_v23 = vpop.xlane.xlu1 %525  ;;  %v529_v24 = vpop.xlane.xlu0 %528 }
 0x15e   : > { %6613 = vrsqrt.f32 %v580_v21  ;;  %v566_v25 = vmul.f32 0.03125, %v526_v23  ;;  %v567_v28 = vmul.f32 0.03125, %v529_v24 }
 0x15f   : > { %6615 = vrsqrt.f32 %v581_v22 }
 0x160   : > { %v582_v29 = vadd.f32 1e-05, %v566_v25  ;;  %v583_v30 = vadd.f32 1e-05, %v567_v28 }
 0x161   : > { %v532_v31 = vpop.xlane.xlu1 %531  ;;  %v535_v34 = vpop.xlane.xlu0 %534 }
 0x162   : > { %6617 = vrsqrt.f32 %v582_v29  ;;  %v568_v35 = vmul.f32 0.03125, %v532_v31  ;;  %v569_v38 = vmul.f32 0.03125, %v535_v34 }
 0x163   : > { %6619 = vrsqrt.f32 %v583_v30 }
 0x164   : > { %v6612_v32 = vpop.eup %6611  ;;  %v584_v42 = vadd.f32 1e-05, %v568_v35  ;;  %v585_v43 = vadd.f32 1e-05, %v569_v38 }
 0x165   : > { %v538_v47 = vpop.xlane.xlu1 %537  ;;  %v541_v48 = vpop.xlane.xlu0 %540  ;;  %v611_v49 = vmul.f32 %v6612_v32, %v7178_v52 }
 0x166   : > { %6621 = vrsqrt.f32 %v584_v42  ;;  %v570_v50 = vmul.f32 0.03125, %v538_v47  ;;  %v571_v36 = vmul.f32 0.03125, %v541_v48 }
 0x167   : > { %6623 = vrsqrt.f32 %v585_v43  ;;  %v634_v55 = vmul.f32 %v7283_v46, %v611_v49 }
 0x168   : > { %v6614_v56 = vpop.eup %6613  ;;  %v586_v57 = vadd.f32 1e-05, %v570_v50  ;;  %v587_v58 = vadd.f32 1e-05, %v571_v36 }
 0x169   : > { %v6616_v59 = vpop.eup %6615  ;;  %v544_v62 = vpop.xlane.xlu1 %543  ;;  %v657_v0 = vadd.f32 %v7289_v54, %v634_v55  ;;  %v612_v52 = vmul.f32 %v6614_v56, %v7186_v60 }
 0x16a   : > { %v547_v40 = vpop.xlane.xlu0 %546  ;;  %6625 = vrsqrt.f32 %v586_v57  ;;  %v572_v1 = vmul.f32 0.03125, %v544_v62  ;;  %v613_v3 = vmul.f32 %v6616_v59, %v7180_v53 }
 0x16b   : > { %v573_v2 = vmul.f32 0.03125, %v547_v40  ;;  %6627 = vrsqrt.f32 %v587_v58  ;;  %5377 = vmatprep.mubr.msk.f32.mxu0 %vm417_vm0, %v657_v0  ;;  %v635_v4 = vmul.f32 %v7283_v46, %v612_v52 }
 0x16c   : > { %v6618_v44 = vpop.eup %6617  ;;  %v588_v45 = vadd.f32 1e-05, %v572_v1  ;;  %v636_v8 = vmul.f32 %v7283_v46, %v613_v3 }
 0x16d   : > { %v589_v5 = vadd.f32 1e-05, %v573_v2  ;;  %v6620_v9 = vpop.eup %6619  ;;  %v550_v10 = vpop.xlane.xlu1 %549  ;;  %v658_v60 = vadd.f32 %v7289_v54, %v635_v4  ;;  %v614_v12 = vmul.f32 %v6618_v44, %v7188_v61 }
 0x16e   : > { %v553_v11 = vpop.xlane.xlu0 %552  ;;  %6629 = vrsqrt.f32 %v588_v45  ;;  %v574_v13 = vmul.f32 0.03125, %v550_v10  ;;  %v659_v14 = vadd.f32 %v7289_v54, %v636_v8  ;;  %v615_v18 = vmul.f32 %v6620_v9, %v7196_v6 }
 0x16f   : > { %v575_v53 = vmul.f32 0.03125, %v553_v11  ;;  %6631 = vrsqrt.f32 %v589_v5  ;;  %5378 = vmatmul.mubr.msk.f32.vlgmr.msra.gmra.mrb[0].mxu0 %vm417_vm0, %v658_v60  ;;  %v637_v15 = vmul.f32 %v7283_v46, %v614_v12 }
 0x170   : > { %v6622_v19 = vpop.eup %6621  ;;  %v590_v20 = vadd.f32 1e-05, %v574_v13  ;;  %5380 = vmatprep.mubr.msk.f32.mxu0 %vm417_vm0, %v659_v14  ;;  %v638_v25 = vmul.f32 %v7283_v46, %v615_v18  ;;  %v7357_v14 = vld [vmem:[%s9441_s4] ss:$0 sm:$0xff] }
 0x171   : > { %v591_v21 = vadd.f32 1e-05, %v575_v53  ;;  %v6624_v22 = vpop.eup %6623  ;;  %v556_v23 = vpop.xlane.xlu1 %555  ;;  %v660_v24 = vadd.f32 %v7289_v54, %v637_v15  ;;  %v616_v28 = vmul.f32 %v6622_v19, %v7198_v7 }
 0x172   : > { %v559_v61 = vpop.xlane.xlu0 %558  ;;  %6633 = vrsqrt.f32 %v590_v20  ;;  %v576_v29 = vmul.f32 0.03125, %v556_v23  ;;  %v617_v31 = vmul.f32 %v6624_v22, %v7207_v16  ;;  %v661_v6 = vadd.f32 %v7289_v54, %v638_v25 }
 0x173   : > { %v577_v30 = vmul.f32 0.03125, %v559_v61  ;;  %6635 = vrsqrt.f32 %v591_v21  ;;  %5381 = vmatmul.mubr.msk.f32.gmra.mrb[2].mxu0 %vm417_vm0, %v660_v24  ;;  %v639_v34 = vmul.f32 %v7283_v46, %v616_v28 }
 0x174   : > { %v6626_v35 = vpop.eup %6625  ;;  %v592_v38 = vadd.f32 1e-05, %v576_v29  ;;  %v640_v42 = vmul.f32 %v7283_v46, %v617_v31  ;;  %5383 = vmatprep.mubr.msk.f32.mxu0 %vm417_vm0, %v661_v6 }
 0x175   : > { %v593_v32 = vadd.f32 1e-05, %v577_v30  ;;  %v6628_v43 = vpop.eup %6627  ;;  %v562_v7 = vpop.xlane.xlu1 %561  ;;  %v662_v47 = vadd.f32 %v7289_v54, %v639_v34  ;;  %v618_v16 = vmul.f32 %v6626_v35, %v7210_v17 }
 0x176   : > { %6637 = vrsqrt.f32 %v592_v38  ;;  %v578_v48 = vmul.f32 0.03125, %v562_v7  ;;  %v663_v49 = vadd.f32 %v7289_v54, %v640_v42  ;;  %v619_v50 = vmul.f32 %v6628_v43, %v7219_v26 }
 0x177   : > { %6639 = vrsqrt.f32 %v593_v32  ;;  %5384 = vmatmul.mubr.msk.f32.gmra.mrb[4].mxu0 %vm417_vm0, %v662_v47  ;;  %v641_v36 = vmul.f32 %v7283_v46, %v618_v16 }
 0x178   : > { %v6630_v55 = vpop.eup %6629  ;;  %v594_v56 = vadd.f32 1e-05, %v578_v48  ;;  %5386 = vmatprep.mubr.msk.f32.mxu0 %vm417_vm0, %v663_v49  ;;  %v642_v57 = vmul.f32 %v7283_v46, %v619_v50 }
 0x179   : > { %v6632_v58 = vpop.eup %6631  ;;  %v664_v17 = vadd.f32 %v7289_v54, %v641_v36  ;;  %v620_v59 = vmul.f32 %v6630_v55, %v7222_v27 }
 0x17a   : > { %6641 = vrsqrt.f32 %v594_v56  ;;  %v665_v62 = vadd.f32 %v7289_v54, %v642_v57  ;;  %v621_v26 = vmul.f32 %v6632_v58, %v7231_v39 }
 0x17b   : > { %5387 = vmatmul.mubr.msk.f32.gmra.mrb[6].mxu0 %vm417_vm0, %v664_v17  ;;  %v643_v40 = vmul.f32 %v7283_v46, %v620_v59 }
 0x17c   : > { %v6634_v0 = vpop.eup %6633  ;;  %5389 = vmatprep.mubr.msk.f32.mxu0 %vm417_vm0, %v665_v62  ;;  %v644_v52 = vmul.f32 %v7283_v46, %v621_v26 }
 0x17d   : > { %v6636_v1 = vpop.eup %6635  ;;  %v666_v2 = vadd.f32 %v7289_v54, %v643_v40  ;;  %v622_v3 = vmul.f32 %v6634_v0, %v7234_v33 }
 0x17e   : > { %v667_v27 = vadd.f32 %v7289_v54, %v644_v52  ;;  %v623_v4 = vmul.f32 %v6636_v1, %v7243_v51 }
 0x17f   : > { %5390 = vmatmul.mubr.msk.f32.gmra.mrb[8].mxu0 %vm417_vm0, %v666_v2  ;;  %v645_v39 = vmul.f32 %v7283_v46, %v622_v3 }
 0x180   : > { %v6638_v44 = vpop.eup %6637  ;;  %5392 = vmatprep.mubr.msk.f32.mxu0 %vm417_vm0, %v667_v27  ;;  %v646_v45 = vmul.f32 %v7283_v46, %v623_v4 }
 0x181   : > { %v6640_v5 = vpop.eup %6639  ;;  %v668_v8 = vadd.f32 %v7289_v54, %v645_v39  ;;  %v624_v9 = vmul.f32 %v6638_v44, %v7246_v37 }
 0x182   : > { %v669_v33 = vadd.f32 %v7289_v54, %v646_v45  ;;  %v625_v10 = vmul.f32 %v6640_v5, %v7255_v63 }
 0x183   : > { %5393 = vmatmul.mubr.msk.f32.gmra.mrb[10].mxu0 %vm417_vm0, %v668_v8  ;;  %v647_v51 = vmul.f32 %v7283_v46, %v624_v9 }
 0x184   : > { %v6642_v11 = vpop.eup %6641  ;;  %5395 = vmatprep.mubr.msk.f32.mxu0 %vm417_vm0, %v669_v33  ;;  %v648_v60 = vmul.f32 %v7283_v46, %v625_v10 }
 0x185   : > { %v670_v12 = vadd.f32 %v7289_v54, %v647_v51  ;;  %v626_v13 = vmul.f32 %v6642_v11, %v7258_v41 }
 0x186   : > { %v671_v53 = vadd.f32 %v7289_v54, %v648_v60 }
 0x187   : > { %5396 = vmatmul.mubr.msk.f32.gmra.mrb[12].mxu0 %vm417_vm0, %v670_v12  ;;  %v649_v37 = vmul.f32 %v7283_v46, %v626_v13 }
 0x188   : > { %5398 = vmatprep.mubr.msk.f32.mxu0 %vm417_vm0, %v671_v53 }
 0x189   : > { %v672_v63 = vadd.f32 %v7289_v54, %v649_v37 }
 0x18b   : > { %5399 = vmatmul.mubr.msk.f32.gmra.mrb[14].mxu0 %vm417_vm0, %v672_v63 }
 0x242   : > { %v5379_v15 = vpop.f32.mrb[0].mxu0 }
 0x243   : > { %v7360_v41 = vadd.f32 %v5379_v15, %v7357_v14  ;;  %v798_v18 = vpop.f32.mrb[1].mxu0 }
 0x244   : > { %v7363_v19 = vadd.f32 %v7357_v14, %v798_v18 }
 0x245   : > { %1234 = vrot.lane.b32.xlu1 %v7360_v41, %s6971_s19 }
 0x246   : > { %v5382_v46 = vpop.f32.mrb[2].mxu0  ;;  %5417 = vmatprep.mubr.msk.f32.mxu1 %vm933_vm1, %v7363_v19  ;;  %v7371_v54 = vpack.i.bf16 %v7360_v41, %v7363_v19 }
 0x247   : > { %v808_v20 = vpop.f32.mrb[3].mxu0  ;;  %v7408_v35 = vadd.f32 %v5382_v46, %v7357_v14 }
 0x248   : > { %6292 = vrot.lane.b32.xlu0 %v7371_v54, %s6972_s20  ;;  %v7386_v24 = vadd.f32 %v7357_v14, %v808_v20 }
 0x249   : > { %1572 = vrot.lane.b32.xlu1 %v7360_v41, %s6973_s21 }
 0x24a   : > { %v5385_v21 = vpop.f32.mrb[4].mxu0  ;;  %v7422_v47 = vpack.i.bf16 %v7408_v35, %v7386_v24 }
 0x24b   : > { %v818_v22 = vpop.f32.mrb[5].mxu0  ;;  %v7389_v25 = vadd.f32 %v5385_v21, %v7357_v14 }
 0x24c   : > { %1232 = vrot.lane.b32.xlu0 %v7363_v19, %s6971_s19  ;;  %v7392_v28 = vadd.f32 %v7357_v14, %v818_v22 }
 0x24d   : > { %6297 = vrot.lane.b32.xlu1 %v7371_v54, %s6974_s22 }
 0x24e   : > { %v5388_v23 = vpop.f32.mrb[6].mxu0  ;;  %v7405_v34 = vpack.i.bf16 %v7389_v25, %v7392_v28 }
 0x24f   : > { %v828_v61 = vpop.f32.mrb[7].mxu0  ;;  %v7432_v48 = vadd.f32 %v5388_v23, %v7357_v14 }
 0x250   : > { %1570 = vrot.lane.b32.xlu0 %v7363_v19, %s6973_s21  ;;  %v7435_v49 = vadd.f32 %v7357_v14, %v828_v61 }
 0x251   : > { %6302 = vrot.lane.b32.xlu1 %v7371_v54, %s6975_s23 }
 0x252   : > { %v5391_v29 = vpop.f32.mrb[8].mxu0  ;;  %v7449_v57 = vpack.i.bf16 %v7432_v48, %v7435_v49 }
 0x253   : > { %v838_v30 = vpop.f32.mrb[9].mxu0  ;;  %v7468_v58 = vadd.f32 %v5391_v29, %v7357_v14 }
 0x254   : > { %v7395_v31 = vadd.f32 %v7357_v14, %v838_v30  ;;  %1236 = vrot.lane.b32.xlu0 %v7386_v24, %s6971_s19  ;;  %9502 = vst [vmem:[#allocation4_spill] sm:$0xff] %v7449_v57 }
 0x255   : > { %6307 = vrot.lane.b32.xlu1 %v7371_v54, %s6976_s10 }
 0x256   : > { %v5394_v6 = vpop.f32.mrb[10].mxu0  ;;  %5445 = vmatprep.mubr.msk.f32.mxu0 %vm933_vm1, %v7395_v31  ;;  %v7476_v17 = vpack.i.bf16 %v7468_v58, %v7395_v31 }
 0x257   : > { %v7411_v38 = vadd.f32 %v5394_v6, %v7357_v14  ;;  %v848_v32 = vpop.f32.mrb[11].mxu0 }
 0x258   : > { %6332 = vrot.lane.b32.xlu0 %v7405_v34, %s6974_s22  ;;  %9503 = vst [vmem:[#allocation5_spill] sm:$0xff] %v7476_v17  ;;  %v7491_v59 = vadd.f32 %v7357_v14, %v848_v32 }
 0x259   : > { %1238 = vrot.lane.b32.xlu1 %v7408_v35, %s6971_s19 }
 0x25a   : > { %v5397_v42 = vpop.f32.mrb[12].mxu0  ;;  %v7503_v26 = vpack.i.bf16 %v7411_v38, %v7491_v59 }
 0x25b   : > { %v7418_v43 = vadd.f32 %v5397_v42, %v7357_v14  ;;  %v858_v7 = vpop.f32.mrb[13].mxu0 }
 0x25c   : > { %v7425_v16 = vadd.f32 %v7357_v14, %v858_v7  ;;  %6337 = vrot.lane.b32.xlu0 %v7405_v34, %s6975_s23  ;;  %9505 = vst [vmem:[#allocation7_spill] sm:$0xff] %v7503_v26 }
 0x25d   : > { %6312 = vrot.lane.b32.xlu1 %v7422_v47, %s6972_s20 }
 0x25e   : > { %v5400_v50 = vpop.f32.mrb[14].mxu0  ;;  %v7499_v62 = vpack.i.bf16 %v7418_v43, %v7425_v16 }
 0x25f   : > { %v7438_v36 = vadd.f32 %v5400_v50, %v7357_v14  ;;  %v868_v55 = vpop.f32.mrb[15].mxu0 }
 0x260   : > { %v7441_v56 = vadd.f32 %v7357_v14, %v868_v55  ;;  %1240 = vrot.lane.b32.xlu0 %v7392_v28, %s6971_s19  ;;  %9504 = vst [vmem:[#allocation6_spill] sm:$0xff] %v7499_v62 }
 0x261   : > { %6317 = vrot.lane.b32.xlu1 %v7422_v47, %s6974_s22 }
 0x262   : > { %v7523_v40 = vpack.i.bf16 %v7438_v36, %v7441_v56 }
 0x264   : > { %6342 = vrot.lane.b32.xlu0 %v7449_v57, %s6972_s20  ;;  %9506 = vst [vmem:[#allocation8_spill] sm:$0xff] %v7523_v40 }
 0x265   : > { %6322 = vrot.lane.b32.xlu1 %v7422_v47, %s6975_s23 }
 0x268   : > { %6347 = vrot.lane.b32.xlu0 %v7449_v57, %s6974_s22 }
 0x269   : > { %1242 = vrot.lane.b32.xlu1 %v7389_v25, %s6971_s19 }
 0x26c   : > { %6352 = vrot.lane.b32.xlu0 %v7449_v57, %s6975_s23 }
 0x26d   : > { %6327 = vrot.lane.b32.xlu1 %v7405_v34, %s6972_s20 }
 0x270   : > { %1244 = vrot.lane.b32.xlu0 %v7435_v49, %s6971_s19 }
 0x271   : > { %1246 = vrot.lane.b32.xlu1 %v7432_v48, %s6971_s19 }
 0x274   : > { %1401 = vrot.lane.b32.xlu0 %v7395_v31, %s6971_s19 }
 0x275   : > { %1403 = vrot.lane.b32.xlu1 %v7468_v58, %s6971_s19 }
 0x278   : > { %6382 = vrot.lane.b32.xlu0 %v7405_v34, %s6976_s10 }
 0x279   : > { %6357 = vrot.lane.b32.xlu1 %v7476_v17, %s6972_s20 }
 0x27c   : > { %1739 = vrot.lane.b32.xlu0 %v7395_v31, %s6973_s21 }
 0x27d   : > { %6362 = vrot.lane.b32.xlu1 %v7476_v17, %s6974_s22 }
 0x280   : > { %1574 = vrot.lane.b32.xlu0 %v7386_v24, %s6973_s21 }
 0x281   : > { %6367 = vrot.lane.b32.xlu1 %v7476_v17, %s6975_s23 }
 0x284   : > { %1405 = vrot.lane.b32.xlu0 %v7491_v59, %s6971_s19 }
 0x285   : > { %1407 = vrot.lane.b32.xlu1 %v7411_v38, %s6971_s19 }
 0x288   : > { %6402 = vrot.lane.b32.xlu0 %v7499_v62, %s6972_s20 }
 0x289   : > { %6372 = vrot.lane.b32.xlu1 %v7503_v26, %s6972_s20 }
 0x28c   : > { %6407 = vrot.lane.b32.xlu0 %v7499_v62, %s6974_s22 }
 0x28d   : > { %6377 = vrot.lane.b32.xlu1 %v7422_v47, %s6976_s10 }
 0x290   : > { %6412 = vrot.lane.b32.xlu0 %v7499_v62, %s6975_s23 }
 0x291   : > { %6387 = vrot.lane.b32.xlu1 %v7476_v17, %s6976_s10 }
 0x294   : > { %1409 = vrot.lane.b32.xlu0 %v7425_v16, %s6971_s19 }
 0x295   : > { %1741 = vrot.lane.b32.xlu1 %v7468_v58, %s6973_s21 }
 0x298   : > { %6417 = vrot.lane.b32.xlu0 %v7523_v40, %s6972_s20 }
 0x299   : > { %1576 = vrot.lane.b32.xlu1 %v7408_v35, %s6973_s21 }
 0x29c   : > { %6422 = vrot.lane.b32.xlu0 %v7449_v57, %s6976_s10 }
 0x29d   : > { %6392 = vrot.lane.b32.xlu1 %v7503_v26, %s6974_s22 }
 0x2a0   : > { %1578 = vrot.lane.b32.xlu0 %v7392_v28, %s6973_s21 }
 0x2a1   : > { %6397 = vrot.lane.b32.xlu1 %v7503_v26, %s6975_s23 }
 0x2a4   : > { %1582 = vrot.lane.b32.xlu0 %v7435_v49, %s6973_s21 }
 0x2a5   : > { %1411 = vrot.lane.b32.xlu1 %v7418_v43, %s6971_s19 }
 0x2a8   : > { %6432 = vrot.lane.b32.xlu0 %v7499_v62, %s6976_s10 }
 0x2a9   : > { %1415 = vrot.lane.b32.xlu1 %v7438_v36, %s6971_s19 }
 0x2ac   : > { %1910 = vrot.lane.b32.xlu0 %v7360_v41, %s6977_s11 }
 0x2ad   : > { %6427 = vrot.lane.b32.xlu1 %v7503_v26, %s6976_s10 }
 0x2b0   : > { %1912 = vrot.lane.b32.xlu0 %v7386_v24, %s6977_s11 }
 0x2b1   : > { %1580 = vrot.lane.b32.xlu1 %v7389_v25, %s6973_s21 }
 0x2b4   : > { %1914 = vrot.lane.b32.xlu0 %v7408_v35, %s6977_s11 }
 0x2b5   : > { %1584 = vrot.lane.b32.xlu1 %v7432_v48, %s6973_s21 }
 0x2b7   : > { %v7557_v0 = vpop.permute.xlu1 %1234 }
 0x2b8   : > { %6437 = vrot.lane.b32.xlu0 %v7523_v40, %s6974_s22 }
 0x2b9   : > { %1908 = vrot.lane.b32.xlu1 %v7363_v19, %s6977_s11 }
 0x2ba   : > { %v6293_v52 = vpop.permute.xlu0 %6292 }
 0x2bb   : > { %v7563_v1 = vpop.permute.xlu1 %1572  ;;  %v6295_v2 = vunpack.i.h.bf16 %v6293_v52  ;;  %v6294_v3 = vunpack.i.l.bf16 %v6293_v52 }
 0x2bc   : > { %1747 = vrot.lane.b32.xlu0 %v7425_v16, %s6973_s21 }
 0x2bd   : > { %1743 = vrot.lane.b32.xlu1 %v7491_v59, %s6973_s21  ;;  %v5889_v4 = vpack.c.bf16 %v6295_v2, %v6294_v3 }
 0x2be   : > { %v7575_v39 = vpop.permute.xlu0 %1232 }
 0x2bf   : > { %v7577_v44 = vpop.permute.xlu1 %6297  ;;  %5891 = vmatprep.subr.msk.bf16.mxu1 %vm7569_vm2, %v5889_v4 }
 0x2c0   : > { %1749 = vrot.lane.b32.xlu0 %v7418_v43, %s6973_s21  ;;  %5894 = vmatpush3.bf16.xpose.msk.msra.mxu1 %vm7569_vm2, %v5889_v4  ;;  %v6300_v42 = vunpack.i.h.bf16 %v7577_v44  ;;  %v6299_v7 = vunpack.i.l.bf16 %v7577_v44 }
 0x2c1   : > { %1745 = vrot.lane.b32.xlu1 %v7411_v38, %s6973_s21 }
 0x2c2   : > { %v7587_v45 = vpop.permute.xlu0 %1570  ;;  %v5937_v52 = vpack.c.bf16 %v6300_v42, %v6299_v7 }
 0x2c3   : > { %v7589_v5 = vpop.permute.xlu1 %6302 }
 0x2c4   : > { %1753 = vrot.lane.b32.xlu0 %v7438_v36, %s6973_s21 }
 0x2c5   : > { %1916 = vrot.lane.b32.xlu1 %v7392_v28, %s6977_s11 }
 0x2c6   : > { %v7595_v8 = vpop.permute.xlu0 %1236 }
 0x2c7   : > { %v7597_v9 = vpop.permute.xlu1 %6307 }
 0x2c8   : > { %2077 = vrot.lane.b32.xlu0 %v7395_v31, %s6977_s11 }
 0x2c9   : > { %1918 = vrot.lane.b32.xlu1 %v7389_v25, %s6977_s11 }
 0x2ca   : > { %v7603_v33 = vpop.permute.xlu0 %6332 }
 0x2cb   : > { %v7605_v10 = vpop.permute.xlu1 %1238 }
 0x2cc   : > { %2081 = vrot.lane.b32.xlu0 %v7491_v59, %s6977_s11 }
 0x2cd   : > { %1920 = vrot.lane.b32.xlu1 %v7435_v49, %s6977_s11 }
 0x2ce   : > { %v7611_v51 = vpop.permute.xlu0 %6337 }
 0x2cf   : > { %v6313_v11 = vpop.permute.xlu1 %6312 }
 0x2d0   : > { %v6315_v60 = vunpack.i.h.bf16 %v6313_v11  ;;  %v6314_v12 = vunpack.i.l.bf16 %v6313_v11  ;;  %2085 = vrot.lane.b32.xlu0 %v7425_v16, %s6977_s11 }
 0x2d1   : > { %1922 = vrot.lane.b32.xlu1 %v7432_v48, %s6977_s11 }
 0x2d2   : > { %v5895_v13 = vpack.c.bf16 %v6315_v60, %v6314_v12  ;;  %v7617_v53 = vpop.permute.xlu0 %1240 }
 0x2d3   : > { %v6318_v37 = vpop.permute.xlu1 %6317 }
 0x2d4   : > { %6442 = vrot.lane.b32.xlu0 %v7371_v54, %s6978_s13  ;;  %5897 = vmatprep.subr.msk.bf16.mxu1 %vm7569_vm2, %v5895_v13  ;;  %v6320_v60 = vunpack.i.h.bf16 %v6318_v37  ;;  %v6319_v12 = vunpack.i.l.bf16 %v6318_v37 }
 0x2d5   : > { %2079 = vrot.lane.b32.xlu1 %v7468_v58, %s6977_s11  ;;  %5900 = vmatpush3.bf16.xpose.msk.msra.mxu1 %vm7569_vm2, %v5895_v13 }
 0x2d6   : > { %v6343_v63 = vpop.permute.xlu0 %6342 }
 0x2d7   : > { %v7627_v14 = vpop.permute.xlu1 %6322  ;;  %v6345_v20 = vunpack.i.h.bf16 %v6343_v63  ;;  %v6344_v21 = vunpack.i.l.bf16 %v6343_v63 }
 0x2d8   : > { %6452 = vrot.lane.b32.xlu0 %v7523_v40, %s6975_s23 }
 0x2d9   : > { %2083 = vrot.lane.b32.xlu1 %v7411_v38, %s6977_s11  ;;  %v5907_v31 = vpack.c.bf16 %v6345_v20, %v6344_v21 }
 0x2da   : > { %v7633_v15 = vpop.permute.xlu0 %6347 }
 0x2db   : > { %v7635_v18 = vpop.permute.xlu1 %1242 }
 0x2dc   : > { %1413 = vrot.lane.b32.xlu0 %v7441_v56, %s6971_s19  ;;  %s6984_s19 = smov 24  }
 0x2dd   : > { %2087 = vrot.lane.b32.xlu1 %v7418_v43, %s6977_s11 }
 0x2de   : > { %v7641_v19 = vpop.permute.xlu0 %6352 }
 0x2df   : > { %v6328_v46 = vpop.permute.xlu1 %6327 }
 0x2e0   : > { %v6330_v22 = vunpack.i.h.bf16 %v6328_v46  ;;  %v6329_v23 = vunpack.i.l.bf16 %v6328_v46  ;;  %6457 = vrot.lane.b32.xlu0 %v7405_v34, %s6978_s13  ;;  %v5943_v46 = vpack.c.bf16 %v6320_v60, %v6319_v12 }
 0x2e1   : > { %2091 = vrot.lane.b32.xlu1 %v7438_v36, %s6977_s11 }
 0x2e2   : > { %v5901_v61 = vpack.c.bf16 %v6330_v22, %v6329_v23  ;;  %v7647_v29 = vpop.permute.xlu0 %1244 }
 0x2e3   : > { %v7649_v30 = vpop.permute.xlu1 %1246 }
 0x2e4   : > { %6467 = vrot.lane.b32.xlu0 %v7476_v17, %s6978_s13  ;;  %5903 = vmatprep.subr.msk.bf16.mxu1 %vm7569_vm2, %v5901_v61 }
 0x2e5   : > { %6447 = vrot.lane.b32.xlu1 %v7422_v47, %s6978_s13  ;;  %5906 = vmatpush3.bf16.xpose.msk.msra.mxu1 %vm7569_vm2, %v5901_v61 }
 0x2e6   : > { %v7659_v6 = vpop.permute.xlu0 %1401  ;;  %5909 = vmatprep.subr.msk.bf16.mxu1 %vm7569_vm2, %v5907_v31 }
 0x2e7   : > { %v7663_v32 = vpop.permute.xlu1 %1403 }
 0x2e8   : > { %6477 = vrot.lane.b32.xlu0 %v7503_v26, %s6978_s13 }
 0x2e9   : > { %6462 = vrot.lane.b32.xlu1 %v7449_v57, %s6978_s13 }
 0x2ea   : > { %v7671_v50 = vpop.permute.xlu0 %6382 }
 0x2eb   : > { %v6358_v55 = vpop.permute.xlu1 %6357 }
 0x2ec   : > { %v6360_v2 = vunpack.i.h.bf16 %v6358_v55  ;;  %v6359_v3 = vunpack.i.l.bf16 %v6358_v55  ;;  %6487 = vrot.lane.b32.xlu0 %v7499_v62, %s6978_s13 }
 0x2ed   : > { %6472 = vrot.lane.b32.xlu1 %v7371_v54, %s6979_s24  ;;  %5912 = vmatpush3.bf16.xpose.msk.msra.mxu1 %vm7569_vm2, %v5907_v31 }
 0x2ee   : > { %v5913_v4 = vpack.c.bf16 %v6360_v2, %v6359_v3  ;;  %v7679_v44 = vpop.permute.xlu0 %1739  ;;  %5939 = vmatprep.subr.msk.bf16.mxu1 %vm7569_vm2, %v5937_v52  ;;  %v6305_v3 = vunpack.i.h.bf16 %v7589_v5 }
 0x2ef   : > { %v7683_v11 = vpop.permute.xlu1 %6362 }
 0x2f0   : > { %5915 = vmatprep.subr.msk.bf16.mxu0 %vm7569_vm2, %v5913_v4  ;;  %6507 = vrot.lane.b32.xlu0 %v7476_v17, %s6979_s24 }
 0x2f1   : > { %5918 = vmatpush3.bf16.xpose.msk.msra.mxu0 %vm7569_vm2, %v5913_v4  ;;  %6482 = vrot.lane.b32.xlu1 %v7422_v47, %s6979_s24  ;;  %v6304_v4 = vunpack.i.l.bf16 %v7589_v5 }
 0x2f2   : > { %v7693_v13 = vpop.permute.xlu0 %1574 }
 0x2f3   : > { %v7695_v63 = vpop.permute.xlu1 %6367 }
 0x2f4   : > { %6517 = vrot.lane.b32.xlu0 %v7503_v26, %s6979_s24  ;;  %5418 = vmatmul.mubr.msk.f32.vlgmr.msra.gmra.mrb[0].mxu1 %vm933_vm1, %v7360_v41  ;;  %v6335_v41 = vunpack.i.h.bf16 %v7603_v33 }
 0x2f5   : > { %6492 = vrot.lane.b32.xlu1 %v7405_v34, %s6979_s24  ;;  %5420 = vmatprep.mubr.msk.f32.mxu1 %vm933_vm1, %v7386_v24  ;;  %v6334_v24 = vunpack.i.l.bf16 %v7603_v33 }
 0x2f6   : > { %5942 = vmatpush3.bf16.xpose.msk.msra.mxu1 %vm7569_vm2, %v5937_v52  ;;  %v7707_v37 = vpop.permute.xlu0 %1405 }
 0x2f7   : > { %5945 = vmatprep.subr.msk.bf16.mxu1 %vm7569_vm2, %v5943_v46  ;;  %v7711_v20 = vpop.permute.xlu1 %1407 }
 0x2f8   : > { %6527 = vrot.lane.b32.xlu0 %v7499_v62, %s6979_s24  ;;  %5421 = vmatmul.mubr.msk.f32.gmra.mrb[2].mxu1 %vm933_vm1, %v7408_v35  ;;  %v5949_v35 = vpack.c.bf16 %v6335_v41, %v6334_v24  ;;  %v6365_v24 = vunpack.i.h.bf16 %v7683_v11 }
 0x2f9   : > { %6497 = vrot.lane.b32.xlu1 %v7523_v40, %s6976_s10  ;;  %5423 = vmatprep.mubr.msk.f32.mxu1 %vm933_vm1, %v7392_v28 }
 0x2fa   : > { %v6403_v21 = vpop.permute.xlu0 %6402 }
 0x2fb   : > { %v6373_v22 = vpop.permute.xlu1 %6372  ;;  %v6405_v31 = vunpack.i.h.bf16 %v6403_v21  ;;  %v6404_v42 = vunpack.i.l.bf16 %v6403_v21  ;;  %v6364_v21 = vunpack.i.l.bf16 %v7683_v11 }
 0x2fc   : > { %v6375_v23 = vunpack.i.h.bf16 %v6373_v22  ;;  %v6374_v61 = vunpack.i.l.bf16 %v6373_v22  ;;  %1751 = vrot.lane.b32.xlu0 %v7441_v56, %s6973_s21  ;;  %5424 = vmatmul.mubr.msk.f32.gmra.mrb[4].mxu1 %vm933_vm1, %v7389_v25  ;;  %v6350_v25 = vunpack.i.h.bf16 %v7633_v15  ;;  %v5985_v22 = vpack.c.bf16 %v6305_v3, %v6304_v4 }
 0x2fd   : > { %6502 = vrot.lane.b32.xlu1 %v7449_v57, %s6979_s24  ;;  %5426 = vmatprep.mubr.msk.f32.mxu1 %vm933_vm1, %v7435_v49  ;;  %v6349_v49 = vunpack.i.l.bf16 %v7633_v15  ;;  %v5925_v55 = vpack.c.bf16 %v6405_v31, %v6404_v42  ;;  %v5961_v11 = vpack.c.bf16 %v6365_v24, %v6364_v21  ;;  %v6324_v31 = vunpack.i.l.bf16 %v7627_v14 }
 0x2fe   : > { %v5919_v28 = vpack.c.bf16 %v6375_v23, %v6374_v61  ;;  %5948 = vmatpush3.bf16.xpose.msk.msra.mxu1 %vm7569_vm2, %v5943_v46  ;;  %v7733_v33 = vpop.permute.xlu0 %6407  ;;  %v6369_v24 = vunpack.i.l.bf16 %v7695_v63 }
 0x2ff   : > { %5951 = vmatprep.subr.msk.bf16.mxu1 %vm7569_vm2, %v5949_v35  ;;  %v7737_v7 = vpop.permute.xlu1 %6377 }
 0x300   : > { %5921 = vmatprep.subr.msk.bf16.mxu0 %vm7569_vm2, %v5919_v28  ;;  %6542 = vrot.lane.b32.xlu0 %v7476_v17, %s6980_s17  ;;  %v8352_v17 = vld [vmem:[%s9442_s5 + $0xa0] sm:$0xff] }
 0x301   : > { %5427 = vmatmul.mubr.msk.f32.gmra.mrb[6].mxu1 %vm933_vm1, %v7432_v48  ;;  %5924 = vmatpush3.bf16.xpose.msk.msra.mxu0 %vm7569_vm2, %v5919_v28  ;;  %v5955_v48 = vpack.c.bf16 %v6350_v25, %v6349_v49 }
 0x302   : > { %6512 = vrot.lane.b32.xlu1 %v7371_v54, %s6980_s17  ;;  %5473 = vmatprep.mubr.msk.f32.mxu1 %vm933_vm1, %v7575_v39  ;;  %v7753_v52 = vpop.permute.xlu0 %6412 }
 0x303   : > { %5927 = vmatprep.subr.msk.bf16.mxu0 %vm7569_vm2, %v5925_v55  ;;  %v7757_v2 = vpop.permute.xlu1 %6387 }
 0x304   : > { %6552 = vrot.lane.b32.xlu0 %v7503_v26, %s6980_s17 }
 0x306   : > { %6522 = vrot.lane.b32.xlu1 %v7422_v47, %s6980_s17  ;;  %5954 = vmatpush3.bf16.xpose.msk.msra.mxu1 %vm7569_vm2, %v5949_v35  ;;  %v7765_v15 = vpop.permute.xlu0 %1409  ;;  %v6325_v35 = vunpack.i.h.bf16 %v7627_v14 }
 0x307   : > { %5957 = vmatprep.subr.msk.bf16.mxu1 %vm7569_vm2, %v5955_v48  ;;  %v7769_v39 = vpop.permute.xlu1 %1741 }
 0x308   : > { %6562 = vrot.lane.b32.xlu0 %v7499_v62, %s6980_s17  ;;  %v5991_v25 = vpack.c.bf16 %v6325_v35, %v6324_v31 }
 0x309   : > { %5930 = vmatpush3.bf16.xpose.msk.msra.mxu0 %vm7569_vm2, %v5925_v55 }
 0x30a   : > { %6532 = vrot.lane.b32.xlu1 %v7405_v34, %s6980_s17  ;;  %v6418_v60 = vpop.permute.xlu0 %6417 }
 0x30b   : > { %v6420_v12 = vunpack.i.h.bf16 %v6418_v60  ;;  %v6419_v46 = vunpack.i.l.bf16 %v6418_v60  ;;  %v7779_v41 = vpop.permute.xlu1 %1576 }
 0x30c   : > { %2089 = vrot.lane.b32.xlu0 %v7441_v56, %s6977_s11 }
 0x30d   : > { %v5931_v5 = vpack.c.bf16 %v6420_v12, %v6419_v46  ;;  %v6370_v46 = vunpack.i.h.bf16 %v7695_v63 }
 0x30e   : > { %6537 = vrot.lane.b32.xlu1 %v7449_v57, %s6980_s17  ;;  %5960 = vmatpush3.bf16.xpose.msk.msra.mxu1 %vm7569_vm2, %v5955_v48  ;;  %v7789_v23 = vpop.permute.xlu0 %6422 }
 0x30f   : > { %5987 = vmatprep.subr.msk.bf16.mxu1 %vm7569_vm2, %v5985_v22  ;;  %v6393_v61 = vpop.permute.xlu1 %6392  ;;  %5933 = vmatprep.subr.msk.bf16.mxu0 %vm7569_vm2, %v5931_v5 }
 0x310   : > { %6572 = vrot.lane.b32.xlu0 %v7523_v40, %s6978_s13  ;;  %v6395_v49 = vunpack.i.h.bf16 %v6393_v61  ;;  %v6394_v14 = vunpack.i.l.bf16 %v6393_v61  ;;  %v6379_v61 = vunpack.i.l.bf16 %v7737_v7 }
 0x311   : > { %5936 = vmatpush3.bf16.xpose.msk.msra.mxu0 %vm7569_vm2, %v5931_v5  ;;  %v6380_v5 = vunpack.i.h.bf16 %v7737_v7 }
 0x312   : > { %6547 = vrot.lane.b32.xlu1 %v7371_v54, %s6981_s18  ;;  %v7803_v42 = vpop.permute.xlu0 %1578  ;;  %5963 = vmatprep.subr.msk.bf16.mxu0 %vm7569_vm2, %v5961_v11 }
 0x313   : > { %v7807_v28 = vpop.permute.xlu1 %6397  ;;  %v6039_v35 = vpack.c.bf16 %v6380_v5, %v6379_v61 }
 0x314   : > { %6577 = vrot.lane.b32.xlu0 %v7523_v40, %s6979_s24  ;;  %v6399_v7 = vunpack.i.l.bf16 %v7807_v28  ;;  %v8428_v40 = vld [vmem:[%s9442_s5 + $0xd8] sm:$0xff] }
 0x315   : > { %5474 = vmatmul.mubr.msk.f32.vlgmr.msra.gmra.mrb[8].mxu1 %vm933_vm1, %v7557_v0  ;;  %v6339_v0 = vunpack.i.l.bf16 %v7611_v51 }
 0x316   : > { %6557 = vrot.lane.b32.xlu1 %v7422_v47, %s6981_s18  ;;  %5476 = vmatprep.mubr.msk.f32.mxu1 %vm933_vm1, %v7595_v8  ;;  %v7817_v54 = vpop.permute.xlu0 %1582  ;;  %v6340_v47 = vunpack.i.h.bf16 %v7611_v51  ;;  %v5967_v8 = vpack.c.bf16 %v6395_v49, %v6394_v14 }
 0x317   : > { %5990 = vmatpush3.bf16.xpose.msk.msra.mxu1 %vm7569_vm2, %v5985_v22  ;;  %v7821_v55 = vpop.permute.xlu1 %1411 }
 0x318   : > { %5993 = vmatprep.subr.msk.bf16.mxu1 %vm7569_vm2, %v5991_v25  ;;  %5446 = vmatmul.mubr.msk.f32.vlgmr.msra.gmra.mrb[16].mxu0 %vm933_vm1, %v7468_v58 }
 0x319   : > { %5477 = vmatmul.mubr.msk.f32.gmra.mrb[10].mxu1 %vm933_vm1, %v7605_v10  ;;  %5448 = vmatprep.mubr.msk.f32.mxu0 %vm933_vm1, %v7491_v59  ;;  %v6410_v59 = vunpack.i.h.bf16 %v7733_v33  ;;  %v6409_v10 = vunpack.i.l.bf16 %v7733_v33  ;;  %v6309_v33 = vunpack.i.l.bf16 %v7597_v9 }
 0x31a   : > { %6567 = vrot.lane.b32.xlu1 %v7405_v34, %s6981_s18  ;;  %5479 = vmatprep.mubr.msk.f32.mxu1 %vm933_vm1, %v7617_v53  ;;  %v7837_v48 = vpop.permute.xlu0 %6432  ;;  %v5997_v34 = vpack.c.bf16 %v6340_v47, %v6339_v0  ;;  %v6354_v53 = vunpack.i.l.bf16 %v7641_v19 }
 0x31b   : > { %5966 = vmatpush3.bf16.xpose.msk.msra.mxu0 %vm7569_vm2, %v5961_v11  ;;  %v7841_v58 = vpop.permute.xlu1 %1415 }
 0x31c   : > { %5969 = vmatprep.subr.msk.bf16.mxu0 %vm7569_vm2, %v5967_v8  ;;  %5449 = vmatmul.mubr.msk.f32.gmra.mrb[18].mxu0 %vm933_vm1, %v7411_v38 }
 0x31d   : > { %5480 = vmatmul.mubr.msk.f32.gmra.mrb[12].mxu1 %vm933_vm1, %v7635_v18  ;;  %5451 = vmatprep.mubr.msk.f32.mxu0 %vm933_vm1, %v7425_v16  ;;  %v6355_v16 = vunpack.i.h.bf16 %v7641_v19  ;;  %v5973_v18 = vpack.c.bf16 %v6410_v59, %v6409_v10 }
 0x31e   : > { %5482 = vmatprep.mubr.msk.f32.mxu1 %vm933_vm1, %v7647_v29  ;;  %v7855_v51 = vpop.permute.xlu0 %1910 }
 0x31f   : > { %5996 = vmatpush3.bf16.xpose.msk.msra.mxu1 %vm7569_vm2, %v5991_v25  ;;  %v7859_v38 = vpop.permute.xlu1 %6427  ;;  %v6400_v25 = vunpack.i.h.bf16 %v7807_v28  ;;  %v6385_v28 = vunpack.i.h.bf16 %v7671_v50 }
 0x320   : > { %5999 = vmatprep.subr.msk.bf16.mxu1 %vm7569_vm2, %v5997_v34  ;;  %5452 = vmatmul.mubr.msk.f32.gmra.mrb[20].mxu0 %vm933_vm1, %v7418_v43 }
 0x321   : > { %5483 = vmatmul.mubr.msk.f32.gmra.mrb[14].mxu1 %vm933_vm1, %v7649_v30  ;;  %5454 = vmatprep.mubr.msk.f32.mxu0 %vm933_vm1, %v7441_v56  ;;  %v6003_v56 = vpack.c.bf16 %v6355_v16, %v6354_v53  ;;  %v6310_v30 = vunpack.i.h.bf16 %v7597_v9  ;;  %v6009_v9 = vpack.c.bf16 %v6370_v46, %v6369_v24  ;;  %v6015_v14 = vpack.c.bf16 %v6400_v25, %v6399_v7 }
 0x322   : > { %5529 = vmatprep.mubr.msk.f32.mxu1 %vm933_vm1, %v7587_v45  ;;  %v7873_v29 = vpop.permute.xlu0 %1912  ;;  %v6435_v25 = vunpack.i.h.bf16 %v7837_v48  ;;  %v6434_v7 = vunpack.i.l.bf16 %v7837_v48 }
 0x323   : > { %5972 = vmatpush3.bf16.xpose.msk.msra.mxu0 %vm7569_vm2, %v5967_v8  ;;  %v1581_v43 = vpop.permute.xlu1 %1580  ;;  %v6033_v12 = vpack.c.bf16 %v6310_v30, %v6309_v33  ;;  %v6389_v30 = vunpack.i.l.bf16 %v7757_v2 }
 0x324   : > { %5975 = vmatprep.subr.msk.bf16.mxu0 %vm7569_vm2, %v5973_v18  ;;  %5455 = vmatmul.mubr.msk.f32.gmra.mrb[22].mxu0 %vm933_vm1, %v7438_v36  ;;  %v6069_v48 = vpack.c.bf16 %v6435_v25, %v6434_v7 }
 0x325   : > { %5501 = vmatprep.mubr.msk.f32.mxu0 %vm933_vm1, %v7659_v6 }
 0x326   : > { %v7883_v19 = vpop.permute.xlu0 %1914 }
 0x327   : > { %6002 = vmatpush3.bf16.xpose.msk.msra.mxu1 %vm7569_vm2, %v5997_v34  ;;  %v1585_v45 = vpop.permute.xlu1 %1584 }
 0x328   : > { %6005 = vmatprep.subr.msk.bf16.mxu1 %vm7569_vm2, %v6003_v56 }
 0x32a   : > { %v6438_v3 = vpop.permute.xlu0 %6437 }
 0x32b   : > { %5978 = vmatpush3.bf16.xpose.msk.msra.mxu0 %vm7569_vm2, %v5973_v18  ;;  %v6440_v36 = vunpack.i.h.bf16 %v6438_v3  ;;  %v6439_v6 = vunpack.i.l.bf16 %v6438_v3  ;;  %v1909_v4 = vpop.permute.xlu1 %1908 }
 0x32d   : > { %v5979_v60 = vpack.c.bf16 %v6440_v36, %v6439_v6 }
 0x32e   : > { %v7895_v21 = vpop.permute.xlu0 %1747 }
 0x32f   : > { %6008 = vmatpush3.bf16.xpose.msk.msra.mxu1 %vm7569_vm2, %v6003_v56  ;;  %v7899_v22 = vpop.permute.xlu1 %1743  ;;  %5981 = vmatprep.subr.msk.bf16.mxu0 %vm7569_vm2, %v5979_v60 }
 0x330   : > { %6035 = vmatprep.subr.msk.bf16.mxu1 %vm7569_vm2, %v6033_v12 }
 0x332   : > { %v7907_v11 = vpop.permute.xlu0 %1749 }
 0x333   : > { %5984 = vmatpush3.bf16.xpose.msk.msra.mxu0 %vm7569_vm2, %v5979_v60  ;;  %v7911_v63 = vpop.permute.xlu1 %1745  ;;  %v6430_v60 = vunpack.i.h.bf16 %v7859_v38 }
 0x334   : > { %6011 = vmatprep.subr.msk.bf16.mxu0 %vm7569_vm2, %v6009_v9 }
 0x336   : > { %5530 = vmatmul.mubr.msk.f32.vlgmr.msra.gmra.mrb[16].mxu1 %vm933_vm1, %v7563_v1  ;;  %v7917_v31 = vpop.permute.xlu0 %1753 }
 0x337   : > { %5532 = vmatprep.mubr.msk.f32.mxu1 %vm933_vm1, %v7693_v13  ;;  %6038 = vmatpush3.bf16.xpose.msk.msra.mxu1 %vm7569_vm2, %v6033_v12  ;;  %v7925_v49 = vpop.permute.xlu1 %1916  ;;  %v6384_v13 = vunpack.i.l.bf16 %v7671_v50 }
 0x338   : > { %6041 = vmatprep.subr.msk.bf16.mxu1 %vm7569_vm2, %v6039_v35 }
 0x339   : > { %v6045_v50 = vpack.c.bf16 %v6385_v28, %v6384_v13 }
 0x33a   : > { %5502 = vmatmul.mubr.msk.f32.vlgmr.msra.gmra.mrb[24].mxu0 %vm933_vm1, %v7663_v32  ;;  %5533 = vmatmul.mubr.msk.f32.gmra.mrb[18].mxu1 %vm933_vm1, %v7779_v41  ;;  %v7933_v1 = vpop.permute.xlu0 %2077  ;;  %v6414_v41 = vunpack.i.l.bf16 %v7753_v52 }
 0x33b   : > { %5504 = vmatprep.mubr.msk.f32.mxu0 %vm933_vm1, %v7707_v37  ;;  %5535 = vmatprep.mubr.msk.f32.mxu1 %vm933_vm1, %v7803_v42  ;;  %v7941_v47 = vpop.permute.xlu1 %1918  ;;  %v6415_v37 = vunpack.i.h.bf16 %v7753_v52 }
 0x33c   : > { %6014 = vmatpush3.bf16.xpose.msk.msra.mxu0 %vm7569_vm2, %v6009_v9 }
 0x33d   : > { %6017 = vmatprep.subr.msk.bf16.mxu0 %vm7569_vm2, %v6015_v14  ;;  %v6021_v52 = vpack.c.bf16 %v6415_v37, %v6414_v41 }
 0x33e   : > { %5505 = vmatmul.mubr.msk.f32.gmra.mrb[26].mxu0 %vm933_vm1, %v7711_v20  ;;  %5536 = vmatmul.mubr.msk.f32.gmra.mrb[20].mxu1 %vm933_vm1, %v1581_v43  ;;  %v7950_v32 = vpop.permute.xlu0 %2081 }
 0x33f   : > { %5507 = vmatprep.mubr.msk.f32.mxu0 %vm933_vm1, %v7765_v15  ;;  %5538 = vmatprep.mubr.msk.f32.mxu1 %vm933_vm1, %v7817_v54  ;;  %v7958_v42 = vpop.permute.xlu1 %1920  ;;  %v6425_v15 = vunpack.i.h.bf16 %v7789_v23  ;;  %v6424_v54 = vunpack.i.l.bf16 %v7789_v23 }
 0x340   : > { %6044 = vmatpush3.bf16.xpose.msk.msra.mxu1 %vm7569_vm2, %v6039_v35 }
 0x341   : > { %6047 = vmatprep.subr.msk.bf16.mxu1 %vm7569_vm2, %v6045_v50  ;;  %v6051_v8 = vpack.c.bf16 %v6425_v15, %v6424_v54 }
 0x342   : > { %5508 = vmatmul.mubr.msk.f32.gmra.mrb[28].mxu0 %vm933_vm1, %v7821_v55  ;;  %5539 = vmatmul.mubr.msk.f32.gmra.mrb[22].mxu1 %vm933_vm1, %v1585_v45  ;;  %v7967_v20 = vpop.permute.xlu0 %2085  ;;  %v6390_v45 = vunpack.i.h.bf16 %v7757_v2 }
 0x343   : > { %5585 = vmatprep.mubr.msk.f32.mxu1 %vm933_vm1, %v1909_v4  ;;  %v7972_v0 = vpop.permute.xlu1 %1922 }
 0x344   : > { %6020 = vmatpush3.bf16.xpose.msk.msra.mxu0 %vm7569_vm2, %v6015_v14  ;;  %v6057_v2 = vpack.c.bf16 %v6390_v45, %v6389_v30 }
 0x345   : > { %6023 = vmatprep.subr.msk.bf16.mxu0 %vm7569_vm2, %v6021_v52 }
 0x346   : > { %v6443_v55 = vpop.permute.xlu0 %6442 }
 0x347   : > { %v7978_v34 = vpop.permute.xlu1 %2079  ;;  %v6445_v59 = vunpack.i.h.bf16 %v6443_v55  ;;  %v6444_v10 = vunpack.i.l.bf16 %v6443_v55 }
 0x348   : > { %6050 = vmatpush3.bf16.xpose.msk.msra.mxu1 %vm7569_vm2, %v6045_v50 }
 0x349   : > { %6053 = vmatprep.subr.msk.bf16.mxu1 %vm7569_vm2, %v6051_v8  ;;  %v6081_v33 = vpack.c.bf16 %v6445_v59, %v6444_v10 }
 0x34a   : > { %v6453_v23 = vpop.permute.xlu0 %6452 }
 0x34b   : > { %v6455_v16 = vunpack.i.h.bf16 %v6453_v23  ;;  %v6454_v53 = vunpack.i.l.bf16 %v6453_v23  ;;  %v7984_v18 = vpop.permute.xlu1 %2083 }
 0x34c   : > { %6026 = vmatpush3.bf16.xpose.msk.msra.mxu0 %vm7569_vm2, %v6021_v52 }
 0x34d   : > { %v6027_v43 = vpack.c.bf16 %v6455_v16, %v6454_v53 }
 0x34e   : > { %v1414_v56 = vpop.permute.xlu0 %1413 }
 0x34f   : > { %v7990_v3 = vpop.permute.xlu1 %2087  ;;  %5510 = vmatprep.mubr.msk.f32.mxu0 %vm933_vm1, %v1414_v56  ;;  %6029 = vmatprep.subr.msk.bf16.mxu0 %vm7569_vm2, %v6027_v43 }
 0x350   : > { %6056 = vmatpush3.bf16.xpose.msk.msra.mxu1 %vm7569_vm2, %v6051_v8  ;;  %5511 = vmatmul.mubr.msk.f32.gmra.mrb[30].mxu0 %vm933_vm1, %v7841_v58 }
 0x351   : > { %6082 = vmatprep.subr.bf16.mxu1 %v6081_v33  ;;  %5557 = vmatprep.mubr.msk.f32.mxu0 %vm933_vm1, %v7679_v44  ;;  %v6429_v44 = vunpack.i.l.bf16 %v7859_v38 }
 0x352   : > { %v6458_v36 = vpop.permute.xlu0 %6457 }
 0x353   : > { %v8001_v6 = vpop.permute.xlu1 %2091  ;;  %v6460_v5 = vunpack.i.h.bf16 %v6458_v36  ;;  %v6459_v61 = vunpack.i.l.bf16 %v6458_v36  ;;  %v6063_v35 = vpack.c.bf16 %v6430_v60, %v6429_v44 }
 0x354   : > { %6032 = vmatpush3.bf16.xpose.msk.msra.mxu0 %vm7569_vm2, %v6027_v43 }
 0x355   : > { %6059 = vmatprep.subr.msk.bf16.mxu0 %vm7569_vm2, %v6057_v2 }
 0x356   : > { %v8007_v4 = vpop.permute.xlu0 %6467 }
 0x357   : > { %5586 = vmatmul.mubr.msk.f32.vlgmr.msra.gmra.mrb[24].mxu1 %vm933_vm1, %v7855_v51  ;;  %v6448_v58 = vpop.permute.xlu1 %6447  ;;  %v6470_v54 = vunpack.i.h.bf16 %v8007_v4 }
 0x358   : > { %5588 = vmatprep.mubr.msk.f32.mxu1 %vm933_vm1, %v7873_v29  ;;  %6084 = vmatpush3.bf16.msra.mxu1 %v6081_v33  ;;  %v6450_v12 = vunpack.i.h.bf16 %v6448_v58  ;;  %v6449_v46 = vunpack.i.l.bf16 %v6448_v58 }
 0x35a   : > { %v8015_v24 = vpop.permute.xlu0 %6477  ;;  %v6085_v9 = vpack.c.bf16 %v6450_v12, %v6449_v46 }
 0x35b   : > { %5558 = vmatmul.mubr.msk.f32.vlgmr.msra.gmra.mrb[32].mxu0 %vm933_vm1, %v7769_v39  ;;  %5589 = vmatmul.mubr.msk.f32.gmra.mrb[26].mxu1 %vm933_vm1, %v7883_v19  ;;  %v6463_v51 = vpop.permute.xlu1 %6462  ;;  %v6089_v19 = vpack.c.bf16 %v6460_v5, %v6459_v61  ;;  %v6480_v59 = vunpack.i.h.bf16 %v8015_v24  ;;  %v6479_v10 = vunpack.i.l.bf16 %v8015_v24  ;;  %v8122_v5 = vld [vmem:[%s9442_s5 + $0x28] sm:$0xff] }
 0x35c   : > { %5560 = vmatprep.mubr.msk.f32.mxu0 %vm933_vm1, %v7899_v22  ;;  %5591 = vmatprep.mubr.msk.f32.mxu1 %vm933_vm1, %v7925_v49  ;;  %v6465_v38 = vunpack.i.h.bf16 %v6463_v51  ;;  %v6464_v39 = vunpack.i.l.bf16 %v6463_v51 }
 0x35d   : > { %6062 = vmatpush3.bf16.xpose.msk.msra.mxu0 %vm7569_vm2, %v6057_v2  ;;  %6086 = vmatprep.subr.bf16.mxu1 %v6085_v9 }
 0x35e   : > { %6065 = vmatprep.subr.msk.bf16.mxu0 %vm7569_vm2, %v6063_v35  ;;  %6088 = vmatpush3.bf16.msra.mxu1 %v6085_v9  ;;  %v6488_v29 = vpop.permute.xlu0 %6487  ;;  %v6093_v13 = vpack.c.bf16 %v6465_v38, %v6464_v39  ;;  %v8117_v9 = vld [vmem:[%s9442_s5 + $0x10] sm:$0xff] }
 0x35f   : > { %5561 = vmatmul.mubr.msk.f32.gmra.mrb[34].mxu0 %vm933_vm1, %v7911_v63  ;;  %5592 = vmatmul.mubr.msk.f32.gmra.mrb[28].mxu1 %vm933_vm1, %v7941_v47  ;;  %v6473_v22 = vpop.permute.xlu1 %6472  ;;  %v6490_v16 = vunpack.i.h.bf16 %v6488_v29  ;;  %v6489_v53 = vunpack.i.l.bf16 %v6488_v29  ;;  %v8135_v29 = vld [vmem:[%s9442_s5 + $0x20] sm:$0xff] }
 0x360   : > { %5563 = vmatprep.mubr.msk.f32.mxu0 %vm933_vm1, %v7895_v21  ;;  %5594 = vmatprep.mubr.msk.f32.mxu1 %vm933_vm1, %v7958_v42  ;;  %v6475_v49 = vunpack.i.h.bf16 %v6473_v22  ;;  %v6474_v28 = vunpack.i.l.bf16 %v6473_v22  ;;  %v8142_v22 = vld [vmem:[%s9442_s5 + $0x38] sm:$0xff] }
 0x361   : > { %6090 = vmatprep.subr.bf16.mxu1 %v6089_v19  ;;  %v6105_v43 = vpack.c.bf16 %v6490_v16, %v6489_v53 }
 0x362   : > { %6092 = vmatpush3.bf16.msra.mxu1 %v6089_v19  ;;  %v6508_v63 = vpop.permute.xlu0 %6507  ;;  %v8047_v21 = vpack.c.bf16 %v6475_v49, %v6474_v28  ;;  %v8152_v28 = vld [vmem:[%s9442_s5 + $0x30] sm:$0xff] }
 0x363   : > { %5564 = vmatmul.mubr.msk.f32.gmra.mrb[36].mxu0 %vm933_vm1, %v7907_v11  ;;  %5595 = vmatmul.mubr.msk.f32.gmra.mrb[30].mxu1 %vm933_vm1, %v7972_v0  ;;  %v8043_v14 = vpop.permute.xlu1 %6482  ;;  %v6469_v0 = vunpack.i.l.bf16 %v8007_v4  ;;  %v6509_v33 = vunpack.i.l.bf16 %v6508_v63 }
 0x364   : > { %9509 = vst [vmem:[#allocation9_spill] sm:$0xff] %v8043_v14  ;;  %6094 = vmatprep.subr.bf16.mxu1 %v6093_v13  ;;  %9510 = vst [vmem:[#allocation10_spill] sm:$0xff] %v8047_v21 }
 0x365   : > { %6068 = vmatpush3.bf16.xpose.msk.msra.mxu0 %vm7569_vm2, %v6063_v35  ;;  %v6097_v8 = vpack.c.bf16 %v6470_v54, %v6469_v0  ;;  %v8174_v54 = vld [vmem:[%s9442_s5 + $0x40] sm:$0xff] }
 0x366   : > { %6071 = vmatprep.subr.msk.bf16.mxu0 %vm7569_vm2, %v6069_v48  ;;  %6096 = vmatpush3.bf16.msra.mxu1 %v6093_v13  ;;  %v8051_v47 = vpop.permute.xlu0 %6517 }
 0x367   : > { %9511 = vst [vmem:[#allocation11_spill] sm:$0xff] %v8051_v47  ;;  %6114 = vmatprep.subr.bf16.mxu1 %v8047_v21  ;;  %v8054_v11 = vpop.permute.xlu1 %6492 }
 0x368   : > { %9512 = vst [vmem:[#allocation12_spill] sm:$0xff] %v8054_v11 }
 0x36a   : > { %v8056_v50 = vpop.permute.xlu0 %6527 }
 0x36b   : > { %9513 = vst [vmem:[#allocation13_spill] sm:$0xff] %v8056_v50  ;;  %v6498_v37 = vpop.permute.xlu1 %6497 }
 0x36c   : > { %v6500_v41 = vunpack.i.h.bf16 %v6498_v37  ;;  %v6499_v42 = vunpack.i.l.bf16 %v6498_v37 }
 0x36d   : > { %6074 = vmatpush3.bf16.xpose.msk.msra.mxu0 %vm7569_vm2, %v6069_v48 }
 0x36e   : > { %v6075_v52 = vpack.c.bf16 %v6500_v41, %v6499_v42  ;;  %v1752_v15 = vpop.permute.xlu0 %1751 }
 0x36f   : > { %5566 = vmatprep.mubr.msk.f32.mxu0 %vm933_vm1, %v1752_v15 }
 0x370   : > { %5567 = vmatmul.mubr.msk.f32.gmra.mrb[38].mxu0 %vm933_vm1, %v7917_v31  ;;  %6077 = vmatprep.subr.msk.bf16.mxu0 %vm7569_vm2, %v6075_v52 }
 0x371   : > { %5613 = vmatprep.mubr.msk.f32.mxu0 %vm933_vm1, %v7933_v1  ;;  %v6101_v1 = vpack.c.bf16 %v6480_v59, %v6479_v10 }
 0x372   : > { %v8069_v55 = vpop.permute.xlu0 %6542 }
 0x373   : > { %9514 = vst [vmem:[#allocation14_spill] sm:$0xff] %v8069_v55 }
 0x375   : > { %6080 = vmatpush3.bf16.xpose.msk.msra.mxu0 %vm7569_vm2, %v6075_v52  ;;  %v8169_v52 = vld [vmem:[%s9442_s5 + $0x48] sm:$0xff] }
 0x376   : > { %6098 = vmatprep.subr.bf16.mxu0 %v6097_v8  ;;  %v8073_v23 = vpop.permute.xlu0 %6552 }
 0x377   : > { %9515 = vst [vmem:[#allocation15_spill] sm:$0xff] %v8073_v23 }
 0x37a   : > { %v8077_v31 = vpop.permute.xlu0 %6562 }
 0x37b   : > { %9516 = vst [vmem:[#allocation16_spill] sm:$0xff] %v8077_v31  ;;  %v8337_v31 = vld [vmem:[%s9442_s5 + $0xa8] sm:$0xff] }
 0x37c   : > { %5614 = vmatmul.mubr.msk.f32.vlgmr.msra.gmra.mrb[40].mxu0 %vm933_vm1, %v7978_v34  ;;  %v6510_v34 = vunpack.i.h.bf16 %v6508_v63 }
 0x37d   : > { %5616 = vmatprep.mubr.msk.f32.mxu0 %vm933_vm1, %v7950_v32  ;;  %6100 = vmatpush3.bf16.msra.mxu0 %v6097_v8 }
 0x37e   : > { %6102 = vmatprep.subr.bf16.mxu0 %v6101_v1  ;;  %v2090_v27 = vpop.permute.xlu0 %2089 }
 0x380   : > { %5617 = vmatmul.mubr.msk.f32.gmra.mrb[42].mxu0 %vm933_vm1, %v7984_v18  ;;  %v8092_v18 = vpack.c.bf16 %v6510_v34, %v6509_v33 }
 0x381   : > { %5619 = vmatprep.mubr.msk.f32.mxu0 %vm933_vm1, %v7967_v20  ;;  %6104 = vmatpush3.bf16.msra.mxu0 %v6101_v1  ;;  %v878_v20 = vld [vmem:[%s9442_s5 + $0x8] sm:$0xff]  ;;  %v8189_v1 = vld [vmem:[%s9442_s5 + $0x58] sm:$0xff] }
 0x382   : > { %6106 = vmatprep.subr.bf16.mxu0 %v6105_v43  ;;  %v6573_v56 = vpop.permute.xlu0 %6572  ;;  %9517 = vst [vmem:[#allocation17_spill] sm:$0xff] %v8092_v18 }
 0x383   : > { %v6575_v45 = vunpack.i.h.bf16 %v6573_v56  ;;  %v6574_v30 = vunpack.i.l.bf16 %v6573_v56 }
 0x384   : > { %5620 = vmatmul.mubr.msk.f32.gmra.mrb[44].mxu0 %vm933_vm1, %v7990_v3  ;;  %v877_v3 = vld [vmem:[%s9442_s5] sm:$0xff] }
 0x385   : > { %5622 = vmatprep.mubr.msk.f32.mxu0 %vm933_vm1, %v2090_v27  ;;  %6108 = vmatpush3.bf16.msra.mxu0 %v6105_v43  ;;  %v6109_v32 = vpack.c.bf16 %v6575_v45, %v6574_v30 }
 0x387   : > { %6110 = vmatprep.subr.bf16.mxu0 %v6109_v32 }
 0x388   : > { %5623 = vmatmul.mubr.msk.f32.gmra.mrb[46].mxu0 %vm933_vm1, %v8001_v6  ;;  %v880_v6 = vld [vmem:[%s9442_s5 + $0x18] sm:$0xff] }
 0x389   : > { %6112 = vmatpush3.bf16.msra.mxu0 %v6109_v32 }
 0x38a   : > { %6130 = vmatprep.subr.bf16.mxu0 %v8092_v18 }
 0x3c7   : > { %v5419_v36 = vpop.f32.mrb[0].mxu1 }
 0x3c8   : > { %v8101_v2 = vadd.f32 %v5419_v36, %v878_v20  ;;  %v1032_v4 = vpop.f32.mrb[1].mxu1 }
 0x3c9   : > { %v8103_v58 = vadd.f32 %v1032_v4, %v877_v3 }
 0x3ca   : > { %v2250_v60 = vsel %vm2246_vm3, %v8101_v2, -inf }
 0x3cb   : > { %2251 = vmax.xlane.f32.xlu1 %v2250_v60  ;;  %v5422_v44 = vpop.f32.mrb[2].mxu1  ;;  %v2247_v12 = vsel %vm2246_vm3, %v8103_v58, -inf }
 0x3cc   : > { %v8112_v46 = vadd.f32 %v5422_v44, %v880_v6  ;;  %v1042_v24 = vpop.f32.mrb[3].mxu1  ;;  %2248 = vmax.xlane.f32.xlu0 %v2247_v12 }
 0x3cd   : > { %v8127_v51 = vadd.f32 %v1042_v24, %v8117_v9 }
 0x3ce   : > { %v2256_v61 = vsel %vm2246_vm3, %v8112_v46, -inf }
 0x3cf   : > { %v5425_v35 = vpop.f32.mrb[4].mxu1  ;;  %v2253_v7 = vsel %vm2246_vm3, %v8127_v51, -inf }
 0x3d0   : > { %v8130_v38 = vadd.f32 %v5425_v35, %v8122_v5  ;;  %v1052_v39 = vpop.f32.mrb[5].mxu1  ;;  %2257 = vmax.xlane.f32.xlu0 %v2256_v61  ;;  %v8217_v35 = vld [vmem:[%s9442_s5 + $0x68] sm:$0xff] }
 0x3d1   : > { %v8145_v25 = vadd.f32 %v1052_v39, %v8135_v29 }
 0x3d2   : > { %v2262_v19 = vsel %vm2246_vm3, %v8130_v38, -inf }
 0x3d3   : > { %2263 = vmax.xlane.f32.xlu1 %v2262_v19  ;;  %v2259_v41 = vsel %vm2246_vm3, %v8145_v25, -inf }
 0x3d4   : > { %v5428_v49 = vpop.f32.mrb[6].mxu1  ;;  %2254 = vmax.xlane.f32.xlu0 %v2253_v7 }
 0x3d5   : > { %v8155_v63 = vadd.f32 %v5428_v49, %v8142_v22  ;;  %v1062_v13 = vpop.f32.mrb[7].mxu1 }
 0x3d6   : > { %v8158_v48 = vadd.f32 %v1062_v13, %v8152_v28 }
 0x3d7   : > { %v2268_v37 = vsel %vm2246_vm3, %v8155_v63, -inf }
 0x3d8   : > { %2269 = vmax.xlane.f32.xlu1 %v2268_v37  ;;  %2260 = vmax.xlane.f32.xlu0 %v2259_v41  ;;  %v2265_v42 = vsel %vm2246_vm3, %v8158_v48, -inf }
 0x3dc   : > { %2266 = vmax.xlane.f32.xlu0 %v2265_v42  ;;  %v8232_v42 = vld [vmem:[%s9442_s5 + $0x60] sm:$0xff] }
 0x3e8   : > { %v5475_v15 = vpop.f32.mrb[8].mxu1 }
 0x3e9   : > { %v8177_v0 = vadd.f32 %v5475_v15, %v8169_v52  ;;  %v1362_v8 = vpop.f32.mrb[9].mxu1 }
 0x3ea   : > { %v8180_v59 = vadd.f32 %v1362_v8, %v8174_v54 }
 0x3eb   : > { %v5447_v10 = vpop.f32.mrb[16].mxu0  ;;  %v2298_v16 = vsel %vm2246_vm3, %v8177_v0, -inf }
 0x3ec   : > { %v8184_v53 = vadd.f32 %v5447_v10, %v878_v20  ;;  %2299 = vmax.xlane.f32.xlu1 %v2298_v16  ;;  %v5478_v27 = vpop.f32.mrb[10].mxu1  ;;  %v1193_v43 = vpop.f32.mrb[17].mxu0  ;;  %v2295_v32 = vsel %vm2246_vm3, %v8180_v59, -inf  ;;  %v8203_v20 = vld [vmem:[%s9442_s5 + $0x50] sm:$0xff] }
 0x3ed   : > { %v1372_v56 = vpop.f32.mrb[11].mxu1  ;;  %v8191_v45 = vadd.f32 %v1193_v43, %v877_v3  ;;  %v8196_v34 = vadd.f32 %v5478_v27, %v8189_v1  ;;  %v8247_v27 = vld [vmem:[%s9442_s5 + $0x78] sm:$0xff] }
 0x3ee   : > { %v2274_v30 = vsel %vm2246_vm3, %v8184_v53, -inf  ;;  %v8210_v12 = vadd.f32 %v1372_v56, %v8203_v20 }
 0x3ef   : > { %v5450_v33 = vpop.f32.mrb[18].mxu0  ;;  %2275 = vmax.xlane.f32.xlu0 %v2274_v30  ;;  %v2271_v44 = vsel %vm2246_vm3, %v8191_v45, -inf  ;;  %v2304_v61 = vsel %vm2246_vm3, %v8196_v34, -inf }
 0x3f0   : > { %v5481_v36 = vpop.f32.mrb[12].mxu1  ;;  %2296 = vmax.xlane.f32.xlu1 %v2295_v32  ;;  %v1203_v3 = vpop.f32.mrb[19].mxu0  ;;  %v8205_v60 = vadd.f32 %v5450_v33, %v880_v6  ;;  %v2301_v41 = vsel %vm2246_vm3, %v8210_v12, -inf  ;;  %v8262_v33 = vld [vmem:[%s9442_s5 + $0x70] sm:$0xff] }
 0x3f1   : > { %v1382_v4 = vpop.f32.mrb[13].mxu1  ;;  %v8220_v7 = vadd.f32 %v1203_v3, %v8117_v9  ;;  %v8225_v13 = vadd.f32 %v5481_v36, %v8217_v35 }
 0x3f2   : > { %v2280_v49 = vsel %vm2246_vm3, %v8205_v60, -inf  ;;  %v8240_v10 = vadd.f32 %v1382_v4, %v8232_v42 }
 0x3f3   : > { %v5453_v24 = vpop.f32.mrb[20].mxu0  ;;  %2272 = vmax.xlane.f32.xlu0 %v2271_v44  ;;  %v2277_v8 = vsel %vm2246_vm3, %v8220_v7, -inf  ;;  %v2310_v16 = vsel %vm2246_vm3, %v8225_v13, -inf }
 0x3f4   : > { %v5484_v39 = vpop.f32.mrb[14].mxu1  ;;  %2305 = vmax.xlane.f32.xlu1 %v2304_v61  ;;  %v1213_v6 = vpop.f32.mrb[21].mxu0  ;;  %v8235_v9 = vadd.f32 %v5453_v24, %v8122_v5  ;;  %v2307_v30 = vsel %vm2246_vm3, %v8240_v10, -inf }
 0x3f5   : > { %v1392_v19 = vpop.f32.mrb[15].mxu1  ;;  %v8250_v43 = vadd.f32 %v1213_v6, %v8135_v29  ;;  %v8255_v56 = vadd.f32 %v5484_v39, %v8247_v27  ;;  %v8289_v39 = vld [vmem:[%s9442_s5 + $0x80] sm:$0xff] }
 0x3f6   : > { %v2286_v5 = vsel %vm2246_vm3, %v8235_v9, -inf  ;;  %v8270_v36 = vadd.f32 %v1392_v19, %v8262_v33 }
 0x3f7   : > { %v5456_v37 = vpop.f32.mrb[22].mxu0  ;;  %2281 = vmax.xlane.f32.xlu0 %v2280_v49  ;;  %v2283_v29 = vsel %vm2246_vm3, %v8250_v43, -inf  ;;  %v2316_v3 = vsel %vm2246_vm3, %v8255_v56, -inf }
 0x3f8   : > { %2302 = vmax.xlane.f32.xlu1 %v2301_v41  ;;  %v1223_v15 = vpop.f32.mrb[23].mxu0  ;;  %v8265_v32 = vadd.f32 %v5456_v37, %v8142_v22  ;;  %v8282_v22 = vld [vmem:[%s9442_s5 + $0x88] sm:$0xff]  ;;  %v2313_v24 = vsel %vm2246_vm3, %v8270_v36, -inf }
 0x3f9   : > { %v8275_v4 = vadd.f32 %v1223_v15, %v8152_v28  ;;  %v8304_v15 = vld [vmem:[%s9442_s5 + $0x98] sm:$0xff] }
 0x3fa   : > { %v2292_v44 = vsel %vm2246_vm3, %v8265_v32, -inf }
 0x3fb   : > { %2278 = vmax.xlane.f32.xlu0 %v2277_v8  ;;  %v2289_v19 = vsel %vm2246_vm3, %v8275_v4, -inf }
 0x3fc   : > { %2311 = vmax.xlane.f32.xlu1 %v2310_v16 }
 0x3ff   : > { %2287 = vmax.xlane.f32.xlu0 %v2286_v5 }
 0x400   : > { %2308 = vmax.xlane.f32.xlu1 %v2307_v30 }
 0x403   : > { %2284 = vmax.xlane.f32.xlu0 %v2283_v29 }
 0x404   : > { %2317 = vmax.xlane.f32.xlu1 %v2316_v3 }
 0x407   : > { %2293 = vmax.xlane.f32.xlu0 %v2292_v44 }
 0x408   : > { %2314 = vmax.xlane.f32.xlu1 %v2313_v24 }
 0x409   : > { %v5531_v61 = vpop.f32.mrb[16].mxu1 }
 0x40a   : > { %v8292_v28 = vadd.f32 %v5531_v61, %v8282_v22  ;;  %v1700_v6 = vpop.f32.mrb[17].mxu1  ;;  %v8322_v61 = vld [vmem:[%s9442_s5 + $0x90] sm:$0xff] }
 0x40b   : > { %2290 = vmax.xlane.f32.xlu0 %v2289_v19  ;;  %v8297_v49 = vadd.f32 %v1700_v6, %v8289_v39 }
 0x40c   : > { %v2346_v37 = vsel %vm2246_vm3, %v8292_v28, -inf }
 0x40d   : > { %v5503_v41 = vpop.f32.mrb[24].mxu0  ;;  %v5534_v8 = vpop.f32.mrb[18].mxu1  ;;  %2347 = vmax.xlane.f32.xlu1 %v2346_v37  ;;  %v2343_v44 = vsel %vm2246_vm3, %v8297_v49, -inf }
 0x40e   : > { %v8307_v16 = vadd.f32 %v5503_v41, %v8169_v52  ;;  %v1531_v5 = vpop.f32.mrb[25].mxu0  ;;  %v1710_v30 = vpop.f32.mrb[19].mxu1  ;;  %v8310_v29 = vadd.f32 %v5534_v8, %v8304_v15 }
 0x40f   : > { %v8313_v3 = vadd.f32 %v1531_v5, %v8174_v54  ;;  %v8325_v54 = vadd.f32 %v1710_v30, %v8322_v61 }
 0x410   : > { %v2322_v24 = vsel %vm2246_vm3, %v8307_v16, -inf  ;;  %v2352_v8 = vsel %vm2246_vm3, %v8310_v29, -inf }
 0x411   : > { %v5506_v52 = vpop.f32.mrb[26].mxu0  ;;  %v5537_v6 = vpop.f32.mrb[20].mxu1  ;;  %2344 = vmax.xlane.f32.xlu1 %v2343_v44  ;;  %2323 = vmax.xlane.f32.xlu0 %v2322_v24  ;;  %v2319_v5 = vsel %vm2246_vm3, %v8313_v3, -inf  ;;  %v2349_v23 = vsel %vm2246_vm3, %v8325_v54, -inf }
 0x412   : > { %v1541_v19 = vpop.f32.mrb[27].mxu0  ;;  %v1720_v37 = vpop.f32.mrb[21].mxu1  ;;  %v8328_v41 = vadd.f32 %v5506_v52, %v8189_v1  ;;  %v8340_v1 = vadd.f32 %v5537_v6, %v8337_v31 }
 0x413   : > { %v8343_v52 = vadd.f32 %v1541_v19, %v8203_v20 }
 0x414   : > { %v2328_v62 = vsel %vm2246_vm3, %v8328_v41, -inf  ;;  %v2358_v20 = vsel %vm2246_vm3, %v8340_v1, -inf }
 0x415   : > { %v5509_v44 = vpop.f32.mrb[28].mxu0  ;;  %v5540_v24 = vpop.f32.mrb[22].mxu1  ;;  %2353 = vmax.xlane.f32.xlu1 %v2352_v8  ;;  %2320 = vmax.xlane.f32.xlu0 %v2319_v5  ;;  %v8355_v8 = vadd.f32 %v1720_v37, %v8352_v17  ;;  %v2325_v19 = vsel %vm2246_vm3, %v8343_v52, -inf  ;;  %v8367_v5 = vld [vmem:[%s9442_s5 + $0xb8] sm:$0xff] }
 0x416   : > { %v1551_v30 = vpop.f32.mrb[29].mxu0  ;;  %v1730_v26 = vpop.f32.mrb[23].mxu1  ;;  %v8358_v6 = vadd.f32 %v5509_v44, %v8217_v35  ;;  %v8382_v44 = vld [vmem:[%s9442_s5 + $0xb0] sm:$0xff] }
 0x417   : > { %v2355_v35 = vsel %vm2246_vm3, %v8355_v8, -inf }
 0x418   : > { %v2334_v37 = vsel %vm2246_vm3, %v8358_v6, -inf }
 0x419   : > { %2350 = vmax.xlane.f32.xlu1 %v2349_v23  ;;  %2329 = vmax.xlane.f32.xlu0 %v2328_v62  ;;  %v8370_v62 = vadd.f32 %v5540_v24, %v8367_v5  ;;  %v8373_v23 = vadd.f32 %v1551_v30, %v8232_v42  ;;  %v8385_v24 = vadd.f32 %v1730_v26, %v8382_v44 }
 0x41b   : > { %9518 = vst [vmem:[#allocation18_spill] sm:$0xff] %v8370_v62  ;;  %9519 = vst [vmem:[#allocation19_spill] sm:$0xff] %v8385_v24  ;;  %v2364_v30 = vsel %vm2246_vm3, %v8370_v62, -inf }
 0x41d   : > { %2359 = vmax.xlane.f32.xlu1 %v2358_v20  ;;  %2326 = vmax.xlane.f32.xlu0 %v2325_v19  ;;  %v2331_v19 = vsel %vm2246_vm3, %v8373_v23, -inf }
 0x421   : > { %2356 = vmax.xlane.f32.xlu1 %v2355_v35  ;;  %2335 = vmax.xlane.f32.xlu0 %v2334_v37  ;;  %v8396_v37 = vpop.permute.xlu1 %6502 }
 0x422   : > { %9520 = vst [vmem:[#allocation20_spill] sm:$0xff] %v8396_v37 }
 0x423   : > { %v5512_v20 = vpop.f32.mrb[30].mxu0 }
 0x424   : > { %v8388_v42 = vadd.f32 %v5512_v20, %v8247_v27  ;;  %v1561_v55 = vpop.f32.mrb[31].mxu0  ;;  %v8404_v27 = vld [vmem:[%s9442_s5 + $0xc8] sm:$0xff]  ;;  %v2361_v20 = vsel %vm2246_vm3, %v8385_v24, -inf  ;;  %v905_v24 = vld [vmem:[%s9442_s5 + $0xe0] sm:$0xff] }
 0x425   : > { %2365 = vmax.xlane.f32.xlu1 %v2364_v30  ;;  %2332 = vmax.xlane.f32.xlu0 %v2331_v19  ;;  %v8399_v26 = vadd.f32 %v1561_v55, %v8262_v33  ;;  %v8411_v19 = vld [vmem:[%s9442_s5 + $0xc0] sm:$0xff]  ;;  %v8418_v50 = vpop.permute.xlu1 %6512 }
 0x426   : > { %v2340_v35 = vsel %vm2246_vm3, %v8388_v42, -inf  ;;  %9522 = vst [vmem:[#allocation22_spill] sm:$0xff] %v8418_v50 }
 0x427   : > { %v2337_v33 = vsel %vm2246_vm3, %v8399_v26, -inf }
 0x429   : > { %2362 = vmax.xlane.f32.xlu1 %v2361_v20  ;;  %2341 = vmax.xlane.f32.xlu0 %v2340_v35 }
 0x42a   : > { %v5587_v30 = vpop.f32.mrb[24].mxu1 }
 0x42b   : > { %v8414_v18 = vadd.f32 %v5587_v30, %v8404_v27  ;;  %v2038_v55 = vpop.f32.mrb[25].mxu1 }
 0x42c   : > { %v8421_v47 = vadd.f32 %v2038_v55, %v8411_v19 }
 0x42d   : > { %9521 = vst [vmem:[#allocation21_spill] sm:$0xff] %v8414_v18  ;;  %v2394_v35 = vsel %vm2246_vm3, %v8414_v18, -inf  ;;  %2338 = vmax.xlane.f32.xlu0 %v2337_v33  ;;  %v8448_v18 = vpop.permute.xlu1 %6522 }
 0x42e   : > { %9523 = vst [vmem:[#allocation23_spill] sm:$0xff] %v8421_v47  ;;  %v5559_v20 = vpop.f32.mrb[32].mxu0  ;;  %v5590_v30 = vpop.f32.mrb[26].mxu1  ;;  %2395 = vmax.xlane.f32.xlu1 %v2394_v35  ;;  %v2391_v33 = vsel %vm2246_vm3, %v8421_v47, -inf  ;;  %v8446_v35 = vld [vmem:[%s9442_s5 + $0xd0] sm:$0xff]  ;;  %9527 = vst [vmem:[#allocation27_spill] sm:$0xff] %v8448_v18 }
 0x42f   : > { %v8431_v57 = vadd.f32 %v5559_v20, %v8282_v22  ;;  %v1869_v37 = vpop.f32.mrb[33].mxu0  ;;  %v2048_v50 = vpop.f32.mrb[27].mxu1  ;;  %v8434_v55 = vadd.f32 %v5590_v30, %v8428_v40 }
 0x430   : > { %v8437_v21 = vadd.f32 %v1869_v37, %v8289_v39  ;;  %v8451_v39 = vadd.f32 %v2048_v50, %v8446_v35 }
 0x431   : > { %9524 = vst [vmem:[#allocation24_spill] sm:$0xff] %v8431_v57  ;;  %9525 = vst [vmem:[#allocation25_spill] sm:$0xff] %v8434_v55  ;;  %v2370_v11 = vsel %vm2246_vm3, %v8431_v57, -inf  ;;  %v2400_v47 = vsel %vm2246_vm3, %v8434_v55, -inf }
 0x432   : > { %9526 = vst [vmem:[#allocation26_spill] sm:$0xff] %v8437_v21  ;;  %v5562_v22 = vpop.f32.mrb[34].mxu0  ;;  %v5593_v20 = vpop.f32.mrb[28].mxu1  ;;  %2392 = vmax.xlane.f32.xlu1 %v2391_v33  ;;  %2371 = vmax.xlane.f32.xlu0 %v2370_v11  ;;  %9528 = vst [vmem:[#allocation28_spill] sm:$0xff] %v8451_v39  ;;  %v2367_v57 = vsel %vm2246_vm3, %v8437_v21, -inf  ;;  %v8463_v11 = vld [vmem:[%s9442_s5 + $0xe8] sm:$0xff] }
 0x433   : > { %v1879_v30 = vpop.f32.mrb[35].mxu0  ;;  %v2058_v14 = vpop.f32.mrb[29].mxu1  ;;  %v8454_v37 = vadd.f32 %v5562_v22, %v8304_v15  ;;  %v8466_v15 = vadd.f32 %v5593_v20, %v8463_v11  ;;  %v2397_v55 = vsel %vm2246_vm3, %v8451_v39, -inf  ;;  %v908_v39 = vld [vmem:[%s9442_s5 + $0xf8] sm:$0xff] }
 0x434   : > { %v8469_v22 = vadd.f32 %v1879_v30, %v8322_v61 }
 0x435   : > { %9529 = vst [vmem:[#allocation29_spill] sm:$0xff] %v8466_v15  ;;  %v2376_v21 = vsel %vm2246_vm3, %v8454_v37, -inf  ;;  %v2406_v61 = vsel %vm2246_vm3, %v8466_v15, -inf }
 0x436   : > { %v5565_v33 = vpop.f32.mrb[36].mxu0  ;;  %v5596_v62 = vpop.f32.mrb[30].mxu1  ;;  %2401 = vmax.xlane.f32.xlu1 %v2400_v47  ;;  %2368 = vmax.xlane.f32.xlu0 %v2367_v57  ;;  %v8480_v47 = vadd.f32 %v2058_v14, %v905_v24  ;;  %v2373_v30 = vsel %vm2246_vm3, %v8469_v22, -inf }
 0x437   : > { %v1889_v50 = vpop.f32.mrb[37].mxu0  ;;  %v2068_v18 = vpop.f32.mrb[31].mxu1  ;;  %v8483_v20 = vadd.f32 %v5565_v33, %v8337_v31 }
 0x438   : > { %v8478_v57 = vpop.permute.xlu1 %6532  ;;  %v8495_v14 = vadd.f32 %v1889_v50, %v8352_v17  ;;  %v2403_v31 = vsel %vm2246_vm3, %v8480_v47, -inf }
 0x439   : > { %9530 = vst [vmem:[#allocation30_spill] sm:$0xff] %v8478_v57  ;;  %v907_v57 = vld [vmem:[%s9442_s5 + $0xf0] sm:$0xff] }
 0x43a   : > { %2398 = vmax.xlane.f32.xlu1 %v2397_v55  ;;  %2377 = vmax.xlane.f32.xlu0 %v2376_v21  ;;  %v8492_v21 = vadd.f32 %v5596_v62, %v908_v39  ;;  %v2382_v55 = vsel %vm2246_vm3, %v8483_v20, -inf  ;;  %v8509_v50 = vadd.f32 %v2068_v18, %v907_v57  ;;  %v2379_v15 = vsel %vm2246_vm3, %v8495_v14, -inf }
 0x43c   : > { %9531 = vst [vmem:[#allocation31_spill] sm:$0xff] %v8492_v21  ;;  %v8501_v33 = vpop.permute.xlu1 %6537  ;;  %v2409_v18 = vsel %vm2246_vm3, %v8509_v50, -inf }
 0x43d   : > { %9532 = vst [vmem:[#allocation32_spill] sm:$0xff] %v8501_v33 }
 0x43e   : > { %2407 = vmax.xlane.f32.xlu1 %v2406_v61  ;;  %2374 = vmax.xlane.f32.xlu0 %v2373_v30  ;;  %v2412_v30 = vsel %vm2246_vm3, %v8492_v21, -inf }
 0x442   : > { %2404 = vmax.xlane.f32.xlu1 %v2403_v31  ;;  %2383 = vmax.xlane.f32.xlu0 %v2382_v55  ;;  %v8517_v31 = vpop.permute.xlu1 %6547 }
 0x443   : > { %v5568_v61 = vpop.f32.mrb[38].mxu0  ;;  %9533 = vst [vmem:[#allocation33_spill] sm:$0xff] %v8517_v31 }
 0x444   : > { %v8507_v62 = vadd.f32 %v5568_v61, %v8367_v5  ;;  %v1899_v17 = vpop.f32.mrb[39].mxu0 }
 0x445   : > { %v8520_v55 = vadd.f32 %v1899_v17, %v8382_v44 }
 0x446   : > { %2413 = vmax.xlane.f32.xlu1 %v2412_v30  ;;  %2380 = vmax.xlane.f32.xlu0 %v2379_v15  ;;  %v2388_v33 = vsel %vm2246_vm3, %v8507_v62, -inf  ;;  %v8526_v61 = vpop.permute.xlu1 %6557 }
 0x447   : > { %v2385_v5 = vsel %vm2246_vm3, %v8520_v55, -inf  ;;  %9534 = vst [vmem:[#allocation34_spill] sm:$0xff] %v8526_v61 }
 0x44a   : > { %2410 = vmax.xlane.f32.xlu1 %v2409_v18  ;;  %2389 = vmax.xlane.f32.xlu0 %v2388_v33  ;;  %v8538_v18 = vpop.permute.xlu1 %6567 }
 0x44b   : > { %9536 = vst [vmem:[#allocation36_spill] sm:$0xff] %v8538_v18 }
 0x44e   : > { %2386 = vmax.xlane.f32.xlu0 %v2385_v5 }
 0x44f   : > { %v5615_v15 = vpop.f32.mrb[40].mxu0 }
 0x450   : > { %v8529_v30 = vadd.f32 %v5615_v15, %v8404_v27  ;;  %v2207_v21 = vpop.f32.mrb[41].mxu0  ;;  %v8543_v27 = vpop.permute.xlu0 %6577 }
 0x451   : > { %v8532_v31 = vadd.f32 %v2207_v21, %v8411_v19  ;;  %9538 = vst [vmem:[#allocation38_spill] sm:$0xff] %v8543_v27 }
 0x452   : > { %v2418_v44 = vsel %vm2246_vm3, %v8529_v30, -inf }
 0x453   : > { %9535 = vst [vmem:[#allocation35_spill] sm:$0xff] %v8532_v31  ;;  %v5618_v17 = vpop.f32.mrb[42].mxu0  ;;  %2419 = vmax.xlane.f32.xlu1 %v2418_v44  ;;  %v2415_v33 = vsel %vm2246_vm3, %v8532_v31, -inf }
 0x454   : > { %v8541_v5 = vadd.f32 %v5618_v17, %v8428_v40  ;;  %v2217_v61 = vpop.f32.mrb[43].mxu0  ;;  %2416 = vmax.xlane.f32.xlu0 %v2415_v33 }
 0x455   : > { %v8546_v19 = vadd.f32 %v2217_v61, %v8446_v35 }
 0x456   : > { %9537 = vst [vmem:[#allocation37_spill] sm:$0xff] %v8541_v5  ;;  %v2424_v21 = vsel %vm2246_vm3, %v8541_v5, -inf }
 0x457   : > { %v5621_v15 = vpop.f32.mrb[44].mxu0  ;;  %2425 = vmax.xlane.f32.xlu1 %v2424_v21  ;;  %v2421_v44 = vsel %vm2246_vm3, %v8546_v19, -inf }
 0x458   : > { %v8553_v18 = vadd.f32 %v5621_v15, %v8463_v11  ;;  %v2227_v40 = vpop.f32.mrb[45].mxu0  ;;  %2422 = vmax.xlane.f32.xlu0 %v2421_v44  ;;  %v2252_v17 = vpop.xlane.xlu1 %2251 }
 0x459   : > { %v8555_v33 = vadd.f32 %v2227_v40, %v905_v24  ;;  %v2440_v27 = vsub.f32 %v8101_v2, %v2252_v17  ;;  %v2249_v35 = vpop.xlane.xlu0 %2248 }
 0x45a   : > { %9539 = vst [vmem:[#allocation39_spill] sm:$0xff] %v8553_v18  ;;  %v2430_v61 = vsel %vm2246_vm3, %v8553_v18, -inf  ;;  %v2439_v5 = vsub.f32 %v8103_v58, %v2249_v35 }
 0x45b   : > { %9540 = vst [vmem:[#allocation40_spill] sm:$0xff] %v8555_v33  ;;  %v5624_v21 = vpop.f32.mrb[46].mxu0  ;;  %2431 = vmax.xlane.f32.xlu1 %v2430_v61  ;;  %v2505_v31 = vmul.f32 1.442695, %v2440_v27  ;;  %v2427_v11 = vsel %vm2246_vm3, %v8555_v33, -inf }
 0x45c   : > { %v8563_v15 = vadd.f32 %v5624_v21, %v908_v39  ;;  %v2237_v44 = vpop.f32.mrb[47].mxu0  ;;  %2428 = vmax.xlane.f32.xlu0 %v2427_v11  ;;  %v2503_v24 = vmul.f32 1.442695, %v2439_v5 }
 0x45d   : > { %v8565_v40 = vadd.f32 %v2237_v44, %v907_v57  ;;  %6643 = vpow2.f32 %v2505_v31  ;;  %v2258_v2 = vpop.xlane.xlu0 %2257 }
 0x45e   : > { %9541 = vst [vmem:[#allocation41_spill] sm:$0xff] %v8563_v15  ;;  %6645 = vpow2.f32 %v2503_v24  ;;  %v2436_v17 = vsel %vm2246_vm3, %v8563_v15, -inf  ;;  %v2442_v58 = vsub.f32 %v8112_v46, %v2258_v2 }
 0x45f   : > { %9542 = vst [vmem:[#allocation42_spill] sm:$0xff] %v8565_v40  ;;  %2437 = vmax.xlane.f32.xlu1 %v2436_v17  ;;  %v2433_v27 = vsel %vm2246_vm3, %v8565_v40, -inf }
 0x460   : > { %2434 = vmax.xlane.f32.xlu0 %v2433_v27  ;;  %v2509_v39 = vmul.f32 1.442695, %v2442_v58  ;;  %v2264_v35 = vpop.xlane.xlu1 %2263 }
 0x461   : > { %v2444_v61 = vsub.f32 %v8130_v38, %v2264_v35  ;;  %v2255_v5 = vpop.xlane.xlu0 %2254 }
 0x462   : > { %6647 = vpow2.f32 %v2509_v39  ;;  %v2441_v57 = vsub.f32 %v8127_v51, %v2255_v5 }
 0x463   : > { %v2513_v31 = vmul.f32 1.442695, %v2444_v61 }
 0x464   : > { %v2507_v21 = vmul.f32 1.442695, %v2441_v57 }
 0x465   : > { %6649 = vpow2.f32 %v2513_v31  ;;  %v2270_v11 = vpop.xlane.xlu1 %2269  ;;  %v2261_v44 = vpop.xlane.xlu0 %2260 }
 0x466   : > { %6651 = vpow2.f32 %v2507_v21  ;;  %v2446_v46 = vsub.f32 %v8155_v63, %v2270_v11  ;;  %v2443_v24 = vsub.f32 %v8145_v25, %v2261_v44 }
 0x467   : > { %v8576_v2 = vpop.eup %6643 }
 0x468   : > { %v8578_v17 = vpop.eup %6645  ;;  %v2517_v58 = vmul.f32 1.442695, %v2446_v46  ;;  %v2511_v38 = vmul.f32 1.442695, %v2443_v24  ;;  %v2634_v27 = vsel %vm2246_vm3, %v8576_v2, 0.0 }
 0x469   : > { %2635 = vadd.xlane.f32.xlu1 %v2634_v27  ;;  %v2267_v51 = vpop.xlane.xlu0 %2266  ;;  %v2631_v39 = vsel %vm2246_vm3, %v8578_v17, 0.0 }
 0x46a   : > { %6653 = vpow2.f32 %v2517_v58  ;;  %v2445_v35 = vsub.f32 %v8158_v48, %v2267_v51  ;;  %2632 = vadd.xlane.f32.xlu0 %v2631_v39 }
 0x46b   : > { %6655 = vpow2.f32 %v2511_v38 }
 0x46c   : > { %v8585_v25 = vpop.eup %6647  ;;  %v2515_v63 = vmul.f32 1.442695, %v2445_v35 }
 0x46d   : > { %v2640_v61 = vsel %vm2246_vm3, %v8585_v25, 0.0 }
 0x46e   : > { %6657 = vpow2.f32 %v2515_v63  ;;  %2641 = vadd.xlane.f32.xlu1 %v2640_v61 }
 0x46f   : > { %v8589_v5 = vpop.eup %6649 }
 0x470   : > { %v8591_v57 = vpop.eup %6651  ;;  %v2646_v31 = vsel %vm2246_vm3, %v8589_v5, 0.0 }
 0x471   : > { %v2637_v48 = vsel %vm2246_vm3, %v8591_v57, 0.0 }
 0x472   : > { %2647 = vadd.xlane.f32.xlu1 %v2646_v31  ;;  %2638 = vadd.xlane.f32.xlu0 %v2637_v48 }
 0x474   : > { %v8597_v21 = vpop.eup %6653 }
 0x475   : > { %v8599_v11 = vpop.eup %6655  ;;  %v2652_v44 = vsel %vm2246_vm3, %v8597_v21, 0.0 }
 0x476   : > { %2653 = vadd.xlane.f32.xlu1 %v2652_v44  ;;  %v2643_v46 = vsel %vm2246_vm3, %v8599_v11, 0.0 }
 0x477   : > { %2644 = vadd.xlane.f32.xlu0 %v2643_v46 }
 0x478   : > { %v8605_v24 = vpop.eup %6657 }
 0x479   : > { %v8607_v58 = vpop.xlane.xlu1 %2299  ;;  %v2649_v38 = vsel %vm2246_vm3, %v8605_v24, 0.0 }
 0x47a   : > { %2650 = vadd.xlane.f32.xlu1 %v2649_v38 }
 0x47c   : > { %v2276_v27 = vpop.xlane.xlu0 %2275 }
 0x47d   : > { %v2297_v51 = vpop.xlane.xlu1 %2296  ;;  %v2448_v39 = vsub.f32 %v8184_v53, %v2276_v27 }
 0x47e   : > { %v2455_v40 = vsub.f32 %v8180_v59, %v2297_v51 }
 0x47f   : > { %v2521_v35 = vmul.f32 1.442695, %v2448_v39 }
 0x480   : > { %v2273_v63 = vpop.xlane.xlu0 %2272  ;;  %v2535_v39 = vmul.f32 1.442695, %v2455_v40 }
 0x481   : > { %6659 = vpow2.f32 %v2521_v35  ;;  %v2306_v61 = vpop.xlane.xlu1 %2305  ;;  %v2447_v31 = vsub.f32 %v8191_v45, %v2273_v63 }
 0x482   : > { %v2458_v45 = vsub.f32 %v8196_v34, %v2306_v61 }
 0x483   : > { %v2519_v48 = vmul.f32 1.442695, %v2447_v31 }
 0x484   : > { %v2282_v44 = vpop.xlane.xlu0 %2281 }
 0x485   : > { %6661 = vpow2.f32 %v2519_v48  ;;  %v2303_v46 = vpop.xlane.xlu1 %2302  ;;  %v2450_v15 = vsub.f32 %v8205_v60, %v2282_v44 }
 0x487   : > { %v2525_v33 = vmul.f32 1.442695, %v2450_v15  ;;  %v2541_v15 = vmul.f32 1.442695, %v2458_v45 }
 0x488   : > { %v2279_v38 = vpop.xlane.xlu0 %2278 }
 0x489   : > { %6663 = vpow2.f32 %v2525_v33  ;;  %v8615_v18 = vpop.xlane.xlu1 %2311  ;;  %v2449_v53 = vsub.f32 %v8220_v7, %v2279_v38  ;;  %v2457_v7 = vsub.f32 %v8210_v12, %v2303_v46 }
 0x48b   : > { %v8618_v27 = vpop.eup %6659  ;;  %v2523_v35 = vmul.f32 1.442695, %v2449_v53 }
 0x48c   : > { %v2288_v63 = vpop.xlane.xlu0 %2287  ;;  %v2658_v31 = vsel %vm2246_vm3, %v8618_v27, 0.0 }
 0x48d   : > { %6665 = vpow2.f32 %v2523_v35  ;;  %v2309_v60 = vpop.xlane.xlu1 %2308  ;;  %v2452_v59 = vsub.f32 %v8235_v9, %v2288_v63  ;;  %2659 = vadd.xlane.f32.xlu0 %v2658_v31  ;;  %v2539_v9 = vmul.f32 1.442695, %v2457_v7 }
 0x48e   : > { %6667 = vpow2.f32 %v2535_v39  ;;  %v2459_v38 = vsub.f32 %v8240_v10, %v2309_v60 }
 0x48f   : > { %v8624_v33 = vpop.eup %6661  ;;  %v2529_v51 = vmul.f32 1.442695, %v2452_v59 }
 0x490   : > { %v2285_v40 = vpop.xlane.xlu0 %2284  ;;  %v2655_v34 = vsel %vm2246_vm3, %v8624_v33, 0.0  ;;  %v2543_v63 = vmul.f32 1.442695, %v2459_v38 }
 0x491   : > { %6669 = vpow2.f32 %v2529_v51  ;;  %v2318_v61 = vpop.xlane.xlu1 %2317  ;;  %v2451_v48 = vsub.f32 %v8250_v43, %v2285_v40  ;;  %2656 = vadd.xlane.f32.xlu0 %v2655_v34  ;;  %v2456_v43 = vsub.f32 %v8177_v0, %v8607_v58  ;;  %v2460_v58 = vsub.f32 %v8225_v13, %v8615_v18 }
 0x492   : > { %6671 = vpow2.f32 %v2541_v15  ;;  %v2462_v18 = vsub.f32 %v8255_v56, %v2318_v61 }
 0x493   : > { %v8630_v44 = vpop.eup %6663  ;;  %v2527_v53 = vmul.f32 1.442695, %v2451_v48  ;;  %v2537_v7 = vmul.f32 1.442695, %v2456_v43  ;;  %v2545_v13 = vmul.f32 1.442695, %v2460_v58 }
 0x494   : > { %v2294_v39 = vpop.xlane.xlu0 %2293  ;;  %v2664_v12 = vsel %vm2246_vm3, %v8630_v44, 0.0 }
 0x495   : > { %6673 = vpow2.f32 %v2527_v53  ;;  %v2315_v46 = vpop.xlane.xlu1 %2314  ;;  %v2454_v45 = vsub.f32 %v8265_v32, %v2294_v39  ;;  %2665 = vadd.xlane.f32.xlu1 %v2664_v12 }
 0x496   : > { %6675 = vpow2.f32 %v2539_v9  ;;  %v2461_v31 = vsub.f32 %v8270_v36, %v2315_v46 }
 0x497   : > { %v8638_v35 = vpop.eup %6665  ;;  %v2533_v10 = vmul.f32 1.442695, %v2454_v45 }
 0x498   : > { %v2291_v60 = vpop.xlane.xlu0 %2290  ;;  %v2661_v59 = vsel %vm2246_vm3, %v8638_v35, 0.0  ;;  %v8643_v15 = vpop.eup %6667  ;;  %v2547_v36 = vmul.f32 1.442695, %v2461_v31  ;;  %v2549_v31 = vmul.f32 1.442695, %v2462_v18 }
 0x499   : > { %6677 = vpow2.f32 %v2533_v10  ;;  %v2453_v32 = vsub.f32 %v8275_v4, %v2291_v60  ;;  %2662 = vadd.xlane.f32.xlu1 %v2661_v59  ;;  %v2679_v34 = vsel %vm2246_vm3, %v8643_v15, 0.0 }
 0x49a   : > { %v8646_v51 = vpop.xlane.xlu1 %2347  ;;  %6679 = vpow2.f32 %v2543_v63 }
 0x49b   : > { %v8648_v0 = vpop.eup %6669  ;;  %v2531_v40 = vmul.f32 1.442695, %v2453_v32 }
 0x49c   : > { %v2670_v48 = vsel %vm2246_vm3, %v8648_v0, 0.0  ;;  %v8656_v9 = vpop.eup %6671 }
 0x49d   : > { %6681 = vpow2.f32 %v2531_v40  ;;  %2680 = vadd.xlane.f32.xlu1 %v2679_v34  ;;  %2671 = vadd.xlane.f32.xlu0 %v2670_v48  ;;  %v2688_v39 = vsel %vm2246_vm3, %v8656_v9, 0.0 }
 0x49e   : > { %6683 = vpow2.f32 %v2537_v7  ;;  %v8658_v4 = vpop.xlane.xlu1 %2344  ;;  %v2324_v38 = vpop.xlane.xlu0 %2323 }
 0x49f   : > { %v8660_v53 = vpop.eup %6673  ;;  %6685 = vpow2.f32 %v2547_v36  ;;  %v2464_v56 = vsub.f32 %v8307_v16, %v2324_v38 }
 0x4a0   : > { %v2667_v12 = vsel %vm2246_vm3, %v8660_v53, 0.0  ;;  %v8667_v46 = vpop.eup %6675  ;;  %6687 = vpow2.f32 %v2545_v13 }
 0x4a1   : > { %2689 = vadd.xlane.f32.xlu1 %v2688_v39  ;;  %2668 = vadd.xlane.f32.xlu0 %v2667_v12  ;;  %v2685_v10 = vsel %vm2246_vm3, %v8667_v46, 0.0  ;;  %6689 = vpow2.f32 %v2549_v31  ;;  %v2553_v16 = vmul.f32 1.442695, %v2464_v56 }
 0x4a2   : > { %v8669_v45 = vpop.xlane.xlu1 %2353  ;;  %v2321_v43 = vpop.xlane.xlu0 %2320 }
 0x4a3   : > { %v8671_v63 = vpop.eup %6677  ;;  %v2463_v61 = vsub.f32 %v8313_v3, %v2321_v43 }
 0x4a4   : > { %v2676_v60 = vsel %vm2246_vm3, %v8671_v63, 0.0  ;;  %v8679_v59 = vpop.eup %6679 }
 0x4a5   : > { %v2551_v32 = vmul.f32 1.442695, %v2463_v61  ;;  %2686 = vadd.xlane.f32.xlu1 %v2685_v10  ;;  %2677 = vadd.xlane.f32.xlu0 %v2676_v60  ;;  %v2691_v34 = vsel %vm2246_vm3, %v8679_v59, 0.0 }
 0x4a6   : > { %v8681_v7 = vpop.xlane.xlu1 %2350  ;;  %v2330_v58 = vpop.xlane.xlu0 %2329 }
 0x4a7   : > { %v8683_v36 = vpop.eup %6681  ;;  %v2466_v3 = vsub.f32 %v8328_v41, %v2330_v58  ;;  %6691 = vpow2.f32 %v2551_v32 }
 0x4a8   : > { %v8686_v40 = vpop.eup %6683  ;;  %v2673_v48 = vsel %vm2246_vm3, %v8683_v36, 0.0  ;;  %6693 = vpow2.f32 %v2553_v16 }
 0x4a9   : > { %v8692_v38 = vpop.eup %6685  ;;  %2692 = vadd.xlane.f32.xlu1 %v2691_v34  ;;  %2674 = vadd.xlane.f32.xlu0 %v2673_v48  ;;  %v2557_v39 = vmul.f32 1.442695, %v2466_v3  ;;  %v2682_v43 = vsel %vm2246_vm3, %v8686_v40, 0.0 }
 0x4aa   : > { %v8694_v13 = vpop.xlane.xlu1 %2359  ;;  %v2327_v18 = vpop.xlane.xlu0 %2326  ;;  %v2697_v12 = vsel %vm2246_vm3, %v8692_v38, 0.0 }
 0x4ab   : > { %v2465_v41 = vsub.f32 %v8343_v52, %v2327_v18  ;;  %v8701_v31 = vpop.eup %6687  ;;  %6695 = vpow2.f32 %v2557_v39 }
 0x4ac   : > { %v2694_v52 = vsel %vm2246_vm3, %v8701_v31, 0.0  ;;  %v8706_v32 = vpop.eup %6689 }
 0x4ad   : > { %v2555_v56 = vmul.f32 1.442695, %v2465_v41  ;;  %2698 = vadd.xlane.f32.xlu1 %v2697_v12  ;;  %2683 = vadd.xlane.f32.xlu0 %v2682_v43  ;;  %v2471_v12 = vsub.f32 %v8297_v49, %v8658_v4  ;;  %v2473_v49 = vsub.f32 %v8325_v54, %v8681_v7 }
 0x4ae   : > { %v2357_v61 = vpop.xlane.xlu1 %2356  ;;  %v2336_v10 = vpop.xlane.xlu0 %2335 }
 0x4af   : > { %v2468_v60 = vsub.f32 %v8358_v6, %v2336_v10  ;;  %6697 = vpow2.f32 %v2555_v56  ;;  %v2700_v6 = vsel %vm2246_vm3, %v8706_v32, 0.0  ;;  %v2571_v7 = vmul.f32 1.442695, %v2473_v49 }
 0x4b1   : > { %v2561_v58 = vmul.f32 1.442695, %v2468_v60  ;;  %2695 = vadd.xlane.f32.xlu0 %v2694_v52  ;;  %v8708_v16 = vpop.eup %6691  ;;  %v2472_v52 = vsub.f32 %v8292_v28, %v8646_v51 }
 0x4b2   : > { %v8710_v3 = vpop.xlane.xlu1 %2365  ;;  %v2333_v34 = vpop.xlane.xlu0 %2332  ;;  %v2703_v18 = vsel %vm2246_vm3, %v8708_v16, 0.0 }
 0x4b3   : > { %v2467_v48 = vsub.f32 %v8373_v23, %v2333_v34  ;;  %6699 = vpow2.f32 %v2561_v58  ;;  %2704 = vadd.xlane.f32.xlu1 %v2703_v18  ;;  %v8717_v39 = vpop.eup %6693  ;;  %v2569_v51 = vmul.f32 1.442695, %v2472_v52 }
 0x4b4   : > { %v2706_v23 = vsel %vm2246_vm3, %v8717_v39, 0.0 }
 0x4b5   : > { %v2559_v41 = vmul.f32 1.442695, %v2467_v48  ;;  %2701 = vadd.xlane.f32.xlu0 %v2700_v6  ;;  %v8724_v60 = vpop.eup %6695  ;;  %v2567_v48 = vmul.f32 1.442695, %v2471_v12 }
 0x4b6   : > { %v2363_v43 = vpop.xlane.xlu1 %2362  ;;  %v2342_v56 = vpop.xlane.xlu0 %2341  ;;  %v2712_v28 = vsel %vm2246_vm3, %v8724_v60, 0.0 }
 0x4b7   : > { %v2470_v10 = vsub.f32 %v8388_v42, %v2342_v56  ;;  %6701 = vpow2.f32 %v2559_v41  ;;  %v2474_v41 = vsub.f32 %v8310_v29, %v8669_v45  ;;  %v2476_v29 = vsub.f32 %v8340_v1, %v8694_v13 }
 0x4b9   : > { %v2565_v58 = vmul.f32 1.442695, %v2470_v10  ;;  %2707 = vadd.xlane.f32.xlu0 %v2706_v23  ;;  %v8728_v34 = vpop.eup %6697  ;;  %v2573_v52 = vmul.f32 1.442695, %v2474_v41 }
 0x4ba   : > { %v2339_v4 = vpop.xlane.xlu0 %2338  ;;  %v2709_v6 = vsel %vm2246_vm3, %v8728_v34, 0.0 }
 0x4bb   : > { %v8732_v18 = vpop.xlane.xlu1 %2395  ;;  %v2469_v42 = vsub.f32 %v8399_v26, %v2339_v4  ;;  %6703 = vpow2.f32 %v2565_v58  ;;  %2710 = vadd.xlane.f32.xlu1 %v2709_v6  ;;  %v2475_v26 = vsub.f32 %v8355_v8, %v2357_v61  ;;  %v9544_v6 = vld [vmem:[#allocation18_spill] sm:$0xff] }
 0x4bc   : > { %6705 = vpow2.f32 %v2567_v48  ;;  %v9543_v48 = vld [vmem:[#allocation19_spill] sm:$0xff] }
 0x4bd   : > { %v2563_v12 = vmul.f32 1.442695, %v2469_v42  ;;  %2713 = vadd.xlane.f32.xlu0 %v2712_v28  ;;  %v8741_v54 = vpop.eup %6699  ;;  %v2575_v58 = vmul.f32 1.442695, %v2475_v26  ;;  %v2477_v49 = vsub.f32 %v9543_v48, %v2363_v43  ;;  %v2577_v42 = vmul.f32 1.442695, %v2476_v29 }
 0x4be   : > { %v2718_v23 = vsel %vm2246_vm3, %v8741_v54, 0.0  ;;  %v2478_v28 = vsub.f32 %v9544_v6, %v8710_v3  ;;  %v9546_v3 = vld [vmem:[#allocation26_spill] sm:$0xff] }
 0x4bf   : > { %6707 = vpow2.f32 %v2563_v12  ;;  %v8744_v56 = vpop.xlane.xlu1 %2392  ;;  %v2372_v10 = vpop.xlane.xlu0 %2371  ;;  %v2579_v13 = vmul.f32 1.442695, %v2477_v49 }
 0x4c0   : > { %6709 = vpow2.f32 %v2569_v51  ;;  %v9545_v51 = vld [vmem:[#allocation24_spill] sm:$0xff] }
 0x4c1   : > { %2719 = vadd.xlane.f32.xlu0 %v2718_v23  ;;  %v8750_v45 = vpop.eup %6701  ;;  %6711 = vpow2.f32 %v2571_v7  ;;  %v2480_v41 = vsub.f32 %v9545_v51, %v2372_v10 }
 0x4c2   : > { %v2715_v4 = vsel %vm2246_vm3, %v8750_v45, 0.0  ;;  %6713 = vpow2.f32 %v2573_v52  ;;  %v2581_v52 = vmul.f32 1.442695, %v2478_v28 }
 0x4c3   : > { %v8753_v8 = vpop.xlane.xlu1 %2401  ;;  %v2369_v61 = vpop.xlane.xlu0 %2368  ;;  %2716 = vadd.xlane.f32.xlu1 %v2715_v4  ;;  %6715 = vpow2.f32 %v2575_v58  ;;  %v2585_v58 = vmul.f32 1.442695, %v2480_v41 }
 0x4c4   : > { %6717 = vpow2.f32 %v2577_v42  ;;  %v2479_v29 = vsub.f32 %v9546_v3, %v2369_v61 }
 0x4c5   : > { %v8759_v1 = vpop.eup %6703  ;;  %6719 = vpow2.f32 %v2579_v13 }
 0x4c6   : > { %v2724_v7 = vsel %vm2246_vm3, %v8759_v1, 0.0  ;;  %v8766_v26 = vpop.eup %6705  ;;  %6721 = vpow2.f32 %v2581_v52  ;;  %v2583_v61 = vmul.f32 1.442695, %v2479_v29 }
 0x4c7   : > { %v8762_v12 = vpop.xlane.xlu1 %2398  ;;  %v2378_v43 = vpop.xlane.xlu0 %2377  ;;  %2725 = vadd.xlane.f32.xlu0 %v2724_v7  ;;  %v2727_v51 = vsel %vm2246_vm3, %v8766_v26, 0.0  ;;  %6723 = vpow2.f32 %v2585_v58 }
 0x4c8   : > { %v2482_v48 = vsub.f32 %v8454_v37, %v2378_v43  ;;  %6725 = vpow2.f32 %v2583_v61 }
 0x4c9   : > { %v8768_v23 = vpop.eup %6707 }
 0x4ca   : > { %v2721_v10 = vsel %vm2246_vm3, %v8768_v23, 0.0  ;;  %v8774_v49 = vpop.eup %6709  ;;  %v2589_v37 = vmul.f32 1.442695, %v2482_v48 }
 0x4cb   : > { %v8776_v4 = vpop.xlane.xlu1 %2407  ;;  %v2375_v6 = vpop.xlane.xlu0 %2374  ;;  %2722 = vadd.xlane.f32.xlu1 %v2721_v10  ;;  %2728 = vadd.xlane.f32.xlu0 %v2727_v51  ;;  %v2730_v13 = vsel %vm2246_vm3, %v8774_v49, 0.0 }
 0x4cc   : > { %v8780_v42 = vpop.eup %6711  ;;  %v2481_v28 = vsub.f32 %v8469_v22, %v2375_v6  ;;  %6727 = vpow2.f32 %v2589_v37 }
 0x4cd   : > { %9547 = vst [vmem:[#allocation19_spill] sm:$0xff] %v8780_v42  ;;  %v8785_v41 = vpop.eup %6713  ;;  %v2733_v7 = vsel %vm2246_vm3, %v8780_v42, 0.0 }
 0x4ce   : > { %v8789_v3 = vpop.eup %6715  ;;  %v2587_v22 = vmul.f32 1.442695, %v2481_v28  ;;  %v2736_v58 = vsel %vm2246_vm3, %v8785_v41, 0.0 }
 0x4cf   : > { %v2384_v43 = vpop.xlane.xlu0 %2383  ;;  %2731 = vadd.xlane.f32.xlu1 %v2730_v13  ;;  %v8791_v10 = vpop.xlane.xlu1 %2404  ;;  %2734 = vadd.xlane.f32.xlu0 %v2733_v7  ;;  %v2739_v51 = vsel %vm2246_vm3, %v8789_v3, 0.0 }
 0x4d0   : > { %v2484_v52 = vsub.f32 %v8483_v20, %v2384_v43  ;;  %v8796_v48 = vpop.eup %6717  ;;  %6729 = vpow2.f32 %v2587_v22  ;;  %v9550_v43 = vld [vmem:[#allocation23_spill] sm:$0xff] }
 0x4d1   : > { %9548 = vst [vmem:[#allocation18_spill] sm:$0xff] %v8796_v48  ;;  %v8800_v13 = vpop.eup %6719  ;;  %v2742_v28 = vsel %vm2246_vm3, %v8796_v48, 0.0  ;;  %v2487_v7 = vsub.f32 %v9550_v43, %v8744_v56  ;;  %v9553_v43 = vld [vmem:[#allocation28_spill] sm:$0xff] }
 0x4d2   : > { %v2593_v29 = vmul.f32 1.442695, %v2484_v52  ;;  %9549 = vst [vmem:[#allocation24_spill] sm:$0xff] %v8800_v13  ;;  %v8807_v37 = vpop.eup %6721 }
 0x4d3   : > { %v2381_v6 = vpop.xlane.xlu0 %2380  ;;  %2737 = vadd.xlane.f32.xlu1 %v2736_v58  ;;  %2740 = vadd.xlane.f32.xlu0 %v2739_v51  ;;  %v8803_v20 = vpop.xlane.xlu1 %2413  ;;  %v2745_v58 = vsel %vm2246_vm3, %v8800_v13, 0.0  ;;  %v2748_v51 = vsel %vm2246_vm3, %v8807_v37, 0.0  ;;  %v2599_v56 = vmul.f32 1.442695, %v2487_v7  ;;  %v2489_v13 = vsub.f32 %v9553_v43, %v8762_v12 }
 0x4d4   : > { %v2483_v42 = vsub.f32 %v8495_v14, %v2381_v6  ;;  %6731 = vpow2.f32 %v2593_v29  ;;  %v8813_v14 = vpop.eup %6723 }
 0x4d5   : > { %9551 = vst [vmem:[#allocation26_spill] sm:$0xff] %v8813_v14  ;;  %v8820_v48 = vpop.eup %6725 }
 0x4d6   : > { %v2591_v61 = vmul.f32 1.442695, %v2483_v42  ;;  %v9552_v42 = vld [vmem:[#allocation21_spill] sm:$0xff]  ;;  %v2751_v12 = vsel %vm2246_vm3, %v8820_v48, 0.0 }
 0x4d7   : > { %v2390_v52 = vpop.xlane.xlu0 %2389  ;;  %2743 = vadd.xlane.f32.xlu1 %v2742_v28  ;;  %2746 = vadd.xlane.f32.xlu0 %v2745_v58  ;;  %v2488_v29 = vsub.f32 %v9552_v42, %v8732_v18 }
 0x4d8   : > { %v2486_v22 = vsub.f32 %v8507_v62, %v2390_v52  ;;  %6733 = vpow2.f32 %v2591_v61  ;;  %v2754_v62 = vsel %vm2246_vm3, %v8813_v14, 0.0  ;;  %v8826_v52 = vpop.eup %6727  ;;  %v2411_v61 = vpop.xlane.xlu1 %2410  ;;  %v2491_v14 = vsub.f32 %v8480_v47, %v8791_v10 }
 0x4d9   : > { %9554 = vst [vmem:[#allocation23_spill] sm:$0xff] %v8826_v52  ;;  %v2601_v58 = vmul.f32 1.442695, %v2488_v29  ;;  %v2493_v10 = vsub.f32 %v8509_v50, %v2411_v61 }
 0x4da   : > { %v2597_v6 = vmul.f32 1.442695, %v2486_v22  ;;  %v9555_v22 = vld [vmem:[#allocation25_spill] sm:$0xff]  ;;  %v8833_v43 = vpop.eup %6729  ;;  %v2607_v47 = vmul.f32 1.442695, %v2491_v14 }
 0x4db   : > { %v2387_v28 = vpop.xlane.xlu0 %2386  ;;  %2749 = vadd.xlane.f32.xlu1 %v2748_v51  ;;  %2755 = vadd.xlane.f32.xlu0 %v2754_v62  ;;  %v2490_v42 = vsub.f32 %v9555_v22, %v8753_v8  ;;  %v2603_v51 = vmul.f32 1.442695, %v2489_v13  ;;  %v9557_v62 = vld [vmem:[#allocation29_spill] sm:$0xff]  ;;  %v2757_v13 = vsel %vm2246_vm3, %v8833_v43, 0.0  ;;  %v2611_v14 = vmul.f32 1.442695, %v2493_v10 }
 0x4dc   : > { %v2485_v18 = vsub.f32 %v8520_v55, %v2387_v28  ;;  %6735 = vpow2.f32 %v2597_v6  ;;  %v2760_v55 = vsel %vm2246_vm3, %v8826_v52, 0.0  ;;  %v9563_v10 = vld [vmem:[#allocation37_spill] sm:$0xff] }
 0x4dd   : > { %6737 = vpow2.f32 %v2599_v56  ;;  %v2605_v28 = vmul.f32 1.442695, %v2490_v42  ;;  %v9559_v42 = vld [vmem:[#allocation31_spill] sm:$0xff] }
 0x4de   : > { %v2595_v7 = vmul.f32 1.442695, %v2485_v18  ;;  %v8839_v6 = vpop.eup %6731  ;;  %v2492_v18 = vsub.f32 %v9557_v62, %v8776_v4 }
 0x4df   : > { %2752 = vadd.xlane.f32.xlu1 %v2751_v12  ;;  %9556 = vst [vmem:[#allocation21_spill] sm:$0xff] %v8839_v6  ;;  %2761 = vadd.xlane.f32.xlu0 %v2760_v55  ;;  %v2766_v22 = vsel %vm2246_vm3, %v8839_v6, 0.0 }
 0x4e0   : > { %6739 = vpow2.f32 %v2595_v7  ;;  %v2420_v29 = vpop.xlane.xlu1 %2419  ;;  %v2494_v7 = vsub.f32 %v9559_v42, %v8803_v20 }
 0x4e1   : > { %v2417_v8 = vpop.xlane.xlu0 %2416  ;;  %6741 = vpow2.f32 %v2601_v58  ;;  %v2609_v58 = vmul.f32 1.442695, %v2492_v18  ;;  %v2496_v50 = vsub.f32 %v8529_v30, %v2420_v29  ;;  %v9562_v18 = vld [vmem:[#allocation35_spill] sm:$0xff] }
 0x4e2   : > { %v8845_v56 = vpop.eup %6733  ;;  %6743 = vpow2.f32 %v2603_v51  ;;  %v2613_v62 = vmul.f32 1.442695, %v2494_v7 }
 0x4e3   : > { %9558 = vst [vmem:[#allocation28_spill] sm:$0xff] %v8845_v56  ;;  %2758 = vadd.xlane.f32.xlu1 %v2757_v13  ;;  %2767 = vadd.xlane.f32.xlu0 %v2766_v22  ;;  %6745 = vpow2.f32 %v2605_v28  ;;  %v2763_v12 = vsel %vm2246_vm3, %v8845_v56, 0.0  ;;  %v2495_v13 = vsub.f32 %v9562_v18, %v2417_v8  ;;  %v9571_v56 = vld [vmem:[#allocation9_spill] sm:$0xff] }
 0x4e4   : > { %v2426_v4 = vpop.xlane.xlu1 %2425  ;;  %6747 = vpow2.f32 %v2607_v47  ;;  %v2617_v47 = vmul.f32 1.442695, %v2496_v50 }
 0x4e5   : > { %v8857_v61 = vpop.xlane.xlu0 %2422  ;;  %6749 = vpow2.f32 %v2609_v58  ;;  %v2498_v22 = vsub.f32 %v9563_v10, %v2426_v4  ;;  %v2615_v8 = vmul.f32 1.442695, %v2495_v13 }
 0x4e6   : > { %v8854_v55 = vpop.eup %6735  ;;  %6751 = vpow2.f32 %v2611_v14 }
 0x4e7   : > { %9560 = vst [vmem:[#allocation25_spill] sm:$0xff] %v8854_v55  ;;  %2764 = vadd.xlane.f32.xlu1 %v2763_v12  ;;  %v2772_v51 = vsel %vm2246_vm3, %v8854_v55, 0.0  ;;  %v8861_v28 = vpop.eup %6737  ;;  %6753 = vpow2.f32 %v2613_v62  ;;  %v2621_v7 = vmul.f32 1.442695, %v2498_v22 }
 0x4e8   : > { %2773 = vadd.xlane.f32.xlu0 %v2772_v51  ;;  %v8871_v42 = vpop.xlane.xlu1 %2431  ;;  %v2775_v12 = vsel %vm2246_vm3, %v8861_v28, 0.0  ;;  %6755 = vpow2.f32 %v2617_v47 }
 0x4e9   : > { %v8877_v58 = vpop.xlane.xlu0 %2428  ;;  %6757 = vpow2.f32 %v2615_v8 }
 0x4ea   : > { %v8863_v20 = vpop.eup %6739  ;;  %6759 = vpow2.f32 %v2621_v7 }
 0x4eb   : > { %9561 = vst [vmem:[#allocation29_spill] sm:$0xff] %v8863_v20  ;;  %v2769_v30 = vsel %vm2246_vm3, %v8863_v20, 0.0  ;;  %v8869_v29 = vpop.eup %6741 }
 0x4ec   : > { %2770 = vadd.xlane.f32.xlu1 %v2769_v30  ;;  %v8875_v51 = vpop.eup %6743  ;;  %2776 = vadd.xlane.f32.xlu0 %v2775_v12  ;;  %v2778_v4 = vsel %vm2246_vm3, %v8869_v29, 0.0  ;;  %v8887_v10 = vpop.xlane.xlu1 %2437 }
 0x4ed   : > { %v8881_v14 = vpop.eup %6745  ;;  %v2781_v50 = vsel %vm2246_vm3, %v8875_v51, 0.0  ;;  %v8889_v62 = vpop.xlane.xlu0 %2434 }
 0x4ee   : > { %v8885_v18 = vpop.eup %6747  ;;  %v2784_v13 = vsel %vm2246_vm3, %v8881_v14, 0.0 }
 0x4ef   : > { %9564 = vst [vmem:[#allocation31_spill] sm:$0xff] %v8885_v18  ;;  %v8893_v47 = vpop.eup %6749  ;;  %v2787_v22 = vsel %vm2246_vm3, %v8885_v18, 0.0 }
 0x4f0   : > { %2779 = vadd.xlane.f32.xlu1 %v2778_v4  ;;  %2782 = vadd.xlane.f32.xlu0 %v2781_v50  ;;  %9565 = vst [vmem:[#allocation35_spill] sm:$0xff] %v8893_v47  ;;  %v8897_v30 = vpop.eup %6751  ;;  %v2790_v8 = vsel %vm2246_vm3, %v8893_v47, 0.0 }
 0x4f1   : > { %9566 = vst [vmem:[#allocation37_spill] sm:$0xff] %v8897_v30  ;;  %v8901_v4 = vpop.eup %6753  ;;  %v2793_v50 = vsel %vm2246_vm3, %v8897_v30, 0.0 }
 0x4f2   : > { %9567 = vst [vmem:[#allocation43_spill] sm:$0xff] %v8901_v4  ;;  %v8905_v55 = vpop.eup %6755 }
 0x4f3   : > { %9568 = vst [vmem:[#allocation44_spill] sm:$0xff] %v8905_v55  ;;  %v8909_v20 = vpop.eup %6757 }
 0x4f4   : > { %2785 = vadd.xlane.f32.xlu1 %v2784_v13  ;;  %2788 = vadd.xlane.f32.xlu0 %v2787_v22  ;;  %v2796_v13 = vsel %vm2246_vm3, %v8901_v4, 0.0  ;;  %9569 = vst [vmem:[#allocation45_spill] sm:$0xff] %v8909_v20  ;;  %v8913_v6 = vpop.eup %6759 }
 0x4f5   : > { %9570 = vst [vmem:[#allocation46_spill] sm:$0xff] %v8913_v6 }
 0x4f6   : > { %v2636_v12 = vpop.xlane.xlu1 %2635 }
 0x4f7   : > { %6761 = vrcp.f32 %v2636_v12  ;;  %v2633_v7 = vpop.xlane.xlu0 %2632  ;;  %v2802_v12 = vsel %vm2246_vm3, %v8905_v55, 0.0  ;;  %v6485_v55 = vunpack.i.h.bf16 %v9571_v56 }
 0x4f8   : > { %2791 = vadd.xlane.f32.xlu1 %v2790_v8  ;;  %6763 = vrcp.f32 %v2633_v7  ;;  %2794 = vadd.xlane.f32.xlu0 %v2793_v50  ;;  %v2799_v8 = vsel %vm2246_vm3, %v8909_v20, 0.0  ;;  %v2808_v50 = vsel %vm2246_vm3, %v8913_v6, 0.0  ;;  %v9573_v6 = vld [vmem:[#allocation10_spill] sm:$0xff] }
 0x4fb   : > { %v2642_v22 = vpop.xlane.xlu1 %2641 }
 0x4fc   : > { %2797 = vadd.xlane.f32.xlu1 %v2796_v13  ;;  %2803 = vadd.xlane.f32.xlu0 %v2802_v12  ;;  %6765 = vrcp.f32 %v2642_v22  ;;  %v6484_v13 = vunpack.i.l.bf16 %v9571_v56  ;;  %v9572_v22 = vld [vmem:[#allocation12_spill] sm:$0xff] }
 0x4ff   : > { %v2648_v7 = vpop.xlane.xlu1 %2647  ;;  %v2639_v30 = vpop.xlane.xlu0 %2638 }
 0x500   : > { %2800 = vadd.xlane.f32.xlu1 %v2799_v8  ;;  %2809 = vadd.xlane.f32.xlu0 %v2808_v50  ;;  %6767 = vrcp.f32 %v2639_v30  ;;  %v6495_v8 = vunpack.i.h.bf16 %v9572_v22  ;;  %v6494_v50 = vunpack.i.l.bf16 %v9572_v22  ;;  %v6117_v30 = vpack.c.bf16 %v6485_v55, %v6484_v13 }
 0x501   : > { %v6762_v4 = vpop.eup %6761  ;;  %6769 = vrcp.f32 %v2648_v7 }
 0x502   : > { %v6764_v47 = vpop.eup %6763  ;;  %v2888_v20 = vmul.f32 %v6762_v4, %v8576_v2  ;;  %v6121_v2 = vpack.c.bf16 %v6495_v8, %v6494_v50  ;;  %v9574_v4 = vld [vmem:[#allocation20_spill] sm:$0xff] }
 0x503   : > { %v2654_v18 = vpop.xlane.xlu1 %2653  ;;  %v2887_v12 = vmul.f32 %v6764_v47, %v8578_v17  ;;  %v6504_v7 = vunpack.i.l.bf16 %v9574_v4 }
 0x504   : > { %v2645_v52 = vpop.xlane.xlu0 %2644 }
 0x505   : > { %6771 = vrcp.f32 %v2645_v52  ;;  %5641 = vmatprep.mubr.msk.f32.mxu1 %vm2246_vm3, %v2887_v12  ;;  %v6505_v52 = vunpack.i.h.bf16 %v9574_v4  ;;  %v2497_v4 = vsub.f32 %v8546_v19, %v8857_v61 }
 0x506   : > { %5642 = vmatmul.mubr.msk.f32.vlgmr.msra.gmra.mrb[32].mxu1 %vm2246_vm3, %v2888_v20  ;;  %6773 = vrcp.f32 %v2654_v18  ;;  %v6766_v17 = vpop.eup %6765  ;;  %v9575_v18 = vld [vmem:[#allocation22_spill] sm:$0xff] }
 0x507   : > { %6116 = vmatpush3.bf16.msra.mxu1 %v9573_v6  ;;  %v2651_v56 = vpop.xlane.xlu1 %2650  ;;  %v2890_v20 = vmul.f32 %v6766_v17, %v8585_v25  ;;  %v6515_v13 = vunpack.i.h.bf16 %v9575_v18  ;;  %v6514_v22 = vunpack.i.l.bf16 %v9575_v18  ;;  %v6125_v8 = vpack.c.bf16 %v6505_v52, %v6504_v7 }
 0x508   : > { %6775 = vrcp.f32 %v2651_v56  ;;  %6118 = vmatprep.subr.bf16.mxu1 %v6117_v30  ;;  %v9576_v56 = vld [vmem:[#allocation4_spill] sm:$0xff] }
 0x509   : > { %v8942_v17 = vpack.c.bf16 %v6515_v13, %v6514_v22  ;;  %v9580_v13 = vld [vmem:[#allocation42_spill] sm:$0xff] }
 0x50a   : > { %v6768_v47 = vpop.eup %6767  ;;  %v2501_v22 = vsub.f32 %v9580_v13, %v8889_v62 }
 0x50b   : > { %6120 = vmatpush3.bf16.msra.mxu1 %v6117_v30  ;;  %v2889_v12 = vmul.f32 %v6768_v47, %v8591_v57  ;;  %v6770_v55 = vpop.eup %6769 }
 0x50c   : > { %6122 = vmatprep.subr.bf16.mxu1 %v6121_v2  ;;  %v2892_v25 = vmul.f32 %v6770_v55, %v8589_v5 }
 0x50d   : > { %5644 = vmatprep.mubr.msk.f32.mxu1 %vm2246_vm3, %v2889_v12  ;;  %v2619_v12 = vmul.f32 1.442695, %v2497_v4 }
 0x50e   : > { %5645 = vmatmul.mubr.msk.f32.gmra.mrb[34].mxu1 %vm2246_vm3, %v2890_v20  ;;  %v9579_v20 = vld [vmem:[#allocation40_spill] sm:$0xff] }
 0x50f   : > { %v6772_v6 = vpop.eup %6771  ;;  %6124 = vmatpush3.bf16.msra.mxu1 %v6121_v2  ;;  %v9577_v2 = vld [vmem:[#allocation8_spill] sm:$0xff]  ;;  %v2499_v55 = vsub.f32 %v9579_v20, %v8877_v58 }
 0x510   : > { %v2891_v50 = vmul.f32 %v6772_v6, %v8599_v11  ;;  %v6774_v30 = vpop.eup %6773  ;;  %6126 = vmatprep.subr.bf16.mxu1 %v6125_v8 }
 0x511   : > { %6587 = vrot.lane.b32.xlu1 %v9576_v56, %s6981_s18  ;;  %v2894_v11 = vmul.f32 %v6774_v30, %v8597_v21  ;;  %v2623_v18 = vmul.f32 1.442695, %v2499_v55  ;;  %v2627_v56 = vmul.f32 1.442695, %v2501_v22 }
 0x512   : > { %v6776_v57 = vpop.eup %6775  ;;  %5647 = vmatprep.mubr.msk.f32.mxu1 %vm2246_vm3, %v2891_v50  ;;  %v9581_v50 = vld [vmem:[#allocation11_spill] sm:$0xff] }
 0x513   : > { %5648 = vmatmul.mubr.msk.f32.gmra.mrb[36].mxu1 %vm2246_vm3, %v2892_v25  ;;  %v2893_v47 = vmul.f32 %v6776_v57, %v8605_v24  ;;  %v9578_v24 = vld [vmem:[#allocation39_spill] sm:$0xff]  ;;  %v6520_v30 = vunpack.i.h.bf16 %v9581_v50 }
 0x514   : > { %6128 = vmatpush3.bf16.msra.mxu1 %v6125_v8  ;;  %v2500_v7 = vsub.f32 %v9578_v24, %v8871_v42  ;;  %v6519_v42 = vunpack.i.l.bf16 %v9581_v50 }
 0x515   : > { %6146 = vmatprep.subr.bf16.mxu1 %v8942_v17  ;;  %5650 = vmatprep.mubr.msk.f32.mxu1 %vm2246_vm3, %v2893_v47  ;;  %v9582_v47 = vld [vmem:[#allocation41_spill] sm:$0xff] }
 0x516   : > { %6582 = vrot.lane.b32.xlu0 %v9577_v2, %s6980_s17  ;;  %v2625_v6 = vmul.f32 1.442695, %v2500_v7  ;;  %v6133_v24 = vpack.c.bf16 %v6520_v30, %v6519_v42  ;;  %v9584_v7 = vld [vmem:[#allocation17_spill] sm:$0xff]  ;;  %s6982_s17 = smov 8  }
 0x517   : > { %5651 = vmatmul.mubr.msk.f32.gmra.mrb[38].mxu1 %vm2246_vm3, %v2894_v11  ;;  %v2502_v11 = vsub.f32 %v9582_v47, %v8887_v10 }
 0x519   : > { %v2629_v10 = vmul.f32 1.442695, %v2502_v11 }
 0x51a   : > { %v2660_v5 = vpop.xlane.xlu0 %2659 }
 0x51b   : > { %6777 = vrcp.f32 %v2660_v5  ;;  %v9583_v5 = vld [vmem:[#allocation13_spill] sm:$0xff] }
 0x51c   : > { %v6530_v4 = vunpack.i.h.bf16 %v9583_v5 }
 0x51e   : > { %v2657_v52 = vpop.xlane.xlu0 %2656 }
 0x51f   : > { %6779 = vrcp.f32 %v2657_v52  ;;  %v6529_v52 = vunpack.i.l.bf16 %v9583_v5 }
 0x520   : > { %6781 = vpow2.f32 %v2619_v12 }
 0x521   : > { %v6137_v13 = vpack.c.bf16 %v6530_v4, %v6529_v52 }
 0x522   : > { %v2666_v21 = vpop.xlane.xlu1 %2665 }
 0x523   : > { %6783 = vrcp.f32 %v2666_v21  ;;  %v9585_v21 = vld [vmem:[#allocation38_spill] sm:$0xff] }
 0x525   : > { %v6778_v19 = vpop.eup %6777 }
 0x526   : > { %v2663_v8 = vpop.xlane.xlu1 %2662  ;;  %v2896_v62 = vmul.f32 %v6778_v19, %v8618_v27 }
 0x527   : > { %6785 = vrcp.f32 %v2663_v8 }
 0x528   : > { %6787 = vpow2.f32 %v2625_v6  ;;  %v6580_v6 = vunpack.i.h.bf16 %v9585_v21 }
 0x529   : > { %v6780_v61 = vpop.eup %6779  ;;  %6789 = vpow2.f32 %v2623_v18  ;;  %v6579_v18 = vunpack.i.l.bf16 %v9585_v21 }
 0x52a   : > { %v2681_v58 = vpop.xlane.xlu1 %2680  ;;  %v2672_v25 = vpop.xlane.xlu0 %2671  ;;  %v2895_v57 = vmul.f32 %v6780_v61, %v8624_v33 }
 0x52b   : > { %6791 = vrcp.f32 %v2681_v58  ;;  %v8970_v20 = vpop.eup %6781  ;;  %v9586_v58 = vld [vmem:[#allocation14_spill] sm:$0xff] }
 0x52c   : > { %5669 = vmatprep.mubr.msk.f32.mxu0 %vm2246_vm3, %v2895_v57  ;;  %6793 = vpow2.f32 %v2627_v56  ;;  %v2805_v42 = vsel %vm2246_vm3, %v8970_v20, 0.0  ;;  %v6544_v57 = vunpack.i.l.bf16 %v9586_v58 }
 0x52d   : > { %5670 = vmatmul.mubr.msk.f32.vlgmr.msra.gmra.mrb[48].mxu0 %vm2246_vm3, %v2896_v62  ;;  %6795 = vrcp.f32 %v2672_v25  ;;  %v6784_v27 = vpop.eup %6783  ;;  %v6545_v25 = vunpack.i.h.bf16 %v9586_v58 }
 0x52e   : > { %6132 = vmatpush3.bf16.msra.mxu0 %v9584_v7  ;;  %v2690_v12 = vpop.xlane.xlu1 %2689  ;;  %v2669_v33 = vpop.xlane.xlu0 %2668  ;;  %v2898_v50 = vmul.f32 %v6784_v27, %v8630_v44 }
 0x52f   : > { %6134 = vmatprep.subr.bf16.mxu0 %v6133_v24  ;;  %6797 = vrcp.f32 %v2669_v33 }
 0x530   : > { %6799 = vpow2.f32 %v2629_v10 }
 0x531   : > { %v6786_v55 = vpop.eup %6785 }
 0x532   : > { %v8974_v22 = vpop.eup %6787  ;;  %6136 = vmatpush3.bf16.msra.mxu0 %v6133_v24  ;;  %v2687_v8 = vpop.xlane.xlu1 %2686  ;;  %v2897_v61 = vmul.f32 %v6786_v55, %v8638_v35  ;;  %v6141_v35 = vpack.c.bf16 %v6580_v6, %v6579_v18  ;;  %v8994_v24 = vpack.c.bf16 %v6545_v25, %v6544_v57 }
 0x533   : > { %v2678_v19 = vpop.xlane.xlu0 %2677  ;;  %6138 = vmatprep.subr.bf16.mxu0 %v6137_v13  ;;  %v8978_v30 = vpop.eup %6789  ;;  %v2814_v47 = vsel %vm2246_vm3, %v8974_v22, 0.0 }
 0x534   : > { %5672 = vmatprep.mubr.msk.f32.mxu0 %vm2246_vm3, %v2897_v61  ;;  %6801 = vrcp.f32 %v2678_v19  ;;  %v2811_v4 = vsel %vm2246_vm3, %v8978_v30, 0.0 }
 0x535   : > { %v6792_v56 = vpop.eup %6791  ;;  %2806 = vadd.xlane.f32.xlu1 %v2805_v42  ;;  %5673 = vmatmul.mubr.msk.f32.gmra.mrb[50].mxu0 %vm2246_vm3, %v2898_v50  ;;  %v9587_v50 = vld [vmem:[#allocation27_spill] sm:$0xff] }
 0x536   : > { %2815 = vadd.xlane.f32.xlu0 %v2814_v47  ;;  %6140 = vmatpush3.bf16.msra.mxu0 %v6137_v13  ;;  %v2693_v44 = vpop.xlane.xlu1 %2692  ;;  %v2903_v62 = vmul.f32 %v6792_v56, %v8643_v15  ;;  %v8989_v5 = vpop.eup %6793  ;;  %v6525_v42 = vunpack.i.h.bf16 %v9587_v50  ;;  %v6524_v56 = vunpack.i.l.bf16 %v9587_v50 }
 0x537   : > { %v2675_v11 = vpop.xlane.xlu0 %2674  ;;  %6142 = vmatprep.subr.bf16.mxu0 %v6141_v35  ;;  %v6796_v52 = vpop.eup %6795  ;;  %v2817_v27 = vsel %vm2246_vm3, %v8989_v5, 0.0 }
 0x538   : > { %6803 = vrcp.f32 %v2675_v11  ;;  %5697 = vmatprep.mubr.msk.f32.mxu1 %vm2246_vm3, %v2903_v62  ;;  %v2900_v55 = vmul.f32 %v6796_v52, %v8648_v0 }
 0x539   : > { %2812 = vadd.xlane.f32.xlu1 %v2811_v4  ;;  %v6798_v7 = vpop.eup %6797  ;;  %6805 = vrcp.f32 %v2687_v8  ;;  %v6149_v4 = vpack.c.bf16 %v6525_v42, %v6524_v56  ;;  %v9593_v42 = vld [vmem:[#allocation33_spill] sm:$0xff] }
 0x53a   : > { %6144 = vmatpush3.bf16.msra.mxu0 %v6141_v35  ;;  %v2699_v10 = vpop.xlane.xlu1 %2698  ;;  %v2899_v15 = vmul.f32 %v6798_v7, %v8660_v53  ;;  %v9001_v21 = vpop.eup %6799  ;;  %v6550_v56 = vunpack.i.h.bf16 %v9593_v42 }
 0x53b   : > { %v2684_v33 = vpop.xlane.xlu0 %2683  ;;  %6162 = vmatprep.subr.bf16.mxu0 %v8994_v24  ;;  %v2820_v18 = vsel %vm2246_vm3, %v9001_v21, 0.0 }
 0x53c   : > { %6807 = vrcp.f32 %v2684_v33  ;;  %5675 = vmatprep.mubr.msk.f32.mxu0 %vm2246_vm3, %v2899_v15  ;;  %v9589_v33 = vld [vmem:[#allocation5_spill] sm:$0xff]  ;;  %v9590_v15 = vld [vmem:[#allocation32_spill] sm:$0xff] }
 0x53d   : > { %2818 = vadd.xlane.f32.xlu1 %v2817_v27  ;;  %6809 = vrcp.f32 %v2690_v12  ;;  %5676 = vmatmul.mubr.msk.f32.gmra.mrb[52].mxu0 %vm2246_vm3, %v2900_v55  ;;  %v6540_v27 = vunpack.i.h.bf16 %v9590_v15  ;;  %v6539_v55 = vunpack.i.l.bf16 %v9590_v15 }
 0x53e   : > { %6811 = vrcp.f32 %v2693_v44  ;;  %v6802_v53 = vpop.eup %6801 }
 0x53f   : > { %v2696_v6 = vpop.xlane.xlu0 %2695  ;;  %v2902_v61 = vmul.f32 %v6802_v53, %v8671_v63  ;;  %v9588_v63 = vld [vmem:[#allocation30_spill] sm:$0xff]  ;;  %v6157_v50 = vpack.c.bf16 %v6540_v27, %v6539_v55 }
 0x540   : > { %v2705_v13 = vpop.xlane.xlu1 %2704  ;;  %6813 = vrcp.f32 %v2696_v6  ;;  %v6535_v44 = vunpack.i.h.bf16 %v9588_v63  ;;  %v6534_v11 = vunpack.i.l.bf16 %v9588_v63 }
 0x541   : > { %2821 = vadd.xlane.f32.xlu1 %v2820_v18  ;;  %6815 = vrcp.f32 %v2705_v13  ;;  %v9591_v13 = vld [vmem:[#allocation6_spill] sm:$0xff] }
 0x542   : > { %v6804_v8 = vpop.eup %6803  ;;  %6817 = vrcp.f32 %v2699_v10  ;;  %v6153_v6 = vpack.c.bf16 %v6535_v44, %v6534_v11 }
 0x543   : > { %v2702_v0 = vpop.xlane.xlu0 %2701  ;;  %v2901_v19 = vmul.f32 %v6804_v8, %v8683_v36  ;;  %v6806_v12 = vpop.eup %6805 }
 0x544   : > { %6819 = vrcp.f32 %v2702_v0  ;;  %v2905_v36 = vmul.f32 %v6806_v12, %v8667_v46  ;;  %v9592_v0 = vld [vmem:[#allocation15_spill] sm:$0xff] }
 0x545   : > { %5678 = vmatprep.mubr.msk.f32.mxu0 %vm2246_vm3, %v2901_v19  ;;  %v6555_v19 = vunpack.i.h.bf16 %v9592_v0 }
 0x546   : > { %v6808_v58 = vpop.eup %6807  ;;  %5679 = vmatmul.mubr.msk.f32.gmra.mrb[54].mxu0 %vm2246_vm3, %v2902_v61 }
 0x547   : > { %v2708_v25 = vpop.xlane.xlu0 %2707  ;;  %v2904_v57 = vmul.f32 %v6808_v58, %v8686_v40  ;;  %v6810_v47 = vpop.eup %6809  ;;  %v6549_v58 = vunpack.i.l.bf16 %v9593_v42 }
 0x548   : > { %6821 = vrcp.f32 %v2708_v25  ;;  %v6812_v35 = vpop.eup %6811  ;;  %v2711_v62 = vpop.xlane.xlu1 %2710  ;;  %v2906_v46 = vmul.f32 %v6810_v47, %v8656_v9  ;;  %v9594_v25 = vld [vmem:[#allocation7_spill] sm:$0xff] }
 0x549   : > { %5698 = vmatmul.mubr.msk.f32.vlgmr.msra.gmra.mrb[40].mxu1 %vm2246_vm3, %v2904_v57  ;;  %6823 = vrcp.f32 %v2711_v62  ;;  %v2907_v10 = vmul.f32 %v6812_v35, %v8679_v59 }
 0x54a   : > { %6148 = vmatpush3.bf16.msra.mxu1 %v8942_v17  ;;  %5700 = vmatprep.mubr.msk.f32.mxu1 %vm2246_vm3, %v2905_v36  ;;  %v6814_v40 = vpop.eup %6813  ;;  %v9595_v36 = vld [vmem:[#allocation16_spill] sm:$0xff] }
 0x54b   : > { %v2714_v52 = vpop.xlane.xlu0 %2713  ;;  %6150 = vmatprep.subr.bf16.mxu1 %v6149_v4  ;;  %v6816_v7 = vpop.eup %6815  ;;  %v2908_v59 = vmul.f32 %v6814_v40, %v8701_v31  ;;  %v6564_v35 = vunpack.i.l.bf16 %v9595_v36 }
 0x54c   : > { %6825 = vrcp.f32 %v2714_v52  ;;  %6592 = vrot.lane.b32.xlu0 %v9589_v33, %s6981_s18  ;;  %v2911_v17 = vmul.f32 %v6816_v7, %v8708_v16  ;;  %v6818_v18 = vpop.eup %6817  ;;  %v6554_v16 = vunpack.i.l.bf16 %v9592_v0 }
 0x54d   : > { %5701 = vmatmul.mubr.msk.f32.gmra.mrb[42].mxu1 %vm2246_vm3, %v2906_v46  ;;  %v2909_v12 = vmul.f32 %v6818_v18, %v8692_v38  ;;  %v6565_v38 = vunpack.i.h.bf16 %v9595_v36 }
 0x54e   : > { %6152 = vmatpush3.bf16.msra.mxu1 %v6149_v4  ;;  %5703 = vmatprep.mubr.msk.f32.mxu1 %vm2246_vm3, %v2907_v10  ;;  %v6820_v53 = vpop.eup %6819  ;;  %v6165_v11 = vpack.c.bf16 %v6555_v19, %v6554_v16  ;;  %v9597_v19 = vld [vmem:[#allocation19_spill] sm:$0xff]  ;;  %v9598_v16 = vld [vmem:[#allocation36_spill] sm:$0xff] }
 0x54f   : > { %v2720_v9 = vpop.xlane.xlu0 %2719  ;;  %5725 = vmatprep.mubr.msk.f32.mxu0 %vm2246_vm3, %v2911_v17  ;;  %6154 = vmatprep.subr.bf16.mxu1 %v6153_v6  ;;  %v2910_v57 = vmul.f32 %v6820_v53, %v8706_v32  ;;  %v6177_v32 = vpack.c.bf16 %v6550_v56, %v6549_v58  ;;  %v6169_v52 = vpack.c.bf16 %v6565_v38, %v6564_v35  ;;  %v9599_v35 = vld [vmem:[#allocation18_spill] sm:$0xff] }
 0x550   : > { %6827 = vrcp.f32 %v2720_v9  ;;  %6602 = vrot.lane.b32.xlu0 %v9591_v13, %s6981_s18  ;;  %v2717_v61 = vpop.xlane.xlu1 %2716  ;;  %v9596_v9 = vld [vmem:[#allocation34_spill] sm:$0xff] }
 0x551   : > { %5704 = vmatmul.mubr.msk.f32.gmra.mrb[44].mxu1 %vm2246_vm3, %v2908_v59  ;;  %6829 = vrcp.f32 %v2717_v61  ;;  %v6560_v59 = vunpack.i.h.bf16 %v9596_v9  ;;  %v6559_v53 = vunpack.i.l.bf16 %v9596_v9  ;;  %v6570_v61 = vunpack.i.h.bf16 %v9598_v16 }
 0x552   : > { %v6822_v8 = vpop.eup %6821  ;;  %6597 = vrot.lane.b32.xlu1 %v9594_v25, %s6981_s18  ;;  %6156 = vmatpush3.bf16.msra.mxu1 %v6153_v6 }
 0x553   : > { %v2912_v31 = vmul.f32 %v6822_v8, %v8717_v39  ;;  %5706 = vmatprep.mubr.msk.f32.mxu1 %vm2246_vm3, %v2909_v12  ;;  %6158 = vmatprep.subr.bf16.mxu1 %v6157_v50  ;;  %v6824_v47 = vpop.eup %6823  ;;  %v6569_v12 = vunpack.i.l.bf16 %v9598_v16 }
 0x554   : > { %v2726_v44 = vpop.xlane.xlu0 %2725  ;;  %v2913_v39 = vmul.f32 %v6824_v47, %v8728_v34 }
 0x555   : > { %5726 = vmatmul.mubr.msk.f32.vlgmr.msra.gmra.mrb[56].mxu0 %vm2246_vm3, %v2912_v31  ;;  %5707 = vmatmul.mubr.msk.f32.gmra.mrb[46].mxu1 %vm2246_vm3, %v2910_v57  ;;  %6831 = vrcp.f32 %v2726_v44  ;;  %v6185_v57 = vpack.c.bf16 %v6570_v61, %v6569_v12 }
 0x556   : > { %v6826_v63 = vpop.eup %6825  ;;  %6164 = vmatpush3.bf16.msra.mxu0 %v8994_v24  ;;  %6607 = vrot.lane.b32.xlu1 %v9577_v2, %s6981_s18  ;;  %s6983_s18 = smov 16  }
 0x557   : > { %6160 = vmatpush3.bf16.msra.mxu1 %v6157_v50  ;;  %v2914_v62 = vmul.f32 %v6826_v63, %v8724_v60  ;;  %5728 = vmatprep.mubr.msk.f32.mxu0 %vm2246_vm3, %v2913_v39  ;;  %v6181_v50 = vpack.c.bf16 %v6560_v59, %v6559_v53  ;;  %v9600_v39 = vld [vmem:[#allocation24_spill] sm:$0xff] }
 0x558   : > { %6166 = vmatprep.subr.bf16.mxu0 %v6165_v11  ;;  %6178 = vmatprep.subr.bf16.mxu1 %v6177_v32  ;;  %v2723_v4 = vpop.xlane.xlu1 %2722  ;;  %v2729_v34 = vpop.xlane.xlu0 %2728 }
 0x559   : > { %5729 = vmatmul.mubr.msk.f32.gmra.mrb[58].mxu0 %vm2246_vm3, %v2914_v62  ;;  %6833 = vrcp.f32 %v2723_v4 }
 0x55a   : > { %v6828_v24 = vpop.eup %6827  ;;  %6168 = vmatpush3.bf16.msra.mxu0 %v6165_v11  ;;  %6835 = vrcp.f32 %v2729_v34 }
 0x55b   : > { %6170 = vmatprep.subr.bf16.mxu0 %v6169_v52  ;;  %v6830_v2 = vpop.eup %6829  ;;  %v2916_v46 = vmul.f32 %v6828_v24, %v8741_v54 }
 0x55c   : > { %v2732_v40 = vpop.xlane.xlu1 %2731  ;;  %v2735_v60 = vpop.xlane.xlu0 %2734  ;;  %v2915_v7 = vmul.f32 %v6830_v2, %v8750_v45 }
 0x55d   : > { %6837 = vrcp.f32 %v2732_v40 }
 0x55e   : > { %6172 = vmatpush3.bf16.msra.mxu0 %v6169_v52  ;;  %6839 = vrcp.f32 %v2735_v60  ;;  %5731 = vmatprep.mubr.msk.f32.mxu0 %vm2246_vm3, %v2915_v7 }
 0x55f   : > { %5732 = vmatmul.mubr.msk.f32.gmra.mrb[60].mxu0 %vm2246_vm3, %v2916_v46  ;;  %v6832_v15 = vpop.eup %6831 }
 0x560   : > { %v2738_v33 = vpop.xlane.xlu1 %2737  ;;  %v2741_v10 = vpop.xlane.xlu0 %2740  ;;  %v2918_v18 = vmul.f32 %v6832_v15, %v8759_v1 }
 0x561   : > { %6841 = vrcp.f32 %v2738_v33 }
 0x562   : > { %6843 = vrcp.f32 %v2741_v10 }
 0x563   : > { %v6834_v27 = vpop.eup %6833 }
 0x564   : > { %v6836_v55 = vpop.eup %6835  ;;  %v2744_v17 = vpop.xlane.xlu1 %2743  ;;  %v2917_v54 = vmul.f32 %v6834_v27, %v8768_v23 }
 0x565   : > { %6845 = vrcp.f32 %v2744_v17  ;;  %v2747_v6 = vpop.xlane.xlu0 %2746  ;;  %v2919_v45 = vmul.f32 %v6836_v55, %v8766_v26 }
 0x566   : > { %6847 = vrcp.f32 %v2747_v6  ;;  %5734 = vmatprep.mubr.msk.f32.mxu0 %vm2246_vm3, %v2917_v54 }
 0x567   : > { %v6838_v13 = vpop.eup %6837  ;;  %5753 = vmatprep.mubr.msk.f32.mxu1 %vm2246_vm3, %v2919_v45  ;;  %5735 = vmatmul.mubr.msk.f32.gmra.mrb[62].mxu0 %vm2246_vm3, %v2918_v18 }
 0x568   : > { %v6840_v8 = vpop.eup %6839  ;;  %v2920_v23 = vmul.f32 %v6838_v13, %v8774_v49  ;;  %v2750_v0 = vpop.xlane.xlu1 %2749 }
 0x569   : > { %6849 = vrcp.f32 %v2750_v0  ;;  %v2756_v26 = vpop.xlane.xlu0 %2755  ;;  %v2921_v1 = vmul.f32 %v6840_v8, %v9597_v19 }
 0x56a   : > { %5754 = vmatmul.mubr.msk.f32.vlgmr.msra.gmra.mrb[48].mxu1 %vm2246_vm3, %v2920_v23 }
 0x56b   : > { %v6842_v42 = vpop.eup %6841  ;;  %6180 = vmatpush3.bf16.msra.mxu1 %v6177_v32  ;;  %5756 = vmatprep.mubr.msk.f32.mxu1 %vm2246_vm3, %v2921_v1  ;;  %v9601_v1 = vld [vmem:[#allocation26_spill] sm:$0xff] }
 0x56c   : > { %v6844_v56 = vpop.eup %6843  ;;  %6182 = vmatprep.subr.bf16.mxu1 %v6181_v50  ;;  %v2753_v58 = vpop.xlane.xlu1 %2752  ;;  %v2922_v49 = vmul.f32 %v6842_v42, %v8785_v41 }
 0x56d   : > { %6851 = vrcp.f32 %v2753_v58  ;;  %v2762_v31 = vpop.xlane.xlu0 %2761  ;;  %v2923_v25 = vmul.f32 %v6844_v56, %v8789_v3 }
 0x56e   : > { %5757 = vmatmul.mubr.msk.f32.gmra.mrb[50].mxu1 %vm2246_vm3, %v2922_v49  ;;  %v9602_v49 = vld [vmem:[#allocation23_spill] sm:$0xff] }
 0x56f   : > { %v6846_v47 = vpop.eup %6845  ;;  %6184 = vmatpush3.bf16.msra.mxu1 %v6181_v50  ;;  %5759 = vmatprep.mubr.msk.f32.mxu1 %vm2246_vm3, %v2923_v25  ;;  %v9603_v25 = vld [vmem:[#allocation31_spill] sm:$0xff] }
 0x570   : > { %v6848_v36 = vpop.eup %6847  ;;  %6186 = vmatprep.subr.bf16.mxu1 %v6185_v57  ;;  %v2759_v38 = vpop.xlane.xlu1 %2758  ;;  %v2924_v63 = vmul.f32 %v6846_v47, %v9599_v35  ;;  %v9604_v47 = vld [vmem:[#allocation28_spill] sm:$0xff] }
 0x571   : > { %v2768_v44 = vpop.xlane.xlu0 %2767  ;;  %v2925_v11 = vmul.f32 %v6848_v36, %v9600_v39  ;;  %v9607_v39 = vld [vmem:[#allocation37_spill] sm:$0xff] }
 0x572   : > { %5760 = vmatmul.mubr.msk.f32.gmra.mrb[52].mxu1 %vm2246_vm3, %v2924_v63  ;;  %v9606_v63 = vld [vmem:[#allocation21_spill] sm:$0xff] }
 0x573   : > { %v6850_v41 = vpop.eup %6849  ;;  %6188 = vmatpush3.bf16.msra.mxu1 %v6185_v57  ;;  %5762 = vmatprep.mubr.msk.f32.mxu1 %vm2246_vm3, %v2925_v11 }
 0x574   : > { %v2765_v3 = vpop.xlane.xlu1 %2764  ;;  %v2926_v32 = vmul.f32 %v6850_v41, %v8807_v37 }
 0x575   : > { %v2774_v62 = vpop.xlane.xlu0 %2773 }
 0x576   : > { %5763 = vmatmul.mubr.msk.f32.gmra.mrb[54].mxu1 %vm2246_vm3, %v2926_v32 }
 0x577   : > { %v6852_v4 = vpop.eup %6851 }
 0x578   : > { %v2927_v52 = vmul.f32 %v6852_v4, %v8820_v48  ;;  %v9609_v4 = vld [vmem:[#allocation43_spill] sm:$0xff] }
 0x579   : > { %v2771_v24 = vpop.xlane.xlu1 %2770  ;;  %v2777_v34 = vpop.xlane.xlu0 %2776 }
 0x57a   : > { %5781 = vmatprep.mubr.msk.f32.mxu0 %vm2246_vm3, %v2927_v52  ;;  %6853 = vrcp.f32 %v2777_v34 }
 0x57b   : > { %6855 = vrcp.f32 %v2756_v26 }
 0x57d   : > { %v2780_v2 = vpop.xlane.xlu1 %2779  ;;  %v2783_v40 = vpop.xlane.xlu0 %2782 }
 0x57e   : > { %6857 = vrcp.f32 %v2780_v2  ;;  %v9611_v2 = vld [vmem:[#allocation45_spill] sm:$0xff] }
 0x57f   : > { %6859 = vrcp.f32 %v2783_v40 }
 0x580   : > { %6861 = vrcp.f32 %v2759_v38  ;;  %v9605_v38 = vld [vmem:[#allocation35_spill] sm:$0xff] }
 0x581   : > { %v2786_v46 = vpop.xlane.xlu1 %2785  ;;  %v2789_v60 = vpop.xlane.xlu0 %2788  ;;  %6863 = vrcp.f32 %v2762_v31 }
 0x582   : > { %6865 = vrcp.f32 %v2786_v46 }
 0x583   : > { %6867 = vrcp.f32 %v2789_v60 }
 0x584   : > { %v6854_v7 = vpop.eup %6853  ;;  %6869 = vrcp.f32 %v2765_v3  ;;  %v9608_v3 = vld [vmem:[#allocation29_spill] sm:$0xff] }
 0x585   : > { %v2792_v33 = vpop.xlane.xlu1 %2791  ;;  %v2795_v10 = vpop.xlane.xlu0 %2794  ;;  %v2935_v37 = vmul.f32 %v6854_v7, %v8861_v28  ;;  %6871 = vrcp.f32 %v2768_v44 }
 0x586   : > { %6873 = vrcp.f32 %v2792_v33  ;;  %v6856_v9 = vpop.eup %6855 }
 0x587   : > { %5809 = vmatprep.mubr.msk.f32.mxu1 %vm2246_vm3, %v2935_v37  ;;  %6875 = vrcp.f32 %v2795_v10  ;;  %v2928_v16 = vmul.f32 %v6856_v9, %v9601_v1 }
 0x588   : > { %v6858_v53 = vpop.eup %6857  ;;  %6877 = vrcp.f32 %v2771_v24  ;;  %v9610_v24 = vld [vmem:[#allocation25_spill] sm:$0xff] }
 0x589   : > { %v2798_v15 = vpop.xlane.xlu1 %2797  ;;  %v9087_v27 = vpop.xlane.xlu0 %2803  ;;  %v2936_v26 = vmul.f32 %v6858_v53, %v8869_v29 }
 0x58a   : > { %v6860_v8 = vpop.eup %6859  ;;  %6879 = vrcp.f32 %v2798_v15 }
 0x58b   : > { %v6862_v23 = vpop.eup %6861  ;;  %6881 = vrcp.f32 %v2774_v62  ;;  %v2937_v61 = vmul.f32 %v6860_v8, %v8875_v51 }
 0x58c   : > { %v6864_v0 = vpop.eup %6863  ;;  %v2929_v50 = vmul.f32 %v6862_v23, %v8833_v43 }
 0x58d   : > { %v2801_v48 = vpop.xlane.xlu1 %2800  ;;  %v9089_v55 = vpop.xlane.xlu0 %2809  ;;  %v2930_v31 = vmul.f32 %v6864_v0, %v9602_v49 }
 0x58e   : > { %v6866_v19 = vpop.eup %6865  ;;  %6883 = vrcp.f32 %v2801_v48 }
 0x58f   : > { %v6868_v12 = vpop.eup %6867  ;;  %v2938_v29 = vmul.f32 %v6866_v19, %v8881_v14  ;;  %6885 = vrcp.f32 %v9087_v27 }
 0x590   : > { %v6870_v42 = vpop.eup %6869  ;;  %v2939_v51 = vmul.f32 %v6868_v12, %v9603_v25 }
 0x591   : > { %v6588_v17 = vpop.permute.xlu1 %6587  ;;  %v6583_v6 = vpop.permute.xlu0 %6582  ;;  %v2931_v43 = vmul.f32 %v6870_v42, %v9604_v47 }
 0x592   : > { %v6590_v54 = vunpack.i.h.bf16 %v6588_v17  ;;  %v6589_v28 = vunpack.i.l.bf16 %v6588_v17  ;;  %v6585_v45 = vunpack.i.h.bf16 %v6583_v6  ;;  %v6584_v18 = vunpack.i.l.bf16 %v6583_v6  ;;  %v6872_v56 = vpop.eup %6871 }
 0x593   : > { %v6874_v58 = vpop.eup %6873  ;;  %v2932_v44 = vmul.f32 %v6872_v56, %v9606_v63 }
 0x594   : > { %v6189_v59 = vpack.c.bf16 %v6590_v54, %v6589_v28  ;;  %v6173_v13 = vpack.c.bf16 %v6585_v45, %v6584_v18  ;;  %v6876_v57 = vpop.eup %6875  ;;  %v2940_v35 = vmul.f32 %v6874_v58, %v9605_v38 }
 0x595   : > { %v6878_v36 = vpop.eup %6877  ;;  %v2941_v11 = vmul.f32 %v6876_v57, %v9607_v39 }
 0x596   : > { %6190 = vmatprep.subr.bf16.mxu1 %v6189_v59  ;;  %6174 = vmatprep.subr.bf16.mxu0 %v6173_v13  ;;  %v6880_v14 = vpop.eup %6879  ;;  %v2933_v32 = vmul.f32 %v6878_v36, %v9608_v3 }
 0x597   : > { %6192 = vmatpush3.bf16.msra.mxu1 %v6189_v59  ;;  %6176 = vmatpush3.bf16.msra.mxu0 %v6173_v13  ;;  %v6882_v41 = vpop.eup %6881  ;;  %v2942_v52 = vmul.f32 %v6880_v14, %v9609_v4 }
 0x598   : > { %v6884_v62 = vpop.eup %6883  ;;  %v2934_v34 = vmul.f32 %v6882_v41, %v9610_v24 }
 0x599   : > { %v2943_v40 = vmul.f32 %v6884_v62, %v9611_v2  ;;  %v6886_v27 = vpop.eup %6885 }
 0x59a   : > { %5810 = vmatmul.mubr.msk.f32.vlgmr.msra.gmra.mrb[56].mxu1 %vm2246_vm3, %v2936_v26  ;;  %5782 = vmatmul.mubr.msk.f32.vlgmr.msra.gmra.mrb[64].mxu0 %vm2246_vm3, %v2928_v16  ;;  %v9612_v16 = vld [vmem:[#allocation44_spill] sm:$0xff] }
 0x59b   : > { %5812 = vmatprep.mubr.msk.f32.mxu1 %vm2246_vm3, %v2937_v61  ;;  %5784 = vmatprep.mubr.msk.f32.mxu0 %vm2246_vm3, %v2929_v50  ;;  %v2944_v61 = vmul.f32 %v6886_v27, %v9612_v16 }
 0x59e   : > { %5813 = vmatmul.mubr.msk.f32.gmra.mrb[58].mxu1 %vm2246_vm3, %v2938_v29  ;;  %5785 = vmatmul.mubr.msk.f32.gmra.mrb[66].mxu0 %vm2246_vm3, %v2930_v31  ;;  %v9613_v29 = vld [vmem:[#allocation46_spill] sm:$0xff] }
 0x59f   : > { %5815 = vmatprep.mubr.msk.f32.mxu1 %vm2246_vm3, %v2939_v51  ;;  %5787 = vmatprep.mubr.msk.f32.mxu0 %vm2246_vm3, %v2931_v43 }
 0x5a2   : > { %5816 = vmatmul.mubr.msk.f32.gmra.mrb[60].mxu1 %vm2246_vm3, %v2940_v35  ;;  %5788 = vmatmul.mubr.msk.f32.gmra.mrb[68].mxu0 %vm2246_vm3, %v2932_v44 }
 0x5a3   : > { %5818 = vmatprep.mubr.msk.f32.mxu1 %vm2246_vm3, %v2941_v11  ;;  %5790 = vmatprep.mubr.msk.f32.mxu0 %vm2246_vm3, %v2933_v32 }
 0x5a6   : > { %5819 = vmatmul.mubr.msk.f32.gmra.mrb[62].mxu1 %vm2246_vm3, %v2942_v52  ;;  %5791 = vmatmul.mubr.msk.f32.gmra.mrb[70].mxu0 %vm2246_vm3, %v2934_v34 }
 0x5a7   : > { %5837 = vmatprep.mubr.msk.f32.mxu0 %vm2246_vm3, %v2943_v40 }
 0x5c2   : > { %v2807_v46 = vpop.xlane.xlu1 %2806 }
 0x5c3   : > { %v2816_v60 = vpop.xlane.xlu0 %2815  ;;  %6887 = vrcp.f32 %v2807_v46 }
 0x5c4   : > { %6889 = vrcp.f32 %v9089_v55 }
 0x5c6   : > { %v2813_v7 = vpop.xlane.xlu1 %2812 }
 0x5c7   : > { %v6593_v33 = vpop.permute.xlu0 %6592  ;;  %6891 = vrcp.f32 %v2813_v7 }
 0x5c8   : > { %v6595_v10 = vunpack.i.h.bf16 %v6593_v33  ;;  %v6594_v37 = vunpack.i.l.bf16 %v6593_v33  ;;  %6893 = vrcp.f32 %v2816_v60 }
 0x5ca   : > { %v6193_v15 = vpack.c.bf16 %v6595_v10, %v6594_v37  ;;  %v2819_v48 = vpop.xlane.xlu1 %2818 }
 0x5cb   : > { %v6603_v54 = vpop.permute.xlu0 %6602  ;;  %6895 = vrcp.f32 %v2819_v48 }
 0x5cc   : > { %6194 = vmatprep.subr.bf16.mxu0 %v6193_v15  ;;  %v6605_v6 = vunpack.i.h.bf16 %v6603_v54  ;;  %v6604_v45 = vunpack.i.l.bf16 %v6603_v54 }
 0x5cd   : > { %6196 = vmatpush3.bf16.msra.mxu0 %v6193_v15  ;;  %v6888_v1 = vpop.eup %6887 }
 0x5ce   : > { %v2822_v17 = vpop.xlane.xlu1 %2821  ;;  %v6201_v13 = vpack.c.bf16 %v6605_v6, %v6604_v45  ;;  %v6890_v12 = vpop.eup %6889  ;;  %v2945_v50 = vmul.f32 %v6888_v1, %v8970_v20 }
 0x5cf   : > { %6897 = vrcp.f32 %v2822_v17  ;;  %v2946_v58 = vmul.f32 %v6890_v12, %v9613_v29 }
 0x5d1   : > { %v6892_v42 = vpop.eup %6891 }
 0x5d2   : > { %v6598_v28 = vpop.permute.xlu1 %6597  ;;  %v6894_v49 = vpop.eup %6893  ;;  %v2947_v25 = vmul.f32 %v6892_v42, %v8978_v30 }
 0x5d3   : > { %v6600_v18 = vunpack.i.h.bf16 %v6598_v28  ;;  %v6599_v9 = vunpack.i.l.bf16 %v6598_v28  ;;  %v2948_v20 = vmul.f32 %v6894_v49, %v8974_v22 }
 0x5d5   : > { %v6197_v59 = vpack.c.bf16 %v6600_v18, %v6599_v9  ;;  %v6896_v51 = vpop.eup %6895  ;;  %v4417_v18 = vld [vmem:[%s9443_s6] sm:$0xff]  ;;  %v4418_v9 = vld [vmem:[%s9443_s6 + $0x8] sm:$0xff] }
 0x5d6   : > { %v6608_v53 = vpop.permute.xlu1 %6607  ;;  %v2949_v36 = vmul.f32 %v6896_v51, %v8989_v5 }
 0x5d7   : > { %v6610_v8 = vunpack.i.h.bf16 %v6608_v53  ;;  %v6609_v23 = vunpack.i.l.bf16 %v6608_v53  ;;  %6198 = vmatprep.subr.bf16.mxu0 %v6197_v59  ;;  %v4419_v53 = vld [vmem:[%s9443_s6 + $0x10] sm:$0xff] }
 0x5d8   : > { %6200 = vmatpush3.bf16.msra.mxu0 %v6197_v59  ;;  %v6209_v59 = vpack.c.bf16 %v4418_v9, %v4417_v18 }
 0x5d9   : > { %6202 = vmatprep.subr.bf16.mxu0 %v6201_v13  ;;  %v9123_v0 = vpop.f32.mrb[32].mxu1  ;;  %v6205_v19 = vpack.c.bf16 %v6610_v8, %v6609_v23  ;;  %v6898_v47 = vpop.eup %6897 }
 0x5da   : > { %v9125_v26 = vpop.f32.mrb[33].mxu1  ;;  %v2950_v30 = vmul.f32 %v6898_v47, %v9001_v21  ;;  %6217 = vmatprep.subr.bf16.mxu1 %v6209_v59 }
 0x5db   : > { %6219 = vmatpush3.bf16.msra.mxu1 %v6209_v59 }
 0x5dc   : > { %6204 = vmatpush3.bf16.msra.mxu0 %v6201_v13  ;;  %v4420_v13 = vld [vmem:[%s9443_s6 + $0x18] sm:$0xff] }
 0x5dd   : > { %6206 = vmatprep.subr.bf16.mxu0 %v6205_v19  ;;  %v6213_v8 = vpack.c.bf16 %v4420_v13, %v4419_v53 }
 0x5df   : > { %6218 = vmatprep.subr.bf16.mxu1 %v6213_v8 }
 0x5e0   : > { %6208 = vmatpush3.bf16.msra.mxu0 %v6205_v19  ;;  %6220 = vmatpush3.bf16.msra.mxu1 %v6213_v8 }
 0x5e1   : > { %v9128_v55 = vpop.f32.mrb[34].mxu1  ;;  %6210 = vmatprep.subr.bf16.mxu0 %v6209_v59 }
 0x5e2   : > { %v9132_v56 = vpop.f32.mrb[35].mxu1 }
 0x5e3   : > { %5838 = vmatmul.mubr.msk.f32.vlgmr.msra.gmra.mrb[72].mxu0 %vm2246_vm3, %v2944_v61 }
 0x5e4   : > { %5840 = vmatprep.mubr.msk.f32.mxu0 %vm2246_vm3, %v2945_v50  ;;  %6212 = vmatpush3.bf16.msra.mxu0 %v6209_v59 }
 0x5e5   : > { %6214 = vmatprep.subr.bf16.mxu0 %v6213_v8 }
 0x5e6   : > { %v9136_v31 = vpop.f32.mrb[36].mxu1 }
 0x5e7   : > { %5841 = vmatmul.mubr.msk.f32.gmra.mrb[74].mxu0 %vm2246_vm3, %v2946_v58  ;;  %v9140_v57 = vpop.f32.mrb[37].mxu1 }
 0x5e8   : > { %5843 = vmatprep.mubr.msk.f32.mxu0 %vm2246_vm3, %v2947_v25  ;;  %6216 = vmatpush3.bf16.msra.mxu0 %v6213_v8 }
 0x5ea   : > { %v9144_v43 = vpop.f32.mrb[38].mxu1 }
 0x5eb   : > { %5844 = vmatmul.mubr.msk.f32.gmra.mrb[76].mxu0 %vm2246_vm3, %v2948_v20  ;;  %v9148_v38 = vpop.f32.mrb[39].mxu1 }
 0x5ec   : > { %5846 = vmatprep.mubr.msk.f32.mxu0 %vm2246_vm3, %v2949_v36 }
 0x5ef   : > { %5847 = vmatmul.mubr.msk.f32.gmra.mrb[78].mxu0 %vm2246_vm3, %v2950_v30 }
 0x600   : > { %v9153_v35 = vpop.f32.mrb[48].mxu0 }
 0x601   : > { %v9155_v14 = vpop.f32.mrb[49].mxu0 }
 0x608   : > { %v9157_v22 = vpop.f32.mrb[50].mxu0 }
 0x609   : > { %v9159_v63 = vpop.f32.mrb[51].mxu0 }
 0x610   : > { %v9161_v44 = vpop.f32.mrb[52].mxu0 }
 0x611   : > { %v9163_v5 = vpop.f32.mrb[53].mxu0 }
 0x619   : > { %v9165_v39 = vpop.f32.mrb[54].mxu0 }
 0x61a   : > { %v9167_v11 = vpop.f32.mrb[55].mxu0 }
 0x61c   : > { %v5699_v41 = vpop.f32.mrb[40].mxu1 }
 0x61d   : > { %4193 = vrot.lane.b32.xlu0 %v5699_v41, %s6982_s17  ;;  %v3371_v21 = vpop.f32.mrb[41].mxu1 }
 0x620   : > { %v5702_v3 = vpop.f32.mrb[42].mxu1 }
 0x621   : > { %4191 = vrot.lane.b32.xlu0 %v3371_v21, %s6982_s17  ;;  %v3381_v32 = vpop.f32.mrb[43].mxu1 }
 0x624   : > { %v5705_v62 = vpop.f32.mrb[44].mxu1 }
 0x625   : > { %4197 = vrot.lane.b32.xlu0 %v5702_v3, %s6982_s17  ;;  %v3391_v4 = vpop.f32.mrb[45].mxu1 }
 0x628   : > { %v5727_v52 = vpop.f32.mrb[56].mxu0  ;;  %v5708_v24 = vpop.f32.mrb[46].mxu1 }
 0x629   : > { %v3524_v34 = vpop.f32.mrb[57].mxu0  ;;  %4195 = vrot.lane.b32.xlu0 %v3381_v32, %s6982_s17  ;;  %4205 = vrot.lane.b32.xlu1 %v5708_v24, %s6982_s17  ;;  %v3401_v2 = vpop.f32.mrb[47].mxu1 }
 0x62c   : > { %v5730_v40 = vpop.f32.mrb[58].mxu0 }
 0x62d   : > { %v3534_v46 = vpop.f32.mrb[59].mxu0  ;;  %4201 = vrot.lane.b32.xlu0 %v5705_v62, %s6982_s17  ;;  %4209 = vrot.lane.b32.xlu1 %v5727_v52, %s6982_s17 }
 0x631   : > { %4199 = vrot.lane.b32.xlu0 %v3391_v4, %s6982_s17  ;;  %4213 = vrot.lane.b32.xlu1 %v5730_v40, %s6982_s17 }
 0x632   : > { %v5733_v60 = vpop.f32.mrb[60].mxu0 }
 0x633   : > { %v3544_v7 = vpop.f32.mrb[61].mxu0 }
 0x635   : > { %4203 = vrot.lane.b32.xlu0 %v3401_v2, %s6982_s17  ;;  %4211 = vrot.lane.b32.xlu1 %v3534_v46, %s6982_s17 }
 0x639   : > { %4207 = vrot.lane.b32.xlu0 %v3524_v34, %s6982_s17  ;;  %4217 = vrot.lane.b32.xlu1 %v5733_v60, %s6982_s17 }
 0x63a   : > { %v5736_v33 = vpop.f32.mrb[62].mxu0 }
 0x63b   : > { %v3554_v10 = vpop.f32.mrb[63].mxu0 }
 0x63d   : > { %v5755_v37 = vpop.f32.mrb[48].mxu1  ;;  %4215 = vrot.lane.b32.xlu1 %v3544_v7, %s6982_s17 }
 0x63e   : > { %4257 = vrot.lane.b32.xlu0 %v5755_v37, %s6983_s18  ;;  %v3677_v15 = vpop.f32.mrb[49].mxu1 }
 0x641   : > { %v5758_v48 = vpop.f32.mrb[50].mxu1  ;;  %4221 = vrot.lane.b32.xlu1 %v5736_v33, %s6982_s17 }
 0x642   : > { %4255 = vrot.lane.b32.xlu0 %v3677_v15, %s6983_s18  ;;  %v3687_v17 = vpop.f32.mrb[51].mxu1 }
 0x645   : > { %v9186_v54 = vpop.f32.mrb[52].mxu1  ;;  %4219 = vrot.lane.b32.xlu1 %v3554_v10, %s6982_s17  ;;  %s9345_s17 = scalar_lea.vmem [#allocation3], %s7111_s14  ;;  %s5069_s14 = sshll.u32 (%p7073_p6), %s6957_s27, 5 }
 0x646   : > { %4261 = vrot.lane.b32.xlu0 %v5758_v48, %s6983_s18  ;;  %v9190_v28 = vpop.f32.mrb[53].mxu1  ;;  %s4657_s12 = sadd.s32 (%p7073_p6), %s6953_s26, %s5069_s14 }
 0x649   : > { %v5764_v6 = vpop.f32.mrb[54].mxu1 }
 0x64a   : > { %4259 = vrot.lane.b32.xlu0 %v3687_v17, %s6983_s18  ;;  %4269 = vrot.lane.b32.xlu1 %v5764_v6, %s6983_s18  ;;  %v3707_v45 = vpop.f32.mrb[55].mxu1 }
 0x64e   : > { %4267 = vrot.lane.b32.xlu0 %v3707_v45, %s6983_s18 }
 0x66d   : > { %v5811_v23 = vpop.f32.mrb[56].mxu1  ;;  %v5783_v19 = vpop.f32.mrb[64].mxu0 }
 0x66e   : > { %v3983_v27 = vpop.f32.mrb[57].mxu1  ;;  %4273 = vrot.lane.b32.xlu1 %v5783_v19, %s6983_s18  ;;  %v3830_v1 = vpop.f32.mrb[65].mxu0 }
 0x66f   : > { %4271 = vrot.lane.b32.xlu0 %v3830_v1, %s6983_s18 }
 0x671   : > { %v5814_v16 = vpop.f32.mrb[58].mxu1  ;;  %v5786_v61 = vpop.f32.mrb[66].mxu0 }
 0x672   : > { %v3993_v12 = vpop.f32.mrb[59].mxu1  ;;  %4277 = vrot.lane.b32.xlu1 %v5786_v61, %s6983_s18  ;;  %v3840_v50 = vpop.f32.mrb[67].mxu0 }
 0x673   : > { %4321 = vrot.lane.b32.xlu0 %v5811_v23, %s6984_s19 }
 0x675   : > { %v5817_v42 = vpop.f32.mrb[60].mxu1  ;;  %v5789_v29 = vpop.f32.mrb[68].mxu0 }
 0x676   : > { %v4003_v58 = vpop.f32.mrb[61].mxu1  ;;  %4275 = vrot.lane.b32.xlu1 %v3840_v50, %s6983_s18  ;;  %v3850_v49 = vpop.f32.mrb[69].mxu0 }
 0x677   : > { %4319 = vrot.lane.b32.xlu0 %v3983_v27, %s6984_s19 }
 0x679   : > { %v5820_v25 = vpop.f32.mrb[62].mxu1  ;;  %v5792_v51 = vpop.f32.mrb[70].mxu0 }
 0x67a   : > { %v4013_v20 = vpop.f32.mrb[63].mxu1  ;;  %4281 = vrot.lane.b32.xlu1 %v5789_v29, %s6983_s18  ;;  %v3860_v47 = vpop.f32.mrb[71].mxu0 }
 0x67b   : > { %4325 = vrot.lane.b32.xlu0 %v5814_v16, %s6984_s19 }
 0x67e   : > { %4279 = vrot.lane.b32.xlu1 %v3850_v49, %s6983_s18 }
 0x67f   : > { %4323 = vrot.lane.b32.xlu0 %v3993_v12, %s6984_s19 }
 0x682   : > { %4333 = vrot.lane.b32.xlu1 %v5820_v25, %s6984_s19 }
 0x683   : > { %4331 = vrot.lane.b32.xlu0 %v4013_v20, %s6984_s19 }
 0x68f   : > { %v9219_v36 = vpop.permute.xlu0 %4193 }
 0x690   : > { %v4368_v50 = vsel %vm933_vm1, %v9123_v0, %v9219_v36 }
 0x693   : > { %v4192_v30 = vpop.permute.xlu0 %4191 }
 0x694   : > { %v4367_v61 = vsel %vm933_vm1, %v9125_v26, %v4192_v30 }
 0x697   : > { %v9221_v41 = vpop.permute.xlu0 %4197 }
 0x698   : > { %v4370_v30 = vsel %vm933_vm1, %v9128_v55, %v9221_v41 }
 0x69b   : > { %v9223_v21 = vpop.permute.xlu1 %4205  ;;  %v9225_v3 = vpop.permute.xlu0 %4195 }
 0x69c   : > { %v4369_v0 = vsel %vm933_vm1, %v9132_v56, %v9225_v3  ;;  %v4374_v41 = vsel %vm933_vm1, %v9144_v43, %v9223_v21 }
 0x69f   : > { %v4210_v32 = vpop.permute.xlu1 %4209  ;;  %v4202_v62 = vpop.permute.xlu0 %4201 }
 0x6a0   : > { %v4376_v4 = vsel %vm933_vm1, %v9153_v35, %v4210_v32  ;;  %v9231_v52 = vsel %vm933_vm1, %v9136_v31, %v4202_v62 }
 0x6a3   : > { %v4214_v24 = vpop.permute.xlu1 %4213  ;;  %v4200_v34 = vpop.permute.xlu0 %4199 }
 0x6a4   : > { %v4378_v2 = vsel %vm933_vm1, %v9157_v22, %v4214_v24  ;;  %v9237_v40 = vsel %vm933_vm1, %v9140_v57, %v4200_v34 }
 0x6a7   : > { %v4212_v46 = vpop.permute.xlu1 %4211  ;;  %v9239_v60 = vpop.permute.xlu0 %4203 }
 0x6a8   : > { %v4377_v7 = vsel %vm933_vm1, %v9159_v63, %v4212_v46  ;;  %v4373_v56 = vsel %vm933_vm1, %v9148_v38, %v9239_v60 }
 0x6ab   : > { %v4218_v35 = vpop.permute.xlu1 %4217  ;;  %v4208_v33 = vpop.permute.xlu0 %4207 }
 0x6ac   : > { %v4380_v31 = vsel %vm933_vm1, %v9161_v44, %v4218_v35  ;;  %v4375_v10 = vsel %vm933_vm1, %v9155_v14, %v4208_v33 }
 0x6af   : > { %v4216_v37 = vpop.permute.xlu1 %4215 }
 0x6b0   : > { %v4379_v22 = vsel %vm933_vm1, %v9163_v5, %v4216_v37 }
 0x6b3   : > { %v4222_v57 = vpop.permute.xlu1 %4221 }
 0x6b4   : > { %v9251_v15 = vsel %vm933_vm1, %v9165_v39, %v4222_v57 }
 0x6b6   : > { %v5839_v48 = vpop.f32.mrb[72].mxu0 }
 0x6b7   : > { %4337 = vrot.lane.b32.xlu1 %v5839_v48, %s6984_s19  ;;  %v4136_v63 = vpop.f32.mrb[73].mxu0  ;;  %v4220_v17 = vpop.permute.xlu1 %4219 }
 0x6b8   : > { %4335 = vrot.lane.b32.xlu0 %v4136_v63, %s6984_s19  ;;  %v9257_v44 = vsel %vm933_vm1, %v9167_v11, %v4220_v17  ;;  %v4258_v11 = vpop.permute.xlu0 %4257 }
 0x6b9   : > { %v4385_v49 = vsel %vm4383_vm4, %v4368_v50, %v4258_v11 }
 0x6ba   : > { %v5842_v14 = vpop.f32.mrb[74].mxu0 }
 0x6bb   : > { %4283 = vrot.lane.b32.xlu1 %v3860_v47, %s6983_s18  ;;  %v4146_v5 = vpop.f32.mrb[75].mxu0 }
 0x6bc   : > { %4263 = vrot.lane.b32.xlu0 %v9190_v28, %s6983_s18  ;;  %v4256_v28 = vpop.permute.xlu0 %4255  ;;  %v4270_v59 = vpop.permute.xlu1 %4269 }
 0x6be   : > { %v5845_v39 = vpop.f32.mrb[76].mxu0 }
 0x6bf   : > { %4285 = vrot.lane.b32.xlu1 %v5792_v51, %s6983_s18  ;;  %v4156_v6 = vpop.f32.mrb[77].mxu0 }
 0x6c0   : > { %4265 = vrot.lane.b32.xlu0 %v9186_v54, %s6983_s18  ;;  %v4262_v9 = vpop.permute.xlu0 %4261 }
 0x6c1   : > { %v4387_v24 = vsel %vm4383_vm4, %v4370_v30, %v4262_v9 }
 0x6c2   : > { %v5848_v45 = vpop.f32.mrb[78].mxu0 }
 0x6c3   : > { %4341 = vrot.lane.b32.xlu1 %v5842_v14, %s6984_s19  ;;  %v4166_v18 = vpop.f32.mrb[79].mxu0 }
 0x6c4   : > { %4327 = vrot.lane.b32.xlu0 %v4003_v58, %s6984_s19  ;;  %v4260_v54 = vpop.permute.xlu0 %4259 }
 0x6c5   : > { %v4386_v32 = vsel %vm4383_vm4, %v4369_v0, %v4260_v54  ;;  %v6905_v0 = vld [vmem:[%s7114_s15 + $0x48] sm:$0xff] }
 0x6c7   : > { %4339 = vrot.lane.b32.xlu1 %v4146_v5, %s6984_s19 }
 0x6c8   : > { %4329 = vrot.lane.b32.xlu0 %v5817_v42, %s6984_s19  ;;  %v4268_v53 = vpop.permute.xlu0 %4267  ;;  %v4384_v42 = vsel %vm4383_vm4, %v4367_v61, %v4256_v28  ;;  %v6901_v61 = vld [vmem:[%s7114_s15 + $0x18] sm:$0xff] }
 0x6c9   : > { %v4390_v3 = vsel %vm4383_vm4, %v4373_v56, %v4268_v53  ;;  %v6908_v56 = vld [vmem:[%s7114_s15 + $0x58] sm:$0xff] }
 0x6cb   : > { %4345 = vrot.lane.b32.xlu1 %v5845_v39, %s6984_s19 }
 0x6cf   : > { %4343 = vrot.lane.b32.xlu1 %v4156_v6, %s6984_s19 }
 0x6d3   : > { %4347 = vrot.lane.b32.xlu1 %v4166_v18, %s6984_s19 }
 0x6d7   : > { %4349 = vrot.lane.b32.xlu1 %v5848_v45, %s6984_s19 }
 0x6e0   : > { %v4274_v13 = vpop.permute.xlu1 %4273 }
 0x6e1   : > { %v4393_v8 = vsel %vm4383_vm4, %v4376_v4, %v4274_v13  ;;  %v4272_v23 = vpop.permute.xlu0 %4271 }
 0x6e2   : > { %v4392_v19 = vsel %vm4383_vm4, %v4375_v10, %v4272_v23 }
 0x6e4   : > { %v4278_v27 = vpop.permute.xlu1 %4277 }
 0x6e5   : > { %v4395_v1 = vsel %vm4383_vm4, %v4378_v2, %v4278_v27  ;;  %v4322_v16 = vpop.permute.xlu0 %4321 }
 0x6e6   : > { %v4402_v51 = vsel %vm4400_vm5, %v4385_v49, %v4322_v16  ;;  %v6903_v49 = vld [vmem:[%s7114_s15 + $0x38] sm:$0xff] }
 0x6e8   : > { %v4276_v12 = vpop.permute.xlu1 %4275 }
 0x6e9   : > { %v4394_v29 = vsel %vm4383_vm4, %v4377_v7, %v4276_v12  ;;  %v4320_v58 = vpop.permute.xlu0 %4319  ;;  %v4391_v7 = vsel %vm4383_vm4, %v4374_v41, %v4270_v59 }
 0x6ea   : > { %v4401_v25 = vsel %vm4400_vm5, %v4384_v42, %v4320_v58  ;;  %v6902_v42 = vld [vmem:[%s7114_s15 + $0x10] sm:$0xff] }
 0x6eb   : > { %5857 = vmatprep.mubr.msk.f32.mxu0 %vm417_vm0, %v4401_v25 }
 0x6ec   : > { %5858 = vmatmul.mubr.msk.f32.vlgmr.msra.gmra.mrb[80].mxu0 %vm417_vm0, %v4402_v51  ;;  %v4282_v26 = vpop.permute.xlu1 %4281 }
 0x6ed   : > { %v4397_v20 = vsel %vm4383_vm4, %v4380_v31, %v4282_v26  ;;  %v4326_v47 = vpop.permute.xlu0 %4325  ;;  %v6904_v26 = vld [vmem:[%s7114_s15 + $0x30] sm:$0xff] }
 0x6ee   : > { %v4404_v2 = vsel %vm4400_vm5, %v4387_v24, %v4326_v47 }
 0x6f0   : > { %v4280_v36 = vpop.permute.xlu1 %4279 }
 0x6f1   : > { %v4396_v62 = vsel %vm4383_vm4, %v4379_v22, %v4280_v36  ;;  %v4324_v4 = vpop.permute.xlu0 %4323 }
 0x6f2   : > { %v4403_v34 = vsel %vm4400_vm5, %v4386_v32, %v4324_v4  ;;  %v6906_v32 = vld [vmem:[%s7114_s15 + $0x40] sm:$0xff] }
 0x6f3   : > { %5860 = vmatprep.mubr.msk.f32.mxu0 %vm417_vm0, %v4403_v34  ;;  %v6907_v34 = vld [vmem:[%s7114_s15 + $0x28] sm:$0xff] }
 0x6f4   : > { %5861 = vmatmul.mubr.msk.f32.gmra.mrb[82].mxu0 %vm417_vm0, %v4404_v2  ;;  %v4334_v55 = vpop.permute.xlu1 %4333 }
 0x6f5   : > { %v4332_v46 = vpop.permute.xlu0 %4331  ;;  %v4408_v33 = vsel %vm4400_vm5, %v4391_v7, %v4334_v55 }
 0x6f6   : > { %v4407_v35 = vsel %vm4400_vm5, %v4390_v3, %v4332_v46  ;;  %v6909_v46 = vld [vmem:[%s7114_s15 + $0x20] sm:$0xff] }
 0x6f7   : > { %5866 = vmatprep.mubr.msk.f32.mxu1 %vm417_vm0, %v4407_v35  ;;  %v6910_v35 = vld [vmem:[%s7114_s15 + $0x50] sm:$0xff] }
 0x6f8   : > { %5867 = vmatmul.mubr.msk.f32.vlgmr.msra.gmra.mrb[64].mxu1 %vm417_vm0, %v4408_v33 }
 0x729   : > { %v4338_v38 = vpop.permute.xlu1 %4337 }
 0x72a   : > { %v4336_v60 = vpop.permute.xlu0 %4335  ;;  %v4410_v10 = vsel %vm4400_vm5, %v4393_v8, %v4338_v38 }
 0x72b   : > { %v4409_v31 = vsel %vm4400_vm5, %v4392_v19, %v4336_v60  ;;  %v6899_v19 = vld [vmem:[%s7114_s15 + $0x8] sm:$0xff] }
 0x72c   : > { %5869 = vmatprep.mubr.msk.f32.mxu1 %vm417_vm0, %v4409_v31  ;;  %v6911_v60 = vld [vmem:[%s7114_s15 + $0x68] sm:$0xff] }
 0x72d   : > { %v4284_v43 = vpop.permute.xlu1 %4283  ;;  %5870 = vmatmul.mubr.msk.f32.gmra.mrb[66].mxu1 %vm417_vm0, %v4410_v10 }
 0x72e   : > { %v4264_v21 = vpop.permute.xlu0 %4263  ;;  %v4398_v9 = vsel %vm4383_vm4, %v9257_v44, %v4284_v43  ;;  %v6912_v43 = vld [vmem:[%s7114_s15 + $0x60] sm:$0xff] }
 0x72f   : > { %v4388_v48 = vsel %vm4383_vm4, %v9237_v40, %v4264_v21 }
 0x731   : > { %v4286_v37 = vpop.permute.xlu1 %4285 }
 0x732   : > { %v4266_v22 = vpop.permute.xlu0 %4265  ;;  %v4399_v53 = vsel %vm4383_vm4, %v9251_v15, %v4286_v37 }
 0x733   : > { %v4389_v5 = vsel %vm4383_vm4, %v9231_v52, %v4266_v22  ;;  %v6913_v22 = vld [vmem:[%s7114_s15 + $0x78] sm:$0xff] }
 0x735   : > { %v4342_v57 = vpop.permute.xlu1 %4341 }
 0x736   : > { %v4328_v63 = vpop.permute.xlu0 %4327  ;;  %v4412_v45 = vsel %vm4400_vm5, %v4395_v1, %v4342_v57  ;;  %v6900_v1 = vld [vmem:[%s7114_s15] sm:$0xff] }
 0x737   : > { %v4405_v17 = vsel %vm4400_vm5, %v4388_v48, %v4328_v63  ;;  %v6914_v63 = vld [vmem:[%s7114_s15 + $0x70] sm:$0xff]  ;;  %s5070_s15 = sshll.u32 (%p7073_p6), %s4657_s12, 3 }
 0x738   : > { %5863 = vmatprep.mubr.msk.f32.mxu0 %vm417_vm0, %v4405_v17  ;;  %s4659_s21 = scalar_lea.vmem (%p7073_p6), %s9444_s7, %s5070_s15 }
 0x739   : > { %v4340_v14 = vpop.permute.xlu1 %4339 }
 0x73a   : > { %v4411_v39 = vsel %vm4400_vm5, %v4394_v29, %v4340_v14  ;;  %v4330_v6 = vpop.permute.xlu0 %4329 }
 0x73b   : > { %v4406_v18 = vsel %vm4400_vm5, %v4389_v5, %v4330_v6  ;;  %5872 = vmatprep.mubr.msk.f32.mxu1 %vm417_vm0, %v4411_v39 }
 0x73c   : > { %5864 = vmatmul.mubr.msk.f32.gmra.mrb[84].mxu0 %vm417_vm0, %v4406_v18  ;;  %5873 = vmatmul.mubr.msk.f32.gmra.mrb[68].mxu1 %vm417_vm0, %v4412_v45 }
 0x73d   : > { %v4346_v40 = vpop.permute.xlu1 %4345 }
 0x73e   : > { %v4414_v52 = vsel %vm4400_vm5, %v4397_v20, %v4346_v40 }
 0x741   : > { %v4344_v11 = vpop.permute.xlu1 %4343 }
 0x742   : > { %v4413_v28 = vsel %vm4400_vm5, %v4396_v62, %v4344_v11 }
 0x743   : > { %5875 = vmatprep.mubr.msk.f32.mxu1 %vm417_vm0, %v4413_v28 }
 0x744   : > { %5876 = vmatmul.mubr.msk.f32.gmra.mrb[70].mxu1 %vm417_vm0, %v4414_v52 }
 0x745   : > { %v4348_v54 = vpop.permute.xlu1 %4347 }
 0x746   : > { %v4415_v59 = vsel %vm4400_vm5, %v4398_v9, %v4348_v54 }
 0x747   : > { %5878 = vmatprep.mubr.msk.f32.mxu1 %vm417_vm0, %v4415_v59 }
 0x749   : > { %v4350_v13 = vpop.permute.xlu1 %4349 }
 0x74a   : > { %v4416_v8 = vsel %vm4400_vm5, %v4399_v53, %v4350_v13 }
 0x74b   : > { %5879 = vmatmul.mubr.msk.f32.gmra.mrb[72].mxu1 %vm417_vm0, %v4416_v8 }
 0x7bf   : > { %v5859_v23 = vpop.f32.mrb[80].mxu0 }
 0x7c0   : > { %v4615_v27 = vadd.f32 %v6899_v19, %v5859_v23  ;;  %v4535_v44 = vpop.f32.mrb[81].mxu0 }
 0x7c1   : > { %v4614_v16 = vadd.f32 %v6900_v1, %v4535_v44 }
 0x7c2   : > { %4631 = vst.msk [vmem:[%s9345_s17 + $0x8] sm:$0xff] %vm417_vm0, %v4615_v27 }
 0x7c3   : > { %4630 = vst.msk [vmem:[%s9345_s17] sm:$0xff] %vm417_vm0, %v4614_v16 }
 0x7c7   : > { %v5862_v15 = vpop.f32.mrb[82].mxu0 }
 0x7c8   : > { %v4617_v12 = vadd.f32 %v6901_v61, %v5862_v15  ;;  %v4545_v50 = vpop.f32.mrb[83].mxu0 }
 0x7c9   : > { %v4616_v29 = vadd.f32 %v6902_v42, %v4545_v50  ;;  %v4719_v5 = vld [vmem:[%s9345_s17 + $0x8] sm:$0xff] (%p7073_p6) }
 0x7ca   : > { %4633 = vst.msk [vmem:[%s9345_s17 + $0x18] sm:$0xff] %vm417_vm0, %v4617_v12  ;;  %v4717_v14 = vld [vmem:[%s9345_s17] sm:$0xff] (%p7073_p6)  ;;  %4720 = vst [vmem:[%s4659_s21 + $0x10] sm:$0xff] (%p7073_p6), %v4719_v5 }
 0x7cb   : > { %4632 = vst.msk [vmem:[%s9345_s17 + $0x10] sm:$0xff] %vm417_vm0, %v4616_v29  ;;  %v5868_v58 = vpop.f32.mrb[64].mxu1  ;;  %4718 = vst [vmem:[%s4659_s21] sm:$0xff] (%p7073_p6), %v4717_v14 }
 0x7cc   : > { %v4621_v25 = vadd.f32 %v6903_v49, %v5868_v58  ;;  %v4565_v51 = vpop.f32.mrb[65].mxu1 }
 0x7cd   : > { %v4620_v20 = vadd.f32 %v6904_v26, %v4565_v51 }
 0x7ce   : > { %4637 = vst.msk [vmem:[%s9345_s17 + $0x38] sm:$0xff] %vm417_vm0, %v4621_v25 }
 0x7cf   : > { %4636 = vst.msk [vmem:[%s9345_s17 + $0x30] sm:$0xff] %vm417_vm0, %v4620_v20 }
 0x7d1   : > { %v4723_v6 = vld [vmem:[%s9345_s17 + $0x18] sm:$0xff] (%p7073_p6) }
 0x7d2   : > { %v4721_v39 = vld [vmem:[%s9345_s17 + $0x10] sm:$0xff] (%p7073_p6)  ;;  %4724 = vst [vmem:[%s4659_s21 + $0x30] sm:$0xff] (%p7073_p6), %v4723_v6 }
 0x7d3   : > { %4722 = vst [vmem:[%s4659_s21 + $0x20] sm:$0xff] (%p7073_p6), %v4721_v39 }
 0x7d5   : > { %v4731_v11 = vld [vmem:[%s9345_s17 + $0x38] sm:$0xff] (%p7073_p6) }
 0x7d6   : > { %v4729_v40 = vld [vmem:[%s9345_s17 + $0x30] sm:$0xff] (%p7073_p6)  ;;  %4732 = vst [vmem:[%s4659_s21 + $0x70] sm:$0xff] (%p7073_p6), %v4731_v11 }
 0x7d7   : > { %4730 = vst [vmem:[%s4659_s21 + $0x60] sm:$0xff] (%p7073_p6), %v4729_v40 }
 0x800   : > { %v5871_v47 = vpop.f32.mrb[66].mxu1 }
 0x801   : > { %v4623_v36 = vadd.f32 %v6905_v0, %v5871_v47  ;;  %v4575_v30 = vpop.f32.mrb[67].mxu1 }
 0x802   : > { %v4622_v62 = vadd.f32 %v6906_v32, %v4575_v30 }
 0x803   : > { %4639 = vst.msk [vmem:[%s9345_s17 + $0x48] sm:$0xff] %vm417_vm0, %v4623_v36 }
 0x804   : > { %4638 = vst.msk [vmem:[%s9345_s17 + $0x40] sm:$0xff] %vm417_vm0, %v4622_v62 }
 0x80a   : > { %v4735_v52 = vld [vmem:[%s9345_s17 + $0x48] sm:$0xff] (%p7073_p6) }
 0x80b   : > { %v4733_v28 = vld [vmem:[%s9345_s17 + $0x40] sm:$0xff] (%p7073_p6)  ;;  %4736 = vst [vmem:[%s4659_s21 + $0x90] sm:$0xff] (%p7073_p6), %v4735_v52 }
 0x80c   : > { %4734 = vst [vmem:[%s4659_s21 + $0x80] sm:$0xff] (%p7073_p6), %v4733_v28 }
 0x80f   : > { %v5865_v4 = vpop.f32.mrb[84].mxu0  ;;  %v5874_v24 = vpop.f32.mrb[68].mxu1 }
 0x810   : > { %v4619_v2 = vadd.f32 %v6907_v34, %v5865_v4  ;;  %v4625_v55 = vadd.f32 %v6908_v56, %v5874_v24  ;;  %v4555_v41 = vpop.f32.mrb[85].mxu0  ;;  %v4585_v3 = vpop.f32.mrb[69].mxu1 }
 0x811   : > { %v4618_v7 = vadd.f32 %v6909_v46, %v4555_v41  ;;  %v4624_v33 = vadd.f32 %v6910_v35, %v4585_v3 }
 0x812   : > { %4635 = vst.msk [vmem:[%s9345_s17 + $0x28] sm:$0xff] %vm417_vm0, %v4619_v2  ;;  %4641 = vst.msk [vmem:[%s9345_s17 + $0x58] sm:$0xff] %vm417_vm0, %v4625_v55 }
 0x813   : > { %4634 = vst.msk [vmem:[%s9345_s17 + $0x20] sm:$0xff] %vm417_vm0, %v4618_v7  ;;  %4640 = vst.msk [vmem:[%s9345_s17 + $0x50] sm:$0xff] %vm417_vm0, %v4624_v33 }
 0x817   : > { %v5877_v38 = vpop.f32.mrb[70].mxu1 }
 0x818   : > { %v4627_v31 = vadd.f32 %v6911_v60, %v5877_v38  ;;  %v4595_v10 = vpop.f32.mrb[71].mxu1 }
 0x819   : > { %v4626_v21 = vadd.f32 %v6912_v43, %v4595_v10  ;;  %v4727_v18 = vld [vmem:[%s9345_s17 + $0x28] sm:$0xff] (%p7073_p6)  ;;  %v4739_v54 = vld [vmem:[%s9345_s17 + $0x58] sm:$0xff] (%p7073_p6) }
 0x81a   : > { %4643 = vst.msk [vmem:[%s9345_s17 + $0x68] sm:$0xff] %vm417_vm0, %v4627_v31  ;;  %v4725_v45 = vld [vmem:[%s9345_s17 + $0x20] sm:$0xff] (%p7073_p6)  ;;  %v4737_v9 = vld [vmem:[%s9345_s17 + $0x50] sm:$0xff] (%p7073_p6)  ;;  %4728 = vst [vmem:[%s4659_s21 + $0x50] sm:$0xff] (%p7073_p6), %v4727_v18 }
 0x81b   : > { %4642 = vst.msk [vmem:[%s9345_s17 + $0x60] sm:$0xff] %vm417_vm0, %v4626_v21  ;;  %4726 = vst [vmem:[%s4659_s21 + $0x40] sm:$0xff] (%p7073_p6), %v4725_v45 }
 0x81c   : > { %4652 = sbr.rel (!%p7073_p6) target bundleno = 2091 (0x82b), region = 90  ;;  %4738 = vst [vmem:[%s4659_s21 + $0xa0] sm:$0xff] (%p7073_p6), %v4737_v9  ;;  %4740 = vst [vmem:[%s4659_s21 + $0xb0] sm:$0xff] (%p7073_p6), %v4739_v54 }
 0x81e   : > { %v5880_v37 = vpop.f32.mrb[72].mxu1 }
 0x81f   : > { %v4629_v57 = vadd.f32 %v6913_v22, %v5880_v37  ;;  %v4605_v48 = vpop.f32.mrb[73].mxu1 }
 0x820   : > { %v4628_v17 = vadd.f32 %v6914_v63, %v4605_v48 }
 0x821   : > { %4645 = vst.msk [vmem:[%s9345_s17 + $0x78] sm:$0xff] %vm417_vm0, %v4629_v57  ;;  %v4743_v53 = vld [vmem:[%s9345_s17 + $0x68] sm:$0xff] (%p7073_p6) }
 0x822   : > { %4644 = vst.msk [vmem:[%s9345_s17 + $0x70] sm:$0xff] %vm417_vm0, %v4628_v17  ;;  %v4741_v59 = vld [vmem:[%s9345_s17 + $0x60] sm:$0xff] (%p7073_p6)  ;;  %4744 = vst [vmem:[%s4659_s21 + $0xd0] sm:$0xff] (%p7073_p6), %v4743_v53 }
 0x823   : > { %4742 = vst [vmem:[%s4659_s21 + $0xc0] sm:$0xff] %v4741_v59 }
 0x828   : > { %v4747_v8 = vld [vmem:[%s9345_s17 + $0x78] sm:$0xff] }
 0x829   : > { %v4745_v13 = vld [vmem:[%s9345_s17 + $0x70] sm:$0xff]  ;;  %4748 = vst [vmem:[%s4659_s21 + $0xf0] sm:$0xff] %v4747_v8 }
 0x82a   : > { %4746 = vst [vmem:[%s4659_s21 + $0xe0] sm:$0xff] %v4745_v13 }
 0x82b PF: > { %s17_s30 = sadd.s32 1, %s6969_s30   ;;  %s9614_s24 = smov %s6949_s25 }
 0x82c   : > { %p14_p12 = scmp.ge.s32.totalorder %s17_s30, 6   ;;  %s9615_s25 = smov %s7081_s16 }
 0x82d   : > { %s9616_s26 = smov %s6961_s28  ;;  %s9617_s27 = smov %s6965_s29 }
 0x82e   : > { %s9618_s28 = smov %s9621_s8  ;;  %s9619_s29 = smov %s9625_s9 }
 0x82f   :  { %16 = sbr.rel (!%p14_p12) target bundleno = 4 (0x4), region = 159 }

</bundles_post_ra>
